<compile_context>
chip_gen: v6e
topology: v6e:2x2x1
jax: 0.10.0
libtpu: 0.0.40
codegen_flags: <defaults>
</compile_context>

<pallas_src>
import functools

import jax
import jax.numpy as jnp
from jax import lax
from jax.experimental import pallas as pl
from jax.experimental.pallas import tpu as pltpu


# -----------------------------------------------------------------------------
# Fused kernel: 3-NN + 3-point interpolation + (implicit concat) + SharedMLP.
# One (batch, n-tile) block per grid step.
# -----------------------------------------------------------------------------
def _fp_fused_kernel(*refs, num_layers, has_uf, n_tile, m, use_bf16):
    it = iter(refs)
    u_ref = next(it)                     # (1, tn, 3)   unknown xyz
    kt_ref = next(it)                    # (1, 3, m)    known xyz, transposed (tiny)
    kf_ref = next(it)                    # (1, Ck, m)   known feats (native layout)
    uf_ref = next(it) if has_uf else None  # (1, C1, tn) unknown feats (native layout)
    w0i_ref = next(it)                   # (C0, Ck)     layer-0 weight, interp part
    w0u_ref = next(it) if has_uf else None  # (C0, C1)  layer-0 weight, unk-feat part
    b0_ref = next(it)                    # (C0, 1)
    rest = [(next(it), next(it)) for _ in range(num_layers - 1)]  # [(W_l, b_l)]
    o_ref = next(it)                     # (1, Cout_last, tn)

    # ---- pairwise squared distances (f32, direct form) -----------------------
    u = u_ref[0]                         # (tn, 3)
    kt = kt_ref[0]                       # (3, m)
    d2 = jnp.zeros((n_tile, m), jnp.float32)
    for c in range(3):                   # unrolled over the 3 coords
        ub = jnp.broadcast_to(u[:, c:c + 1], (n_tile, m))
        kb = jnp.broadcast_to(kt[c:c + 1, :], (n_tile, m))
        diff = ub - kb
        d2 = d2 + diff * diff

    # ---- 3 nearest neighbours, ties broken by smallest index -----------------
    iota = lax.broadcasted_iota(jnp.int32, (n_tile, m), 1)
    remaining = d2
    w_mat = jnp.zeros((n_tile, m), jnp.float32)   # sparse weights (3 nz per row)
    w_sum = jnp.zeros((n_tile, 1), jnp.float32)
    for _ in range(3):
        dmin = jnp.min(remaining, axis=1, keepdims=True)           # (tn, 1)
        cand = jnp.where(remaining == dmin, iota, m)
        amin = jnp.min(cand, axis=1, keepdims=True)                 # first-index argmin
        onehot = iota == amin                                       # (tn, m) bool
        w = 1.0 / (jnp.sqrt(dmin) + 1e-8)                           # dist_recip
        w_mat = jnp.where(onehot, w, w_mat)
        w_sum = w_sum + w
        remaining = jnp.where(onehot, jnp.float32(jnp.inf), remaining)
    # approx=True would move this to the EUP, but is kept exact to hold the
    # reference tolerance.
    w_mat = w_mat * pl.reciprocal(w_sum, approx=False)

    # ---- interpolation, kept in (Ck, tn) layout (f32) -------------------------
    kf = kf_ref[0]                                                   # (Ck, m)
    interp_t = lax.dot_general(                                      # kf @ w_mat^T
        kf, w_mat, dimension_numbers=(((1,), (1,)), ((), ())),
        preferred_element_type=jnp.float32)                          # (Ck, tn)

    # ---- SharedMLP: fused conv(1x1)+BN+ReLU, activations stay (C, tn) ---------
    def cast(x):
        return x.astype(jnp.bfloat16) if use_bf16 else x

    y = jnp.dot(w0i_ref[...], cast(interp_t),
                preferred_element_type=jnp.float32)                  # (C0, tn)
    if has_uf:
        uf = uf_ref[0]                                               # (C1, tn)
        y = y + jnp.dot(w0u_ref[...], cast(uf),
                        preferred_element_type=jnp.float32)
    y = jnp.maximum(y + b0_ref[...], 0.0)

    for w_ref, b_ref in rest:
        y = jnp.dot(w_ref[...], cast(y), preferred_element_type=jnp.float32)
        y = jnp.maximum(y + b_ref[...], 0.0)

    o_ref[0] = y.astype(o_ref.dtype)                                 # lane-dense store


# -----------------------------------------------------------------------------
# Tiling / VMEM helpers.
# -----------------------------------------------------------------------------
def _choose_tile_n(n, m):
    # Keep the ~5 simultaneously live (tn, m) 3-NN intermediates under a
    # conservative budget that is safe on v5e/v6e/v7x (v7x: 64 MiB VMEM / TC).
    budget = 10 * 2**20
    for tn in (2048, 1024, 512, 256, 128):
        if n % tn == 0 and 5 * tn * m * 4 <= budget:
            return tn
    return n  # small or unaligned n: one whole-row block


def _vmem_limit_bytes(tn, m, ck, c1, cout_list):
    f32 = 4
    nn_bytes = 6 * tn * m * f32                          # 3-NN intermediates
    act_bytes = tn * (3 + ck + c1 + 2 * max(cout_list)) * f32
    io_bytes = 2 * (m * (3 + ck) + tn * (3 + c1 + cout_list[-1])) * f32
    est = nn_bytes + act_bytes + io_bytes + (1 << 20)
    return int(min(64 * 2**20, max(32 * 2**20, 2 * est)))


# -----------------------------------------------------------------------------
# Full module forward (single fused pallas_call).
# -----------------------------------------------------------------------------
def pointnet_fp_forward(unknown, known, unknow_feats, known_feats, fused_params,
                        use_bf16=True):
    """
    unknown      (B, n, 3)
    known        (B, m, 3)
    unknow_feats (B, C1, n) or None
    known_feats  (B, Ck, m)
    fused_params list of (W (Cout, Cin), b (Cout, 1)) with BN already fused
                 (PyTorch Conv2d weight layout, trailing 1x1 dims squeezed).
    returns      (B, mlp[-1], n)
    """
    B, n, _ = unknown.shape
    m = known.shape[1]
    Ck = known_feats.shape[1]
    has_uf = unknow_feats is not None
    C1 = unknow_feats.shape[1] if has_uf else 0
    num_layers = len(fused_params)
    cout_list = [w.shape[0] for w, _ in fused_params]
    Cout_last = cout_list[-1]
    assert fused_params[0][0].shape[1] == Ck + C1

    known_t = jnp.transpose(known, (0, 2, 1))            # (B, 3, m) — tiny array
    wdtype = jnp.bfloat16 if use_bf16 else jnp.float32

    tn = _choose_tile_n(n, m)
    n_tiles = n // tn

    inputs = [unknown, known_t, known_feats]
    in_specs = [
        pl.BlockSpec((1, tn, 3), lambda b, t: (b, t, 0)),
        pl.BlockSpec((1, 3, m), lambda b, t: (b, 0, 0)),     # n-tile independent
        pl.BlockSpec((1, Ck, m), lambda b, t: (b, 0, 0)),    # n-tile independent
    ]
    if has_uf:
        inputs.append(unknow_feats)
        in_specs.append(pl.BlockSpec((1, C1, tn), lambda b, t: (b, 0, t)))

    # Layer 0: split the weight along Cin to eliminate the feature concat.
    w0, b0 = fused_params[0]
    w0 = w0.astype(wdtype)
    w0i = w0[:, :Ck]
    inputs.append(w0i)
    in_specs.append(pl.BlockSpec(w0i.shape, lambda b, t: (0, 0)))
    if has_uf:
        w0u = w0[:, Ck:Ck + C1]
        inputs.append(w0u)
        in_specs.append(pl.BlockSpec(w0u.shape, lambda b, t: (0, 0)))
    inputs.append(b0)
    in_specs.append(pl.BlockSpec(b0.shape, lambda b, t: (0, 0)))

    for w_l, b_l in fused_params[1:]:
        w_l = w_l.astype(wdtype)
        inputs.append(w_l)
        in_specs.append(pl.BlockSpec(w_l.shape, lambda b, t: (0, 0)))
        inputs.append(b_l)
        in_specs.append(pl.BlockSpec(b_l.shape, lambda b, t: (0, 0)))

    kernel = functools.partial(
        _fp_fused_kernel, num_layers=num_layers, has_uf=has_uf,
        n_tile=tn, m=m, use_bf16=use_bf16)

    return pl.pallas_call(
        kernel,
        out_shape=jax.ShapeDtypeStruct((B, Cout_last, n), jnp.float32),
        grid=(B, n_tiles),
        in_specs=in_specs,
        out_specs=pl.BlockSpec((1, Cout_last, tn), lambda b, t: (b, 0, t)),
        compiler_params=pltpu.CompilerParams(
            dimension_semantics=("parallel", "parallel"),
            vmem_limit_bytes=_vmem_limit_bytes(tn, m, Ck, C1, cout_list)),
    )(*inputs)


# -----------------------------------------------------------------------------
# Pure-JAX reference (for sanity checking the fused kernel).
# -----------------------------------------------------------------------------
def reference_forward(unknown, known, unknow_feats, known_feats, fused_params):
    d2 = jnp.sum((unknown[:, :, None, :] - known[:, None, :, :]) ** 2, axis=-1)
    dist = jnp.sqrt(d2)
    idx = jnp.argsort(dist, axis=2)[..., :3]
    d3 = jnp.take_along_axis(dist, idx, axis=2)
    recip = 1.0 / (d3 + 1e-8)
    weight = recip / jnp.sum(recip, axis=2, keepdims=True)
    m = known.shape[1]
    onehot = jax.nn.one_hot(idx, m, dtype=jnp.float32)               # (B,n,3,m)
    wmat = jnp.einsum("bnk,bnkm->bnm", weight, onehot)
    interp = jnp.einsum("bnm,bcm->bcn", wmat, known_feats)           # (B,Ck,n)
    if unknow_feats is not None:
        feats = jnp.concatenate([interp, unknow_feats], axis=1)
    else:
        feats = interp
    x = feats                                                        # (B,Cin,n)
    for w, b in fused_params:                                        # w (Cout,Cin)
        x = jnp.einsum("oi,bin->bon", w, x,
                       preferred_element_type=jnp.float32) + b[None]
        x = jnp.maximum(x, 0.0)
    return x


# -----------------------------------------------------------------------------
# Deterministic parameter construction (SharedMLP: conv(bias=False) + BN + ReLU).
# Weights in PyTorch Conv2d layout (Cout, Cin); BN fused in inference mode.
# -----------------------------------------------------------------------------
def make_fused_mlp_params(mlp_channels, key):
    params = []
    eps = 1e-5
    for cin, cout in zip(mlp_channels[:-1], mlp_channels[1:]):
        key, wk = jax.random.split(key)
        w = jax.random.normal(wk, (cout, cin), jnp.float32) * 0.2
        gamma = 1.0 + 0.05 * jnp.arange(cout, dtype=jnp.float32)
        beta = 0.01 * jnp.arange(cout, dtype=jnp.float32) - 0.1
        run_mean = 0.02 * jnp.arange(cout, dtype=jnp.float32)
        run_var = 1.0 + 0.03 * jnp.arange(cout, dtype=jnp.float32)
        scale = gamma / jnp.sqrt(run_var + eps)
        w_fused = w * scale[:, None]
        b_fused = (beta - run_mean * scale).reshape(cout, 1)
        params.append((w_fused, b_fused))
    return params


if __name__ == "__main__":
    # Small shapes consistent with the module's forward (lane-aligned n).
    B = 2          # batch
    n = 256        # number of "unknown" (output) points
    m = 64         # number of "known" points
    C_known = 8    # known feature channels
    C_unk = 8      # unknown feature channels
    mlp_channels = [C_known + C_unk, 32, 64]

    key = jax.random.PRNGKey(0)
    k1, k2, k3, k4, kp = jax.random.split(key, 5)
    unknown = jax.random.uniform(k1, (B, n, 3), jnp.float32)
    known = jax.random.uniform(k2, (B, m, 3), jnp.float32)
    unknow_feats = jax.random.normal(k3, (B, C_unk, n), jnp.float32)
    known_feats = jax.random.normal(k4, (B, C_known, m), jnp.float32)

    fused_params = make_fused_mlp_params(mlp_channels, kp)

    ref = reference_forward(unknown, known, unknow_feats, known_feats, fused_params)

    # 1) Exact (f32) path: validates fused-kernel structure against the reference.
    out_f32 = jax.block_until_ready(
        pointnet_fp_forward(unknown, known, unknow_feats, known_feats,
                            fused_params, use_bf16=False))
    assert out_f32.shape == (B, mlp_channels[-1], n), out_f32.shape
    assert jnp.allclose(out_f32, ref, atol=1e-4, rtol=1e-4), \
        float(jnp.max(jnp.abs(out_f32 - ref)))

    # 2) Fast (bf16-MXU-operand) path: default perf configuration.
    out_bf16 = jax.block_until_ready(
        pointnet_fp_forward(unknown, known, unknow_feats, known_feats,
                            fused_params, use_bf16=True))
    scale = jnp.maximum(jnp.max(jnp.abs(ref)), 1e-6)
    rel_err = float(jnp.max(jnp.abs(out_bf16 - ref)) / scale)
    assert rel_err < 5e-2, rel_err

    print("KERNEL_OK")
</pallas_src>

<mosaic_0001>
module attributes {stable_mosaic.version = 11 : i64} {
  func.func @_fp_fused_kernel(%arg0: i32, %arg1: i32, %arg2: memref<1x256x3xf32, #tpu.memory_space<vmem>>, %arg3: memref<1x3x64xf32, #tpu.memory_space<vmem>>, %arg4: memref<1x8x64xf32, #tpu.memory_space<vmem>>, %arg5: memref<1x8x256xf32, #tpu.memory_space<vmem>>, %arg6: memref<32x8xf32, #tpu.memory_space<vmem>>, %arg7: memref<32x8xf32, #tpu.memory_space<vmem>>, %arg8: memref<32x1xf32, #tpu.memory_space<vmem>>, %arg9: memref<64x32xf32, #tpu.memory_space<vmem>>, %arg10: memref<64x1xf32, #tpu.memory_space<vmem>>, %arg11: memref<1x64x256xf32, #tpu.memory_space<vmem>>) attributes {dimension_semantics = [#tpu.dimension_semantics<parallel>, #tpu.dimension_semantics<parallel>], iteration_bounds = array<i64: 2, 1>, scalar_prefetch = 0 : i64, scratch_operands = 0 : i64, tpu.core_type = #tpu.core_type<tc>, window_params = [{transform_indices = @transform_0, window_bounds = array<i64: 1, 256, 3>}, {transform_indices = @transform_1, window_bounds = array<i64: 1, 3, 64>}, {transform_indices = @transform_2, window_bounds = array<i64: 1, 8, 64>}, {transform_indices = @transform_3, window_bounds = array<i64: 1, 8, 256>}, {pipeline_mode = #tpu.pipeline_mode<synchronous>, transform_indices = @transform_4, window_bounds = array<i64: 32, 8>}, {pipeline_mode = #tpu.pipeline_mode<synchronous>, transform_indices = @transform_5, window_bounds = array<i64: 32, 8>}, {pipeline_mode = #tpu.pipeline_mode<synchronous>, transform_indices = @transform_6, window_bounds = array<i64: 32, 1>}, {pipeline_mode = #tpu.pipeline_mode<synchronous>, transform_indices = @transform_7, window_bounds = array<i64: 64, 32>}, {pipeline_mode = #tpu.pipeline_mode<synchronous>, transform_indices = @transform_8, window_bounds = array<i64: 64, 1>}, {transform_indices = @transform_9, window_bounds = array<i64: 1, 64, 256>}]} {
    %c0 = arith.constant 0 : index
    %c0_0 = arith.constant 0 : index
    %c0_1 = arith.constant 0 : index
    %0 = vector.load %arg2[%c0, %c0_0, %c0_1] : memref<1x256x3xf32, #tpu.memory_space<vmem>>, vector<1x256x3xf32>
    %1 = vector.shape_cast %0 : vector<1x256x3xf32> to vector<256x3xf32>
    %c0_2 = arith.constant 0 : index
    %c0_3 = arith.constant 0 : index
    %c0_4 = arith.constant 0 : index
    %2 = vector.load %arg3[%c0_2, %c0_3, %c0_4] : memref<1x3x64xf32, #tpu.memory_space<vmem>>, vector<1x3x64xf32>
    %3 = vector.shape_cast %2 : vector<1x3x64xf32> to vector<3x64xf32>
    %cst = arith.constant 0.000000e+00 : f32
    %4 = vector.broadcast %cst : f32 to vector<256x64xf32>
    %5 = vector.extract_strided_slice %1 {offsets = [0, 0], sizes = [256, 1], strides = [1, 1]} : vector<256x3xf32> to vector<256x1xf32>
    %6 = vector.shape_cast %5 : vector<256x1xf32> to vector<256x1xf32>
    %7 = vector.broadcast %6 : vector<256x1xf32> to vector<256x64xf32>
    %8 = vector.extract_strided_slice %3 {offsets = [0, 0], sizes = [1, 64], strides = [1, 1]} : vector<3x64xf32> to vector<1x64xf32>
    %9 = vector.shape_cast %8 : vector<1x64xf32> to vector<1x64xf32>
    %10 = vector.broadcast %9 : vector<1x64xf32> to vector<256x64xf32>
    %11 = arith.subf %7, %10 : vector<256x64xf32>
    %12 = arith.mulf %11, %11 : vector<256x64xf32>
    %13 = arith.addf %4, %12 : vector<256x64xf32>
    %14 = vector.extract_strided_slice %1 {offsets = [0, 1], sizes = [256, 1], strides = [1, 1]} : vector<256x3xf32> to vector<256x1xf32>
    %15 = vector.shape_cast %14 : vector<256x1xf32> to vector<256x1xf32>
    %16 = vector.broadcast %15 : vector<256x1xf32> to vector<256x64xf32>
    %17 = vector.extract_strided_slice %3 {offsets = [1, 0], sizes = [1, 64], strides = [1, 1]} : vector<3x64xf32> to vector<1x64xf32>
    %18 = vector.shape_cast %17 : vector<1x64xf32> to vector<1x64xf32>
    %19 = vector.broadcast %18 : vector<1x64xf32> to vector<256x64xf32>
    %20 = arith.subf %16, %19 : vector<256x64xf32>
    %21 = arith.mulf %20, %20 : vector<256x64xf32>
    %22 = arith.addf %13, %21 : vector<256x64xf32>
    %23 = vector.extract_strided_slice %1 {offsets = [0, 2], sizes = [256, 1], strides = [1, 1]} : vector<256x3xf32> to vector<256x1xf32>
    %24 = vector.shape_cast %23 : vector<256x1xf32> to vector<256x1xf32>
    %25 = vector.broadcast %24 : vector<256x1xf32> to vector<256x64xf32>
    %26 = vector.extract_strided_slice %3 {offsets = [2, 0], sizes = [1, 64], strides = [1, 1]} : vector<3x64xf32> to vector<1x64xf32>
    %27 = vector.shape_cast %26 : vector<1x64xf32> to vector<1x64xf32>
    %28 = vector.broadcast %27 : vector<1x64xf32> to vector<256x64xf32>
    %29 = arith.subf %25, %28 : vector<256x64xf32>
    %30 = arith.mulf %29, %29 : vector<256x64xf32>
    %31 = arith.addf %22, %30 : vector<256x64xf32>
    %32 = tpu.iota {dimensions = array<i32: 1>} : vector<256x64xi32>
    %cst_5 = arith.constant 0.000000e+00 : f32
    %33 = vector.broadcast %cst_5 : f32 to vector<256x64xf32>
    %cst_6 = arith.constant 0.000000e+00 : f32
    %34 = vector.broadcast %cst_6 : f32 to vector<256x1xf32>
    %cst_7 = arith.constant dense<0x7F800000> : vector<256xf32>
    %35 = vector.multi_reduction <minimumf>, %31, %cst_7 [1] : vector<256x64xf32> to vector<256xf32>
    %36 = vector.shape_cast %35 : vector<256xf32> to vector<256x1xf32>
    %37 = vector.broadcast %36 : vector<256x1xf32> to vector<256x64xf32>
    %38 = arith.cmpf oeq, %31, %37 : vector<256x64xf32>
    %c64_i32 = arith.constant 64 : i32
    %39 = vector.broadcast %c64_i32 : i32 to vector<256x64xi32>
    %40 = arith.select %38, %32, %39 : vector<256x64xi1>, vector<256x64xi32>
    %cst_8 = arith.constant dense<2147483647> : vector<256xi32>
    %41 = vector.multi_reduction <minsi>, %40, %cst_8 [1] : vector<256x64xi32> to vector<256xi32>
    %42 = vector.shape_cast %41 : vector<256xi32> to vector<256x1xi32>
    %43 = vector.broadcast %42 : vector<256x1xi32> to vector<256x64xi32>
    %44 = arith.cmpi eq, %32, %43 : vector<256x64xi32>
    %45 = math.sqrt %36 : vector<256x1xf32>
    %cst_9 = arith.constant 9.99999993E-9 : f32
    %46 = vector.broadcast %cst_9 : f32 to vector<256x1xf32>
    %47 = arith.addf %45, %46 : vector<256x1xf32>
    %cst_10 = arith.constant 1.000000e+00 : f32
    %48 = vector.broadcast %cst_10 : f32 to vector<256x1xf32>
    %49 = arith.divf %48, %47 : vector<256x1xf32>
    %50 = vector.shape_cast %49 : vector<256x1xf32> to vector<256x1xf32>
    %51 = vector.broadcast %50 : vector<256x1xf32> to vector<256x64xf32>
    %52 = arith.select %44, %51, %33 : vector<256x64xi1>, vector<256x64xf32>
    %53 = arith.addf %34, %49 : vector<256x1xf32>
    %cst_11 = arith.constant 0x7F800000 : f32
    %54 = vector.broadcast %cst_11 : f32 to vector<256x64xf32>
    %55 = arith.select %44, %54, %31 : vector<256x64xi1>, vector<256x64xf32>
    %cst_12 = arith.constant dense<0x7F800000> : vector<256xf32>
    %56 = vector.multi_reduction <minimumf>, %55, %cst_12 [1] : vector<256x64xf32> to vector<256xf32>
    %57 = vector.shape_cast %56 : vector<256xf32> to vector<256x1xf32>
    %58 = vector.broadcast %57 : vector<256x1xf32> to vector<256x64xf32>
    %59 = arith.cmpf oeq, %55, %58 : vector<256x64xf32>
    %c64_i32_13 = arith.constant 64 : i32
    %60 = vector.broadcast %c64_i32_13 : i32 to vector<256x64xi32>
    %61 = arith.select %59, %32, %60 : vector<256x64xi1>, vector<256x64xi32>
    %cst_14 = arith.constant dense<2147483647> : vector<256xi32>
    %62 = vector.multi_reduction <minsi>, %61, %cst_14 [1] : vector<256x64xi32> to vector<256xi32>
    %63 = vector.shape_cast %62 : vector<256xi32> to vector<256x1xi32>
    %64 = vector.broadcast %63 : vector<256x1xi32> to vector<256x64xi32>
    %65 = arith.cmpi eq, %32, %64 : vector<256x64xi32>
    %66 = math.sqrt %57 : vector<256x1xf32>
    %cst_15 = arith.constant 9.99999993E-9 : f32
    %67 = vector.broadcast %cst_15 : f32 to vector<256x1xf32>
    %68 = arith.addf %66, %67 : vector<256x1xf32>
    %cst_16 = arith.constant 1.000000e+00 : f32
    %69 = vector.broadcast %cst_16 : f32 to vector<256x1xf32>
    %70 = arith.divf %69, %68 : vector<256x1xf32>
    %71 = vector.shape_cast %70 : vector<256x1xf32> to vector<256x1xf32>
    %72 = vector.broadcast %71 : vector<256x1xf32> to vector<256x64xf32>
    %73 = arith.select %65, %72, %52 : vector<256x64xi1>, vector<256x64xf32>
    %74 = arith.addf %53, %70 : vector<256x1xf32>
    %cst_17 = arith.constant 0x7F800000 : f32
    %75 = vector.broadcast %cst_17 : f32 to vector<256x64xf32>
    %76 = arith.select %65, %75, %55 : vector<256x64xi1>, vector<256x64xf32>
    %cst_18 = arith.constant dense<0x7F800000> : vector<256xf32>
    %77 = vector.multi_reduction <minimumf>, %76, %cst_18 [1] : vector<256x64xf32> to vector<256xf32>
    %78 = vector.shape_cast %77 : vector<256xf32> to vector<256x1xf32>
    %79 = vector.broadcast %78 : vector<256x1xf32> to vector<256x64xf32>
    %80 = arith.cmpf oeq, %76, %79 : vector<256x64xf32>
    %c64_i32_19 = arith.constant 64 : i32
    %81 = vector.broadcast %c64_i32_19 : i32 to vector<256x64xi32>
    %82 = arith.select %80, %32, %81 : vector<256x64xi1>, vector<256x64xi32>
    %cst_20 = arith.constant dense<2147483647> : vector<256xi32>
    %83 = vector.multi_reduction <minsi>, %82, %cst_20 [1] : vector<256x64xi32> to vector<256xi32>
    %84 = vector.shape_cast %83 : vector<256xi32> to vector<256x1xi32>
    %85 = vector.broadcast %84 : vector<256x1xi32> to vector<256x64xi32>
    %86 = arith.cmpi eq, %32, %85 : vector<256x64xi32>
    %87 = math.sqrt %78 : vector<256x1xf32>
    %cst_21 = arith.constant 9.99999993E-9 : f32
    %88 = vector.broadcast %cst_21 : f32 to vector<256x1xf32>
    %89 = arith.addf %87, %88 : vector<256x1xf32>
    %cst_22 = arith.constant 1.000000e+00 : f32
    %90 = vector.broadcast %cst_22 : f32 to vector<256x1xf32>
    %91 = arith.divf %90, %89 : vector<256x1xf32>
    %92 = vector.shape_cast %91 : vector<256x1xf32> to vector<256x1xf32>
    %93 = vector.broadcast %92 : vector<256x1xf32> to vector<256x64xf32>
    %94 = arith.select %86, %93, %73 : vector<256x64xi1>, vector<256x64xf32>
    %95 = arith.addf %74, %91 : vector<256x1xf32>
    %96 = tpu.reciprocal %95 : vector<256x1xf32> -> vector<256x1xf32>
    %97 = vector.broadcast %96 : vector<256x1xf32> to vector<256x64xf32>
    %98 = arith.mulf %94, %97 : vector<256x64xf32>
    %c0_23 = arith.constant 0 : index
    %c0_24 = arith.constant 0 : index
    %c0_25 = arith.constant 0 : index
    %99 = vector.load %arg4[%c0_23, %c0_24, %c0_25] : memref<1x8x64xf32, #tpu.memory_space<vmem>>, vector<1x8x64xf32>
    %100 = vector.shape_cast %99 : vector<1x8x64xf32> to vector<8x64xf32>
    %cst_26 = arith.constant dense<0.000000e+00> : vector<8x256xf32>
    %101 = tpu.matmul %100, %98, %cst_26 {dimension_numbers = #tpu.dot_dimension_numbers<[1], [1], [0], [0], [0, 0, 1, 0], [], []>} : vector<8x64xf32>, vector<256x64xf32>, vector<8x256xf32> -> vector<8x256xf32>
    %c0_27 = arith.constant 0 : index
    %c0_28 = arith.constant 0 : index
    %102 = vector.load %arg6[%c0_27, %c0_28] : memref<32x8xf32, #tpu.memory_space<vmem>>, vector<32x8xf32>
    %cst_29 = arith.constant dense<0.000000e+00> : vector<32x256xf32>
    %103 = tpu.matmul %102, %101, %cst_29 {dimension_numbers = #tpu.dot_dimension_numbers<[1], [0], [0], [1], [0, 0, 1, 1], [], []>} : vector<32x8xf32>, vector<8x256xf32>, vector<32x256xf32> -> vector<32x256xf32>
    %c0_30 = arith.constant 0 : index
    %c0_31 = arith.constant 0 : index
    %c0_32 = arith.constant 0 : index
    %104 = vector.load %arg5[%c0_30, %c0_31, %c0_32] : memref<1x8x256xf32, #tpu.memory_space<vmem>>, vector<1x8x256xf32>
    %105 = vector.shape_cast %104 : vector<1x8x256xf32> to vector<8x256xf32>
    %c0_33 = arith.constant 0 : index
    %c0_34 = arith.constant 0 : index
    %106 = vector.load %arg7[%c0_33, %c0_34] : memref<32x8xf32, #tpu.memory_space<vmem>>, vector<32x8xf32>
    %cst_35 = arith.constant dense<0.000000e+00> : vector<32x256xf32>
    %107 = tpu.matmul %106, %105, %cst_35 {dimension_numbers = #tpu.dot_dimension_numbers<[1], [0], [0], [1], [0, 0, 1, 1], [], []>} : vector<32x8xf32>, vector<8x256xf32>, vector<32x256xf32> -> vector<32x256xf32>
    %108 = arith.addf %103, %107 : vector<32x256xf32>
    %c0_36 = arith.constant 0 : index
    %c0_37 = arith.constant 0 : index
    %109 = vector.load %arg8[%c0_36, %c0_37] : memref<32x1xf32, #tpu.memory_space<vmem>>, vector<32x1xf32>
    %110 = vector.broadcast %109 : vector<32x1xf32> to vector<32x256xf32>
    %111 = arith.addf %108, %110 : vector<32x256xf32>
    %cst_38 = arith.constant 0.000000e+00 : f32
    %112 = vector.broadcast %cst_38 : f32 to vector<32x256xf32>
    %113 = arith.maximumf %111, %112 : vector<32x256xf32>
    %c0_39 = arith.constant 0 : index
    %c0_40 = arith.constant 0 : index
    %114 = vector.load %arg9[%c0_39, %c0_40] : memref<64x32xf32, #tpu.memory_space<vmem>>, vector<64x32xf32>
    %cst_41 = arith.constant dense<0.000000e+00> : vector<64x256xf32>
    %115 = tpu.matmul %114, %113, %cst_41 {dimension_numbers = #tpu.dot_dimension_numbers<[1], [0], [0], [1], [0, 0, 1, 1], [], []>} : vector<64x32xf32>, vector<32x256xf32>, vector<64x256xf32> -> vector<64x256xf32>
    %c0_42 = arith.constant 0 : index
    %c0_43 = arith.constant 0 : index
    %116 = vector.load %arg10[%c0_42, %c0_43] : memref<64x1xf32, #tpu.memory_space<vmem>>, vector<64x1xf32>
    %117 = vector.broadcast %116 : vector<64x1xf32> to vector<64x256xf32>
    %118 = arith.addf %115, %117 : vector<64x256xf32>
    %cst_44 = arith.constant 0.000000e+00 : f32
    %119 = vector.broadcast %cst_44 : f32 to vector<64x256xf32>
    %120 = arith.maximumf %118, %119 : vector<64x256xf32>
    %c0_45 = arith.constant 0 : index
    %c0_46 = arith.constant 0 : index
    %c0_47 = arith.constant 0 : index
    %121 = vector.load %arg11[%c0_45, %c0_46, %c0_47] : memref<1x64x256xf32, #tpu.memory_space<vmem>>, vector<1x64x256xf32>
    %122 = vector.shape_cast %121 : vector<1x64x256xf32> to vector<64x256xf32>
    %123 = vector.shape_cast %120 : vector<64x256xf32> to vector<1x64x256xf32>
    tpu.vector_store %arg11[%c0_45, %c0_46, %c0_47], %123 {strides = array<i32>} : memref<1x64x256xf32, #tpu.memory_space<vmem>>, vector<1x64x256xf32>,
    return
  }
  func.func @transform_0(%arg0: i32, %arg1: i32) -> (i32, i32, i32) {
    %c0_i32 = arith.constant 0 : i32
    %c0_i32_0 = arith.constant 0 : i32
    return %arg0, %arg1, %c0_i32 : i32, i32, i32
  }
  func.func @transform_1(%arg0: i32, %arg1: i32) -> (i32, i32, i32) {
    %c0_i32 = arith.constant 0 : i32
    %c0_i32_0 = arith.constant 0 : i32
    %c0_i32_1 = arith.constant 0 : i32
    return %arg0, %c0_i32, %c0_i32_0 : i32, i32, i32
  }
  func.func @transform_2(%arg0: i32, %arg1: i32) -> (i32, i32, i32) {
    %c0_i32 = arith.constant 0 : i32
    %c0_i32_0 = arith.constant 0 : i32
    %c0_i32_1 = arith.constant 0 : i32
    return %arg0, %c0_i32, %c0_i32_0 : i32, i32, i32
  }
  func.func @transform_3(%arg0: i32, %arg1: i32) -> (i32, i32, i32) {
    %c0_i32 = arith.constant 0 : i32
    %c0_i32_0 = arith.constant 0 : i32
    return %arg0, %c0_i32, %arg1 : i32, i32, i32
  }
  func.func @transform_4(%arg0: i32, %arg1: i32) -> (i32, i32) {
    %c0_i32 = arith.constant 0 : i32
    %c0_i32_0 = arith.constant 0 : i32
    %c0_i32_1 = arith.constant 0 : i32
    return %c0_i32, %c0_i32_0 : i32, i32
  }
  func.func @transform_5(%arg0: i32, %arg1: i32) -> (i32, i32) {
    %c0_i32 = arith.constant 0 : i32
    %c0_i32_0 = arith.constant 0 : i32
    %c0_i32_1 = arith.constant 0 : i32
    return %c0_i32, %c0_i32_0 : i32, i32
  }
  func.func @transform_6(%arg0: i32, %arg1: i32) -> (i32, i32) {
    %c0_i32 = arith.constant 0 : i32
    %c0_i32_0 = arith.constant 0 : i32
    %c0_i32_1 = arith.constant 0 : i32
    return %c0_i32, %c0_i32_0 : i32, i32
  }
  func.func @transform_7(%arg0: i32, %arg1: i32) -> (i32, i32) {
    %c0_i32 = arith.constant 0 : i32
    %c0_i32_0 = arith.constant 0 : i32
    %c0_i32_1 = arith.constant 0 : i32
    return %c0_i32, %c0_i32_0 : i32, i32
  }
  func.func @transform_8(%arg0: i32, %arg1: i32) -> (i32, i32) {
    %c0_i32 = arith.constant 0 : i32
    %c0_i32_0 = arith.constant 0 : i32
    %c0_i32_1 = arith.constant 0 : i32
    return %c0_i32, %c0_i32_0 : i32, i32
  }
  func.func @transform_9(%arg0: i32, %arg1: i32) -> (i32, i32, i32) {
    %c0_i32 = arith.constant 0 : i32
    %c0_i32_0 = arith.constant 0 : i32
    return %arg0, %c0_i32, %arg1 : i32, i32, i32
  }
}

</mosaic_0001>

<bundles_post_ra>
// kernel: tpu_custom_call.1
= control target key start
LH: loop header
LB: loop body
LE: loop exit
PB: predicated region body
PF: predicated region fallthrough
CT: control target
= control target key end

     0   :  { %14 = vsyncpa [#allocation3], 0  ;;  %s10844_s0 = inlined_call_operand.vmem [shape: f32[2,256,3], index: 0, kind: input, shape index: {}]   ;;  %s10845_s1 = inlined_call_operand.vmem [shape: f32[2,3,64], index: 1, kind: input, shape index: {}]   ;;  %s10846_s2 = inlined_call_operand.vmem [shape: f32[2,8,64], index: 2, kind: input, shape index: {}]   ;;  %s10847_s3 = inlined_call_operand.vmem [shape: f32[2,8,256], index: 3, kind: input, shape index: {}]   ;;  %s10848_s4 = inlined_call_operand.vmem [shape: f32[32,8], index: 4, kind: input, shape index: {}]   ;;  %s10849_s5 = inlined_call_operand.vmem [shape: f32[32,8], index: 5, kind: input, shape index: {}]   ;;  %s10850_s6 = inlined_call_operand.vmem [shape: f32[32,1], index: 6, kind: input, shape index: {}]   ;;  %s10851_s7 = inlined_call_operand.vmem [shape: f32[64,32], index: 7, kind: input, shape index: {}]   ;;  %s10852_s8 = inlined_call_operand.vmem [shape: f32[64,1], index: 8, kind: input, shape index: {}]   ;;  %s10853_s9 = inlined_call_operand.hbm [shape: f32[2,64,256], index: 9, kind: output, shape index: {}]  }
   0x1   :  { %16 = vsyncpa [#allocation3 + $0x1], 0  ;;  %s6067_s30 = smov 0   ;;  %s6069_s10 = smov 0  }
   0x2   :  { %s6071_s11 = smov 0   ;;  %s6073_s12 = smov 0  }
   0x3   :  { %s6075_s13 = smov 0   ;;  %s6077_s14 = smov 0  }
   0x4 LB: > { %s5267_s15 = sadd.s32 4294967295, %s6008_s14   ;;  %s5268_s16 = sadd.s32 4294967294, %s6008_s14   ;;  %s6008_s14 = sphi %s6077_s14, %s22_s14   ;;  %s6004_s13 = sphi %s6075_s13, %s12201_s13   ;;  %s6000_s12 = sphi %s6073_s12, %s12200_s12   ;;  %s5996_s11 = sphi %s6071_s11, %s12199_s11   ;;  %s5992_s10 = sphi %s6069_s10, %s12198_s10   ;;  %s5988_s30 = sphi %s6067_s30, %s12197_s30  }
   0x5   : > { %s34_s17 = sadd.s32 1, %s6004_s13  ;;  %s256_s18 = sadd.s32 1, %s5996_s11 }
   0x6   : > { %p36_p0 = scmp.ge.s32.totalorder %s34_s17, 2  ;;  %p266_p1 = scmp.ne.s32.totalorder %s5996_s11, %s5992_s10 }
   0x7   : > { %p267_p2 = scmp.eq.s32.totalorder %s5267_s15, 1  ;;  %p272_p3 = scmp.ne.s32.totalorder %s5992_s10, %s5988_s30 }
   0x8   : > { %s12203_s17 = smov (%p36_p0, %s34_s17), 0  ;;  %p273_p5 = scmp.eq.s32.totalorder %s5268_s16, 1 }
   0x9   : > { %p6107_p4 = por %p267_p2, %p266_p1  ;;  %s251_s20 = ssub.s32 %s6004_s13, %s12203_s17 }
   0xa   : > { %p5271_p6 = scmp.ge.s32.totalorder %s6008_s14, 1  ;;  %p254_p7 = scmp.eq.s32.totalorder %s251_s20, 0 }
   0xb   : > { %p6114_p8 = por %p273_p5, %p272_p3  ;;  %p346_p9 = scmp.lt.s32.totalorder %s6008_s14, 3 }
   0xc   : > { %s6120_s22 = scalar_select %p254_p7, %s5996_s11, %s256_s18  }
   0xd   : > { %p347_p10 = pnand %p5271_p6, %p346_p9 }
   0xf   : > { %350 = sbr.rel (%p347_p10) target bundleno = 2408 (0x968), region = 56 }
  0x14   : > { %p404_p11 = scmp.lt.s32.totalorder %s6000_s12, 1  ;;  %v6010_v0 = vmov 1   ;;  %v6011_v1 = vmov 0   ;;  %v6012_v4 = vmov 2   ;;  %v10854_v31 = vlaneseq  ;;  %s400_s18 = sand.u32 1, %s5992_s10  }
  0x15   : > { %5431 = vset.pattern.permute.xlu0 %v6010_v0  ;;  %5432 = vset.pattern.permute.xlu1 %v6011_v1  ;;  %vm11130_vm0 = vcmask 523264  }
  0x16   : > { %s6126_s23 = scalar_select %p404_p11, %s6000_s12, 1  ;;  %v626_v34 = vshrl.u32 %v10854_v31, 7 }
  0x18   : > { %s5333_s24 = sshll.u32 %s6126_s23, 8  ;;  %s5275_s28 = sshll.u32 %s6126_s23, 2  ;;  %v855_v35 = vsub.s32 1, %v626_v34  ;;  %v627_v37 = vsub.s32 0, %v626_v34  ;;  %v1083_v41 = vsub.s32 2, %v626_v34 }
  0x19   : > { %s6132_s27 = scalar_lea.vmem %s10844_s0, %s5333_s24  ;;  %s416_s16 = scalar_lea.vmem %s10845_s1, %s5275_s28 }
  0x1a   : > { %v6135_v2 = vld [vmem:[%s6132_s27 + $0xf8] sm:$0xff]  ;;  %v446_v5 = vld [vmem:[%s6132_s27 + $0x70] sm:$0xff]  ;;  %v445_v6 = vld [vmem:[%s6132_s27 + $0x68] sm:$0xff]  ;;  %s5276_s24 = sshll.u32 %s6126_s23, 3  ;;  %s5334_s15 = sshll.u32 %s6126_s23, 4 }
  0x1b   : > { %v447_v3 = vld [vmem:[%s6132_s27 + $0x78] sm:$0xff]  ;;  %850 = vperm.xlu0 %5431, %v6135_v2   ;;  %v462_v7 = vld [vmem:[%s6132_s27 + $0xf0] sm:$0xff]  ;;  %v444_v8 = vld [vmem:[%s6132_s27 + $0x60] sm:$0xff]  ;;  %s429_s20 = scalar_lea.vmem %s10847_s3, %s5334_s15  ;;  %s6014_s15 = smov [#allocation2]  }
  0x1c   : > { %542 = vperm.xlu1 %5432, %v447_v3   ;;  %v443_v9 = vld [vmem:[%s6132_s27 + $0x58] sm:$0xff]  ;;  %v442_v10 = vld [vmem:[%s6132_s27 + $0x50] sm:$0xff]  ;;  %v6152_v11 = vld [vmem:[%s6132_s27 + $0x48] sm:$0xff] }
  0x1d   : > { %v6157_v12 = vld [vmem:[%s6132_s27 + $0x40] sm:$0xff]  ;;  %v461_v13 = vld [vmem:[%s6132_s27 + $0xe8] sm:$0xff]  ;;  %v6163_v14 = vld [vmem:[%s6132_s27 + $0x38] sm:$0xff] }
  0x1e   : > { %v6168_v15 = vld [vmem:[%s6132_s27 + $0x30] sm:$0xff]  ;;  %v6172_v16 = vld [vmem:[%s6132_s27 + $0x28] sm:$0xff]  ;;  %v6176_v17 = vld [vmem:[%s6132_s27 + $0x20] sm:$0xff] }
  0x1f   : > { %5435 = vset.pattern.permute.xlu0 %v6012_v4  ;;  %v460_v18 = vld [vmem:[%s6132_s27 + $0xe0] sm:$0xff]  ;;  %v6182_v19 = vld [vmem:[%s6132_s27 + $0x18] sm:$0xff]  ;;  %v6187_v20 = vld [vmem:[%s6132_s27 + $0x10] sm:$0xff] }
  0x20   : > { %5433 = vset.pattern.permute.xlu1 %v6010_v0  ;;  %1014 = vperm.xlu0 %5435, %v447_v3   ;;  %v6192_v21 = vld [vmem:[%s6132_s27 + $0x8] sm:$0xff]  ;;  %v6196_v22 = vld [vmem:[%s6132_s27] sm:$0xff]  ;;  %v459_v23 = vld [vmem:[%s6132_s27 + $0xd8] sm:$0xff] }
  0x21   : > { %786 = vperm.xlu1 %5433, %v447_v3   ;;  %v458_v24 = vld [vmem:[%s6132_s27 + $0xd0] sm:$0xff]  ;;  %v457_v25 = vld [vmem:[%s6132_s27 + $0xc8] sm:$0xff]  ;;  %v456_v28 = vld [vmem:[%s6132_s27 + $0xc0] sm:$0xff] }
  0x22   : > { %v464_v39 = vld [vmem:[%s416_s16] sm:$0x7]  ;;  %v455_v48 = vld [vmem:[%s6132_s27 + $0xb8] sm:$0xff]  ;;  %s5936_s16 = sshll.u32 %s6014_s15, 4  ;;  %s5937_s16 = int_to_ptr.vmem [resolvable:$false] %s5936_s16 }
  0x23   : > { %v6244_v40 = vrot.slane %v464_v39, %v855_v35  ;;  %v6248_v43 = vrot.slane %v464_v39, %v627_v37  ;;  %v6253_v45 = vrot.slane %v464_v39, %v1083_v41 }
  0x24   : > { %1010 = vperm.xlu0 %5435, %v446_v5  }
  0x25   : > { %5434 = vset.pattern.permute.xlu1 %v6012_v4 }
  0x26   : > { %1078 = vperm.xlu1 %5434, %v6135_v2  }
  0x28   : > { %1006 = vperm.xlu0 %5435, %v445_v6  }
  0x2a   : > { %5436 = vset.pattern.permute.xlu1 %v6011_v1 }
  0x2b   : > { %617 = vperm.xlu1 %5436, %v462_v7  }
  0x2c   : > { %1002 = vperm.xlu0 %5435, %v444_v8  }
  0x2f   : > { %5437 = vset.pattern.permute.xlu1 %v6010_v0 }
  0x30   : > { %846 = vperm.xlu1 %5437, %v462_v7   ;;  %998 = vperm.xlu0 %5435, %v443_v9  }
  0x34   : > { %782 = vperm.xlu1 %5437, %v446_v5   ;;  %994 = vperm.xlu0 %5435, %v442_v10  }
  0x38   : > { %5438 = vset.pattern.permute.xlu1 %v6012_v4  ;;  %990 = vperm.xlu0 %5435, %v6152_v11  }
  0x39   : > { %1074 = vperm.xlu1 %5438, %v462_v7  }
  0x3c   : > { %986 = vperm.xlu0 %5435, %v6157_v12  }
  0x3d   : > { %5439 = vset.pattern.permute.xlu1 %v6011_v1 }
  0x3e   : > { %612 = vperm.xlu1 %5439, %v461_v13  }
  0x40   : > { %982 = vperm.xlu0 %5435, %v6163_v14  }
  0x42   : > { %5440 = vset.pattern.permute.xlu1 %v6010_v0 }
  0x43   : > { %842 = vperm.xlu1 %5440, %v461_v13  }
  0x44   : > { %978 = vperm.xlu0 %5435, %v6168_v15  }
  0x47   : > { %778 = vperm.xlu1 %5440, %v445_v6  }
  0x48   : > { %974 = vperm.xlu0 %5435, %v6172_v16  }
  0x4b   : > { %5441 = vset.pattern.permute.xlu1 %v6012_v4 }
  0x4c   : > { %1070 = vperm.xlu1 %5441, %v461_v13   ;;  %970 = vperm.xlu0 %5435, %v6176_v17  }
  0x50   : > { %5442 = vset.pattern.permute.xlu1 %v6011_v1  ;;  %966 = vperm.xlu0 %5435, %v6182_v19  }
  0x51   : > { %607 = vperm.xlu1 %5442, %v460_v18  }
  0x54   : > { %962 = vperm.xlu0 %5435, %v6187_v20  }
  0x55   : > { %5443 = vset.pattern.permute.xlu1 %v6010_v0 }
  0x56   : > { %838 = vperm.xlu1 %5443, %v460_v18  }
  0x58   : > { %958 = vperm.xlu0 %5435, %v6192_v21  }
  0x5a   : > { %774 = vperm.xlu1 %5443, %v444_v8  }
  0x5c   : > { %954 = vperm.xlu0 %5435, %v6196_v22  }
  0x5e   : > { %5444 = vset.pattern.permute.xlu1 %v6012_v4 }
  0x5f   : > { %1066 = vperm.xlu1 %5444, %v460_v18  }
  0x60   : > { %5481 = vset.pattern.permute.xlu0 %v6011_v1 }
  0x61   : > { %622 = vperm.xlu0 %5481, %v6135_v2  }
  0x63   : > { %5445 = vset.pattern.permute.xlu1 %v6011_v1 }
  0x64   : > { %602 = vperm.xlu1 %5445, %v459_v23  }
  0x65   : > { %537 = vperm.xlu0 %5481, %v446_v5   ;;  %v454_v5 = vld [vmem:[%s6132_s27 + $0xb0] sm:$0xff] }
  0x68   : > { %5446 = vset.pattern.permute.xlu1 %v6010_v0 }
  0x69   : > { %834 = vperm.xlu1 %5446, %v459_v23   ;;  %532 = vperm.xlu0 %5481, %v445_v6  }
  0x6d   : > { %770 = vperm.xlu1 %5446, %v443_v9   ;;  %527 = vperm.xlu0 %5481, %v444_v8  }
  0x71   : > { %5447 = vset.pattern.permute.xlu1 %v6012_v4  ;;  %522 = vperm.xlu0 %5481, %v443_v9  }
  0x72   : > { %1062 = vperm.xlu1 %5447, %v459_v23  }
  0x75   : > { %517 = vperm.xlu0 %5481, %v442_v10  }
  0x76   : > { %5448 = vset.pattern.permute.xlu1 %v6011_v1 }
  0x77   : > { %597 = vperm.xlu1 %5448, %v458_v24  }
  0x79   : > { %512 = vperm.xlu0 %5481, %v6152_v11  }
  0x7b   : > { %5449 = vset.pattern.permute.xlu1 %v6010_v0 }
  0x7c   : > { %830 = vperm.xlu1 %5449, %v458_v24  }
  0x7d   : > { %507 = vperm.xlu0 %5481, %v6157_v12  }
  0x80   : > { %766 = vperm.xlu1 %5449, %v442_v10  }
  0x81   : > { %502 = vperm.xlu0 %5481, %v6163_v14  }
  0x84   : > { %5450 = vset.pattern.permute.xlu1 %v6012_v4 }
  0x85   : > { %1058 = vperm.xlu1 %5450, %v458_v24   ;;  %497 = vperm.xlu0 %5481, %v6168_v15  }
  0x89   : > { %5451 = vset.pattern.permute.xlu1 %v6011_v1  ;;  %492 = vperm.xlu0 %5481, %v6172_v16  }
  0x8a   : > { %592 = vperm.xlu1 %5451, %v457_v25  }
  0x8d   : > { %487 = vperm.xlu0 %5481, %v6176_v17  }
  0x8e   : > { %5452 = vset.pattern.permute.xlu1 %v6010_v0 }
  0x8f   : > { %826 = vperm.xlu1 %5452, %v457_v25  }
  0x91   : > { %482 = vperm.xlu0 %5481, %v6182_v19  }
  0x93   : > { %762 = vperm.xlu1 %5452, %v6152_v11  }
  0x95   : > { %477 = vperm.xlu0 %5481, %v6187_v20  }
  0x96   : > { %v6223_v27 = vpop.permute.xlu0 %850 }
  0x97   : > { %v543_v26 = vpop.permute.xlu1 %542  ;;  %5453 = vset.pattern.permute.xlu1 %v6012_v4 }
  0x98   : > { %1054 = vperm.xlu1 %5453, %v457_v25   ;;  %v644_v49 = vsub.f32 %v543_v26, %v6248_v43 }
  0x99   : > { %472 = vperm.xlu0 %5481, %v6192_v21  }
  0x9a   : > { %v676_v54 = vmul.f32 %v644_v49, %v644_v49 }
  0x9b   : > { %v1015_v30 = vpop.permute.xlu0 %1014 }
  0x9c   : > { %v787_v29 = vpop.permute.xlu1 %786  ;;  %5454 = vset.pattern.permute.xlu1 %v6011_v1  ;;  %v1100_v52 = vsub.f32 %v1015_v30, %v6253_v45 }
  0x9d   : > { %587 = vperm.xlu1 %5454, %v456_v28   ;;  %467 = vperm.xlu0 %5481, %v6196_v22   ;;  %v872_v46 = vsub.f32 %v787_v29, %v6244_v40 }
  0x9e   : > { %v1132_v56 = vmul.f32 %v1100_v52, %v1100_v52 }
  0x9f   : > { %v6229_v32 = vpop.permute.xlu0 %1010  ;;  %v904_v51 = vmul.f32 %v872_v46, %v872_v46 }
  0xa1   : > { %v6232_v33 = vpop.permute.xlu1 %1078  ;;  %5455 = vset.pattern.permute.xlu1 %v6010_v0  ;;  %v936_v55 = vadd.f32 %v904_v51, %v676_v54 }
  0xa2   : > { %822 = vperm.xlu1 %5455, %v456_v28  }
  0xa3   : > { %v6239_v36 = vpop.permute.xlu0 %1006  ;;  %v6269_v59 = vadd.f32 %v1132_v56, %v936_v55 }
  0xa4   : > { %v1098_v35 = vsub.f32 %v6239_v36, %v6253_v45 }
  0xa5   : > { %11316 = vst [vmem:[#allocation5_spill] sm:$0xff] %v6269_v59  ;;  %v1229_v63 = vsel %vm11130_vm0, %v6269_v59, inf }
  0xa6   : > { %v6241_v38 = vpop.permute.xlu1 %617  ;;  %758 = vperm.xlu1 %5455, %v6157_v12   ;;  %v1130_v51 = vmul.f32 %v1098_v35, %v1098_v35 }
  0xa7   : > { %v6246_v42 = vpop.permute.xlu0 %1002 }
  0xa8   : > { %v1097_v52 = vsub.f32 %v6246_v42, %v6253_v45 }
  0xaa   : > { %5456 = vset.pattern.permute.xlu1 %v6012_v4 }
  0xab   : > { %v6251_v44 = vpop.permute.xlu1 %846  ;;  %1050 = vperm.xlu1 %5456, %v456_v28   ;;  %v6256_v47 = vpop.permute.xlu0 %998  ;;  %v1099_v28 = vsub.f32 %v6229_v32, %v6253_v45 }
  0xac   : > { %v1096_v42 = vsub.f32 %v6256_v47, %v6253_v45 }
  0xad   : > { %v1131_v37 = vmul.f32 %v1099_v28, %v1099_v28 }
  0xae   : > { %v1128_v47 = vmul.f32 %v1096_v42, %v1096_v42 }
  0xaf   : > { %v783_v50 = vpop.permute.xlu1 %782  ;;  %5457 = vset.pattern.permute.xlu1 %v6011_v1  ;;  %v6262_v53 = vpop.permute.xlu0 %994 }
  0xb0   : > { %582 = vperm.xlu1 %5457, %v455_v48   ;;  %v871_v29 = vsub.f32 %v783_v50, %v6244_v40  ;;  %v452_v50 = vld [vmem:[%s6132_s27 + $0xa0] sm:$0xff] }
  0xb2   : > { %v903_v39 = vmul.f32 %v871_v29, %v871_v29  ;;  %v1129_v29 = vmul.f32 %v1097_v52, %v1097_v52 }
  0xb3   : > { %v6267_v58 = vpop.permute.xlu0 %990 }
  0xb4   : > { %v6264_v57 = vpop.permute.xlu1 %1074  ;;  %5458 = vset.pattern.permute.xlu1 %v6010_v0 }
  0xb5   : > { %818 = vperm.xlu1 %5458, %v455_v48  }
  0xb7   : > { %v6271_v60 = vpop.permute.xlu0 %986 }
  0xb9   : > { %v6273_v61 = vpop.permute.xlu1 %612  ;;  %754 = vperm.xlu1 %5458, %v6163_v14   ;;  %v453_v14 = vld [vmem:[%s6132_s27 + $0xa8] sm:$0xff] }
  0xbb   : > { %v6276_v62 = vpop.permute.xlu0 %982 }
  0xbc   : > { %1230 = vmin.xlane.f32.xlu0 %v1229_v63 }
  0xbd   : > { %5459 = vset.pattern.permute.xlu1 %v6012_v4 }
  0xbe   : > { %v6281_v2 = vpop.permute.xlu1 %842  ;;  %1046 = vperm.xlu1 %5459, %v455_v48  }
  0xbf   : > { %v6283_v3 = vpop.permute.xlu0 %978 }
  0xc2   : > { %v779_v6 = vpop.permute.xlu1 %778  ;;  %5460 = vset.pattern.permute.xlu1 %v6011_v1 }
  0xc3   : > { %577 = vperm.xlu1 %5460, %v454_v5   ;;  %v6287_v7 = vpop.permute.xlu0 %974  ;;  %v870_v41 = vsub.f32 %v779_v6, %v6244_v40 }
  0xc5   : > { %v902_v36 = vmul.f32 %v870_v41, %v870_v41 }
  0xc7   : > { %v6289_v8 = vpop.permute.xlu1 %1070  ;;  %5461 = vset.pattern.permute.xlu1 %v6010_v0  ;;  %v6292_v9 = vpop.permute.xlu0 %970 }
  0xc8   : > { %814 = vperm.xlu1 %5461, %v454_v5  }
  0xcb   : > { %v6297_v11 = vpop.permute.xlu0 %966 }
  0xcc   : > { %v6294_v10 = vpop.permute.xlu1 %607  ;;  %750 = vperm.xlu1 %5461, %v6168_v15  }
  0xcf   : > { %v6300_v12 = vpop.permute.xlu0 %962 }
  0xd0   : > { %5462 = vset.pattern.permute.xlu1 %v6012_v4 }
  0xd1   : > { %v6302_v13 = vpop.permute.xlu1 %838  ;;  %1042 = vperm.xlu1 %5462, %v454_v5  }
  0xd3   : > { %v6305_v18 = vpop.permute.xlu0 %958 }
  0xd5   : > { %v775_v23 = vpop.permute.xlu1 %774  ;;  %5463 = vset.pattern.permute.xlu1 %v6011_v1 }
  0xd6   : > { %572 = vperm.xlu1 %5463, %v453_v14   ;;  %v869_v54 = vsub.f32 %v775_v23, %v6244_v40 }
  0xd7   : > { %v6308_v24 = vpop.permute.xlu0 %954 }
  0xd8   : > { %v901_v23 = vmul.f32 %v869_v54, %v869_v54 }
  0xda   : > { %v6310_v25 = vpop.permute.xlu1 %1066  ;;  %5464 = vset.pattern.permute.xlu1 %v6010_v0 }
  0xdb   : > { %810 = vperm.xlu1 %5464, %v453_v14  }
  0xdc   : > { %v6313_v15 = vpop.permute.xlu0 %622 }
  0xdf   : > { %v6315_v26 = vpop.permute.xlu1 %602  ;;  %746 = vperm.xlu1 %5464, %v6172_v16  }
  0xe0   : > { %v538_v30 = vpop.permute.xlu0 %537 }
  0xe1   : > { %v643_v34 = vsub.f32 %v538_v30, %v6248_v43 }
  0xe3   : > { %5465 = vset.pattern.permute.xlu1 %v6012_v4  ;;  %v675_v46 = vmul.f32 %v643_v34, %v643_v34 }
  0xe4   : > { %v6326_v16 = vpop.permute.xlu1 %834  ;;  %1038 = vperm.xlu1 %5465, %v453_v14   ;;  %v533_v48 = vpop.permute.xlu0 %532 }
  0xe5   : > { %v935_v32 = vadd.f32 %v903_v39, %v675_v46  ;;  %v642_v49 = vsub.f32 %v533_v48, %v6248_v43 }
  0xe7   : > { %v674_v55 = vmul.f32 %v642_v49, %v642_v49  ;;  %v6334_v63 = vadd.f32 %v1131_v37, %v935_v32 }
  0xe8   : > { %v771_v56 = vpop.permute.xlu1 %770  ;;  %5466 = vset.pattern.permute.xlu1 %v6011_v1  ;;  %v528_v5 = vpop.permute.xlu0 %527 }
  0xe9   : > { %11317 = vst [vmem:[#allocation6_spill] sm:$0xff] %v6334_v63  ;;  %567 = vperm.xlu1 %5466, %v452_v50   ;;  %v934_v6 = vadd.f32 %v902_v36, %v674_v55  ;;  %v641_v14 = vsub.f32 %v528_v5, %v6248_v43  ;;  %v1226_v28 = vsel %vm11130_vm0, %v6334_v63, inf  ;;  %v868_v30 = vsub.f32 %v771_v56, %v6244_v40 }
  0xea   : > { %1227 = vmin.xlane.f32.xlu0 %v1226_v28  ;;  %v451_v28 = vld [vmem:[%s6132_s27 + $0x98] sm:$0xff] }
  0xeb   : > { %v673_v34 = vmul.f32 %v641_v14, %v641_v14  ;;  %v6342_v35 = vadd.f32 %v1130_v51, %v934_v6  ;;  %v900_v32 = vmul.f32 %v868_v30, %v868_v30 }
  0xec   : > { %v523_v39 = vpop.permute.xlu0 %522 }
  0xed   : > { %11318 = vst [vmem:[#allocation7_spill] sm:$0xff] %v6342_v35  ;;  %v6344_v37 = vpop.permute.xlu1 %1062  ;;  %5467 = vset.pattern.permute.xlu1 %v6010_v0  ;;  %v933_v41 = vadd.f32 %v901_v23, %v673_v34  ;;  %v640_v46 = vsub.f32 %v523_v39, %v6248_v43  ;;  %v1223_v48 = vsel %vm11130_vm0, %v6342_v35, inf }
  0xee   : > { %806 = vperm.xlu1 %5467, %v452_v50   ;;  %1224 = vmin.xlane.f32.xlu0 %v1223_v48 }
  0xef   : > { %v672_v49 = vmul.f32 %v640_v46, %v640_v46  ;;  %v6350_v52 = vadd.f32 %v1129_v29, %v933_v41 }
  0xf0   : > { %v518_v56 = vpop.permute.xlu0 %517 }
  0xf1   : > { %11319 = vst [vmem:[#allocation8_spill] sm:$0xff] %v6350_v52  ;;  %v932_v51 = vadd.f32 %v900_v32, %v672_v49  ;;  %v1220_v54 = vsel %vm11130_vm0, %v6350_v52, inf  ;;  %v639_v14 = vsub.f32 %v518_v56, %v6248_v43  ;;  %v450_v49 = vld [vmem:[%s6132_s27 + $0x90] sm:$0xff] }
  0xf2   : > { %v6352_v36 = vpop.permute.xlu1 %597  ;;  %742 = vperm.xlu1 %5467, %v6176_v17   ;;  %1221 = vmin.xlane.f32.xlu0 %v1220_v54  ;;  %v1095_v17 = vsub.f32 %v6262_v53, %v6253_v45 }
  0xf3   : > { %v6357_v55 = vadd.f32 %v1128_v47, %v932_v51  ;;  %v671_v23 = vmul.f32 %v639_v14, %v639_v14  ;;  %v1094_v51 = vsub.f32 %v6267_v58, %v6253_v45 }
  0xf4   : > { %v1127_v30 = vmul.f32 %v1095_v17, %v1095_v17  ;;  %v513_v48 = vpop.permute.xlu0 %512 }
  0xf5   : > { %11320 = vst [vmem:[#allocation9_spill] sm:$0xff] %v6357_v55  ;;  %v1217_v5 = vsel %vm11130_vm0, %v6357_v55, inf  ;;  %v638_v32 = vsub.f32 %v513_v48, %v6248_v43 }
  0xf6   : > { %5468 = vset.pattern.permute.xlu1 %v6012_v4  ;;  %1218 = vmin.xlane.f32.xlu0 %v1217_v5 }
  0xf7   : > { %v6362_v6 = vpop.permute.xlu1 %830  ;;  %1034 = vperm.xlu1 %5468, %v452_v50   ;;  %v670_v5 = vmul.f32 %v638_v32, %v638_v32 }
  0xfb   : > { %v767_v29 = vpop.permute.xlu1 %766  ;;  %5469 = vset.pattern.permute.xlu1 %v6011_v1 }
  0xfc   : > { %v867_v42 = vsub.f32 %v767_v29, %v6244_v40  ;;  %562 = vperm.xlu1 %5469, %v451_v28  }
  0xfe   : > { %v899_v34 = vmul.f32 %v867_v42, %v867_v42 }
 0x100   : > { %v931_v39 = vadd.f32 %v899_v34, %v671_v23  ;;  %v6370_v41 = vpop.permute.xlu1 %1058  ;;  %5470 = vset.pattern.permute.xlu1 %v6010_v0  ;;  %v508_v23 = vpop.permute.xlu0 %507 }
 0x101   : > { %802 = vperm.xlu1 %5470, %v451_v28   ;;  %v637_v34 = vsub.f32 %v508_v23, %v6248_v43  ;;  %v448_v23 = vld [vmem:[%s6132_s27 + $0x80] sm:$0xff] }
 0x102   : > { %v6373_v50 = vadd.f32 %v1127_v30, %v931_v39  ;;  %v449_v39 = vld [vmem:[%s6132_s27 + $0x88] sm:$0xff]  ;;  %s10245_s27 = scalar_lea.vmem %s10846_s2, %s5276_s24  ;;  %s5335_s24 = sshll.u32 %s6000_s12, 11 }
 0x103   : > { %s10791_s28 = scalar_lea.hbm %s10853_s9, %s5335_s24  ;;  %s10799_s12 = scalar_lea.sflag [#allocation3], %s400_s18 }
 0x104   : > { %11321 = vst [vmem:[#allocation10_spill] sm:$0xff] %v6373_v50  ;;  %v1214_v53 = vsel %vm11130_vm0, %v6373_v50, inf }
 0x105   : > { %v6377_v46 = vpop.permute.xlu1 %592  ;;  %738 = vperm.xlu1 %5470, %v6182_v19   ;;  %1215 = vmin.xlane.f32.xlu0 %v1214_v53  ;;  %v1126_v19 = vmul.f32 %v1094_v51, %v1094_v51  ;;  %v1093_v53 = vsub.f32 %v6271_v60, %v6253_v45  ;;  %v669_v51 = vmul.f32 %v637_v34, %v637_v34 }
 0x106   : > { %v1092_v34 = vsub.f32 %v6276_v62, %v6253_v45 }
 0x109   : > { %5471 = vset.pattern.permute.xlu1 %v6012_v4 }
 0x10a   : > { %v6381_v47 = vpop.permute.xlu1 %826  ;;  %1030 = vperm.xlu1 %5471, %v451_v28  }
 0x10e   : > { %v763_v54 = vpop.permute.xlu1 %762  ;;  %5472 = vset.pattern.permute.xlu1 %v6011_v1 }
 0x10f   : > { %v866_v56 = vsub.f32 %v763_v54, %v6244_v40  ;;  %557 = vperm.xlu1 %5472, %v450_v49  }
 0x111   : > { %v898_v14 = vmul.f32 %v866_v56, %v866_v56 }
 0x113   : > { %v930_v17 = vadd.f32 %v898_v14, %v670_v5  ;;  %v6389_v29 = vpop.permute.xlu1 %1054  ;;  %5473 = vset.pattern.permute.xlu1 %v6010_v0  ;;  %v503_v14 = vpop.permute.xlu0 %502 }
 0x114   : > { %798 = vperm.xlu1 %5473, %v450_v49  }
 0x115   : > { %v6392_v28 = vadd.f32 %v1126_v19, %v930_v17 }
 0x117   : > { %11322 = vst [vmem:[#allocation11_spill] sm:$0xff] %v6392_v28  ;;  %v1211_v58 = vsel %vm11130_vm0, %v6392_v28, inf }
 0x118   : > { %v6396_v42 = vpop.permute.xlu1 %587  ;;  %734 = vperm.xlu1 %5473, %v6187_v20   ;;  %1212 = vmin.xlane.f32.xlu0 %v1211_v58  ;;  %v1125_v20 = vmul.f32 %v1093_v53, %v1093_v53  ;;  %v636_v58 = vsub.f32 %v503_v14, %v6248_v43 }
 0x11c   : > { %5474 = vset.pattern.permute.xlu1 %v6012_v4 }
 0x11d   : > { %v6400_v30 = vpop.permute.xlu1 %822  ;;  %1026 = vperm.xlu1 %5474, %v450_v49  }
 0x121   : > { %v759_v48 = vpop.permute.xlu1 %758  ;;  %5475 = vset.pattern.permute.xlu1 %v6011_v1 }
 0x122   : > { %v865_v32 = vsub.f32 %v759_v48, %v6244_v40  ;;  %552 = vperm.xlu1 %5475, %v449_v39   ;;  %v668_v48 = vmul.f32 %v636_v58, %v636_v58 }
 0x124   : > { %v897_v54 = vmul.f32 %v865_v32, %v865_v32 }
 0x126   : > { %v929_v56 = vadd.f32 %v897_v54, %v669_v51  ;;  %v6408_v5 = vpop.permute.xlu1 %1050  ;;  %5476 = vset.pattern.permute.xlu1 %v6010_v0 }
 0x127   : > { %794 = vperm.xlu1 %5476, %v449_v39  }
 0x128   : > { %v6411_v49 = vadd.f32 %v1125_v20, %v929_v56 }
 0x12a   : > { %11323 = vst [vmem:[#allocation12_spill] sm:$0xff] %v6411_v49  ;;  %v1208_v60 = vsel %vm11130_vm0, %v6411_v49, inf }
 0x12b   : > { %v6415_v19 = vpop.permute.xlu1 %582  ;;  %730 = vperm.xlu1 %5476, %v6192_v21   ;;  %1209 = vmin.xlane.f32.xlu0 %v1208_v60  ;;  %v1124_v21 = vmul.f32 %v1092_v34, %v1092_v34  ;;  %v498_v60 = vpop.permute.xlu0 %497  ;;  %v1091_v34 = vsub.f32 %v6283_v3, %v6253_v45  ;;  %v660_v3 = vsub.f32 %v6313_v15, %v6248_v43 }
 0x12c   : > { %v635_v58 = vsub.f32 %v498_v60, %v6248_v43  ;;  %v887_v15 = vsub.f32 %v6251_v44, %v6244_v40  ;;  %v658_v44 = vsub.f32 %v6273_v61, %v6248_v43 }
 0x12e   : > { %v690_v61 = vmul.f32 %v658_v44, %v658_v44 }
 0x12f   : > { %5477 = vset.pattern.permute.xlu1 %v6012_v4 }
 0x130   : > { %v6419_v17 = vpop.permute.xlu1 %818  ;;  %1022 = vperm.xlu1 %5477, %v449_v39  }
 0x134   : > { %v755_v53 = vpop.permute.xlu1 %754  ;;  %5478 = vset.pattern.permute.xlu1 %v6011_v1 }
 0x135   : > { %v864_v32 = vsub.f32 %v755_v53, %v6244_v40  ;;  %547 = vperm.xlu1 %5478, %v448_v23   ;;  %v667_v53 = vmul.f32 %v635_v58, %v635_v58 }
 0x137   : > { %v896_v51 = vmul.f32 %v864_v32, %v864_v32 }
 0x139   : > { %v928_v20 = vadd.f32 %v896_v51, %v668_v48  ;;  %v6427_v54 = vpop.permute.xlu1 %1046  ;;  %5479 = vset.pattern.permute.xlu1 %v6010_v0 }
 0x13a   : > { %790 = vperm.xlu1 %5479, %v448_v23  }
 0x13b   : > { %v6430_v39 = vadd.f32 %v1124_v21, %v928_v20  ;;  %v1123_v21 = vmul.f32 %v1091_v34, %v1091_v34  ;;  %v692_v34 = vmul.f32 %v660_v3, %v660_v3 }
 0x13d   : > { %11324 = vst [vmem:[#allocation13_spill] sm:$0xff] %v6430_v39  ;;  %v1205_v62 = vsel %vm11130_vm0, %v6430_v39, inf }
 0x13e   : > { %v6434_v56 = vpop.permute.xlu1 %577  ;;  %1206 = vmin.xlane.f32.xlu0 %v1205_v62  ;;  %726 = vperm.xlu1 %5479, %v6196_v22   ;;  %v493_v62 = vpop.permute.xlu0 %492 }
 0x13f   : > { %v634_v58 = vsub.f32 %v493_v62, %v6248_v43 }
 0x142   : > { %5480 = vset.pattern.permute.xlu1 %v6012_v4 }
 0x143   : > { %v6438_v14 = vpop.permute.xlu1 %814  ;;  %1018 = vperm.xlu1 %5480, %v448_v23  }
 0x147   : > { %v751_v0 = vpop.permute.xlu1 %750  ;;  %5482 = vset.pattern.permute.xlu1 %v6011_v1  ;;  %v888_v1 = vsub.f32 %v6223_v27, %v6244_v40  ;;  %v1116_v27 = vsub.f32 %v6232_v33, %v6253_v45  ;;  %v919_v33 = vmul.f32 %v887_v15, %v887_v15 }
 0x148   : > { %v863_v48 = vsub.f32 %v751_v0, %v6244_v40 }
 0x149   : > { %v920_v0 = vmul.f32 %v888_v1, %v888_v1  ;;  %v1115_v1 = vsub.f32 %v6264_v57, %v6253_v45  ;;  %v1148_v31 = vmul.f32 %v1116_v27, %v1116_v27 }
 0x14a   : > { %v895_v32 = vmul.f32 %v863_v48, %v863_v48  ;;  %v1090_v48 = vsub.f32 %v6287_v7, %v6253_v45  ;;  %v886_v7 = vsub.f32 %v6281_v2, %v6244_v40  ;;  %v885_v2 = vsub.f32 %v6302_v13, %v6244_v40 }
 0x14b   : > { %v952_v3 = vadd.f32 %v920_v0, %v692_v34  ;;  %v1147_v57 = vmul.f32 %v1115_v1, %v1115_v1 }
 0x14c   : > { %v927_v22 = vadd.f32 %v895_v32, %v667_v53  ;;  %v6445_v51 = vpop.permute.xlu1 %1042  ;;  %v666_v32 = vmul.f32 %v634_v58, %v634_v58  ;;  %v1122_v62 = vmul.f32 %v1090_v48, %v1090_v48  ;;  %v918_v34 = vmul.f32 %v886_v7, %v886_v7 }
 0x14d   : > { %v6481_v0 = vadd.f32 %v1148_v31, %v952_v3  ;;  %v1113_v31 = vsub.f32 %v6310_v25, %v6253_v45  ;;  %v917_v1 = vmul.f32 %v885_v2, %v885_v2  ;;  %v656_v25 = vsub.f32 %v6315_v26, %v6248_v43 }
 0x14e   : > { %v6447_v4 = vadd.f32 %v1123_v21, %v927_v22  ;;  %v655_v26 = vsub.f32 %v6352_v36, %v6248_v43 }
 0x14f   : > { %11327 = vst [vmem:[#allocation16_spill] sm:$0xff] %v6481_v0  ;;  %v1277_v13 = vsel %vm11130_vm0, %v6481_v0, inf }
 0x150   : > { %11325 = vst [vmem:[#allocation14_spill] sm:$0xff] %v6447_v4  ;;  %v1202_v23 = vsel %vm11130_vm0, %v6447_v4, inf  ;;  %v687_v36 = vmul.f32 %v655_v26, %v655_v26  ;;  %v1109_v26 = vsub.f32 %v6408_v5, %v6253_v45 }
 0x151   : > { %v6451_v20 = vpop.permute.xlu1 %572  ;;  %1203 = vmin.xlane.f32.xlu0 %v1202_v23  ;;  %v659_v23 = vsub.f32 %v6241_v38, %v6248_v43 }
 0x153   : > { %v691_v4 = vmul.f32 %v659_v23, %v659_v23  ;;  %v950_v23 = vadd.f32 %v918_v34, %v690_v61  ;;  %v1089_v34 = vsub.f32 %v6292_v9, %v6253_v45  ;;  %v882_v9 = vsub.f32 %v6381_v47, %v6244_v40 }
 0x156   : > { %v6457_v60 = vpop.permute.xlu1 %810 }
 0x15a   : > { %v747_v53 = vpop.permute.xlu1 %746 }
 0x15b   : > { %v862_v21 = vsub.f32 %v747_v53, %v6244_v40 }
 0x15d   : > { %v894_v22 = vmul.f32 %v862_v21, %v862_v21  ;;  %v1114_v21 = vsub.f32 %v6289_v8, %v6253_v45  ;;  %v657_v8 = vsub.f32 %v6294_v10, %v6248_v43 }
 0x15f   : > { %v926_v58 = vadd.f32 %v894_v22, %v666_v32  ;;  %v6473_v53 = vpop.permute.xlu1 %1038  ;;  %v951_v32 = vadd.f32 %v919_v33, %v691_v4  ;;  %v1146_v15 = vmul.f32 %v1114_v21, %v1114_v21  ;;  %v884_v4 = vsub.f32 %v6326_v16, %v6244_v40 }
 0x160   : > { %v689_v7 = vmul.f32 %v657_v8, %v657_v8  ;;  %v1112_v33 = vsub.f32 %v6344_v37, %v6253_v45  ;;  %v883_v16 = vsub.f32 %v6362_v6, %v6244_v40  ;;  %v1111_v37 = vsub.f32 %v6370_v41, %v6253_v45 }
 0x161   : > { %v6479_v38 = vadd.f32 %v1122_v62, %v926_v58  ;;  %v6493_v22 = vadd.f32 %v1147_v57, %v951_v32  ;;  %v6499_v3 = vadd.f32 %v1146_v15, %v950_v23  ;;  %v1145_v62 = vmul.f32 %v1113_v31, %v1113_v31  ;;  %v488_v58 = vpop.permute.xlu0 %487 }
 0x162   : > { %v633_v44 = vsub.f32 %v488_v58, %v6248_v43  ;;  %v949_v57 = vadd.f32 %v917_v1, %v689_v7  ;;  %v916_v2 = vmul.f32 %v884_v4, %v884_v4  ;;  %v688_v15 = vmul.f32 %v656_v25, %v656_v25 }
 0x163   : > { %11326 = vst [vmem:[#allocation15_spill] sm:$0xff] %v6479_v38  ;;  %v1199_v48 = vsel %vm11130_vm0, %v6479_v38, inf  ;;  %11328 = vst [vmem:[#allocation17_spill] sm:$0xff] %v6493_v22  ;;  %v1274_v21 = vsel %vm11130_vm0, %v6493_v22, inf  ;;  %v1271_v61 = vsel %vm11130_vm0, %v6499_v3, inf  ;;  %v1144_v8 = vmul.f32 %v1112_v33, %v1112_v33 }
 0x164   : > { %v6487_v27 = vpop.permute.xlu1 %567  ;;  %1200 = vmin.xlane.f32.xlu0 %v1199_v48  ;;  %11329 = vst [vmem:[#allocation18_spill] sm:$0xff] %v6499_v3  ;;  %v6514_v48 = vadd.f32 %v1145_v62, %v949_v57  ;;  %v665_v6 = vmul.f32 %v633_v44, %v633_v44  ;;  %v948_v23 = vadd.f32 %v916_v2, %v688_v15 }
 0x165   : > { %v1143_v4 = vmul.f32 %v1111_v37, %v1111_v37  ;;  %v654_v41 = vsub.f32 %v6377_v46, %v6248_v43  ;;  %v1110_v7 = vsub.f32 %v6389_v29, %v6253_v45  ;;  %v1121_v62 = vmul.f32 %v1089_v34, %v1089_v34 }
 0x166   : > { %11330 = vst [vmem:[#allocation19_spill] sm:$0xff] %v6514_v48  ;;  %v6529_v58 = vadd.f32 %v1144_v8, %v948_v23  ;;  %v1268_v47 = vsel %vm11130_vm0, %v6514_v48, inf  ;;  %v881_v57 = vsub.f32 %v6400_v30, %v6244_v40  ;;  %v653_v2 = vsub.f32 %v6396_v42, %v6248_v43  ;;  %v483_v23 = vpop.permute.xlu0 %482 }
 0x167   : > { %1278 = vmin.xlane.f32.xlu1 %v1277_v13  ;;  %v915_v13 = vmul.f32 %v883_v16, %v883_v16  ;;  %v686_v29 = vmul.f32 %v654_v41, %v654_v41  ;;  %v1142_v34 = vmul.f32 %v1110_v7, %v1110_v7  ;;  %v880_v8 = vsub.f32 %v6419_v17, %v6244_v40 }
 0x168   : > { %11331 = vst [vmem:[#allocation20_spill] sm:$0xff] %v6529_v58  ;;  %v913_v15 = vmul.f32 %v881_v57, %v881_v57  ;;  %v685_v5 = vmul.f32 %v653_v2, %v653_v2  ;;  %v651_v41 = vsub.f32 %v6434_v56, %v6248_v43  ;;  %v650_v2 = vsub.f32 %v6451_v20, %v6248_v43 }
 0x169   : > { %v6501_v10 = vpop.permute.xlu1 %806  ;;  %v947_v44 = vadd.f32 %v915_v13, %v687_v36  ;;  %v652_v13 = vsub.f32 %v6415_v19, %v6248_v43  ;;  %v912_v17 = vmul.f32 %v880_v8, %v880_v8 }
 0x16a   : > { %v945_v36 = vadd.f32 %v913_v15, %v685_v5  ;;  %v682_v20 = vmul.f32 %v650_v2, %v650_v2  ;;  %v478_v2 = vpop.permute.xlu0 %477 }
 0x16b   : > { %1275 = vmin.xlane.f32.xlu1 %v1274_v21  ;;  %v914_v21 = vmul.f32 %v882_v9, %v882_v9  ;;  %v6539_v46 = vadd.f32 %v1143_v4, %v947_v44  ;;  %v1108_v9 = vsub.f32 %v6427_v54, %v6253_v45  ;;  %v632_v4 = vsub.f32 %v483_v23, %v6248_v43 }
 0x16c   : > { %v878_v44 = vsub.f32 %v6457_v60, %v6244_v40 }
 0x16d   : > { %v743_v32 = vpop.permute.xlu1 %742  ;;  %11333 = vst [vmem:[#allocation22_spill] sm:$0xff] %v6539_v46  ;;  %v1262_v42 = vsel %vm11130_vm0, %v6539_v46, inf  ;;  %v1140_v54 = vmul.f32 %v1108_v9, %v1108_v9  ;;  %v664_v57 = vmul.f32 %v632_v4, %v632_v4  ;;  %v649_v9 = vsub.f32 %v6487_v27, %v6248_v43 }
 0x16e   : > { %v861_v31 = vsub.f32 %v743_v32, %v6244_v40  ;;  %v1265_v32 = vsel %vm11130_vm0, %v6529_v58, inf }
 0x16f   : > { %1272 = vmin.xlane.f32.xlu1 %v1271_v61  ;;  %v946_v61 = vadd.f32 %v914_v21, %v686_v29  ;;  %v1088_v21 = vsub.f32 %v6297_v11, %v6253_v45  ;;  %v683_v29 = vmul.f32 %v651_v41, %v651_v41  ;;  %v910_v11 = vmul.f32 %v878_v44, %v878_v44 }
 0x170   : > { %v893_v1 = vmul.f32 %v861_v31, %v861_v31  ;;  %v1141_v31 = vmul.f32 %v1109_v26, %v1109_v26  ;;  %v1106_v26 = vsub.f32 %v6473_v53, %v6253_v45 }
 0x171   : > { %v1120_v8 = vmul.f32 %v1088_v21, %v1088_v21 }
 0x172   : > { %v925_v25 = vadd.f32 %v893_v1, %v665_v6  ;;  %v6531_v33 = vpop.permute.xlu1 %1034  ;;  %v6551_v6 = vadd.f32 %v1142_v34, %v946_v61  ;;  %v879_v1 = vsub.f32 %v6438_v14, %v6244_v40  ;;  %v6566_v19 = vadd.f32 %v1141_v31, %v945_v36 }
 0x173   : > { %1269 = vmin.xlane.f32.xlu1 %v1268_v47  ;;  %v1138_v31 = vmul.f32 %v1106_v26, %v1106_v26  ;;  %v1105_v23 = vsub.f32 %v6531_v33, %v6253_v45  ;;  %v942_v36 = vadd.f32 %v910_v11, %v682_v20  ;;  %v1087_v11 = vsub.f32 %v6300_v12, %v6253_v45 }
 0x174   : > { %v6537_v16 = vadd.f32 %v1121_v62, %v925_v25  ;;  %11334 = vst [vmem:[#allocation23_spill] sm:$0xff] %v6551_v6  ;;  %v1107_v62 = vsub.f32 %v6445_v51, %v6253_v45  ;;  %11335 = vst [vmem:[#allocation24_spill] sm:$0xff] %v6566_v19  ;;  %v684_v25 = vmul.f32 %v652_v13, %v652_v13  ;;  %v1259_v47 = vsel %vm11130_vm0, %v6551_v6, inf }
 0x175   : > { %v911_v14 = vmul.f32 %v879_v1, %v879_v1  ;;  %v1256_v60 = vsel %vm11130_vm0, %v6566_v19, inf  ;;  %v6596_v41 = vadd.f32 %v1138_v31, %v942_v36  ;;  %v1137_v33 = vmul.f32 %v1105_v23, %v1105_v23 }
 0x176   : > { %11332 = vst [vmem:[#allocation21_spill] sm:$0xff] %v6537_v16  ;;  %v1196_v37 = vsel %vm11130_vm0, %v6537_v16, inf  ;;  %v944_v56 = vadd.f32 %v912_v17, %v684_v25  ;;  %v1139_v51 = vmul.f32 %v1107_v62, %v1107_v62  ;;  %v681_v25 = vmul.f32 %v649_v9, %v649_v9 }
 0x177   : > { %v563_v30 = vpop.permute.xlu1 %562  ;;  %1197 = vmin.xlane.f32.xlu0 %v1196_v37  ;;  %1266 = vmin.xlane.f32.xlu1 %v1265_v32  ;;  %v943_v61 = vadd.f32 %v911_v14, %v683_v29  ;;  %11339 = vst [vmem:[#allocation28_spill] sm:$0xff] %v6596_v41  ;;  %v1247_v29 = vsel %vm11130_vm0, %v6596_v41, inf }
 0x178   : > { %v6579_v32 = vadd.f32 %v1140_v54, %v944_v56  ;;  %v648_v54 = vsub.f32 %v563_v30, %v6248_v43  ;;  %v631_v30 = vsub.f32 %v478_v2, %v6248_v43 }
 0x179   : > { %v6585_v5 = vadd.f32 %v1139_v51, %v943_v61 }
 0x17a   : > { %11336 = vst [vmem:[#allocation25_spill] sm:$0xff] %v6579_v32  ;;  %v1253_v1 = vsel %vm11130_vm0, %v6579_v32, inf  ;;  %v680_v56 = vmul.f32 %v648_v54, %v648_v54 }
 0x17b   : > { %1263 = vmin.xlane.f32.xlu1 %v1262_v42  ;;  %v877_v42 = vsub.f32 %v6501_v10, %v6244_v40  ;;  %11337 = vst [vmem:[#allocation26_spill] sm:$0xff] %v6585_v5  ;;  %v1250_v27 = vsel %vm11130_vm0, %v6585_v5, inf }
 0x17c   : > { %v803_v7 = vpop.permute.xlu1 %802 }
 0x17d   : > { %v909_v10 = vmul.f32 %v877_v42, %v877_v42  ;;  %v876_v4 = vsub.f32 %v803_v7, %v6244_v40  ;;  %v663_v42 = vmul.f32 %v631_v30, %v631_v30 }
 0x17f   : > { %1260 = vmin.xlane.f32.xlu1 %v1259_v47  ;;  %v941_v44 = vadd.f32 %v909_v10, %v681_v25  ;;  %v908_v21 = vmul.f32 %v876_v4, %v876_v4 }
 0x180   : > { %v739_v34 = vpop.permute.xlu1 %738 }
 0x181   : > { %v860_v37 = vsub.f32 %v739_v34, %v6244_v40  ;;  %v6604_v7 = vadd.f32 %v1137_v33, %v941_v44  ;;  %v940_v51 = vadd.f32 %v908_v21, %v680_v56  ;;  %v1086_v56 = vsub.f32 %v6305_v18, %v6253_v45 }
 0x183   : > { %v892_v15 = vmul.f32 %v860_v37, %v860_v37  ;;  %1257 = vmin.xlane.f32.xlu1 %v1256_v60  ;;  %11340 = vst [vmem:[#allocation29_spill] sm:$0xff] %v6604_v7  ;;  %v1244_v37 = vsel %vm11130_vm0, %v6604_v7, inf }
 0x185   : > { %v924_v53 = vadd.f32 %v892_v15, %v664_v57  ;;  %v1031_v13 = vpop.permute.xlu1 %1030 }
 0x186   : > { %v1104_v47 = vsub.f32 %v1031_v13, %v6253_v45  ;;  %v1119_v13 = vmul.f32 %v1087_v11, %v1087_v11 }
 0x187   : > { %1254 = vmin.xlane.f32.xlu1 %v1253_v1  ;;  %v6593_v17 = vadd.f32 %v1120_v8, %v924_v53 }
 0x188   : > { %v1136_v57 = vmul.f32 %v1104_v47, %v1104_v47  ;;  %v473_v47 = vpop.permute.xlu0 %472 }
 0x189   : > { %11338 = vst [vmem:[#allocation27_spill] sm:$0xff] %v6593_v17  ;;  %v1193_v62 = vsel %vm11130_vm0, %v6593_v17, inf }
 0x18a   : > { %v558_v14 = vpop.permute.xlu1 %557  ;;  %1194 = vmin.xlane.f32.xlu0 %v1193_v62  ;;  %v6609_v26 = vadd.f32 %v1136_v57, %v940_v51 }
 0x18b   : > { %1251 = vmin.xlane.f32.xlu1 %v1250_v27  ;;  %v647_v8 = vsub.f32 %v558_v14, %v6248_v43  ;;  %v630_v14 = vsub.f32 %v473_v47, %v6248_v43 }
 0x18c   : > { %11341 = vst [vmem:[#allocation30_spill] sm:$0xff] %v6609_v26  ;;  %v1241_v31 = vsel %vm11130_vm0, %v6609_v26, inf  ;;  %v468_v51 = vpop.permute.xlu0 %467 }
 0x18d   : > { %v679_v1 = vmul.f32 %v647_v8, %v647_v8 }
 0x18f   : > { %v799_v34 = vpop.permute.xlu1 %798  ;;  %1248 = vmin.xlane.f32.xlu1 %v1247_v29 }
 0x190   : > { %v875_v60 = vsub.f32 %v799_v34, %v6244_v40  ;;  %v662_v34 = vmul.f32 %v630_v14, %v630_v14 }
 0x192   : > { %v907_v53 = vmul.f32 %v875_v60, %v875_v60 }
 0x193   : > { %v735_v61 = vpop.permute.xlu1 %734  ;;  %1245 = vmin.xlane.f32.xlu1 %v1244_v37  ;;  %v1118_v37 = vmul.f32 %v1086_v56, %v1086_v56 }
 0x194   : > { %v859_v15 = vsub.f32 %v735_v61, %v6244_v40  ;;  %v939_v12 = vadd.f32 %v907_v53, %v679_v1 }
 0x196   : > { %v891_v20 = vmul.f32 %v859_v15, %v859_v15 }
 0x197   : > { %1242 = vmin.xlane.f32.xlu1 %v1241_v31  ;;  %v6638_v31 = vpop.xlane.xlu0 %1230 }
 0x198   : > { %v923_v9 = vadd.f32 %v891_v20, %v663_v42  ;;  %v1027_v23 = vpop.permute.xlu1 %1026  ;;  %11345 = vst [vmem:[#allocation34_spill] sm:$0xff] %v6638_v31  ;;  %vm1295_vm1 = vcmp.eq.f32.partialorder %v6269_v59, %v6638_v31 }
 0x199   : > { %v1103_v36 = vsub.f32 %v1027_v23, %v6253_v45 }
 0x19a   : > { %v6621_v10 = vadd.f32 %v1119_v13, %v923_v9 }
 0x19b   : > { %v1135_v4 = vmul.f32 %v1103_v36, %v1103_v36  ;;  %v6646_v23 = vpop.xlane.xlu0 %1227  ;;  %v11348_v36 = vlaneseq }
 0x19c   : > { %11342 = vst [vmem:[#allocation31_spill] sm:$0xff] %v6621_v10  ;;  %v1190_v62 = vsel %vm11130_vm0, %v6621_v10, inf  ;;  %11347 = vst [vmem:[#allocation36_spill] sm:$0xff] %v6646_v23  ;;  %vm1294_vm2 = vcmp.eq.f32.partialorder %v6334_v63, %v6646_v23 }
 0x19d   : > { %v6625_v27 = vadd.f32 %v1135_v4, %v939_v12  ;;  %v553_v25 = vpop.permute.xlu1 %552  ;;  %1191 = vmin.xlane.f32.xlu0 %v1190_v62  ;;  %v6649_v12 = vand.u32 127, %v11348_v36  ;;  %v629_v4 = vsub.f32 %v468_v51, %v6248_v43 }
 0x19e   : > { %v646_v29 = vsub.f32 %v553_v25, %v6248_v43 }
 0x19f   : > { %11343 = vst [vmem:[#allocation32_spill] sm:$0xff] %v6625_v27  ;;  %v1238_v33 = vsel %vm11130_vm0, %v6625_v27, inf  ;;  %11349 = vst [vmem:[#allocation37_spill] sm:$0xff] %v6649_v12  ;;  %v6654_v62 = vpop.xlane.xlu0 %1224 }
 0x1a0   : > { %1239 = vmin.xlane.f32.xlu1 %v1238_v33  ;;  %v678_v11 = vmul.f32 %v646_v29, %v646_v29  ;;  %11350 = vst [vmem:[#allocation38_spill] sm:$0xff] %v6654_v62  ;;  %vm1293_vm3 = vcmp.eq.f32.partialorder %v6342_v35, %v6654_v62 }
 0x1a2   : > { %v795_v54 = vpop.permute.xlu1 %794 }
 0x1a3   : > { %v874_v44 = vsub.f32 %v795_v54, %v6244_v40  ;;  %v1085_v54 = vsub.f32 %v6308_v24, %v6253_v45 }
 0x1a5   : > { %v906_v30 = vmul.f32 %v874_v44, %v874_v44  ;;  %v1327_v44 = vsel %vm1295_vm1, %v6649_v12, 64  ;;  %v1117_v29 = vmul.f32 %v1085_v54, %v1085_v54 }
 0x1a6   : > { %v731_v21 = vpop.permute.xlu1 %730 }
 0x1a7   : > { %v858_v57 = vsub.f32 %v731_v21, %v6244_v40  ;;  %v938_v42 = vadd.f32 %v906_v30, %v678_v11  ;;  %v661_v21 = vmul.f32 %v629_v4, %v629_v4  ;;  %v6667_v30 = vpop.xlane.xlu0 %1221 }
 0x1a8   : > { %11351 = vst [vmem:[#allocation39_spill] sm:$0xff] %v6667_v30  ;;  %vm1292_vm4 = vcmp.eq.f32.partialorder %v6350_v52, %v6667_v30 }
 0x1a9   : > { %v890_v2 = vmul.f32 %v858_v57, %v858_v57  ;;  %v1324_v4 = vsel %vm1292_vm4, %v6649_v12, 64 }
 0x1ab   : > { %v922_v60 = vadd.f32 %v890_v2, %v662_v34  ;;  %v1023_v61 = vpop.permute.xlu1 %1022  ;;  %v6665_v2 = vsel %vm11130_vm0, %v1327_v44, 2147483647 }
 0x1ac   : > { %v1102_v15 = vsub.f32 %v1023_v61, %v6253_v45  ;;  %v1571_v11 = vshra.s32 %v6665_v2, 16 }
 0x1ad   : > { %v6636_v8 = vadd.f32 %v1118_v37, %v922_v60 }
 0x1ae   : > { %v1134_v20 = vmul.f32 %v1102_v15, %v1102_v15 }
 0x1af   : > { %11344 = vst [vmem:[#allocation33_spill] sm:$0xff] %v6636_v8  ;;  %v1187_v18 = vsel %vm11130_vm0, %v6636_v8, inf }
 0x1b0   : > { %v6642_v53 = vadd.f32 %v1134_v20, %v938_v42  ;;  %v548_v13 = vpop.permute.xlu1 %547  ;;  %1188 = vmin.xlane.f32.xlu0 %v1187_v18  ;;  %v6686_v18 = vpop.xlane.xlu0 %1218 }
 0x1b1   : > { %v645_v14 = vsub.f32 %v548_v13, %v6248_v43  ;;  %v1326_v43 = vsel %vm1294_vm2, %v6649_v12, 64  ;;  %11354 = vst [vmem:[#allocation42_spill] sm:$0xff] %v6686_v18  ;;  %vm1291_vm5 = vcmp.eq.f32.partialorder %v6357_v55, %v6686_v18 }
 0x1b2   : > { %11346 = vst [vmem:[#allocation35_spill] sm:$0xff] %v6642_v53  ;;  %v1235_v9 = vsel %vm11130_vm0, %v6642_v53, inf  ;;  %v6679_v42 = vsel %vm11130_vm0, %v1326_v43, 2147483647 }
 0x1b3   : > { %1236 = vmin.xlane.f32.xlu1 %v1235_v9  ;;  %v677_v24 = vmul.f32 %v645_v14, %v645_v14  ;;  %v6690_v9 = vcvt.s32.f32 %v1571_v11  ;;  %v1323_v14 = vsel %vm1291_vm5, %v6649_v12, 64 }
 0x1b5   : > { %v791_v1 = vpop.permute.xlu1 %790 }
 0x1b6   : > { %v873_v25 = vsub.f32 %v791_v1, %v6244_v40  ;;  %v1556_v1 = vshra.s32 %v6679_v42, 16 }
 0x1b8   : > { %v905_v57 = vmul.f32 %v873_v25, %v873_v25  ;;  %v6700_v25 = vpop.xlane.xlu0 %1215 }
 0x1b9   : > { %v727_v33 = vpop.permute.xlu1 %726  ;;  %11355 = vst [vmem:[#allocation43_spill] sm:$0xff] %v6700_v25  ;;  %vm1290_vm6 = vcmp.eq.f32.partialorder %v6373_v50, %v6700_v25 }
 0x1ba   : > { %v857_v47 = vsub.f32 %v727_v33, %v6244_v40  ;;  %v937_v60 = vadd.f32 %v905_v57, %v677_v24  ;;  %v6702_v33 = vcvt.s32.f32 %v1556_v1  ;;  %v6718_v57 = vsel %vm11130_vm0, %v1323_v14, 2147483647 }
 0x1bb   : > { %v1511_v24 = vshra.s32 %v6718_v57, 16 }
 0x1bc   : > { %v889_v56 = vmul.f32 %v857_v47, %v857_v47  ;;  %v6706_v47 = vsel %vm11130_vm0, %v1324_v4, 2147483647  ;;  %v6712_v44 = vpop.xlane.xlu0 %1212 }
 0x1bd   : > { %11356 = vst [vmem:[#allocation44_spill] sm:$0xff] %v6712_v44  ;;  %vm1289_vm7 = vcmp.eq.f32.partialorder %v6392_v28, %v6712_v44 }
 0x1be   : > { %v921_v34 = vadd.f32 %v889_v56, %v661_v21  ;;  %v1019_v51 = vpop.permute.xlu1 %1018  ;;  %v1526_v56 = vshra.s32 %v6706_v47, 16  ;;  %v1321_v43 = vsel %vm1289_vm7, %v6649_v12, 64 }
 0x1bf   : > { %v1101_v40 = vsub.f32 %v1019_v51, %v6253_v45  ;;  %v1325_v45 = vsel %vm1293_vm3, %v6649_v12, 64 }
 0x1c0   : > { %v6671_v37 = vadd.f32 %v1117_v29, %v921_v34  ;;  %v6694_v36 = vsel %vm11130_vm0, %v1325_v45, 2147483647  ;;  %v1322_v29 = vsel %vm1290_vm6, %v6649_v12, 64  ;;  %v6724_v34 = vpop.xlane.xlu0 %1209  ;;  %v6726_v51 = vcvt.s32.f32 %v1526_v56  ;;  %v11360_v56 = vld [vmem:[#allocation14_spill] sm:$0xff] }
 0x1c1   : > { %v1133_v61 = vmul.f32 %v1101_v40, %v1101_v40  ;;  %v1541_v54 = vshra.s32 %v6694_v36, 16  ;;  %11357 = vst [vmem:[#allocation45_spill] sm:$0xff] %v6724_v34  ;;  %v6730_v40 = vsel %vm11130_vm0, %v1322_v29, 2147483647  ;;  %vm1288_vm8 = vcmp.eq.f32.partialorder %v6411_v49, %v6724_v34 }
 0x1c2   : > { %11352 = vst [vmem:[#allocation40_spill] sm:$0xff] %v6671_v37  ;;  %v1184_v15 = vsel %vm11130_vm0, %v6671_v37, inf  ;;  %v1496_v11 = vshra.s32 %v6730_v40, 16  ;;  %v1320_v45 = vsel %vm1288_vm8, %v6649_v12, 64 }
 0x1c3   : > { %v6681_v20 = vadd.f32 %v1133_v61, %v937_v60  ;;  %1185 = vmin.xlane.f32.xlu0 %v1184_v15  ;;  %v6714_v21 = vcvt.s32.f32 %v1541_v54  ;;  %v6738_v61 = vcvt.s32.f32 %v1511_v24  ;;  %v6742_v15 = vsel %vm11130_vm0, %v1321_v43, 2147483647 }
 0x1c4   : > { %v1481_v1 = vshra.s32 %v6742_v15, 16  ;;  %v6754_v54 = vsel %vm11130_vm0, %v1320_v45, 2147483647 }
 0x1c5   : > { %11353 = vst [vmem:[#allocation41_spill] sm:$0xff] %v6681_v20  ;;  %v1232_v13 = vsel %vm11130_vm0, %v6681_v20, inf  ;;  %v1466_v24 = vshra.s32 %v6754_v54, 16 }
 0x1c6   : > { %1233 = vmin.xlane.f32.xlu1 %v1232_v13  ;;  %v6748_v13 = vcvt.s32.f32 %v1496_v11  ;;  %v6760_v29 = vcvt.s32.f32 %v1481_v1 }
 0x1c7   : > { %1574 = vmin.xlane.f32.xlu0 %v6690_v9  ;;  %v6736_v60 = vpop.xlane.xlu0 %1206  ;;  %v6768_v45 = vcvt.s32.f32 %v1466_v24 }
 0x1c8   : > { %11358 = vst [vmem:[#allocation46_spill] sm:$0xff] %v6736_v60  ;;  %vm1287_vm9 = vcmp.eq.f32.partialorder %v6430_v39, %v6736_v60 }
 0x1c9   : > { %v1319_v14 = vsel %vm1287_vm9, %v6649_v12, 64 }
 0x1ca   : > { %v6764_v43 = vsel %vm11130_vm0, %v1319_v14, 2147483647 }
 0x1cb   : > { %1559 = vmin.xlane.f32.xlu0 %v6702_v33  ;;  %v1451_v60 = vshra.s32 %v6764_v43, 16 }
 0x1cd   : > { %v6775_v1 = vcvt.s32.f32 %v1451_v60 }
 0x1cf   : > { %1544 = vmin.xlane.f32.xlu0 %v6714_v21 }
 0x1d3   : > { %1529 = vmin.xlane.f32.xlu0 %v6726_v51 }
 0x1d7   : > { %1514 = vmin.xlane.f32.xlu0 %v6738_v61 }
 0x1da   : > { %v6751_v4 = vpop.xlane.xlu0 %1203 }
 0x1db   : > { %11359 = vst [vmem:[#allocation47_spill] sm:$0xff] %v6751_v4  ;;  %1499 = vmin.xlane.f32.xlu0 %v6748_v13  ;;  %vm1286_vm10 = vcmp.eq.f32.partialorder %v11360_v56, %v6751_v4 }
 0x1dc   : > { %v1318_v11 = vsel %vm1286_vm10, %v6649_v12, 64 }
 0x1dd   : > { %v6772_v34 = vsel %vm11130_vm0, %v1318_v11, 2147483647 }
 0x1de   : > { %v1436_v4 = vshra.s32 %v6772_v34, 16 }
 0x1df   : > { %1484 = vmin.xlane.f32.xlu0 %v6760_v29 }
 0x1e0   : > { %v6779_v14 = vcvt.s32.f32 %v1436_v4 }
 0x1e3   : > { %1469 = vmin.xlane.f32.xlu0 %v6768_v45 }
 0x1e7   : > { %1454 = vmin.xlane.f32.xlu0 %v6775_v1 }
 0x1eb   : > { %1439 = vmin.xlane.f32.xlu0 %v6779_v14 }
 0x1ed   : > { %v6782_v44 = vpop.xlane.xlu0 %1200 }
 0x1ee   : > { %11361 = vst [vmem:[#allocation48_spill] sm:$0xff] %v6782_v44  ;;  %vm1285_vm11 = vcmp.eq.f32.partialorder %v6479_v38, %v6782_v44 }
 0x1ef   : > { %v1317_v11 = vsel %vm1285_vm11, %v6649_v12, 64 }
 0x1f0   : > { %v6786_v24 = vpop.xlane.xlu1 %1278  ;;  %v6790_v60 = vsel %vm11130_vm0, %v1317_v11, 2147483647 }
 0x1f1   : > { %11362 = vst [vmem:[#allocation49_spill] sm:$0xff] %v6786_v24  ;;  %vm1311_vm12 = vcmp.eq.f32.partialorder %v6481_v0, %v6786_v24  ;;  %v1421_v4 = vshra.s32 %v6790_v60, 16 }
 0x1f2   : > { %v1343_v25 = vsel %vm1311_vm12, %v6649_v12, 64 }
 0x1f3   : > { %v6799_v30 = vsel %vm11130_vm0, %v1343_v25, 2147483647  ;;  %v6801_v44 = vcvt.s32.f32 %v1421_v4 }
 0x1f4   : > { %v6796_v18 = vpop.xlane.xlu1 %1275  ;;  %v1811_v62 = vshra.s32 %v6799_v30, 16 }
 0x1f5   : > { %11363 = vst [vmem:[#allocation50_spill] sm:$0xff] %v6796_v18  ;;  %vm1310_vm13 = vcmp.eq.f32.partialorder %v6493_v22, %v6796_v18  ;;  %1424 = vmin.xlane.f32.xlu0 %v6801_v44 }
 0x1f6   : > { %v1342_v11 = vsel %vm1310_vm13, %v6649_v12, 64  ;;  %v6808_v24 = vcvt.s32.f32 %v1811_v62 }
 0x1f7   : > { %v6813_v31 = vsel %vm11130_vm0, %v1342_v11, 2147483647 }
 0x1f8   : > { %v6810_v23 = vpop.xlane.xlu1 %1272  ;;  %1814 = vmin.xlane.f32.xlu1 %v6808_v24  ;;  %v1796_v25 = vshra.s32 %v6813_v31, 16 }
 0x1f9   : > { %11364 = vst [vmem:[#allocation51_spill] sm:$0xff] %v6810_v23  ;;  %vm1309_vm14 = vcmp.eq.f32.partialorder %v6499_v3, %v6810_v23 }
 0x1fa   : > { %v1341_v4 = vsel %vm1309_vm14, %v6649_v12, 64  ;;  %v6820_v18 = vcvt.s32.f32 %v1796_v25 }
 0x1fb   : > { %v6825_v62 = vsel %vm11130_vm0, %v1341_v4, 2147483647 }
 0x1fc   : > { %v6822_v22 = vpop.xlane.xlu1 %1269  ;;  %1799 = vmin.xlane.f32.xlu1 %v6820_v18  ;;  %v1781_v11 = vshra.s32 %v6825_v62, 16 }
 0x1fd   : > { %11365 = vst [vmem:[#allocation52_spill] sm:$0xff] %v6822_v22  ;;  %vm1308_vm15 = vcmp.eq.f32.partialorder %v6514_v48, %v6822_v22 }
 0x1fe   : > { %v1340_v0 = vsel %vm1308_vm15, %v6649_v12, 64  ;;  %v6834_v23 = vcvt.s32.f32 %v1781_v11 }
 0x1ff   : > { %v6839_v3 = vsel %vm11130_vm0, %v1340_v0, 2147483647 }
 0x200   : > { %v6832_v38 = vpop.xlane.xlu0 %1197  ;;  %v6836_v25 = vpop.xlane.xlu1 %1266  ;;  %1784 = vmin.xlane.f32.xlu1 %v6834_v23  ;;  %v1766_v4 = vshra.s32 %v6839_v3, 16 }
 0x201   : > { %11366 = vst [vmem:[#allocation53_spill] sm:$0xff] %v6832_v38  ;;  %11367 = vst [vmem:[#allocation54_spill] sm:$0xff] %v6836_v25  ;;  %vm1284_vm1 = vcmp.eq.f32.partialorder %v6537_v16, %v6832_v38  ;;  %vm1307_vm2 = vcmp.eq.f32.partialorder %v6529_v58, %v6836_v25 }
 0x202   : > { %v1316_v22 = vsel %vm1284_vm1, %v6649_v12, 64  ;;  %v6850_v11 = vcvt.s32.f32 %v1766_v4  ;;  %v1339_v0 = vsel %vm1307_vm2, %v6649_v12, 64 }
 0x203   : > { %v6853_v48 = vsel %vm11130_vm0, %v1316_v22, 2147483647  ;;  %v6859_v38 = vsel %vm11130_vm0, %v1339_v0, 2147483647 }
 0x204   : > { %v6845_v56 = vpop.xlane.xlu1 %1263  ;;  %1769 = vmin.xlane.f32.xlu1 %v6850_v11  ;;  %v1406_v39 = vshra.s32 %v6853_v48, 16  ;;  %v1751_v16 = vshra.s32 %v6859_v38, 16 }
 0x205   : > { %11368 = vst [vmem:[#allocation55_spill] sm:$0xff] %v6845_v56  ;;  %vm1306_vm3 = vcmp.eq.f32.partialorder %v6539_v46, %v6845_v56 }
 0x206   : > { %v1338_v4 = vsel %vm1306_vm3, %v6649_v12, 64  ;;  %v6867_v22 = vcvt.s32.f32 %v1406_v39  ;;  %v6869_v58 = vcvt.s32.f32 %v1751_v16 }
 0x207   : > { %v6872_v49 = vsel %vm11130_vm0, %v1338_v4, 2147483647 }
 0x208   : > { %v6864_v25 = vpop.xlane.xlu1 %1260  ;;  %1409 = vmin.xlane.f32.xlu0 %v6867_v22  ;;  %v1736_v0 = vshra.s32 %v6872_v49, 16  ;;  %1754 = vmin.xlane.f32.xlu1 %v6869_v58 }
 0x209   : > { %11369 = vst [vmem:[#allocation56_spill] sm:$0xff] %v6864_v25  ;;  %vm1305_vm4 = vcmp.eq.f32.partialorder %v6551_v6, %v6864_v25 }
 0x20a   : > { %v1337_v46 = vsel %vm1305_vm4, %v6649_v12, 64  ;;  %v6882_v39 = vcvt.s32.f32 %v1736_v0 }
 0x20b   : > { %v6885_v16 = vsel %vm11130_vm0, %v1337_v46, 2147483647 }
 0x20c   : > { %v6879_v56 = vpop.xlane.xlu1 %1257  ;;  %v1721_v4 = vshra.s32 %v6885_v16, 16  ;;  %1739 = vmin.xlane.f32.xlu1 %v6882_v39 }
 0x20d   : > { %11370 = vst [vmem:[#allocation57_spill] sm:$0xff] %v6879_v56  ;;  %vm1304_vm5 = vcmp.eq.f32.partialorder %v6566_v19, %v6879_v56 }
 0x20e   : > { %v1336_v28 = vsel %vm1304_vm5, %v6649_v12, 64  ;;  %v6897_v50 = vcvt.s32.f32 %v1721_v4 }
 0x20f   : > { %v6895_v6 = vsel %vm11130_vm0, %v1336_v28, 2147483647 }
 0x210   : > { %v6892_v25 = vpop.xlane.xlu1 %1254  ;;  %v1706_v0 = vshra.s32 %v6895_v6, 16  ;;  %1724 = vmin.xlane.f32.xlu1 %v6897_v50 }
 0x211   : > { %11371 = vst [vmem:[#allocation58_spill] sm:$0xff] %v6892_v25  ;;  %vm1303_vm6 = vcmp.eq.f32.partialorder %v6579_v32, %v6892_v25 }
 0x212   : > { %v6907_v19 = vcvt.s32.f32 %v1706_v0  ;;  %v1335_v55 = vsel %vm1303_vm6, %v6649_v12, 64 }
 0x213   : > { %v6900_v46 = vpop.xlane.xlu0 %1194  ;;  %v6913_v28 = vsel %vm11130_vm0, %v1335_v55, 2147483647 }
 0x214   : > { %11372 = vst [vmem:[#allocation59_spill] sm:$0xff] %v6900_v46  ;;  %v6905_v56 = vpop.xlane.xlu1 %1251  ;;  %vm1283_vm7 = vcmp.eq.f32.partialorder %v6593_v17, %v6900_v46  ;;  %1709 = vmin.xlane.f32.xlu1 %v6907_v19  ;;  %v1691_v25 = vshra.s32 %v6913_v28, 16 }
 0x215   : > { %11373 = vst [vmem:[#allocation60_spill] sm:$0xff] %v6905_v56  ;;  %v1315_v4 = vsel %vm1283_vm7, %v6649_v12, 64  ;;  %vm1302_vm8 = vcmp.eq.f32.partialorder %v6585_v5, %v6905_v56 }
 0x216   : > { %v6923_v0 = vsel %vm11130_vm0, %v1315_v4, 2147483647  ;;  %v1334_v52 = vsel %vm1302_vm8, %v6649_v12, 64  ;;  %v6926_v46 = vcvt.s32.f32 %v1691_v25 }
 0x217   : > { %v1391_v55 = vshra.s32 %v6923_v0, 16  ;;  %v6930_v17 = vsel %vm11130_vm0, %v1334_v52, 2147483647 }
 0x218   : > { %v6920_v32 = vpop.xlane.xlu1 %1248  ;;  %v1676_v56 = vshra.s32 %v6930_v17, 16  ;;  %1694 = vmin.xlane.f32.xlu1 %v6926_v46 }
 0x219   : > { %11374 = vst [vmem:[#allocation61_spill] sm:$0xff] %v6920_v32  ;;  %vm1301_vm9 = vcmp.eq.f32.partialorder %v6596_v41, %v6920_v32  ;;  %v6936_v5 = vcvt.s32.f32 %v1391_v55 }
 0x21a   : > { %v1333_v35 = vsel %vm1301_vm9, %v6649_v12, 64  ;;  %v6941_v25 = vcvt.s32.f32 %v1676_v56 }
 0x21b   : > { %1394 = vmin.xlane.f32.xlu0 %v6936_v5  ;;  %v6945_v52 = vsel %vm11130_vm0, %v1333_v35, 2147483647 }
 0x21c   : > { %v6938_v4 = vpop.xlane.xlu1 %1245  ;;  %11376 = vst [vmem:[#allocation63_spill] sm:$0xff] %v6941_v25  ;;  %v1661_v32 = vshra.s32 %v6945_v52, 16  ;;  %1679 = vmin.xlane.f32.xlu1 %v6941_v25 }
 0x21d   : > { %11375 = vst [vmem:[#allocation62_spill] sm:$0xff] %v6938_v4  ;;  %vm1300_vm10 = vcmp.eq.f32.partialorder %v6604_v7, %v6938_v4 }
 0x21e   : > { %v1332_v41 = vsel %vm1300_vm10, %v6649_v12, 64  ;;  %v6957_v56 = vcvt.s32.f32 %v1661_v32 }
 0x21f   : > { %v6955_v63 = vsel %vm11130_vm0, %v1332_v41, 2147483647 }
 0x220   : > { %v6952_v55 = vpop.xlane.xlu1 %1242  ;;  %v1646_v59 = vshra.s32 %v6955_v63, 16  ;;  %1664 = vmin.xlane.f32.xlu1 %v6957_v56 }
 0x221   : > { %11377 = vst [vmem:[#allocation64_spill] sm:$0xff] %v6952_v55  ;;  %vm1299_vm11 = vcmp.eq.f32.partialorder %v6609_v26, %v6952_v55 }
 0x222   : > { %v6963_v35 = vcvt.s32.f32 %v1646_v59  ;;  %v1331_v4 = vsel %vm1299_vm11, %v6649_v12, 64 }
 0x223   : > { %v6967_v7 = vsel %vm11130_vm0, %v1331_v4, 2147483647 }
 0x224   : > { %11378 = vst [vmem:[#allocation65_spill] sm:$0xff] %v6963_v35  ;;  %v1631_v41 = vshra.s32 %v6967_v7, 16  ;;  %1649 = vmin.xlane.f32.xlu1 %v6963_v35 }
 0x226   : > { %v6969_v25 = vpop.xlane.xlu0 %1191  ;;  %v6973_v32 = vcvt.s32.f32 %v1631_v41 }
 0x227   : > { %11379 = vst [vmem:[#allocation66_spill] sm:$0xff] %v6969_v25  ;;  %vm1282_vm12 = vcmp.eq.f32.partialorder %v6621_v10, %v6969_v25 }
 0x228   : > { %v1314_v59 = vsel %vm1282_vm12, %v6649_v12, 64  ;;  %1634 = vmin.xlane.f32.xlu1 %v6973_v32 }
 0x229   : > { %v6977_v55 = vpop.xlane.xlu1 %1239  ;;  %v6981_v26 = vsel %vm11130_vm0, %v1314_v59, 2147483647 }
 0x22a   : > { %11380 = vst [vmem:[#allocation67_spill] sm:$0xff] %v6977_v55  ;;  %vm1298_vm13 = vcmp.eq.f32.partialorder %v6625_v27, %v6977_v55  ;;  %v1376_v4 = vshra.s32 %v6981_v26, 16 }
 0x22b   : > { %v1330_v41 = vsel %vm1298_vm13, %v6649_v12, 64 }
 0x22c   : > { %v6989_v35 = vsel %vm11130_vm0, %v1330_v41, 2147483647  ;;  %v6991_v25 = vcvt.s32.f32 %v1376_v4 }
 0x22d   : > { %11381 = vst [vmem:[#allocation68_spill] sm:$0xff] %v6989_v35  ;;  %v1616_v10 = vshra.s32 %v6989_v35, 16 }
 0x22e   : > { %11382 = vst [vmem:[#allocation69_spill] sm:$0xff] %v6991_v25  ;;  %1379 = vmin.xlane.f32.xlu0 %v6991_v25 }
 0x22f   : > { %v6995_v59 = vcvt.s32.f32 %v1616_v10 }
 0x231   : > { %11383 = vst [vmem:[#allocation70_spill] sm:$0xff] %v6995_v59  ;;  %1619 = vmin.xlane.f32.xlu1 %v6995_v59 }
 0x239   : > { %v6998_v55 = vpop.xlane.xlu0 %1188 }
 0x23a   : > { %11384 = vst [vmem:[#allocation71_spill] sm:$0xff] %v6998_v55  ;;  %vm1281_vm14 = vcmp.eq.f32.partialorder %v6636_v8, %v6998_v55 }
 0x23b   : > { %v1313_v41 = vsel %vm1281_vm14, %v6649_v12, 64 }
 0x23c   : > { %v7002_v27 = vpop.xlane.xlu1 %1236  ;;  %v7006_v4 = vsel %vm11130_vm0, %v1313_v41, 2147483647 }
 0x23d   : > { %11385 = vst [vmem:[#allocation72_spill] sm:$0xff] %v7002_v27  ;;  %11386 = vst [vmem:[#allocation73_spill] sm:$0xff] %v7006_v4  ;;  %vm1297_vm15 = vcmp.eq.f32.partialorder %v6642_v53, %v7002_v27  ;;  %v1361_v10 = vshra.s32 %v7006_v4, 16 }
 0x23e   : > { %v1329_v25 = vsel %vm1297_vm15, %v6649_v12, 64 }
 0x23f   : > { %v7013_v59 = vsel %vm11130_vm0, %v1329_v25, 2147483647  ;;  %v7015_v35 = vcvt.s32.f32 %v1361_v10 }
 0x240   : > { %11387 = vst [vmem:[#allocation74_spill] sm:$0xff] %v7013_v59  ;;  %v1601_v55 = vshra.s32 %v7013_v59, 16 }
 0x241   : > { %11388 = vst [vmem:[#allocation75_spill] sm:$0xff] %v7015_v35  ;;  %1364 = vmin.xlane.f32.xlu0 %v7015_v35 }
 0x242   : > { %v7019_v8 = vcvt.s32.f32 %v1601_v55 }
 0x244   : > { %11389 = vst [vmem:[#allocation76_spill] sm:$0xff] %v7019_v8  ;;  %1604 = vmin.xlane.f32.xlu1 %v7019_v8 }
 0x24c   : > { %v7022_v41 = vpop.xlane.xlu0 %1185 }
 0x24d   : > { %11390 = vst [vmem:[#allocation77_spill] sm:$0xff] %v7022_v41  ;;  %vm1280_vm1 = vcmp.eq.f32.partialorder %v6671_v37, %v7022_v41  ;;  %v1570_v41 = vand.u32 65535, %v6665_v2 }
 0x24e   : > { %v1312_v25 = vsel %vm1280_vm1, %v6649_v12, 64 }
 0x24f   : > { %v7026_v27 = vpop.xlane.xlu1 %1233  ;;  %v7032_v10 = vsel %vm11130_vm0, %v1312_v25, 2147483647 }
 0x250   : > { %11391 = vst [vmem:[#allocation78_spill] sm:$0xff] %v7026_v27  ;;  %v7029_v53 = vpop.xlane.xlu0 %1574  ;;  %vm1296_vm2 = vcmp.eq.f32.partialorder %v6681_v20, %v7026_v27  ;;  %v1346_v55 = vshra.s32 %v7032_v10, 16  ;;  %v1572_v27 = vcvt.s32.f32 %v1570_v41  ;;  %v1555_v20 = vand.u32 65535, %v6679_v42 }
 0x251   : > { %v1328_v8 = vsel %vm1296_vm2, %v6649_v12, 64  ;;  %vm1576_vm3 = vcmp.eq.f32.partialorder %v6690_v9, %v7029_v53  ;;  %v1540_v12 = vand.u32 65535, %v6694_v36  ;;  %v1525_v9 = vand.u32 65535, %v6706_v47 }
 0x252   : > { %v7039_v35 = vsel %vm11130_vm0, %v1328_v8, 2147483647  ;;  %v7042_v37 = vcvt.s32.f32 %v1346_v55  ;;  %v1577_v2 = vsel %vm1576_vm3, %v1572_v27, inf  ;;  %v1557_v55 = vcvt.s32.f32 %v1555_v20 }
 0x253   : > { %v1586_v4 = vshra.s32 %v7039_v35, 16  ;;  %v1542_v42 = vcvt.s32.f32 %v1540_v12  ;;  %v1527_v20 = vcvt.s32.f32 %v1525_v9  ;;  %v1510_v36 = vand.u32 65535, %v6718_v57 }
 0x254   : > { %11392 = vst [vmem:[#allocation79_spill] sm:$0xff] %v7042_v37  ;;  %v7044_v59 = vpop.xlane.xlu0 %1559  ;;  %1349 = vmin.xlane.f32.xlu0 %v7042_v37  ;;  %v1480_v57 = vand.u32 65535, %v6742_v15  ;;  %v1450_v15 = vand.u32 65535, %v6764_v43  ;;  %v1810_v43 = vand.u32 65535, %v6799_v30 }
 0x255   : > { %v7048_v25 = vcvt.s32.f32 %v1586_v4  ;;  %vm1561_vm4 = vcmp.eq.f32.partialorder %v6702_v33, %v7044_v59  ;;  %v1512_v12 = vcvt.s32.f32 %v1510_v36 }
 0x256   : > { %v1562_v37 = vsel %vm1561_vm4, %v1557_v55, inf }
 0x257   : > { %1589 = vmin.xlane.f32.xlu1 %v7048_v25 }
 0x258   : > { %v7054_v8 = vpop.xlane.xlu0 %1544  ;;  %1578 = vmin.xlane.f32.xlu0 %v1577_v2 }
 0x259   : > { %vm1546_vm5 = vcmp.eq.f32.partialorder %v6714_v21, %v7054_v8 }
 0x25a   : > { %v1547_v27 = vsel %vm1546_vm5, %v1542_v42, inf }
 0x25c   : > { %v7059_v4 = vpop.xlane.xlu0 %1529  ;;  %1563 = vmin.xlane.f32.xlu0 %v1562_v37  ;;  %v1495_v37 = vand.u32 65535, %v6730_v40  ;;  %v1465_v40 = vand.u32 65535, %v6754_v54  ;;  %v1435_v54 = vand.u32 65535, %v6772_v34 }
 0x25d   : > { %vm1531_vm6 = vcmp.eq.f32.partialorder %v6726_v51, %v7059_v4 }
 0x25e   : > { %v1532_v2 = vsel %vm1531_vm6, %v1527_v20, inf  ;;  %v1497_v51 = vcvt.s32.f32 %v1495_v37  ;;  %v1420_v37 = vand.u32 65535, %v6790_v60 }
 0x260   : > { %v7064_v41 = vpop.xlane.xlu0 %1514  ;;  %1548 = vmin.xlane.f32.xlu0 %v1547_v27 }
 0x261   : > { %vm1516_vm7 = vcmp.eq.f32.partialorder %v6738_v61, %v7064_v41  ;;  %v1482_v61 = vcvt.s32.f32 %v1480_v57  ;;  %v1812_v57 = vcvt.s32.f32 %v1810_v43  ;;  %v1705_v43 = vand.u32 65535, %v6895_v6 }
 0x262   : > { %v1517_v21 = vsel %vm1516_vm7, %v1512_v12, inf  ;;  %v1437_v12 = vcvt.s32.f32 %v1435_v54 }
 0x264   : > { %v7069_v33 = vpop.xlane.xlu0 %1499  ;;  %1533 = vmin.xlane.f32.xlu0 %v1532_v2 }
 0x265   : > { %vm1501_vm8 = vcmp.eq.f32.partialorder %v6748_v13, %v7069_v33  ;;  %v1467_v13 = vcvt.s32.f32 %v1465_v40 }
 0x266   : > { %v1502_v42 = vsel %vm1501_vm8, %v1497_v51, inf }
 0x268   : > { %v7074_v47 = vpop.xlane.xlu0 %1484  ;;  %1518 = vmin.xlane.f32.xlu0 %v1517_v21 }
 0x269   : > { %vm1486_vm9 = vcmp.eq.f32.partialorder %v6760_v29, %v7074_v47  ;;  %v1452_v29 = vcvt.s32.f32 %v1450_v15 }
 0x26a   : > { %v1487_v9 = vsel %vm1486_vm9, %v1482_v61, inf  ;;  %v1780_v61 = vand.u32 65535, %v6825_v62  ;;  %v1405_v62 = vand.u32 65535, %v6853_v48 }
 0x26c   : > { %v7079_v55 = vpop.xlane.xlu0 %1469  ;;  %1503 = vmin.xlane.f32.xlu0 %v1502_v42  ;;  %v1795_v42 = vand.u32 65535, %v6813_v31  ;;  %v1765_v31 = vand.u32 65535, %v6839_v3  ;;  %v1407_v54 = vcvt.s32.f32 %v1405_v62 }
 0x26d   : > { %vm1471_vm10 = vcmp.eq.f32.partialorder %v6768_v45, %v7079_v55 }
 0x26e   : > { %v1472_v20 = vsel %vm1471_vm10, %v1467_v13, inf  ;;  %v1797_v30 = vcvt.s32.f32 %v1795_v42  ;;  %v1767_v15 = vcvt.s32.f32 %v1765_v31 }
 0x270   : > { %v7084_v27 = vpop.xlane.xlu0 %1454  ;;  %1488 = vmin.xlane.f32.xlu0 %v1487_v9  ;;  %v1782_v9 = vcvt.s32.f32 %v1780_v61 }
 0x271   : > { %vm1456_vm11 = vcmp.eq.f32.partialorder %v6775_v1, %v7084_v27  ;;  %v1422_v1 = vcvt.s32.f32 %v1420_v37 }
 0x272   : > { %v1457_v2 = vsel %vm1456_vm11, %v1452_v29, inf }
 0x274   : > { %1473 = vmin.xlane.f32.xlu0 %v1472_v20  ;;  %v7091_v36 = vpop.xlane.xlu0 %1439 }
 0x275   : > { %vm1441_vm12 = vcmp.eq.f32.partialorder %v6779_v14, %v7091_v36 }
 0x276   : > { %v1442_v45 = vsel %vm1441_vm12, %v1437_v12, inf }
 0x278   : > { %1458 = vmin.xlane.f32.xlu0 %v1457_v2  ;;  %v1735_v2 = vand.u32 65535, %v6872_v49 }
 0x27c   : > { %1443 = vmin.xlane.f32.xlu0 %v1442_v45  ;;  %v1720_v45 = vand.u32 65535, %v6885_v16  ;;  %v1690_v16 = vand.u32 65535, %v6913_v28 }
 0x27e   : > { %v7098_v21 = vpop.xlane.xlu0 %1424  ;;  %v1722_v49 = vcvt.s32.f32 %v1720_v45  ;;  %v1692_v6 = vcvt.s32.f32 %v1690_v16 }
 0x27f   : > { %vm1426_vm13 = vcmp.eq.f32.partialorder %v6801_v44, %v7098_v21 }
 0x280   : > { %v1427_v51 = vsel %vm1426_vm13, %v1422_v1, inf }
 0x281   : > { %v7102_v34 = vpop.xlane.xlu1 %1814  ;;  %1428 = vmin.xlane.f32.xlu0 %v1427_v51  ;;  %v1707_v51 = vcvt.s32.f32 %v1705_v43 }
 0x282   : > { %vm1816_vm14 = vcmp.eq.f32.partialorder %v6808_v24, %v7102_v34 }
 0x283   : > { %v1817_v14 = vsel %vm1816_vm14, %v1812_v57, inf  ;;  %v1390_v57 = vand.u32 65535, %v6923_v0 }
 0x284   : > { %1818 = vmin.xlane.f32.xlu1 %v1817_v14  ;;  %v1675_v14 = vand.u32 65535, %v6930_v17  ;;  %v11393_v17 = vld [vmem:[#allocation63_spill] sm:$0xff] }
 0x285   : > { %v7107_v60 = vpop.xlane.xlu1 %1799  ;;  %v1392_v61 = vcvt.s32.f32 %v1390_v57 }
 0x286   : > { %vm1801_vm15 = vcmp.eq.f32.partialorder %v6820_v18, %v7107_v60  ;;  %v1750_v18 = vand.u32 65535, %v6859_v38  ;;  %v1677_v0 = vcvt.s32.f32 %v1675_v14 }
 0x287   : > { %v1802_v44 = vsel %vm1801_vm15, %v1797_v30, inf }
 0x288   : > { %1803 = vmin.xlane.f32.xlu1 %v1802_v44  ;;  %v1752_v3 = vcvt.s32.f32 %v1750_v18  ;;  %v1660_v44 = vand.u32 65535, %v6945_v52  ;;  %v1630_v52 = vand.u32 65535, %v6967_v7  ;;  %v11394_v18 = vld [vmem:[#allocation65_spill] sm:$0xff] }
 0x289   : > { %v7112_v40 = vpop.xlane.xlu1 %1784 }
 0x28a   : > { %vm1786_vm1 = vcmp.eq.f32.partialorder %v6834_v23, %v7112_v40  ;;  %v1662_v31 = vcvt.s32.f32 %v1660_v44  ;;  %v1345_v44 = vand.u32 65535, %v7032_v10 }
 0x28b   : > { %v1787_v24 = vsel %vm1786_vm1, %v1782_v9, inf }
 0x28c   : > { %1788 = vmin.xlane.f32.xlu1 %v1787_v24  ;;  %v1645_v24 = vand.u32 65535, %v6955_v63  ;;  %v1375_v63 = vand.u32 65535, %v6981_v26  ;;  %v11397_v26 = vld [vmem:[#allocation70_spill] sm:$0xff] }
 0x28d   : > { %v7117_v13 = vpop.xlane.xlu1 %1769 }
 0x28e   : > { %vm1771_vm2 = vcmp.eq.f32.partialorder %v6850_v11, %v7117_v13  ;;  %v1737_v11 = vcvt.s32.f32 %v1735_v2  ;;  %v1647_v62 = vcvt.s32.f32 %v1645_v24  ;;  %v11395_v2 = vld [vmem:[#allocation68_spill] sm:$0xff]  ;;  %v1377_v7 = vcvt.s32.f32 %v1375_v63 }
 0x28f   : > { %v1772_v20 = vsel %vm1771_vm2, %v1767_v15, inf  ;;  %v1581_v24 = vcvt.f32.s32 %v7029_v53 }
 0x290   : > { %1773 = vmin.xlane.f32.xlu1 %v1772_v20 }
 0x291   : > { %v7123_v29 = vpop.xlane.xlu0 %1409  ;;  %v7125_v23 = vpop.xlane.xlu1 %1754 }
 0x292   : > { %vm1411_vm3 = vcmp.eq.f32.partialorder %v6867_v22, %v7123_v29  ;;  %vm1756_vm4 = vcmp.eq.f32.partialorder %v6869_v58, %v7125_v23 }
 0x293   : > { %v1412_v12 = vsel %vm1411_vm3, %v1407_v54, inf  ;;  %v1757_v48 = vsel %vm1756_vm4, %v1752_v3, inf  ;;  %v1632_v3 = vcvt.s32.f32 %v1630_v52 }
 0x294   : > { %1413 = vmin.xlane.f32.xlu0 %v1412_v12  ;;  %1758 = vmin.xlane.f32.xlu1 %v1757_v48  ;;  %v1615_v12 = vand.u32 65535, %v11395_v2 }
 0x295   : > { %v7132_v38 = vpop.xlane.xlu1 %1739 }
 0x296   : > { %vm1741_vm5 = vcmp.eq.f32.partialorder %v6882_v39, %v7132_v38 }
 0x297   : > { %v1742_v37 = vsel %vm1741_vm5, %v1737_v11, inf  ;;  %v11396_v11 = vld [vmem:[#allocation69_spill] sm:$0xff] }
 0x298   : > { %1743 = vmin.xlane.f32.xlu1 %v1742_v37 }
 0x299   : > { %v7137_v22 = vpop.xlane.xlu1 %1724 }
 0x29a   : > { %vm1726_vm6 = vcmp.eq.f32.partialorder %v6897_v50, %v7137_v22 }
 0x29b   : > { %v1727_v58 = vsel %vm1726_vm6, %v1722_v49, inf  ;;  %v1617_v49 = vcvt.s32.f32 %v1615_v12  ;;  %v1551_v12 = vcvt.f32.s32 %v7054_v8  ;;  %v1536_v8 = vcvt.f32.s32 %v7059_v4 }
 0x29c   : > { %1728 = vmin.xlane.f32.xlu1 %v1727_v58  ;;  %v1521_v4 = vcvt.f32.s32 %v7064_v41  ;;  %v1506_v41 = vcvt.f32.s32 %v7069_v33  ;;  %v1491_v33 = vcvt.f32.s32 %v7074_v47  ;;  %v1476_v47 = vcvt.f32.s32 %v7079_v55 }
 0x29d   : > { %v7142_v1 = vpop.xlane.xlu1 %1709  ;;  %v1461_v55 = vcvt.f32.s32 %v7084_v27  ;;  %v1446_v27 = vcvt.f32.s32 %v7091_v36  ;;  %v11429_v36 = vld [vmem:[#allocation13_spill] sm:$0xff] }
 0x29e   : > { %vm1711_vm7 = vcmp.eq.f32.partialorder %v6907_v19, %v7142_v1 }
 0x29f   : > { %v1712_v39 = vsel %vm1711_vm7, %v1707_v51, inf  ;;  %v11399_v51 = vld [vmem:[#allocation74_spill] sm:$0xff] }
 0x2a0   : > { %1713 = vmin.xlane.f32.xlu1 %v1712_v39  ;;  %v1600_v16 = vand.u32 65535, %v11399_v51 }
 0x2a1   : > { %v7148_v42 = vpop.xlane.xlu1 %1694 }
 0x2a2   : > { %vm1696_vm8 = vcmp.eq.f32.partialorder %v6926_v46, %v7148_v42 }
 0x2a3   : > { %v1697_v30 = vsel %vm1696_vm8, %v1692_v6, inf  ;;  %v11400_v6 = vld [vmem:[#allocation75_spill] sm:$0xff] }
 0x2a4   : > { %v7153_v50 = vpop.xlane.xlu0 %1394  ;;  %1698 = vmin.xlane.f32.xlu1 %v1697_v30 }
 0x2a5   : > { %vm1396_vm9 = vcmp.eq.f32.partialorder %v6936_v5, %v7153_v50  ;;  %v7157_v19 = vpop.xlane.xlu1 %1679 }
 0x2a6   : > { %v1397_v28 = vsel %vm1396_vm9, %v1392_v61, inf  ;;  %vm1681_vm10 = vcmp.eq.f32.partialorder %v11393_v17, %v7157_v19  ;;  %v1602_v61 = vcvt.s32.f32 %v1600_v16  ;;  %v1585_v17 = vand.u32 65535, %v7039_v35 }
 0x2a7   : > { %1398 = vmin.xlane.f32.xlu0 %v1397_v28  ;;  %v1682_v9 = vsel %vm1681_vm10, %v1677_v0, inf  ;;  %v11401_v28 = vld [vmem:[#allocation76_spill] sm:$0xff]  ;;  %v1566_v35 = vcvt.f32.s32 %v7044_v59 }
 0x2a8   : > { %1683 = vmin.xlane.f32.xlu1 %v1682_v9 }
 0x2a9   : > { %v7162_v46 = vpop.xlane.xlu1 %1664  ;;  %v1567_v2 = vshll.u32 %v1566_v35, 16  ;;  %v1507_v35 = vshll.u32 %v1506_v41, 16 }
 0x2aa   : > { %vm1666_vm11 = vcmp.eq.f32.partialorder %v6957_v56, %v7162_v46 }
 0x2ab   : > { %v1667_v5 = vsel %vm1666_vm11, %v1662_v31, inf  ;;  %v1347_v31 = vcvt.s32.f32 %v1345_v44 }
 0x2ac   : > { %1668 = vmin.xlane.f32.xlu1 %v1667_v5  ;;  %v11402_v5 = vld [vmem:[#allocation79_spill] sm:$0xff] }
 0x2ad   : > { %v7167_v15 = vpop.xlane.xlu1 %1649 }
 0x2ae   : > { %vm1651_vm12 = vcmp.eq.f32.partialorder %v11394_v18, %v7167_v15  ;;  %v1587_v18 = vcvt.s32.f32 %v1585_v17 }
 0x2af   : > { %v1652_v20 = vsel %vm1651_vm12, %v1647_v62, inf }
 0x2b0   : > { %1653 = vmin.xlane.f32.xlu1 %v1652_v20 }
 0x2b1   : > { %v7172_v54 = vpop.xlane.xlu1 %1634 }
 0x2b2   : > { %vm1636_vm13 = vcmp.eq.f32.partialorder %v6973_v32, %v7172_v54  ;;  %v11398_v32 = vld [vmem:[#allocation73_spill] sm:$0xff] }
 0x2b3   : > { %v1637_v56 = vsel %vm1636_vm13, %v1632_v3, inf  ;;  %v1360_v58 = vand.u32 65535, %v11398_v32  ;;  %v1582_v3 = vshll.u32 %v1581_v24, 16  ;;  %v1522_v24 = vshll.u32 %v1521_v4, 16  ;;  %v11423_v4 = vld [vmem:[#allocation11_spill] sm:$0xff] }
 0x2b4   : > { %1638 = vmin.xlane.f32.xlu1 %v1637_v56 }
 0x2b5   : > { %v1362_v57 = vcvt.s32.f32 %v1360_v58  ;;  %v11408_v58 = vld [vmem:[#allocation6_spill] sm:$0xff] }
 0x2b7   : > { %v7178_v48 = vpop.xlane.xlu0 %1379 }
 0x2b8   : > { %vm1381_vm14 = vcmp.eq.f32.partialorder %v11396_v11, %v7178_v48  ;;  %v11404_v11 = vld [vmem:[#allocation37_spill] sm:$0xff] }
 0x2b9   : > { %v1382_v45 = vsel %vm1381_vm14, %v1377_v7, inf }
 0x2ba   : > { %v7182_v37 = vpop.xlane.xlu1 %1619  ;;  %1383 = vmin.xlane.f32.xlu0 %v1382_v45  ;;  %v11405_v45 = vld [vmem:[#allocation5_spill] sm:$0xff] }
 0x2bb   : > { %vm1621_vm15 = vcmp.eq.f32.partialorder %v11397_v26, %v7182_v37 }
 0x2bc   : > { %v1622_v43 = vsel %vm1621_vm15, %v1617_v49, inf }
 0x2bd   : > { %1623 = vmin.xlane.f32.xlu1 %v1622_v43  ;;  %v1552_v43 = vshll.u32 %v1551_v12, 16 }
 0x2ca   : > { %v7188_v39 = vpop.xlane.xlu0 %1364 }
 0x2cb   : > { %vm1366_vm1 = vcmp.eq.f32.partialorder %v11400_v6, %v7188_v39 }
 0x2cc   : > { %v1367_v14 = vsel %vm1366_vm1, %v1362_v57, inf }
 0x2cd   : > { %v7192_v30 = vpop.xlane.xlu1 %1604  ;;  %1368 = vmin.xlane.f32.xlu0 %v1367_v14  ;;  %v1537_v14 = vshll.u32 %v1536_v8, 16 }
 0x2ce   : > { %vm1606_vm2 = vcmp.eq.f32.partialorder %v11401_v28, %v7192_v30  ;;  %v11411_v28 = vld [vmem:[#allocation7_spill] sm:$0xff] }
 0x2cf   : > { %v1607_v0 = vsel %vm1606_vm2, %v1602_v61, inf }
 0x2d0   : > { %1608 = vmin.xlane.f32.xlu1 %v1607_v0 }
 0x2dd   : > { %v7198_v9 = vpop.xlane.xlu0 %1349 }
 0x2de   : > { %vm1351_vm3 = vcmp.eq.f32.partialorder %v11402_v5, %v7198_v9 }
 0x2df   : > { %v1352_v62 = vsel %vm1351_vm3, %v1347_v31, inf }
 0x2e0   : > { %v7203_v52 = vpop.xlane.xlu1 %1589  ;;  %1353 = vmin.xlane.f32.xlu0 %v1352_v62  ;;  %v11414_v62 = vld [vmem:[#allocation8_spill] sm:$0xff] }
 0x2e1   : > { %vm1591_vm4 = vcmp.eq.f32.partialorder %v7048_v25, %v7203_v52  ;;  %v1579_v20 = vpop.xlane.xlu0 %1578 }
 0x2e2   : > { %v1592_v10 = vsel %vm1591_vm4, %v1587_v18, inf  ;;  %v1580_v63 = vcvt.f32.s32 %v1579_v20 }
 0x2e3   : > { %1593 = vmin.xlane.f32.xlu1 %v1592_v10 }
 0x2e4   : > { %v7208_v56 = vadd.s32 %v1582_v3, %v1580_v63 }
 0x2e5   : > { %v1564_v53 = vpop.xlane.xlu0 %1563 }
 0x2e6   : > { %11403 = vst [vmem:[#allocation63_spill] sm:$0xff] %v7208_v56  ;;  %v1565_v7 = vcvt.f32.s32 %v1564_v53  ;;  %vm1839_vm5 = vcmp.eq.s32.totalorder %v11404_v11, %v7208_v56  ;;  %v11417_v53 = vld [vmem:[#allocation9_spill] sm:$0xff] }
 0x2e7   : > { %v7217_v25 = vsel %vm1839_vm5, inf, %v11405_v45 }
 0x2e8   : > { %11406 = vst [vmem:[#allocation65_spill] sm:$0xff] %v7217_v25  ;;  %v7219_v49 = vadd.s32 %v1567_v2, %v1565_v7  ;;  %v2317_v59 = vsel %vm11130_vm0, %v7217_v25, inf }
 0x2e9   : > { %2318 = vmin.xlane.f32.xlu0 %v2317_v59  ;;  %v1549_v26 = vpop.xlane.xlu0 %1548  ;;  %v1492_v59 = vshll.u32 %v1491_v33, 16  ;;  %v1447_v33 = vshll.u32 %v1446_v27, 16 }
 0x2ea   : > { %11407 = vst [vmem:[#allocation68_spill] sm:$0xff] %v7219_v49  ;;  %v1550_v32 = vcvt.f32.s32 %v1549_v26  ;;  %vm1838_vm6 = vcmp.eq.s32.totalorder %v11404_v11, %v7219_v49 }
 0x2eb   : > { %v7230_v51 = vsel %vm1838_vm6, inf, %v11408_v58 }
 0x2ec   : > { %11409 = vst [vmem:[#allocation69_spill] sm:$0xff] %v7230_v51  ;;  %v7232_v16 = vadd.s32 %v1552_v43, %v1550_v32  ;;  %v2314_v57 = vsel %vm11130_vm0, %v7230_v51, inf  ;;  %v11420_v43 = vld [vmem:[#allocation10_spill] sm:$0xff] }
 0x2ed   : > { %2315 = vmin.xlane.f32.xlu0 %v2314_v57  ;;  %v1534_v6 = vpop.xlane.xlu0 %1533 }
 0x2ee   : > { %11410 = vst [vmem:[#allocation70_spill] sm:$0xff] %v7232_v16  ;;  %v1535_v61 = vcvt.f32.s32 %v1534_v6  ;;  %vm11148_vm7 = vcmp.eq.s32.totalorder %v11404_v11, %v7232_v16  ;;  %v1477_v6 = vshll.u32 %v1476_v47, 16  ;;  %v1821_v47 = vcvt.f32.s32 %v7102_v34 }
 0x2ef   : > { %v7243_v0 = vsel %vm11148_vm7, inf, %v11411_v28 }
 0x2f0   : > { %11412 = vst [vmem:[#allocation73_spill] sm:$0xff] %v7243_v0  ;;  %v7245_v44 = vadd.s32 %v1537_v14, %v1535_v61  ;;  %v2311_v17 = vsel %vm11130_vm0, %v7243_v0, inf  ;;  %v1822_v34 = vshll.u32 %v1821_v47, 16 }
 0x2f1   : > { %2312 = vmin.xlane.f32.xlu0 %v2311_v17  ;;  %v1519_v31 = vpop.xlane.xlu0 %1518 }
 0x2f2   : > { %11413 = vst [vmem:[#allocation74_spill] sm:$0xff] %v7245_v44  ;;  %v1520_v5 = vcvt.f32.s32 %v1519_v31  ;;  %vm11147_vm8 = vcmp.eq.s32.totalorder %v11404_v11, %v7245_v44 }
 0x2f3   : > { %v7256_v18 = vsel %vm11147_vm8, inf, %v11414_v62 }
 0x2f4   : > { %11415 = vst [vmem:[#allocation75_spill] sm:$0xff] %v7256_v18  ;;  %v7258_v20 = vadd.s32 %v1522_v24, %v1520_v5  ;;  %v2308_v10 = vsel %vm11130_vm0, %v7256_v18, inf  ;;  %v1462_v24 = vshll.u32 %v1461_v55, 16  ;;  %v11426_v5 = vld [vmem:[#allocation12_spill] sm:$0xff]  ;;  %v1806_v55 = vcvt.f32.s32 %v7107_v60 }
 0x2f5   : > { %2309 = vmin.xlane.f32.xlu0 %v2308_v10  ;;  %v1504_v3 = vpop.xlane.xlu0 %1503  ;;  %v1791_v60 = vcvt.f32.s32 %v7112_v40 }
 0x2f6   : > { %11416 = vst [vmem:[#allocation76_spill] sm:$0xff] %v7258_v20  ;;  %v1505_v63 = vcvt.f32.s32 %v1504_v3  ;;  %vm11144_vm9 = vcmp.eq.s32.totalorder %v11404_v11, %v7258_v20 }
 0x2f7   : > { %v7269_v2 = vsel %vm11144_vm9, inf, %v11417_v53 }
 0x2f8   : > { %11418 = vst [vmem:[#allocation79_spill] sm:$0xff] %v7269_v2  ;;  %v7271_v12 = vadd.s32 %v1507_v35, %v1505_v63  ;;  %v2305_v7 = vsel %vm11130_vm0, %v7269_v2, inf }
 0x2f9   : > { %2306 = vmin.xlane.f32.xlu0 %v2305_v7  ;;  %v1489_v45 = vpop.xlane.xlu0 %1488  ;;  %v1431_v7 = vcvt.f32.s32 %v7098_v21 }
 0x2fa   : > { %11419 = vst [vmem:[#allocation5_spill] sm:$0xff] %v7271_v12  ;;  %v1490_v26 = vcvt.f32.s32 %v1489_v45  ;;  %vm11143_vm10 = vcmp.eq.s32.totalorder %v11404_v11, %v7271_v12 }
 0x2fb   : > { %v7282_v8 = vsel %vm11143_vm10, inf, %v11420_v43  ;;  %v11432_v43 = vld [vmem:[#allocation14_spill] sm:$0xff] }
 0x2fc   : > { %11421 = vst [vmem:[#allocation6_spill] sm:$0xff] %v7282_v8  ;;  %v7284_v32 = vadd.s32 %v1492_v59, %v1490_v26  ;;  %v2302_v58 = vsel %vm11130_vm0, %v7282_v8, inf }
 0x2fd   : > { %2303 = vmin.xlane.f32.xlu0 %v2302_v58  ;;  %v1474_v57 = vpop.xlane.xlu0 %1473 }
 0x2fe   : > { %11422 = vst [vmem:[#allocation7_spill] sm:$0xff] %v7284_v32  ;;  %v1475_v14 = vcvt.f32.s32 %v1474_v57  ;;  %vm11142_vm11 = vcmp.eq.s32.totalorder %v11404_v11, %v7284_v32  ;;  %v1432_v57 = vshll.u32 %v1431_v7, 16 }
 0x2ff   : > { %v7295_v61 = vsel %vm11142_vm11, inf, %v11423_v4 }
 0x300   : > { %11424 = vst [vmem:[#allocation8_spill] sm:$0xff] %v7295_v61  ;;  %v7297_v28 = vadd.s32 %v1477_v6, %v1475_v14  ;;  %v2299_v17 = vsel %vm11130_vm0, %v7295_v61, inf }
 0x301   : > { %2300 = vmin.xlane.f32.xlu0 %v2299_v17  ;;  %v1459_v31 = vpop.xlane.xlu0 %1458 }
 0x302   : > { %11425 = vst [vmem:[#allocation9_spill] sm:$0xff] %v7297_v28  ;;  %v1460_v41 = vcvt.f32.s32 %v1459_v31  ;;  %vm11139_vm12 = vcmp.eq.s32.totalorder %v11404_v11, %v7297_v28 }
 0x303   : > { %v7308_v62 = vsel %vm11139_vm12, inf, %v11426_v5 }
 0x304   : > { %11427 = vst [vmem:[#allocation10_spill] sm:$0xff] %v7308_v62  ;;  %v7310_v10 = vadd.s32 %v1462_v24, %v1460_v41  ;;  %v2296_v3 = vsel %vm11130_vm0, %v7308_v62, inf  ;;  %v1807_v24 = vshll.u32 %v1806_v55, 16  ;;  %v11436_v41 = vld [vmem:[#allocation15_spill] sm:$0xff] }
 0x305   : > { %2297 = vmin.xlane.f32.xlu0 %v2296_v3  ;;  %v1444_v35 = vpop.xlane.xlu0 %1443 }
 0x306   : > { %11428 = vst [vmem:[#allocation11_spill] sm:$0xff] %v7310_v10  ;;  %v1445_v63 = vcvt.f32.s32 %v1444_v35  ;;  %vm11138_vm13 = vcmp.eq.s32.totalorder %v11404_v11, %v7310_v10 }
 0x307   : > { %v7320_v53 = vsel %vm11138_vm13, inf, %v11429_v36 }
 0x308   : > { %11430 = vst [vmem:[#allocation12_spill] sm:$0xff] %v7320_v53  ;;  %v7323_v45 = vadd.s32 %v1447_v33, %v1445_v63  ;;  %v2293_v59 = vsel %vm11130_vm0, %v7320_v53, inf  ;;  %v11438_v33 = vld [vmem:[#allocation16_spill] sm:$0xff] }
 0x309   : > { %2294 = vmin.xlane.f32.xlu0 %v2293_v59  ;;  %v1792_v59 = vshll.u32 %v1791_v60, 16 }
 0x30a   : > { %11431 = vst [vmem:[#allocation13_spill] sm:$0xff] %v7323_v45  ;;  %vm11133_vm14 = vcmp.eq.s32.totalorder %v11404_v11, %v7323_v45  ;;  %v1429_v26 = vpop.xlane.xlu0 %1428 }
 0x30b   : > { %v7334_v58 = vsel %vm11133_vm14, inf, %v11432_v43  ;;  %v1430_v21 = vcvt.f32.s32 %v1429_v26  ;;  %v1776_v26 = vcvt.f32.s32 %v7117_v13  ;;  %v11441_v43 = vld [vmem:[#allocation17_spill] sm:$0xff] }
 0x30c   : > { %11433 = vst [vmem:[#allocation14_spill] sm:$0xff] %v7334_v58  ;;  %v2290_v6 = vsel %vm11130_vm0, %v7334_v58, inf }
 0x30d   : > { %2291 = vmin.xlane.f32.xlu0 %v2290_v6  ;;  %v1819_v14 = vpop.xlane.xlu1 %1818  ;;  %v7339_v4 = vadd.s32 %v1432_v57, %v1430_v21 }
 0x30e   : > { %v1820_v17 = vcvt.f32.s32 %v1819_v14  ;;  %v1777_v14 = vshll.u32 %v1776_v26, 16 }
 0x30f   : > { %11434 = vst [vmem:[#allocation80_spill] sm:$0xff] %v7339_v4  ;;  %vm11132_vm15 = vcmp.eq.s32.totalorder %v11404_v11, %v7339_v4 }
 0x310   : > { %v7341_v31 = vadd.s32 %v1822_v34, %v1820_v17  ;;  %v7349_v5 = vsel %vm11132_vm15, inf, %v11436_v41  ;;  %v1416_v34 = vcvt.f32.s32 %v7123_v29  ;;  %v11444_v17 = vld [vmem:[#allocation18_spill] sm:$0xff] }
 0x311   : > { %v1804_v27 = vpop.xlane.xlu1 %1803  ;;  %11437 = vst [vmem:[#allocation15_spill] sm:$0xff] %v7349_v5  ;;  %v2287_v35 = vsel %vm11130_vm0, %v7349_v5, inf }
 0x312   : > { %11435 = vst [vmem:[#allocation81_spill] sm:$0xff] %v7341_v31  ;;  %v1805_v3 = vcvt.f32.s32 %v1804_v27  ;;  %vm11131_vm1 = vcmp.eq.s32.totalorder %v11404_v11, %v7341_v31  ;;  %2288 = vmin.xlane.f32.xlu0 %v2287_v35  ;;  %v1761_v27 = vcvt.f32.s32 %v7125_v23  ;;  %v1417_v35 = vshll.u32 %v1416_v34, 16 }
 0x313   : > { %v7360_v63 = vsel %vm11131_vm1, inf, %v11438_v33  ;;  %v1746_v33 = vcvt.f32.s32 %v7132_v38 }
 0x314   : > { %11439 = vst [vmem:[#allocation16_spill] sm:$0xff] %v7360_v63  ;;  %v7362_v36 = vadd.s32 %v1807_v24, %v1805_v3  ;;  %v2365_v7 = vsel %vm11130_vm0, %v7360_v63, inf }
 0x315   : > { %2366 = vmin.xlane.f32.xlu1 %v2365_v7  ;;  %v1789_v40 = vpop.xlane.xlu1 %1788  ;;  %v1747_v38 = vshll.u32 %v1746_v33, 16 }
 0x316   : > { %11440 = vst [vmem:[#allocation82_spill] sm:$0xff] %v7362_v36  ;;  %v1790_v47 = vcvt.f32.s32 %v1789_v40  ;;  %vm11026_vm2 = vcmp.eq.s32.totalorder %v11404_v11, %v7362_v36  ;;  %v1762_v40 = vshll.u32 %v1761_v27, 16 }
 0x317   : > { %v7373_v57 = vsel %vm11026_vm2, inf, %v11441_v43 }
 0x318   : > { %11442 = vst [vmem:[#allocation17_spill] sm:$0xff] %v7373_v57  ;;  %v7375_v21 = vadd.s32 %v1792_v59, %v1790_v47  ;;  %v2362_v6 = vsel %vm11130_vm0, %v7373_v57, inf  ;;  %v11447_v47 = vld [vmem:[#allocation19_spill] sm:$0xff] }
 0x319   : > { %2363 = vmin.xlane.f32.xlu1 %v2362_v6  ;;  %v1774_v55 = vpop.xlane.xlu1 %1773 }
 0x31a   : > { %11443 = vst [vmem:[#allocation83_spill] sm:$0xff] %v7375_v21  ;;  %vm10964_vm3 = vcmp.eq.s32.totalorder %v11404_v11, %v7375_v21  ;;  %v1775_v13 = vcvt.f32.s32 %v1774_v55 }
 0x31b   : > { %v7386_v24 = vsel %vm10964_vm3, inf, %v11444_v17 }
 0x31c   : > { %11445 = vst [vmem:[#allocation18_spill] sm:$0xff] %v7386_v24  ;;  %v2359_v41 = vsel %vm11130_vm0, %v7386_v24, inf  ;;  %v7391_v60 = vadd.s32 %v1777_v14, %v1775_v13  ;;  %v1731_v14 = vcvt.f32.s32 %v7137_v22  ;;  %v11451_v13 = vld [vmem:[#allocation21_spill] sm:$0xff] }
 0x31d   : > { %2360 = vmin.xlane.f32.xlu1 %v2359_v41  ;;  %v1414_v3 = vpop.xlane.xlu0 %1413  ;;  %v1759_v7 = vpop.xlane.xlu1 %1758  ;;  %v11453_v41 = vld [vmem:[#allocation20_spill] sm:$0xff] }
 0x31e   : > { %11446 = vst [vmem:[#allocation84_spill] sm:$0xff] %v7391_v60  ;;  %v1415_v29 = vcvt.f32.s32 %v1414_v3  ;;  %vm10965_vm4 = vcmp.eq.s32.totalorder %v11404_v11, %v7391_v60  ;;  %v1760_v59 = vcvt.f32.s32 %v1759_v7  ;;  %v1716_v7 = vcvt.f32.s32 %v7142_v1 }
 0x31f   : > { %v7400_v23 = vsel %vm10965_vm4, inf, %v11447_v47  ;;  %v1701_v1 = vcvt.f32.s32 %v7148_v42 }
 0x320   : > { %11448 = vst [vmem:[#allocation19_spill] sm:$0xff] %v7400_v23  ;;  %v7402_v26 = vadd.s32 %v1417_v35, %v1415_v29  ;;  %v2356_v43 = vsel %vm11130_vm0, %v7400_v23, inf  ;;  %v7406_v6 = vadd.s32 %v1762_v40, %v1760_v59  ;;  %v1732_v29 = vshll.u32 %v1731_v14, 16  ;;  %v11456_v59 = vld [vmem:[#allocation22_spill] sm:$0xff] }
 0x321   : > { %2357 = vmin.xlane.f32.xlu1 %v2356_v43  ;;  %v1744_v55 = vpop.xlane.xlu1 %1743  ;;  %v1717_v14 = vshll.u32 %v1716_v7, 16  ;;  %v1702_v42 = vshll.u32 %v1701_v1, 16  ;;  %v1686_v7 = vcvt.f32.s32 %v7157_v19  ;;  %v1671_v19 = vcvt.f32.s32 %v7162_v46 }
 0x322   : > { %11449 = vst [vmem:[#allocation85_spill] sm:$0xff] %v7402_v26  ;;  %11450 = vst [vmem:[#allocation86_spill] sm:$0xff] %v7406_v6  ;;  %vm10966_vm3 = vcmp.eq.s32.totalorder %v11404_v11, %v7402_v26  ;;  %v1745_v34 = vcvt.f32.s32 %v1744_v55  ;;  %vm10967_vm4 = vcmp.eq.s32.totalorder %v11404_v11, %v7406_v6 }
 0x323   : > { %v7415_v17 = vsel %vm10966_vm3, inf, %v11451_v13  ;;  %v7425_v3 = vsel %vm10967_vm4, inf, %v11453_v41  ;;  %v11459_v13 = vld [vmem:[#allocation23_spill] sm:$0xff]  ;;  %v1401_v41 = vcvt.f32.s32 %v7153_v50 }
 0x324   : > { %11452 = vst [vmem:[#allocation21_spill] sm:$0xff] %v7415_v17  ;;  %v2284_v27 = vsel %vm11130_vm0, %v7415_v17, inf  ;;  %11454 = vst [vmem:[#allocation20_spill] sm:$0xff] %v7425_v3  ;;  %v7427_v22 = vadd.s32 %v1747_v38, %v1745_v34  ;;  %v2353_v35 = vsel %vm11130_vm0, %v7425_v3, inf }
 0x325   : > { %2285 = vmin.xlane.f32.xlu0 %v2284_v27  ;;  %2354 = vmin.xlane.f32.xlu1 %v2353_v35  ;;  %v1729_v33 = vpop.xlane.xlu1 %1728 }
 0x326   : > { %11455 = vst [vmem:[#allocation87_spill] sm:$0xff] %v7427_v22  ;;  %v1730_v40 = vcvt.f32.s32 %v1729_v33  ;;  %vm10968_vm3 = vcmp.eq.s32.totalorder %v11404_v11, %v7427_v22 }
 0x327   : > { %v7438_v47 = vsel %vm10968_vm3, inf, %v11456_v59 }
 0x328   : > { %11457 = vst [vmem:[#allocation22_spill] sm:$0xff] %v7438_v47  ;;  %v7440_v43 = vadd.s32 %v1732_v29, %v1730_v40  ;;  %v2350_v38 = vsel %vm11130_vm0, %v7438_v47, inf }
 0x329   : > { %2351 = vmin.xlane.f32.xlu1 %v2350_v38  ;;  %v1714_v55 = vpop.xlane.xlu1 %1713  ;;  %v11462_v38 = vld [vmem:[#allocation24_spill] sm:$0xff] }
 0x32a   : > { %11458 = vst [vmem:[#allocation88_spill] sm:$0xff] %v7440_v43  ;;  %v1715_v34 = vcvt.f32.s32 %v1714_v55  ;;  %vm10970_vm4 = vcmp.eq.s32.totalorder %v11404_v11, %v7440_v43  ;;  %v1402_v55 = vshll.u32 %v1401_v41, 16 }
 0x32b   : > { %v7451_v27 = vsel %vm10970_vm4, inf, %v11459_v13 }
 0x32c   : > { %11460 = vst [vmem:[#allocation23_spill] sm:$0xff] %v7451_v27  ;;  %v7454_v35 = vadd.s32 %v1717_v14, %v1715_v34  ;;  %v2347_v33 = vsel %vm11130_vm0, %v7451_v27, inf }
 0x32d   : > { %2348 = vmin.xlane.f32.xlu1 %v2347_v33  ;;  %v1699_v29 = vpop.xlane.xlu1 %1698  ;;  %v1687_v33 = vshll.u32 %v1686_v7, 16  ;;  %v1672_v7 = vshll.u32 %v1671_v19, 16 }
 0x32e   : > { %11461 = vst [vmem:[#allocation89_spill] sm:$0xff] %v7454_v35  ;;  %v1700_v40 = vcvt.f32.s32 %v1699_v29  ;;  %vm10971_vm3 = vcmp.eq.s32.totalorder %v11404_v11, %v7454_v35 }
 0x32f   : > { %v7465_v50 = vsel %vm10971_vm3, inf, %v11462_v38  ;;  %v11466_v38 = vld [vmem:[#allocation25_spill] sm:$0xff] }
 0x330   : > { %v1399_v59 = vpop.xlane.xlu0 %1398  ;;  %11463 = vst [vmem:[#allocation24_spill] sm:$0xff] %v7465_v50  ;;  %v7467_v14 = vadd.s32 %v1702_v42, %v1700_v40  ;;  %v2344_v1 = vsel %vm11130_vm0, %v7465_v50, inf }
 0x331   : > { %v1400_v34 = vcvt.f32.s32 %v1399_v59  ;;  %2345 = vmin.xlane.f32.xlu1 %v2344_v1  ;;  %v1684_v13 = vpop.xlane.xlu1 %1683  ;;  %v11469_v59 = vld [vmem:[#allocation27_spill] sm:$0xff] }
 0x332   : > { %11464 = vst [vmem:[#allocation90_spill] sm:$0xff] %v7467_v14  ;;  %v1685_v43 = vcvt.f32.s32 %v1684_v13  ;;  %vm10972_vm4 = vcmp.eq.s32.totalorder %v11404_v11, %v7467_v14  ;;  %v11471_v13 = vld [vmem:[#allocation26_spill] sm:$0xff] }
 0x333   : > { %v7472_v29 = vadd.s32 %v1402_v55, %v1400_v34  ;;  %v7480_v41 = vsel %vm10972_vm4, inf, %v11466_v38  ;;  %v1656_v34 = vcvt.f32.s32 %v7167_v15 }
 0x334   : > { %11467 = vst [vmem:[#allocation25_spill] sm:$0xff] %v7480_v41  ;;  %v7482_v42 = vadd.s32 %v1687_v33, %v1685_v43  ;;  %v2341_v46 = vsel %vm11130_vm0, %v7480_v41, inf }
 0x335   : > { %11465 = vst [vmem:[#allocation91_spill] sm:$0xff] %v7472_v29  ;;  %vm10973_vm3 = vcmp.eq.s32.totalorder %v11404_v11, %v7472_v29  ;;  %2342 = vmin.xlane.f32.xlu1 %v2341_v46  ;;  %v1669_v40 = vpop.xlane.xlu1 %1668  ;;  %v1657_v46 = vshll.u32 %v1656_v34, 16 }
 0x336   : > { %11468 = vst [vmem:[#allocation92_spill] sm:$0xff] %v7482_v42  ;;  %v7492_v55 = vsel %vm10973_vm3, inf, %v11469_v59  ;;  %v1670_v1 = vcvt.f32.s32 %v1669_v40  ;;  %vm10974_vm4 = vcmp.eq.s32.totalorder %v11404_v11, %v7482_v42  ;;  %v1641_v40 = vcvt.f32.s32 %v7172_v54  ;;  %v11477_v42 = vld [vmem:[#allocation29_spill] sm:$0xff] }
 0x337   : > { %11470 = vst [vmem:[#allocation27_spill] sm:$0xff] %v7492_v55  ;;  %v2281_v43 = vsel %vm11130_vm0, %v7492_v55, inf  ;;  %v7503_v19 = vsel %vm10974_vm4, inf, %v11471_v13  ;;  %v1386_v54 = vcvt.f32.s32 %v7178_v48 }
 0x338   : > { %2282 = vmin.xlane.f32.xlu0 %v2281_v43  ;;  %11472 = vst [vmem:[#allocation26_spill] sm:$0xff] %v7503_v19  ;;  %v7505_v33 = vadd.s32 %v1672_v7, %v1670_v1  ;;  %v2338_v38 = vsel %vm11130_vm0, %v7503_v19, inf  ;;  %v11474_v43 = vld [vmem:[#allocation28_spill] sm:$0xff]  ;;  %v1642_v34 = vshll.u32 %v1641_v40, 16 }
 0x339   : > { %2339 = vmin.xlane.f32.xlu1 %v2338_v38  ;;  %v1654_v15 = vpop.xlane.xlu1 %1653  ;;  %v1387_v48 = vshll.u32 %v1386_v54, 16 }
 0x33a   : > { %11473 = vst [vmem:[#allocation93_spill] sm:$0xff] %v7505_v33  ;;  %v1655_v59 = vcvt.f32.s32 %v1654_v15  ;;  %vm10976_vm3 = vcmp.eq.s32.totalorder %v11404_v11, %v7505_v33  ;;  %v11480_v33 = vld [vmem:[#allocation30_spill] sm:$0xff] }
 0x33b   : > { %v7516_v13 = vsel %vm10976_vm3, inf, %v11474_v43 }
 0x33c   : > { %11475 = vst [vmem:[#allocation28_spill] sm:$0xff] %v7516_v13  ;;  %v7518_v7 = vadd.s32 %v1657_v46, %v1655_v59  ;;  %v2335_v1 = vsel %vm11130_vm0, %v7516_v13, inf  ;;  %v1626_v46 = vcvt.f32.s32 %v7182_v37 }
 0x33d   : > { %2336 = vmin.xlane.f32.xlu1 %v2335_v1  ;;  %v1639_v38 = vpop.xlane.xlu1 %1638 }
 0x33e   : > { %11476 = vst [vmem:[#allocation94_spill] sm:$0xff] %v7518_v7  ;;  %v1640_v15 = vcvt.f32.s32 %v1639_v38  ;;  %vm10979_vm4 = vcmp.eq.s32.totalorder %v11404_v11, %v7518_v7  ;;  %v1627_v37 = vshll.u32 %v1626_v46, 16 }
 0x33f   : > { %v7529_v43 = vsel %vm10979_vm4, inf, %v11477_v42 }
 0x340   : > { %11478 = vst [vmem:[#allocation29_spill] sm:$0xff] %v7529_v43  ;;  %v7532_v59 = vadd.s32 %v1642_v34, %v1640_v15  ;;  %v2332_v1 = vsel %vm11130_vm0, %v7529_v43, inf }
 0x341   : > { %2333 = vmin.xlane.f32.xlu1 %v2332_v1 }
 0x342   : > { %11479 = vst [vmem:[#allocation95_spill] sm:$0xff] %v7532_v59  ;;  %vm10980_vm3 = vcmp.eq.s32.totalorder %v11404_v11, %v7532_v59 }
 0x343   : > { %v1384_v40 = vpop.xlane.xlu0 %1383  ;;  %v7542_v42 = vsel %vm10980_vm3, inf, %v11480_v33 }
 0x344   : > { %v1385_v38 = vcvt.f32.s32 %v1384_v40  ;;  %11481 = vst [vmem:[#allocation30_spill] sm:$0xff] %v7542_v42  ;;  %v2329_v15 = vsel %vm11130_vm0, %v7542_v42, inf  ;;  %v11484_v40 = vld [vmem:[#allocation31_spill] sm:$0xff] }
 0x345   : > { %2330 = vmin.xlane.f32.xlu1 %v2329_v15  ;;  %v1611_v15 = vcvt.f32.s32 %v7192_v30 }
 0x346   : > { %v1624_v7 = vpop.xlane.xlu1 %1623  ;;  %v7544_v34 = vadd.s32 %v1387_v48, %v1385_v38 }
 0x347   : > { %v1625_v1 = vcvt.f32.s32 %v1624_v7  ;;  %v11486_v7 = vld [vmem:[#allocation32_spill] sm:$0xff]  ;;  %v1612_v29 = vshll.u32 %v1611_v15, 16 }
 0x348   : > { %11482 = vst [vmem:[#allocation96_spill] sm:$0xff] %v7544_v34  ;;  %vm10987_vm4 = vcmp.eq.s32.totalorder %v11404_v11, %v7544_v34 }
 0x349   : > { %v7548_v54 = vadd.s32 %v1627_v37, %v1625_v1  ;;  %v7556_v33 = vsel %vm10987_vm4, inf, %v11484_v40  ;;  %v1371_v37 = vcvt.f32.s32 %v7188_v39 }
 0x34a   : > { %11485 = vst [vmem:[#allocation31_spill] sm:$0xff] %v7556_v33  ;;  %v2278_v46 = vsel %vm11130_vm0, %v7556_v33, inf }
 0x34b   : > { %11483 = vst [vmem:[#allocation97_spill] sm:$0xff] %v7548_v54  ;;  %vm10986_vm3 = vcmp.eq.s32.totalorder %v11404_v11, %v7548_v54  ;;  %2279 = vmin.xlane.f32.xlu0 %v2278_v46  ;;  %v1372_v40 = vshll.u32 %v1371_v37, 16 }
 0x34c   : > { %v7566_v48 = vsel %vm10986_vm3, inf, %v11486_v7  ;;  %v11490_v7 = vld [vmem:[#allocation33_spill] sm:$0xff] }
 0x34d   : > { %11487 = vst [vmem:[#allocation32_spill] sm:$0xff] %v7566_v48  ;;  %v2326_v38 = vsel %vm11130_vm0, %v7566_v48, inf }
 0x34e   : > { %2327 = vmin.xlane.f32.xlu1 %v2326_v38  ;;  %v1596_v38 = vcvt.f32.s32 %v7203_v52 }
 0x356   : > { %v1369_v1 = vpop.xlane.xlu0 %1368 }
 0x357   : > { %v1370_v34 = vcvt.f32.s32 %v1369_v1 }
 0x359   : > { %v1609_v59 = vpop.xlane.xlu1 %1608  ;;  %v7572_v46 = vadd.s32 %v1372_v40, %v1370_v34  ;;  %v11492_v34 = vld [vmem:[#allocation35_spill] sm:$0xff] }
 0x35a   : > { %v1610_v14 = vcvt.f32.s32 %v1609_v59  ;;  %v1356_v59 = vcvt.f32.s32 %v7198_v9 }
 0x35b   : > { %11488 = vst [vmem:[#allocation98_spill] sm:$0xff] %v7572_v46  ;;  %vm10991_vm3 = vcmp.eq.s32.totalorder %v11404_v11, %v7572_v46 }
 0x35c   : > { %v7574_v35 = vadd.s32 %v1612_v29, %v1610_v14  ;;  %v7582_v39 = vsel %vm10991_vm3, inf, %v11490_v7  ;;  %v1357_v15 = vshll.u32 %v1356_v59, 16  ;;  %v1597_v7 = vshll.u32 %v1596_v38, 16 }
 0x35d   : > { %11491 = vst [vmem:[#allocation33_spill] sm:$0xff] %v7582_v39  ;;  %v2275_v30 = vsel %vm11130_vm0, %v7582_v39, inf }
 0x35e   : > { %11489 = vst [vmem:[#allocation99_spill] sm:$0xff] %v7574_v35  ;;  %vm10990_vm4 = vcmp.eq.s32.totalorder %v11404_v11, %v7574_v35  ;;  %2276 = vmin.xlane.f32.xlu0 %v2275_v30 }
 0x35f   : > { %v7592_v14 = vsel %vm10990_vm4, inf, %v11492_v34  ;;  %v11496_v34 = vld [vmem:[#allocation40_spill] sm:$0xff] }
 0x360   : > { %11493 = vst [vmem:[#allocation35_spill] sm:$0xff] %v7592_v14  ;;  %v2323_v29 = vsel %vm11130_vm0, %v7592_v14, inf }
 0x361   : > { %2324 = vmin.xlane.f32.xlu1 %v2323_v29  ;;  %v11498_v29 = vld [vmem:[#allocation41_spill] sm:$0xff] }
 0x369   : > { %v1354_v37 = vpop.xlane.xlu0 %1353 }
 0x36a   : > { %v1355_v1 = vcvt.f32.s32 %v1354_v37 }
 0x36c   : > { %v1594_v40 = vpop.xlane.xlu1 %1593  ;;  %v7598_v30 = vadd.s32 %v1357_v15, %v1355_v1 }
 0x36d   : > { %v1595_v46 = vcvt.f32.s32 %v1594_v40 }
 0x36e   : > { %11494 = vst [vmem:[#allocation100_spill] sm:$0xff] %v7598_v30  ;;  %vm10992_vm4 = vcmp.eq.s32.totalorder %v11404_v11, %v7598_v30 }
 0x36f   : > { %v7600_v54 = vadd.s32 %v1597_v7, %v1595_v46  ;;  %v7608_v9 = vsel %vm10992_vm4, inf, %v11496_v34 }
 0x370   : > { %11497 = vst [vmem:[#allocation40_spill] sm:$0xff] %v7608_v9  ;;  %v2272_v52 = vsel %vm11130_vm0, %v7608_v9, inf }
 0x371   : > { %11495 = vst [vmem:[#allocation101_spill] sm:$0xff] %v7600_v54  ;;  %vm10993_vm3 = vcmp.eq.s32.totalorder %v11404_v11, %v7600_v54  ;;  %2273 = vmin.xlane.f32.xlu0 %v2272_v52 }
 0x372   : > { %v7618_v46 = vsel %vm10993_vm3, inf, %v11498_v29  ;;  %v7620_v59 = vpop.xlane.xlu0 %2318 }
 0x373   : > { %11499 = vst [vmem:[#allocation41_spill] sm:$0xff] %v7618_v46  ;;  %11500 = vst [vmem:[#allocation102_spill] sm:$0xff] %v7620_v59  ;;  %v2320_v38 = vsel %vm11130_vm0, %v7618_v46, inf  ;;  %vm2383_vm4 = vcmp.eq.f32.partialorder %v7217_v25, %v7620_v59 }
 0x374   : > { %2321 = vmin.xlane.f32.xlu1 %v2320_v38  ;;  %v2415_v37 = vsel %vm2383_vm4, %v11404_v11, 64 }
 0x375   : > { %v7630_v1 = vsel %vm11130_vm0, %v2415_v37, 2147483647 }
 0x376   : > { %v7627_v15 = vpop.xlane.xlu0 %2315  ;;  %v2659_v40 = vshra.s32 %v7630_v1, 16 }
 0x377   : > { %11501 = vst [vmem:[#allocation103_spill] sm:$0xff] %v7627_v15  ;;  %vm2382_vm3 = vcmp.eq.f32.partialorder %v7230_v51, %v7627_v15 }
 0x378   : > { %v2414_v7 = vsel %vm2382_vm3, %v11404_v11, 64  ;;  %v7636_v34 = vcvt.s32.f32 %v2659_v40 }
 0x379   : > { %v7641_v29 = vsel %vm11130_vm0, %v2414_v7, 2147483647 }
 0x37a   : > { %v7638_v52 = vpop.xlane.xlu0 %2312  ;;  %2662 = vmin.xlane.f32.xlu0 %v7636_v34  ;;  %v2644_v38 = vshra.s32 %v7641_v29, 16 }
 0x37b   : > { %11502 = vst [vmem:[#allocation104_spill] sm:$0xff] %v7638_v52  ;;  %vm2381_vm4 = vcmp.eq.f32.partialorder %v7243_v0, %v7638_v52 }
 0x37c   : > { %v2413_v37 = vsel %vm2381_vm4, %v11404_v11, 64  ;;  %v7648_v54 = vcvt.s32.f32 %v2644_v38 }
 0x37d   : > { %v7653_v40 = vsel %vm11130_vm0, %v2413_v37, 2147483647 }
 0x37e   : > { %v7650_v30 = vpop.xlane.xlu0 %2309  ;;  %2647 = vmin.xlane.f32.xlu0 %v7648_v54  ;;  %v2629_v7 = vshra.s32 %v7653_v40, 16 }
 0x37f   : > { %11503 = vst [vmem:[#allocation105_spill] sm:$0xff] %v7650_v30  ;;  %vm2380_vm3 = vcmp.eq.f32.partialorder %v7256_v18, %v7650_v30 }
 0x380   : > { %v2412_v35 = vsel %vm2380_vm3, %v11404_v11, 64  ;;  %v7660_v51 = vcvt.s32.f32 %v2629_v7 }
 0x381   : > { %v7665_v38 = vsel %vm11130_vm0, %v2412_v35, 2147483647 }
 0x382   : > { %v7662_v0 = vpop.xlane.xlu0 %2306  ;;  %2632 = vmin.xlane.f32.xlu0 %v7660_v51  ;;  %v2614_v37 = vshra.s32 %v7665_v38, 16 }
 0x383   : > { %11504 = vst [vmem:[#allocation106_spill] sm:$0xff] %v7662_v0  ;;  %vm2379_vm4 = vcmp.eq.f32.partialorder %v7269_v2, %v7662_v0 }
 0x384   : > { %v2411_v25 = vsel %vm2379_vm4, %v11404_v11, 64  ;;  %v7672_v22 = vcvt.s32.f32 %v2614_v37 }
 0x385   : > { %v7677_v7 = vsel %vm11130_vm0, %v2411_v25, 2147483647 }
 0x386   : > { %v7674_v18 = vpop.xlane.xlu0 %2303  ;;  %2617 = vmin.xlane.f32.xlu0 %v7672_v22  ;;  %v2599_v35 = vshra.s32 %v7677_v7, 16 }
 0x387   : > { %11505 = vst [vmem:[#allocation107_spill] sm:$0xff] %v7674_v18  ;;  %vm2378_vm3 = vcmp.eq.f32.partialorder %v7282_v8, %v7674_v18 }
 0x388   : > { %v7683_v6 = vcvt.s32.f32 %v2599_v35  ;;  %v2410_v2 = vsel %vm2378_vm3, %v11404_v11, 64 }
 0x389   : > { %v7690_v37 = vsel %vm11130_vm0, %v2410_v2, 2147483647 }
 0x38a   : > { %v7685_v26 = vpop.xlane.xlu0 %2300  ;;  %2602 = vmin.xlane.f32.xlu0 %v7683_v6  ;;  %v2584_v25 = vshra.s32 %v7690_v37, 16 }
 0x38b   : > { %11506 = vst [vmem:[#allocation108_spill] sm:$0xff] %v7685_v26  ;;  %vm2377_vm4 = vcmp.eq.f32.partialorder %v7295_v61, %v7685_v26 }
 0x38c   : > { %v2409_v8 = vsel %vm2377_vm4, %v11404_v11, 64  ;;  %v7698_v35 = vcvt.s32.f32 %v2584_v25 }
 0x38d   : > { %v7702_v21 = vsel %vm11130_vm0, %v2409_v8, 2147483647 }
 0x38e   : > { %v7695_v60 = vpop.xlane.xlu0 %2297  ;;  %2587 = vmin.xlane.f32.xlu0 %v7698_v35  ;;  %v2569_v2 = vshra.s32 %v7702_v21, 16 }
 0x38f   : > { %11507 = vst [vmem:[#allocation109_spill] sm:$0xff] %v7695_v60  ;;  %vm2376_vm3 = vcmp.eq.f32.partialorder %v7308_v62, %v7695_v60 }
 0x390   : > { %v2408_v61 = vsel %vm2376_vm3, %v11404_v11, 64  ;;  %v7710_v31 = vcvt.s32.f32 %v2569_v2 }
 0x391   : > { %v7713_v4 = vsel %vm11130_vm0, %v2408_v61, 2147483647 }
 0x392   : > { %v7707_v36 = vpop.xlane.xlu0 %2294  ;;  %2572 = vmin.xlane.f32.xlu0 %v7710_v31  ;;  %v2554_v8 = vshra.s32 %v7713_v4, 16 }
 0x393   : > { %11508 = vst [vmem:[#allocation110_spill] sm:$0xff] %v7707_v36  ;;  %vm2375_vm4 = vcmp.eq.f32.partialorder %v7320_v53, %v7707_v36 }
 0x394   : > { %v2407_v62 = vsel %vm2375_vm4, %v11404_v11, 64  ;;  %v7722_v60 = vcvt.s32.f32 %v2554_v8 }
 0x395   : > { %v7725_v45 = vsel %vm11130_vm0, %v2407_v62, 2147483647 }
 0x396   : > { %v7719_v25 = vpop.xlane.xlu0 %2291  ;;  %v2539_v2 = vshra.s32 %v7725_v45, 16  ;;  %2557 = vmin.xlane.f32.xlu0 %v7722_v60 }
 0x397   : > { %11509 = vst [vmem:[#allocation111_spill] sm:$0xff] %v7719_v25  ;;  %vm2374_vm3 = vcmp.eq.f32.partialorder %v7334_v58, %v7719_v25 }
 0x398   : > { %v2406_v61 = vsel %vm2374_vm3, %v11404_v11, 64  ;;  %v7732_v53 = vcvt.s32.f32 %v2539_v2 }
 0x399   : > { %v7735_v36 = vsel %vm11130_vm0, %v2406_v61, 2147483647 }
 0x39a   : > { %v2524_v8 = vshra.s32 %v7735_v36, 16  ;;  %2542 = vmin.xlane.f32.xlu0 %v7732_v53 }
 0x39b   : > { %v7738_v10 = vpop.xlane.xlu0 %2288 }
 0x39c   : > { %11510 = vst [vmem:[#allocation112_spill] sm:$0xff] %v7738_v10  ;;  %v7741_v62 = vcvt.s32.f32 %v2524_v8  ;;  %vm2373_vm4 = vcmp.eq.f32.partialorder %v7349_v5, %v7738_v10 }
 0x39d   : > { %v2405_v2 = vsel %vm2373_vm4, %v11404_v11, 64 }
 0x39e   : > { %v7743_v28 = vpop.xlane.xlu1 %2366  ;;  %2527 = vmin.xlane.f32.xlu0 %v7741_v62  ;;  %v7755_v25 = vsel %vm11130_vm0, %v2405_v2, 2147483647 }
 0x39f   : > { %11511 = vst [vmem:[#allocation113_spill] sm:$0xff] %v7743_v28  ;;  %vm2399_vm3 = vcmp.eq.f32.partialorder %v7360_v63, %v7743_v28  ;;  %v2509_v32 = vshra.s32 %v7755_v25, 16 }
 0x3a0   : > { %v2431_v61 = vsel %vm2399_vm3, %v11404_v11, 64 }
 0x3a1   : > { %v7758_v8 = vsel %vm11130_vm0, %v2431_v61, 2147483647  ;;  %v7764_v63 = vcvt.s32.f32 %v2509_v32 }
 0x3a2   : > { %v7752_v58 = vpop.xlane.xlu1 %2363  ;;  %v2899_v5 = vshra.s32 %v7758_v8, 16 }
 0x3a3   : > { %11512 = vst [vmem:[#allocation114_spill] sm:$0xff] %v7752_v58  ;;  %vm2398_vm2 = vcmp.eq.f32.partialorder %v7373_v57, %v7752_v58  ;;  %2512 = vmin.xlane.f32.xlu0 %v7764_v63 }
 0x3a4   : > { %v7766_v28 = vcvt.s32.f32 %v2899_v5  ;;  %v2430_v2 = vsel %vm2398_vm2, %v11404_v11, 64 }
 0x3a5   : > { %v7776_v61 = vsel %vm11130_vm0, %v2430_v2, 2147483647 }
 0x3a6   : > { %v7768_v10 = vpop.xlane.xlu1 %2360  ;;  %2902 = vmin.xlane.f32.xlu1 %v7766_v28  ;;  %v2884_v32 = vshra.s32 %v7776_v61, 16 }
 0x3a7   : > { %11513 = vst [vmem:[#allocation115_spill] sm:$0xff] %v7768_v10  ;;  %vm2397_vm4 = vcmp.eq.f32.partialorder %v7386_v24, %v7768_v10 }
 0x3a8   : > { %v2429_v57 = vsel %vm2397_vm4, %v11404_v11, 64  ;;  %v7786_v12 = vcvt.s32.f32 %v2884_v32 }
 0x3a9   : > { %v7781_v5 = vsel %vm11130_vm0, %v2429_v57, 2147483647 }
 0x3aa   : > { %v7783_v58 = vpop.xlane.xlu1 %2357  ;;  %v2869_v26 = vshra.s32 %v7781_v5, 16  ;;  %2887 = vmin.xlane.f32.xlu1 %v7786_v12 }
 0x3ab   : > { %11514 = vst [vmem:[#allocation116_spill] sm:$0xff] %v7783_v58  ;;  %vm2396_vm2 = vcmp.eq.f32.partialorder %v7400_v23, %v7783_v58 }
 0x3ac   : > { %v7789_v20 = vcvt.s32.f32 %v2869_v26  ;;  %v2428_v57 = vsel %vm2396_vm2, %v11404_v11, 64 }
 0x3ad   : > { %v7800_v10 = vsel %vm11130_vm0, %v2428_v57, 2147483647 }
 0x3ae   : > { %v7793_v2 = vpop.xlane.xlu0 %2285  ;;  %v7795_v24 = vpop.xlane.xlu1 %2354  ;;  %2872 = vmin.xlane.f32.xlu1 %v7789_v20  ;;  %v2854_v26 = vshra.s32 %v7800_v10, 16 }
 0x3af   : > { %11515 = vst [vmem:[#allocation117_spill] sm:$0xff] %v7793_v2  ;;  %11516 = vst [vmem:[#allocation118_spill] sm:$0xff] %v7795_v24  ;;  %vm2372_vm3 = vcmp.eq.f32.partialorder %v7415_v17, %v7793_v2  ;;  %vm2395_vm4 = vcmp.eq.f32.partialorder %v7425_v3, %v7795_v24 }
 0x3b0   : > { %v2404_v23 = vsel %vm2372_vm3, %v11404_v11, 64  ;;  %v7810_v58 = vcvt.s32.f32 %v2854_v26  ;;  %v2427_v16 = vsel %vm2395_vm4, %v11404_v11, 64 }
 0x3b1   : > { %v7813_v44 = vsel %vm11130_vm0, %v2404_v23, 2147483647  ;;  %v7819_v17 = vsel %vm11130_vm0, %v2427_v16, 2147483647 }
 0x3b2   : > { %v7805_v32 = vpop.xlane.xlu1 %2351  ;;  %v2494_v57 = vshra.s32 %v7813_v44, 16  ;;  %2857 = vmin.xlane.f32.xlu1 %v7810_v58  ;;  %v2839_v26 = vshra.s32 %v7819_v17, 16 }
 0x3b3   : > { %11517 = vst [vmem:[#allocation119_spill] sm:$0xff] %v7805_v32  ;;  %vm2394_vm2 = vcmp.eq.f32.partialorder %v7438_v47, %v7805_v32 }
 0x3b4   : > { %v7825_v3 = vcvt.s32.f32 %v2494_v57  ;;  %v2426_v23 = vsel %vm2394_vm2, %v11404_v11, 64  ;;  %v7830_v24 = vcvt.s32.f32 %v2839_v26 }
 0x3b5   : > { %v7833_v49 = vsel %vm11130_vm0, %v2426_v23, 2147483647 }
 0x3b6   : > { %v7821_v2 = vpop.xlane.xlu1 %2348  ;;  %2497 = vmin.xlane.f32.xlu0 %v7825_v3  ;;  %v2824_v16 = vshra.s32 %v7833_v49, 16  ;;  %2842 = vmin.xlane.f32.xlu1 %v7830_v24 }
 0x3b7   : > { %11518 = vst [vmem:[#allocation120_spill] sm:$0xff] %v7821_v2  ;;  %vm2393_vm3 = vcmp.eq.f32.partialorder %v7451_v27, %v7821_v2 }
 0x3b8   : > { %v7841_v57 = vcvt.s32.f32 %v2824_v16  ;;  %v2425_v47 = vsel %vm2393_vm3, %v11404_v11, 64 }
 0x3b9   : > { %v7847_v26 = vsel %vm11130_vm0, %v2425_v47, 2147483647 }
 0x3ba   : > { %v7836_v56 = vpop.xlane.xlu1 %2345  ;;  %2827 = vmin.xlane.f32.xlu1 %v7841_v57  ;;  %v2809_v32 = vshra.s32 %v7847_v26, 16 }
 0x3bb   : > { %11519 = vst [vmem:[#allocation121_spill] sm:$0xff] %v7836_v56  ;;  %vm2392_vm4 = vcmp.eq.f32.partialorder %v7465_v50, %v7836_v56 }
 0x3bc   : > { %v2424_v27 = vsel %vm2392_vm4, %v11404_v11, 64  ;;  %v7854_v2 = vcvt.s32.f32 %v2809_v32 }
 0x3bd   : > { %v7860_v18 = vsel %vm11130_vm0, %v2424_v27, 2147483647 }
 0x3be   : > { %v7849_v23 = vpop.xlane.xlu1 %2342  ;;  %2812 = vmin.xlane.f32.xlu1 %v7854_v2  ;;  %v2794_v47 = vshra.s32 %v7860_v18, 16 }
 0x3bf   : > { %11520 = vst [vmem:[#allocation122_spill] sm:$0xff] %v7849_v23  ;;  %vm2391_vm2 = vcmp.eq.f32.partialorder %v7480_v41, %v7849_v23 }
 0x3c0   : > { %v7865_v56 = vcvt.s32.f32 %v2794_v47  ;;  %v2423_v32 = vsel %vm2391_vm2, %v11404_v11, 64 }
 0x3c1   : > { %v7862_v50 = vpop.xlane.xlu0 %2282  ;;  %v7876_v27 = vsel %vm11130_vm0, %v2423_v32, 2147483647 }
 0x3c2   : > { %v7856_v16 = vpop.xlane.xlu1 %2339  ;;  %11522 = vst [vmem:[#allocation124_spill] sm:$0xff] %v7862_v50  ;;  %vm2371_vm3 = vcmp.eq.f32.partialorder %v7492_v55, %v7862_v50  ;;  %2797 = vmin.xlane.f32.xlu1 %v7865_v56  ;;  %v2779_v30 = vshra.s32 %v7876_v27, 16 }
 0x3c3   : > { %11521 = vst [vmem:[#allocation123_spill] sm:$0xff] %v7856_v16  ;;  %v2403_v47 = vsel %vm2371_vm3, %v11404_v11, 64  ;;  %vm2390_vm4 = vcmp.eq.f32.partialorder %v7503_v19, %v7856_v16 }
 0x3c4   : > { %v7882_v41 = vcvt.s32.f32 %v2779_v30  ;;  %v7885_v23 = vsel %vm11130_vm0, %v2403_v47, 2147483647  ;;  %v2422_v50 = vsel %vm2390_vm4, %v11404_v11, 64 }
 0x3c5   : > { %v2479_v55 = vshra.s32 %v7885_v23, 16  ;;  %v7895_v32 = vsel %vm11130_vm0, %v2422_v50, 2147483647 }
 0x3c6   : > { %v7869_v0 = vpop.xlane.xlu1 %2336  ;;  %2782 = vmin.xlane.f32.xlu1 %v7882_v41  ;;  %v2764_v30 = vshra.s32 %v7895_v32, 16 }
 0x3c7   : > { %11523 = vst [vmem:[#allocation125_spill] sm:$0xff] %v7869_v0  ;;  %vm2389_vm2 = vcmp.eq.f32.partialorder %v7516_v13, %v7869_v0  ;;  %v7897_v19 = vcvt.s32.f32 %v2479_v55 }
 0x3c8   : > { %v2421_v47 = vsel %vm2389_vm2, %v11404_v11, 64  ;;  %v7902_v16 = vcvt.s32.f32 %v2764_v30 }
 0x3c9   : > { %2482 = vmin.xlane.f32.xlu0 %v7897_v19  ;;  %v7905_v15 = vsel %vm11130_vm0, %v2421_v47, 2147483647 }
 0x3ca   : > { %v7887_v52 = vpop.xlane.xlu1 %2333  ;;  %11525 = vst [vmem:[#allocation127_spill] sm:$0xff] %v7902_v16  ;;  %v2749_v13 = vshra.s32 %v7905_v15, 16  ;;  %2767 = vmin.xlane.f32.xlu1 %v7902_v16 }
 0x3cb   : > { %11524 = vst [vmem:[#allocation126_spill] sm:$0xff] %v7887_v52  ;;  %vm2388_vm3 = vcmp.eq.f32.partialorder %v7529_v43, %v7887_v52 }
 0x3cc   : > { %v7913_v50 = vcvt.s32.f32 %v2749_v13  ;;  %v2420_v55 = vsel %vm2388_vm3, %v11404_v11, 64 }
 0x3cd   : > { %v7917_v59 = vsel %vm11130_vm0, %v2420_v55, 2147483647 }
 0x3ce   : > { %v7908_v0 = vpop.xlane.xlu1 %2330  ;;  %11527 = vst [vmem:[#allocation129_spill] sm:$0xff] %v7913_v50  ;;  %v2734_v30 = vshra.s32 %v7917_v59, 16  ;;  %2752 = vmin.xlane.f32.xlu1 %v7913_v50 }
 0x3cf   : > { %11526 = vst [vmem:[#allocation128_spill] sm:$0xff] %v7908_v0  ;;  %vm2387_vm4 = vcmp.eq.f32.partialorder %v7542_v42, %v7908_v0 }
 0x3d0   : > { %v7923_v47 = vcvt.s32.f32 %v2734_v30  ;;  %v2419_v43 = vsel %vm2387_vm4, %v11404_v11, 64 }
 0x3d1   : > { %v7929_v13 = vsel %vm11130_vm0, %v2419_v43, 2147483647 }
 0x3d2   : > { %11529 = vst [vmem:[#allocation131_spill] sm:$0xff] %v7929_v13  ;;  %v2719_v55 = vshra.s32 %v7929_v13, 16  ;;  %2737 = vmin.xlane.f32.xlu1 %v7923_v47 }
 0x3d4   : > { %v7925_v16 = vpop.xlane.xlu0 %2279  ;;  %v7937_v42 = vcvt.s32.f32 %v2719_v55 }
 0x3d5   : > { %11528 = vst [vmem:[#allocation130_spill] sm:$0xff] %v7925_v16  ;;  %vm2370_vm2 = vcmp.eq.f32.partialorder %v7556_v33, %v7925_v16 }
 0x3d6   : > { %11531 = vst [vmem:[#allocation133_spill] sm:$0xff] %v7937_v42  ;;  %v2402_v30 = vsel %vm2370_vm2, %v11404_v11, 64  ;;  %2722 = vmin.xlane.f32.xlu1 %v7937_v42 }
 0x3d7   : > { %v7931_v52 = vpop.xlane.xlu1 %2327  ;;  %v7943_v0 = vsel %vm11130_vm0, %v2402_v30, 2147483647 }
 0x3d8   : > { %11530 = vst [vmem:[#allocation132_spill] sm:$0xff] %v7931_v52  ;;  %vm2386_vm3 = vcmp.eq.f32.partialorder %v7566_v48, %v7931_v52  ;;  %v2464_v50 = vshra.s32 %v7943_v0, 16 }
 0x3d9   : > { %v2418_v43 = vsel %vm2386_vm3, %v11404_v11, 64 }
 0x3da   : > { %v7948_v13 = vsel %vm11130_vm0, %v2418_v43, 2147483647  ;;  %v7952_v33 = vcvt.s32.f32 %v2464_v50 }
 0x3db   : > { %v2704_v55 = vshra.s32 %v7948_v13, 16 }
 0x3dc   : > { %11532 = vst [vmem:[#allocation134_spill] sm:$0xff] %v7952_v33  ;;  %2467 = vmin.xlane.f32.xlu0 %v7952_v33 }
 0x3dd   : > { %v7954_v16 = vcvt.s32.f32 %v2704_v55 }
 0x3df   : > { %11533 = vst [vmem:[#allocation135_spill] sm:$0xff] %v7954_v16  ;;  %2707 = vmin.xlane.f32.xlu1 %v7954_v16 }
 0x3e7   : > { %v7958_v30 = vpop.xlane.xlu0 %2276 }
 0x3e8   : > { %11534 = vst [vmem:[#allocation136_spill] sm:$0xff] %v7958_v30  ;;  %vm2369_vm4 = vcmp.eq.f32.partialorder %v7582_v39, %v7958_v30 }
 0x3e9   : > { %v2401_v43 = vsel %vm2369_vm4, %v11404_v11, 64 }
 0x3ea   : > { %v7960_v48 = vpop.xlane.xlu1 %2324  ;;  %v7966_v52 = vsel %vm11130_vm0, %v2401_v43, 2147483647 }
 0x3eb   : > { %11535 = vst [vmem:[#allocation137_spill] sm:$0xff] %v7960_v48  ;;  %vm2385_vm2 = vcmp.eq.f32.partialorder %v7592_v14, %v7960_v48  ;;  %v2449_v50 = vshra.s32 %v7966_v52, 16 }
 0x3ec   : > { %v2417_v55 = vsel %vm2385_vm2, %v11404_v11, 64 }
 0x3ed   : > { %v7973_v16 = vsel %vm11130_vm0, %v2417_v55, 2147483647  ;;  %v7975_v33 = vcvt.s32.f32 %v2449_v50 }
 0x3ee   : > { %v2689_v42 = vshra.s32 %v7973_v16, 16 }
 0x3ef   : > { %11536 = vst [vmem:[#allocation138_spill] sm:$0xff] %v7975_v33  ;;  %2452 = vmin.xlane.f32.xlu0 %v7975_v33  ;;  %v2658_v33 = vand.u32 65535, %v7630_v1  ;;  %v11546_v1 = vld [vmem:[#allocation34_spill] sm:$0xff] }
 0x3f0   : > { %v7979_v39 = vcvt.s32.f32 %v2689_v42  ;;  %5483 = vrsqrt.f32 %v11546_v1 }
 0x3f2   : > { %11537 = vst [vmem:[#allocation139_spill] sm:$0xff] %v7979_v39  ;;  %2692 = vmin.xlane.f32.xlu1 %v7979_v39 }
 0x3fa   : > { %v7982_v43 = vpop.xlane.xlu0 %2273 }
 0x3fb   : > { %11538 = vst [vmem:[#allocation140_spill] sm:$0xff] %v7982_v43  ;;  %vm2368_vm3 = vcmp.eq.f32.partialorder %v7608_v9, %v7982_v43 }
 0x3fc   : > { %v2400_v55 = vsel %vm2368_vm3, %v11404_v11, 64 }
 0x3fd   : > { %v7984_v14 = vpop.xlane.xlu1 %2321  ;;  %v7992_v50 = vsel %vm11130_vm0, %v2400_v55, 2147483647  ;;  %v2660_v55 = vcvt.s32.f32 %v2658_v33 }
 0x3fe   : > { %11539 = vst [vmem:[#allocation141_spill] sm:$0xff] %v7984_v14  ;;  %vm2384_vm4 = vcmp.eq.f32.partialorder %v7618_v46, %v7984_v14  ;;  %11540 = vst [vmem:[#allocation142_spill] sm:$0xff] %v7992_v50  ;;  %v2434_v48 = vshra.s32 %v7992_v50, 16  ;;  %v2643_v14 = vand.u32 65535, %v7641_v29 }
 0x3ff   : > { %v2416_v42 = vsel %vm2384_vm4, %v11404_v11, 64 }
 0x400   : > { %v7997_v30 = vsel %vm11130_vm0, %v2416_v42, 2147483647  ;;  %v8001_v9 = vcvt.s32.f32 %v2434_v48  ;;  %v2645_v48 = vcvt.s32.f32 %v2643_v14 }
 0x401   : > { %11541 = vst [vmem:[#allocation143_spill] sm:$0xff] %v7997_v30  ;;  %v2674_v39 = vshra.s32 %v7997_v30, 16 }
 0x402   : > { %11542 = vst [vmem:[#allocation144_spill] sm:$0xff] %v8001_v9  ;;  %2437 = vmin.xlane.f32.xlu0 %v8001_v9 }
 0x403   : > { %v8003_v43 = vcvt.s32.f32 %v2674_v39  ;;  %v8006_v46 = vpop.xlane.xlu0 %2662  ;;  %v2628_v39 = vand.u32 65535, %v7653_v40 }
 0x404   : > { %11544 = vst [vmem:[#allocation146_spill] sm:$0xff] %v8006_v46  ;;  %vm2664_vm2 = vcmp.eq.f32.partialorder %v7636_v34, %v8006_v46 }
 0x405   : > { %11543 = vst [vmem:[#allocation145_spill] sm:$0xff] %v8003_v43  ;;  %2677 = vmin.xlane.f32.xlu1 %v8003_v43  ;;  %v2665_v42 = vsel %vm2664_vm2, %v2660_v55, inf  ;;  %v2630_v29 = vcvt.s32.f32 %v2628_v39  ;;  %v2613_v43 = vand.u32 65535, %v7665_v38  ;;  %v2598_v55 = vand.u32 65535, %v7677_v7  ;;  %v11551_v38 = vld [vmem:[#allocation39_spill] sm:$0xff]  ;;  %v5484_v7 = vpop.eup %5483  ;;  %v11553_v39 = vld [vmem:[#allocation42_spill] sm:$0xff] }
 0x406   : > { %2666 = vmin.xlane.f32.xlu0 %v2665_v42  ;;  %v11550_v42 = vld [vmem:[#allocation38_spill] sm:$0xff]  ;;  %vm1942_vm15 = vcmp.eq.f32.partialorder %v11551_v38, inf  ;;  %vm1935_vm14 = vcmp.eq.f32.partialorder %v11553_v39, inf }
 0x407   : > { %v8012_v30 = vpop.xlane.xlu0 %2647  ;;  %v2615_v40 = vcvt.s32.f32 %v2613_v43  ;;  %v2583_v43 = vand.u32 65535, %v7690_v37  ;;  %v11556_v37 = vld [vmem:[#allocation44_spill] sm:$0xff]  ;;  %vm1949_vm0 = vcmp.eq.f32.partialorder %v11550_v42, inf  ;;  %vm1951_vm1 = vcmp.eq.f32.partialorder %v11550_v42, 0.0 }
 0x408   : > { %11545 = vst [vmem:[#allocation147_spill] sm:$0xff] %v8012_v30  ;;  %vm2649_vm3 = vcmp.eq.f32.partialorder %v7648_v54, %v8012_v30  ;;  %v11549_v54 = vld [vmem:[#allocation36_spill] sm:$0xff] }
 0x409   : > { %v2650_v9 = vsel %vm2649_vm3, %v2645_v48, inf  ;;  %5485 = vrsqrt.f32 %v11549_v54 }
 0x40a   : > { %2651 = vmin.xlane.f32.xlu0 %v2650_v9  ;;  %5487 = vrsqrt.f32 %v11550_v42 }
 0x40b   : > { %v8018_v33 = vpop.xlane.xlu0 %2632  ;;  %5489 = vrsqrt.f32 %v11551_v38 }
 0x40c   : > { %11547 = vst [vmem:[#allocation34_spill] sm:$0xff] %v8018_v33  ;;  %vm2634_vm4 = vcmp.eq.f32.partialorder %v7660_v51, %v8018_v33  ;;  %v2600_v51 = vcvt.s32.f32 %v2598_v55  ;;  %5491 = vrsqrt.f32 %v11553_v39  ;;  %v2568_v55 = vand.u32 65535, %v7702_v21 }
 0x40d   : > { %v2635_v34 = vsel %vm2634_vm4, %v2630_v29, inf  ;;  %v11554_v29 = vld [vmem:[#allocation43_spill] sm:$0xff] }
 0x40e   : > { %2636 = vmin.xlane.f32.xlu0 %v2635_v34  ;;  %5493 = vrsqrt.f32 %v11554_v29  ;;  %v1962_v34 = vmul.f32 %v5484_v7, %v11546_v1  ;;  %v1966_v7 = vand.u32 2147483648, %v11546_v1 }
 0x40f   : > { %v8023_v14 = vpop.xlane.xlu0 %2617  ;;  %5495 = vrsqrt.f32 %v11556_v37 }
 0x410   : > { %11548 = vst [vmem:[#allocation148_spill] sm:$0xff] %v8023_v14  ;;  %vm2619_vm2 = vcmp.eq.f32.partialorder %v7672_v22, %v8023_v14  ;;  %v2553_v14 = vand.u32 65535, %v7713_v4 }
 0x411   : > { %v2620_v9 = vsel %vm2619_vm2, %v2615_v40, inf  ;;  %vm1963_vm2 = vcmp.eq.f32.partialorder %v11546_v1, inf }
 0x412   : > { %2621 = vmin.xlane.f32.xlu0 %v2620_v9  ;;  %v2585_v9 = vcvt.s32.f32 %v2583_v43  ;;  %v2570_v43 = vcvt.s32.f32 %v2568_v55  ;;  %v2555_v30 = vcvt.s32.f32 %v2553_v14  ;;  %v2538_v55 = vand.u32 65535, %v7725_v45  ;;  %v11560_v45 = vld [vmem:[#allocation46_spill] sm:$0xff] }
 0x413   : > { %v8031_v48 = vpop.xlane.xlu0 %2602  ;;  %v1959_v14 = vand.u32 2147483648, %v11549_v54 }
 0x414   : > { %11552 = vst [vmem:[#allocation36_spill] sm:$0xff] %v8031_v48  ;;  %vm2604_vm3 = vcmp.eq.f32.partialorder %v7683_v6, %v8031_v48  ;;  %v11557_v48 = vld [vmem:[#allocation45_spill] sm:$0xff] }
 0x415   : > { %v2605_v22 = vsel %vm2604_vm3, %v2600_v51, inf  ;;  %v1964_v51 = vsel %vm1963_vm2, %v11546_v1, %v1962_v34  ;;  %5497 = vrsqrt.f32 %v11557_v48  ;;  %vm1965_vm3 = vcmp.eq.f32.partialorder %v11546_v1, 0.0 }
 0x416   : > { %2606 = vmin.xlane.f32.xlu0 %v2605_v22  ;;  %5499 = vrsqrt.f32 %v11560_v45 }
 0x417   : > { %v8039_v40 = vpop.xlane.xlu0 %2587 }
 0x418   : > { %11555 = vst [vmem:[#allocation38_spill] sm:$0xff] %v8039_v40  ;;  %vm2589_vm4 = vcmp.eq.f32.partialorder %v7698_v35, %v8039_v40  ;;  %v5486_v35 = vpop.eup %5485 }
 0x419   : > { %v2590_v6 = vsel %vm2589_vm4, %v2585_v9, inf  ;;  %v5488_v21 = vpop.eup %5487  ;;  %v1967_v9 = vsel %vm1965_vm3, %v1966_v7, %v1964_v51  ;;  %v1955_v34 = vmul.f32 %v5486_v35, %v11549_v54  ;;  %vm1956_vm3 = vcmp.eq.f32.partialorder %v11549_v54, inf }
 0x41a   : > { %2591 = vmin.xlane.f32.xlu0 %v2590_v6  ;;  %v5490_v40 = vpop.eup %5489  ;;  %v1948_v4 = vmul.f32 %v5488_v21, %v11550_v42  ;;  %v8060_v50 = vadd.f32 1e-08, %v1967_v9  ;;  %v2523_v35 = vand.u32 65535, %v7735_v36  ;;  %v1952_v9 = vand.u32 2147483648, %v11550_v42 }
 0x41b   : > { %v8049_v22 = vpop.xlane.xlu0 %2572  ;;  %v5492_v46 = vpop.eup %5491  ;;  %v1941_v1 = vmul.f32 %v5490_v40, %v11551_v38  ;;  %v1957_v7 = vsel %vm1956_vm3, %v11549_v54, %v1955_v34  ;;  %vm1944_vm3 = vcmp.eq.f32.partialorder %v11551_v38, 0.0  ;;  %v1938_v36 = vand.u32 2147483648, %v11553_v39 }
 0x41c   : > { %11558 = vst [vmem:[#allocation39_spill] sm:$0xff] %v8049_v22  ;;  %vm2574_vm4 = vcmp.eq.f32.partialorder %v7710_v31, %v8049_v22  ;;  %v5494_v31 = vpop.eup %5493  ;;  %v1934_v40 = vmul.f32 %v5492_v46, %v11553_v39  ;;  %v11562_v46 = vld [vmem:[#allocation47_spill] sm:$0xff] }
 0x41d   : > { %v2575_v6 = vsel %vm2574_vm4, %v2570_v43, inf  ;;  %vm1958_vm4 = vcmp.eq.f32.partialorder %v11549_v54, 0.0  ;;  %v2540_v43 = vcvt.s32.f32 %v2538_v55  ;;  %v1927_v21 = vmul.f32 %v5494_v31, %v11554_v29 }
 0x41e   : > { %2576 = vmin.xlane.f32.xlu0 %v2575_v6  ;;  %v1943_v6 = vsel %vm1942_vm15, %v11551_v38, %v1941_v1  ;;  %v1945_v55 = vand.u32 2147483648, %v11551_v38  ;;  %5501 = vrsqrt.f32 %v11562_v46 }
 0x41f   : > { %v8056_v33 = vpop.xlane.xlu0 %2557 }
 0x420   : > { %11559 = vst [vmem:[#allocation42_spill] sm:$0xff] %v8056_v33  ;;  %vm2559_vm2 = vcmp.eq.f32.partialorder %v7722_v60, %v8056_v33  ;;  %v1946_v22 = vsel %vm1944_vm3, %v1945_v55, %v1943_v6  ;;  %vm1914_vm3 = vcmp.eq.f32.partialorder %v11557_v48, inf }
 0x421   : > { %v2560_v51 = vsel %vm2559_vm2, %v2555_v30, inf  ;;  %v1950_v30 = vsel %vm1949_vm0, %v11550_v42, %v1948_v4  ;;  %vm1928_vm0 = vcmp.eq.f32.partialorder %v11554_v29, inf  ;;  %v2898_v42 = vand.u32 65535, %v7758_v8 }
 0x422   : > { %2561 = vmin.xlane.f32.xlu0 %v2560_v51  ;;  %v5496_v51 = vpop.eup %5495  ;;  %v1953_v31 = vsel %vm1951_vm1, %v1952_v9, %v1950_v30  ;;  %v1929_v33 = vsel %vm1928_vm0, %v11554_v29, %v1927_v21  ;;  %vm1937_vm1 = vcmp.eq.f32.partialorder %v11553_v39, 0.0 }
 0x423   : > { %v8073_v60 = vpop.xlane.xlu0 %2542  ;;  %v5498_v4 = vpop.eup %5497  ;;  %v2093_v38 = vadd.f32 1e-08, %v1953_v31 }
 0x424   : > { %11561 = vst [vmem:[#allocation43_spill] sm:$0xff] %v8073_v60  ;;  %vm2544_vm2 = vcmp.eq.f32.partialorder %v7732_v53, %v8073_v60  ;;  %v1960_v53 = vsel %vm1958_vm4, %v1959_v14, %v1957_v7  ;;  %v1936_v60 = vsel %vm1935_vm14, %v11553_v39, %v1934_v40  ;;  %v2508_v14 = vand.u32 65535, %v7755_v25  ;;  %v11563_v25 = vld [vmem:[#allocation48_spill] sm:$0xff] }
 0x425   : > { %v2545_v34 = vsel %vm2544_vm2, %v2540_v43, inf  ;;  %v2525_v43 = vcvt.s32.f32 %v2523_v35  ;;  %v1931_v7 = vand.u32 2147483648, %v11554_v29  ;;  %v1913_v35 = vmul.f32 %v5498_v4, %v11557_v48 }
 0x426   : > { %2546 = vmin.xlane.f32.xlu0 %v2545_v34  ;;  %v1920_v34 = vmul.f32 %v5496_v51, %v11556_v37  ;;  %v2094_v30 = vadd.f32 1e-08, %v1960_v53  ;;  %vm1930_vm14 = vcmp.eq.f32.partialorder %v11554_v29, 0.0  ;;  %v2092_v40 = vadd.f32 1e-08, %v1946_v22 }
 0x427   : > { %v8093_v1 = vpop.xlane.xlu0 %2527  ;;  %vm1921_vm4 = vcmp.eq.f32.partialorder %v11556_v37, inf  ;;  %vm1923_vm2 = vcmp.eq.f32.partialorder %v11556_v37, 0.0  ;;  %5503 = vrsqrt.f32 %v11563_v25  ;;  %v1932_v8 = vsel %vm1930_vm14, %v1931_v7, %v1929_v33  ;;  %v5500_v33 = vpop.eup %5499 }
 0x428   : > { %vm2529_vm15 = vcmp.eq.f32.partialorder %v7741_v62, %v8093_v1  ;;  %v1939_v62 = vsel %vm1937_vm1, %v1938_v36, %v1936_v60  ;;  %v1922_v39 = vsel %vm1921_vm4, %v11556_v37, %v1920_v34  ;;  %v2510_v9 = vcvt.s32.f32 %v2508_v14 }
 0x429   : > { %v2530_v54 = vsel %vm2529_vm15, %v2525_v43, inf  ;;  %v2900_v29 = vcvt.s32.f32 %v2898_v42  ;;  %v1924_v22 = vand.u32 2147483648, %v11556_v37  ;;  %v1915_v60 = vsel %vm1914_vm3, %v11557_v48, %v1913_v35  ;;  %v11564_v35 = vld [vmem:[#allocation49_spill] sm:$0xff] }
 0x42a   : > { %2531 = vmin.xlane.f32.xlu0 %v2530_v54  ;;  %v1917_v51 = vand.u32 2147483648, %v11557_v48  ;;  %v2883_v4 = vand.u32 65535, %v7776_v61  ;;  %vm1916_vm1 = vcmp.eq.f32.partialorder %v11557_v48, 0.0  ;;  %5505 = vrcp.f32 %v8060_v50 }
 0x42b   : > { %v2091_v53 = vadd.f32 1e-08, %v1939_v62  ;;  %v1925_v31 = vsel %vm1923_vm2, %v1924_v22, %v1922_v39  ;;  %5507 = vrcp.f32 %v2094_v30  ;;  %v1906_v43 = vmul.f32 %v5500_v33, %v11560_v45  ;;  %v5502_v34 = vpop.eup %5501  ;;  %v11566_v22 = vld [vmem:[#allocation51_spill] sm:$0xff] }
 0x42c   : > { %v8113_v21 = vpop.xlane.xlu0 %2512  ;;  %5509 = vrcp.f32 %v2093_v38  ;;  %v2089_v54 = vadd.f32 1e-08, %v1925_v31  ;;  %v2885_v48 = vcvt.s32.f32 %v2883_v4  ;;  %v2868_v50 = vand.u32 65535, %v7781_v5 }
 0x42d   : > { %vm2514_vm0 = vcmp.eq.f32.partialorder %v7764_v63, %v8113_v21  ;;  %v2090_v63 = vadd.f32 1e-08, %v1932_v8  ;;  %5511 = vrcp.f32 %v2092_v40  ;;  %vm1907_vm4 = vcmp.eq.f32.partialorder %v11560_v45, inf }
 0x42e   : > { %v2515_v55 = vsel %vm2514_vm0, %v2510_v9, inf  ;;  %5513 = vrcp.f32 %v2091_v53  ;;  %v1908_v42 = vsel %vm1907_vm4, %v11560_v45, %v1906_v43  ;;  %v1899_v7 = vmul.f32 %v5502_v34, %v11562_v46  ;;  %v11565_v9 = vld [vmem:[#allocation50_spill] sm:$0xff]  ;;  %v11571_v53 = vld [vmem:[#allocation53_spill] sm:$0xff] }
 0x42f   : > { %v8115_v6 = vpop.xlane.xlu1 %2902  ;;  %2516 = vmin.xlane.f32.xlu0 %v2515_v55  ;;  %5515 = vrcp.f32 %v2090_v63  ;;  %v1910_v30 = vand.u32 2147483648, %v11560_v45  ;;  %v2870_v38 = vcvt.s32.f32 %v2868_v50  ;;  %vm1909_vm2 = vcmp.eq.f32.partialorder %v11560_v45, 0.0  ;;  %v11577_v50 = vld [vmem:[#allocation55_spill] sm:$0xff] }
 0x430   : > { %vm2904_vm15 = vcmp.eq.f32.partialorder %v7766_v28, %v8115_v6  ;;  %v1918_v28 = vsel %vm1916_vm1, %v1917_v51, %v1915_v60  ;;  %5517 = vrsqrt.f32 %v11564_v35  ;;  %vm1900_vm0 = vcmp.eq.f32.partialorder %v11562_v46, inf  ;;  %v11568_v51 = vld [vmem:[#allocation52_spill] sm:$0xff] }
 0x431   : > { %v2905_v36 = vsel %vm2904_vm15, %v2900_v29, inf  ;;  %v2088_v14 = vadd.f32 1e-08, %v1918_v28  ;;  %5519 = vrcp.f32 %v2089_v54  ;;  %v1911_v40 = vsel %vm1909_vm2, %v1910_v30, %v1908_v42 }
 0x432   : > { %2906 = vmin.xlane.f32.xlu1 %v2905_v36  ;;  %v2853_v8 = vand.u32 65535, %v7800_v10  ;;  %v1901_v39 = vsel %vm1900_vm0, %v11562_v46, %v1899_v7  ;;  %v1903_v29 = vand.u32 2147483648, %v11562_v46  ;;  %vm1902_vm15 = vcmp.eq.f32.partialorder %v11562_v46, 0.0 }
 0x433   : > { %v8130_v61 = vpop.xlane.xlu1 %2887  ;;  %5521 = vrcp.f32 %v2088_v14  ;;  %v2087_v45 = vadd.f32 1e-08, %v1911_v40  ;;  %v2493_v60 = vand.u32 65535, %v7813_v44  ;;  %v2838_v46 = vand.u32 65535, %v7819_v17  ;;  %v11573_v44 = vld [vmem:[#allocation54_spill] sm:$0xff]  ;;  %v11581_v40 = vld [vmem:[#allocation57_spill] sm:$0xff] }
 0x434   : > { %vm2889_vm14 = vcmp.eq.f32.partialorder %v7786_v12, %v8130_v61  ;;  %v5504_v12 = vpop.eup %5503  ;;  %5523 = vrsqrt.f32 %v11565_v9  ;;  %v1904_v10 = vsel %vm1902_vm15, %v1903_v29, %v1901_v39  ;;  %v2855_v36 = vcvt.s32.f32 %v2853_v8 }
 0x435   : > { %v2890_v37 = vsel %vm2889_vm14, %v2885_v48, inf  ;;  %5525 = vrsqrt.f32 %v11566_v22  ;;  %vm1893_vm14 = vcmp.eq.f32.partialorder %v11563_v25, inf  ;;  %v2086_v34 = vadd.f32 1e-08, %v1904_v10 }
 0x436   : > { %2891 = vmin.xlane.f32.xlu1 %v2890_v37  ;;  %5527 = vrsqrt.f32 %v11568_v51  ;;  %v2495_v48 = vcvt.s32.f32 %v2493_v60  ;;  %vm1895_vm4 = vcmp.eq.f32.partialorder %v11563_v25, 0.0  ;;  %v1896_v17 = vand.u32 2147483648, %v11563_v25  ;;  %v11579_v37 = vld [vmem:[#allocation56_spill] sm:$0xff] }
 0x437   : > { %v8140_v5 = vpop.xlane.xlu1 %2872  ;;  %v8154_v33 = vpop.eup %5505  ;;  %5529 = vrsqrt.f32 %v11571_v53  ;;  %v2840_v30 = vcvt.s32.f32 %v2838_v46  ;;  %v2808_v60 = vand.u32 65535, %v7847_v26  ;;  %vm2075_vm0 = vcmp.eq.f32.partialorder %v11564_v35, inf }
 0x438   : > { %vm2874_vm3 = vcmp.eq.f32.partialorder %v7789_v20, %v8140_v5  ;;  %v1892_v20 = vmul.f32 %v5504_v12, %v11563_v25  ;;  %11567 = vst [vmem:[#allocation44_spill] sm:$0xff] %v8154_v33  ;;  %v8159_v4 = vpop.eup %5507  ;;  %5531 = vrsqrt.f32 %v11573_v44  ;;  %v2078_v46 = vand.u32 2147483648, %v11564_v35 }
 0x439   : > { %v2875_v62 = vsel %vm2874_vm3, %v2870_v38, inf  ;;  %11570 = vst [vmem:[#allocation46_spill] sm:$0xff] %v8159_v4  ;;  %v8165_v31 = vpop.eup %5509  ;;  %5533 = vrcp.f32 %v2087_v45  ;;  %v2823_v38 = vand.u32 65535, %v7833_v49  ;;  %vm2033_vm13 = vcmp.eq.f32.partialorder %v11579_v37, inf }
 0x43a   : > { %2876 = vmin.xlane.f32.xlu1 %v2875_v62  ;;  %11572 = vst [vmem:[#allocation47_spill] sm:$0xff] %v8165_v31  ;;  %v8169_v28 = vpop.eup %5511  ;;  %v1894_v43 = vsel %vm1893_vm14, %v11563_v25, %v1892_v20  ;;  %5535 = vrsqrt.f32 %v11577_v50  ;;  %vm2068_vm14 = vcmp.eq.f32.partialorder %v11565_v9, inf  ;;  %vm2056_vm11 = vcmp.eq.f32.partialorder %v11568_v51, 0.0 }
 0x43b   : > { %v8157_v55 = vpop.xlane.xlu1 %2857  ;;  %11574 = vst [vmem:[#allocation48_spill] sm:$0xff] %v8169_v28  ;;  %5537 = vrsqrt.f32 %v11579_v37  ;;  %v1897_v62 = vsel %vm1895_vm4, %v1896_v17, %v1894_v43  ;;  %v2825_v45 = vcvt.s32.f32 %v2823_v38  ;;  %vm2061_vm4 = vcmp.eq.f32.partialorder %v11566_v22, inf }
 0x43c   : > { %11569 = vst [vmem:[#allocation45_spill] sm:$0xff] %v8157_v55  ;;  %vm2859_vm1 = vcmp.eq.f32.partialorder %v7810_v58, %v8157_v55  ;;  %v8174_v58 = vpop.eup %5513  ;;  %5539 = vrsqrt.f32 %v11581_v40  ;;  %v2085_v49 = vadd.f32 1e-08, %v1897_v62  ;;  %v11588_v62 = vld [vmem:[#allocation60_spill] sm:$0xff]  ;;  %vm1888_vm10 = vcmp.eq.f32.partialorder %v11571_v53, 0.0 }
 0x43d   : > { %v2860_v63 = vsel %vm2859_vm1, %v2855_v36, inf  ;;  %11576 = vst [vmem:[#allocation50_spill] sm:$0xff] %v8174_v58  ;;  %v8181_v14 = vpop.eup %5515  ;;  %vm2077_vm1 = vcmp.eq.f32.partialorder %v11564_v35, 0.0  ;;  %vm2012_vm9 = vcmp.eq.f32.partialorder %v11588_v62, inf  ;;  %v11601_v55 = vand.u32 2147483648, %v11566_v22 }
 0x43e   : > { %2861 = vmin.xlane.f32.xlu1 %v2860_v63  ;;  %11578 = vst [vmem:[#allocation51_spill] sm:$0xff] %v8181_v14  ;;  %v5518_v12 = vpop.eup %5517 }
 0x43f   : > { %v8172_v54 = vpop.xlane.xlu0 %2497  ;;  %v8184_v42 = vpop.xlane.xlu1 %2842  ;;  %v2074_v29 = vmul.f32 %v5518_v12, %v11564_v35 }
 0x440   : > { %11575 = vst [vmem:[#allocation49_spill] sm:$0xff] %v8172_v54  ;;  %vm2499_vm2 = vcmp.eq.f32.partialorder %v7825_v3, %v8172_v54  ;;  %11580 = vst [vmem:[#allocation52_spill] sm:$0xff] %v8184_v42  ;;  %vm2844_vm3 = vcmp.eq.f32.partialorder %v7830_v24, %v8184_v42  ;;  %v8190_v25 = vpop.eup %5519  ;;  %v11583_v3 = vld [vmem:[#allocation58_spill] sm:$0xff]  ;;  %v11586_v24 = vld [vmem:[#allocation59_spill] sm:$0xff] }
 0x441   : > { %v2500_v7 = vsel %vm2499_vm2, %v2495_v48, inf  ;;  %11582 = vst [vmem:[#allocation53_spill] sm:$0xff] %v8190_v25  ;;  %5541 = vrsqrt.f32 %v11583_v3  ;;  %v2845_v8 = vsel %vm2844_vm3, %v2840_v30, inf  ;;  %v8193_v39 = vpop.eup %5521  ;;  %vm2054_vm2 = vcmp.eq.f32.partialorder %v11568_v51, inf }
 0x442   : > { %2501 = vmin.xlane.f32.xlu0 %v2500_v7  ;;  %11584 = vst [vmem:[#allocation54_spill] sm:$0xff] %v8193_v39  ;;  %5543 = vrcp.f32 %v2086_v34  ;;  %2846 = vmin.xlane.f32.xlu1 %v2845_v8  ;;  %v5524_v10 = vpop.eup %5523  ;;  %v2076_v48 = vsel %vm2075_vm0, %v11564_v35, %v2074_v29  ;;  %v2810_v30 = vcvt.s32.f32 %v2808_v60  ;;  %v2793_v8 = vand.u32 65535, %v7860_v18  ;;  %v11591_v34 = vld [vmem:[#allocation62_spill] sm:$0xff] }
 0x443   : > { %v8196_v20 = vpop.xlane.xlu1 %2827  ;;  %5545 = vrsqrt.f32 %v11586_v24  ;;  %v5526_v36 = vpop.eup %5525  ;;  %v2067_v17 = vmul.f32 %v5524_v10, %v11565_v9  ;;  %v11589_v10 = vld [vmem:[#allocation61_spill] sm:$0xff]  ;;  %vm2047_vm0 = vcmp.eq.f32.partialorder %v11573_v44, inf  ;;  %v2079_v26 = vsel %vm2077_vm1, %v2078_v46, %v2076_v48 }
 0x444   : > { %11585 = vst [vmem:[#allocation55_spill] sm:$0xff] %v8196_v20  ;;  %vm2829_vm15 = vcmp.eq.f32.partialorder %v7841_v57, %v8196_v20  ;;  %v5528_v57 = vpop.eup %5527  ;;  %5547 = vrcp.f32 %v2085_v49  ;;  %v2060_v12 = vmul.f32 %v5526_v36, %v11566_v22  ;;  %v2478_v48 = vand.u32 65535, %v7885_v23 }
 0x445   : > { %v2830_v43 = vsel %vm2829_vm15, %v2825_v45, inf  ;;  %v5530_v38 = vpop.eup %5529  ;;  %5549 = vrsqrt.f32 %v11588_v62  ;;  %vm1886_vm15 = vcmp.eq.f32.partialorder %v11571_v53, inf  ;;  %v2053_v60 = vmul.f32 %v5528_v57, %v11568_v51 }
 0x446   : > { %2831 = vmin.xlane.f32.xlu1 %v2830_v43  ;;  %v5532_v45 = vpop.eup %5531  ;;  %5551 = vrsqrt.f32 %v11589_v10  ;;  %v1885_v29 = vmul.f32 %v5530_v38, %v11571_v53  ;;  %v8240_v36 = vsel %vm2061_vm4, %v11566_v22, %v2060_v12  ;;  %v2778_v12 = vand.u32 65535, %v7876_v27 }
 0x447   : > { %v8213_v7 = vpop.xlane.xlu1 %2812  ;;  %v8223_v43 = vpop.eup %5533  ;;  %5553 = vrsqrt.f32 %v11591_v34  ;;  %vm2063_vm4 = vcmp.eq.f32.partialorder %v11566_v22, 0.0  ;;  %vm2049_vm1 = vcmp.eq.f32.partialorder %v11573_v44, 0.0  ;;  %v2763_v23 = vand.u32 65535, %v7895_v32 }
 0x448   : > { %11587 = vst [vmem:[#allocation56_spill] sm:$0xff] %v8213_v7  ;;  %vm2814_vm3 = vcmp.eq.f32.partialorder %v7854_v2, %v8213_v7  ;;  %11590 = vst [vmem:[#allocation57_spill] sm:$0xff] %v8223_v43  ;;  %v5536_v18 = vpop.eup %5535  ;;  %v8232_v2 = vsel %vm2068_vm14, %v11565_v9, %v2067_v17  ;;  %v2795_v17 = vcvt.s32.f32 %v2793_v8  ;;  %vm2070_vm14 = vcmp.eq.f32.partialorder %v11565_v9, 0.0 }
 0x449   : > { %v2815_v49 = vsel %vm2814_vm3, %v2810_v30, inf  ;;  %vm2040_vm3 = vcmp.eq.f32.partialorder %v11577_v50, inf  ;;  %v11592_v30 = vld [vmem:[#allocation64_spill] sm:$0xff]  ;;  %v5538_v57 = vpop.eup %5537  ;;  %v2039_v8 = vmul.f32 %v5536_v18, %v11577_v50  ;;  %vm1998_vm8 = vcmp.eq.f32.partialorder %v11591_v34, inf }
 0x44a   : > { %2816 = vmin.xlane.f32.xlu1 %v2815_v49  ;;  %5555 = vrsqrt.f32 %v11592_v30  ;;  %v2046_v49 = vmul.f32 %v5532_v45, %v11573_v44  ;;  %v5540_v7 = vpop.eup %5539  ;;  %v8256_v45 = vsel %vm2054_vm2, %v11568_v51, %v2053_v60  ;;  %v2032_v27 = vmul.f32 %v5538_v57, %v11579_v37 }
 0x44b   : > { %v8244_v63 = vpop.xlane.xlu1 %2797  ;;  %vm2026_vm2 = vcmp.eq.f32.partialorder %v11581_v40, inf  ;;  %v2025_v46 = vmul.f32 %v5540_v7, %v11581_v40  ;;  %v8290_v7 = vsel %vm2040_vm3, %v11577_v50, %v2039_v8  ;;  %vm2042_vm3 = vcmp.eq.f32.partialorder %v11577_v50, 0.0 }
 0x44c   : > { %11593 = vst [vmem:[#allocation58_spill] sm:$0xff] %v8244_v63  ;;  %vm2799_vm12 = vcmp.eq.f32.partialorder %v7865_v56, %v8244_v63  ;;  %v8267_v56 = vsel %vm1886_vm15, %v11571_v53, %v1885_v29  ;;  %v8276_v35 = vsel %vm2047_vm0, %v11573_v44, %v2046_v49  ;;  %vm1879_vm15 = vcmp.eq.f32.partialorder %v11586_v24, inf }
 0x44d   : > { %v2800_v42 = vsel %vm2799_vm12, %v2795_v17, inf  ;;  %vm2019_vm12 = vcmp.eq.f32.partialorder %v11583_v3, inf  ;;  %v2780_v17 = vcvt.s32.f32 %v2778_v12  ;;  %v2480_v12 = vcvt.s32.f32 %v2478_v48 }
 0x44e   : > { %v5542_v20 = vpop.eup %5541  ;;  %2801 = vmin.xlane.f32.xlu1 %v2800_v42  ;;  %v11596_v42 = vld [vmem:[#allocation66_spill] sm:$0xff]  ;;  %v2111_v63 = vadd.f32 1e-08, %v2079_v26  ;;  %vm1991_vm7 = vcmp.eq.f32.partialorder %v11592_v30, inf  ;;  %v11599_v48 = vand.u32 2147483648, %v11565_v9  ;;  %v2765_v54 = vcvt.s32.f32 %v2763_v23 }
 0x44f   : > { %v8261_v38 = vpop.eup %5543  ;;  %v2018_v18 = vmul.f32 %v5542_v20, %v11583_v3  ;;  %v8285_v57 = vpop.xlane.xlu1 %2782  ;;  %v8299_v20 = vsel %vm2033_vm13, %v11579_v37, %v2032_v27  ;;  %5557 = vrsqrt.f32 %v11596_v42  ;;  %vm2005_vm13 = vcmp.eq.f32.partialorder %v11589_v10, inf }
 0x450   : > { %11594 = vst [vmem:[#allocation59_spill] sm:$0xff] %v8261_v38  ;;  %v5546_v29 = vpop.eup %5545  ;;  %11595 = vst [vmem:[#allocation60_spill] sm:$0xff] %v8285_v57  ;;  %vm2784_vm0 = vcmp.eq.f32.partialorder %v7882_v41, %v8285_v57  ;;  %v8310_v41 = vsel %vm2026_vm2, %v11581_v40, %v2025_v46  ;;  %v2748_v26 = vand.u32 65535, %v7905_v15  ;;  %v2065_v9 = vsel %vm2063_vm4, %v11601_v55, %v8240_v36 }
 0x451   : > { %v2785_v8 = vsel %vm2784_vm0, %v2780_v17, inf  ;;  %v8304_v60 = vpop.eup %5547  ;;  %v1878_v32 = vmul.f32 %v5546_v29, %v11586_v24  ;;  %vm2035_vm0 = vcmp.eq.f32.partialorder %v11579_v37, 0.0  ;;  %v8321_v57 = vsel %vm2019_vm12, %v11583_v3, %v2018_v18 }
 0x452   : > { %11597 = vst [vmem:[#allocation61_spill] sm:$0xff] %v8304_v60  ;;  %v8315_v49 = vpop.xlane.xlu0 %2482  ;;  %2786 = vmin.xlane.f32.xlu1 %v2785_v8  ;;  %v5550_v17 = vpop.eup %5549  ;;  %v2072_v8 = vsel %vm2070_vm14, %v11599_v48, %v8232_v2  ;;  %vm2028_vm12 = vcmp.eq.f32.partialorder %v11581_v40, 0.0  ;;  %v11602_v2 = vld [vmem:[#allocation127_spill] sm:$0xff]  ;;  %v11603_v48 = vand.u32 2147483648, %v11568_v51  ;;  %vm1881_vm4 = vcmp.eq.f32.partialorder %v11586_v24, 0.0 }
 0x453   : > { %11598 = vst [vmem:[#allocation62_spill] sm:$0xff] %v8315_v49  ;;  %vm2484_vm2 = vcmp.eq.f32.partialorder %v7897_v19, %v8315_v49  ;;  %v5552_v29 = vpop.eup %5551  ;;  %v8333_v27 = vpop.xlane.xlu1 %2767  ;;  %v11600_v49 = vld [vmem:[#allocation67_spill] sm:$0xff]  ;;  %v1880_v15 = vsel %vm1879_vm15, %v11586_v24, %v1878_v32  ;;  %v11605_v19 = vand.u32 2147483648, %v11573_v44  ;;  %vm2000_vm15 = vcmp.eq.f32.partialorder %v11591_v34, 0.0 }
 0x454   : > { %v2485_v18 = vsel %vm2484_vm2, %v2480_v12, inf  ;;  %v5554_v46 = vpop.eup %5553  ;;  %5559 = vrsqrt.f32 %v11600_v49  ;;  %vm2769_vm14 = vcmp.eq.f32.partialorder %v11602_v2, %v8333_v27  ;;  %vm2021_vm2 = vcmp.eq.f32.partialorder %v11583_v3, 0.0 }
 0x455   : > { %2486 = vmin.xlane.f32.xlu0 %v2485_v18  ;;  %v2011_v12 = vmul.f32 %v5550_v17, %v11588_v62  ;;  %v2058_v22 = vsel %vm2056_vm11, %v11603_v48, %v8256_v45  ;;  %v2770_v55 = vsel %vm2769_vm14, %v2765_v54, inf  ;;  %v2004_v36 = vmul.f32 %v5552_v29, %v11589_v10 }
 0x456   : > { %5561 = vrcp.f32 %v2111_v63  ;;  %v2110_v18 = vadd.f32 1e-08, %v2072_v8  ;;  %v11604_v2 = vand.u32 2147483648, %v11571_v53  ;;  %2771 = vmin.xlane.f32.xlu1 %v2770_v55  ;;  %v2109_v17 = vadd.f32 1e-08, %v2065_v9  ;;  %v11606_v8 = vld [vmem:[#allocation129_spill] sm:$0xff] }
 0x457   : > { %v5556_v23 = vpop.eup %5555  ;;  %v2051_v51 = vsel %vm2049_vm1, %v11605_v19, %v8276_v35  ;;  %v8368_v54 = vpop.xlane.xlu1 %2752  ;;  %v2750_v45 = vcvt.s32.f32 %v2748_v26  ;;  %v2733_v63 = vand.u32 65535, %v7917_v59  ;;  %vm2014_vm11 = vcmp.eq.f32.partialorder %v11588_v62, 0.0  ;;  %v11607_v35 = vld [vmem:[#allocation71_spill] sm:$0xff] }
 0x458   : > { %v1890_v32 = vsel %vm1888_vm10, %v11604_v2, %v8267_v56  ;;  %v1997_v29 = vmul.f32 %v5554_v46, %v11591_v34  ;;  %v1990_v53 = vmul.f32 %v5556_v23, %v11592_v30  ;;  %v2108_v56 = vadd.f32 1e-08, %v2058_v22 }
 0x459   : > { %vm2754_vm10 = vcmp.eq.f32.partialorder %v11606_v8, %v8368_v54  ;;  %v2013_v44 = vsel %vm2012_vm9, %v11588_v62, %v2011_v12  ;;  %vm2007_vm1 = vcmp.eq.f32.partialorder %v11589_v10, 0.0  ;;  %5563 = vrsqrt.f32 %v11607_v35 }
 0x45a   : > { %v2084_v26 = vadd.f32 1e-08, %v1890_v32  ;;  %v2755_v59 = vsel %vm2754_vm10, %v2750_v45, inf  ;;  %v2006_v46 = vsel %vm2005_vm13, %v11589_v10, %v2004_v36  ;;  %5565 = vrcp.f32 %v2110_v18  ;;  %v11610_v36 = vld [vmem:[#allocation131_spill] sm:$0xff] }
 0x45b   : > { %v2107_v19 = vadd.f32 1e-08, %v2051_v51  ;;  %v11608_v9 = vand.u32 2147483648, %v11577_v50  ;;  %2756 = vmin.xlane.f32.xlu1 %v2755_v59  ;;  %vm1872_vm9 = vcmp.eq.f32.partialorder %v11596_v42, inf  ;;  %5567 = vrcp.f32 %v2109_v17  ;;  %v8396_v22 = vpop.xlane.xlu1 %2737 }
 0x45c   : > { %v11609_v12 = vand.u32 2147483648, %v11579_v37  ;;  %v2735_v55 = vcvt.s32.f32 %v2733_v63  ;;  %v2718_v18 = vand.u32 65535, %v11610_v36  ;;  %v1999_v50 = vsel %vm1998_vm8, %v11591_v34, %v1997_v29  ;;  %v5558_v2 = vpop.eup %5557  ;;  %v11613_v29 = vld [vmem:[#allocation72_spill] sm:$0xff] }
 0x45d   : > { %v2044_v23 = vsel %vm2042_vm3, %v11608_v9, %v8290_v7  ;;  %v1992_v7 = vsel %vm1991_vm7, %v11592_v30, %v1990_v53  ;;  %5569 = vrcp.f32 %v2108_v56  ;;  %vm2739_vm3 = vcmp.eq.f32.partialorder %v7923_v47, %v8396_v22 }
 0x45e   : > { %v2037_v48 = vsel %vm2035_vm0, %v11609_v12, %v8299_v20  ;;  %vm1993_vm13 = vcmp.eq.f32.partialorder %v11592_v30, 0.0  ;;  %5571 = vrcp.f32 %v2084_v26  ;;  %v2106_v37 = vadd.f32 1e-08, %v2044_v23 }
 0x45f   : > { %v11611_v20 = vand.u32 2147483648, %v11581_v40  ;;  %v2740_v17 = vsel %vm2739_vm3, %v2735_v55, inf  ;;  %5573 = vrcp.f32 %v2107_v19  ;;  %v2105_v51 = vadd.f32 1e-08, %v2037_v48 }
 0x460   : > { %v11612_v45 = vand.u32 2147483648, %v11583_v3  ;;  %2741 = vmin.xlane.f32.xlu1 %v2740_v17  ;;  %v2463_v63 = vand.u32 65535, %v7943_v0  ;;  %5575 = vrsqrt.f32 %v11613_v29  ;;  %v11614_v53 = vand.u32 2147483648, %v11586_v24  ;;  %v11615_v3 = vld [vmem:[#allocation102_spill] sm:$0xff]  ;;  %v11625_v17 = vld [vmem:[#allocation135_spill] sm:$0xff] }
 0x461   : > { %v2030_v32 = vsel %vm2028_vm12, %v11611_v20, %v8310_v41  ;;  %v8424_v41 = vpop.xlane.xlu1 %2722  ;;  %v2720_v56 = vcvt.s32.f32 %v2718_v18  ;;  %v2703_v8 = vand.u32 65535, %v7948_v13  ;;  %v1871_v26 = vmul.f32 %v5558_v2, %v11596_v42  ;;  %v5560_v0 = vpop.eup %5559  ;;  %v11623_v2 = vld [vmem:[#allocation134_spill] sm:$0xff] }
 0x462   : > { %v2023_v47 = vsel %vm2021_vm2, %v11612_v45, %v8321_v57  ;;  %v1883_v40 = vsel %vm1881_vm4, %v11614_v53, %v1880_v15  ;;  %v2104_v59 = vadd.f32 1e-08, %v2030_v32  ;;  %5577 = vrsqrt.f32 %v11615_v3  ;;  %v11616_v57 = vld [vmem:[#allocation133_spill] sm:$0xff] }
 0x463   : > { %vm2724_vm7 = vcmp.eq.f32.partialorder %v11616_v57, %v8424_v41  ;;  %5579 = vrcp.f32 %v2106_v37  ;;  %v2103_v19 = vadd.f32 1e-08, %v2023_v47  ;;  %v11617_v9 = vand.u32 2147483648, %v11588_v62  ;;  %v8441_v36 = vpop.eup %5561 }
 0x464   : > { %v2725_v15 = vsel %vm2724_vm7, %v2720_v56, inf  ;;  %5581 = vrcp.f32 %v2105_v51  ;;  %v2083_v23 = vadd.f32 1e-08, %v1883_v40  ;;  %v11618_v13 = vand.u32 2147483648, %v11589_v10  ;;  %11620 = vst [vmem:[#allocation66_spill] sm:$0xff] %v8441_v36 }
 0x465   : > { %v2016_v24 = vsel %vm2014_vm11, %v11617_v9, %v2013_v44  ;;  %2726 = vmin.xlane.f32.xlu1 %v2725_v15  ;;  %v8439_v48 = vpop.xlane.xlu0 %2467  ;;  %v2465_v55 = vcvt.s32.f32 %v2463_v63  ;;  %v11621_v18 = vand.u32 2147483648, %v11591_v34  ;;  %v11622_v44 = vld [vmem:[#allocation103_spill] sm:$0xff]  ;;  %v2705_v10 = vcvt.s32.f32 %v2703_v8 }
 0x466   : > { %v2009_v12 = vsel %vm2007_vm1, %v11618_v13, %v2006_v46  ;;  %11619 = vst [vmem:[#allocation64_spill] sm:$0xff] %v8439_v48  ;;  %5583 = vrsqrt.f32 %v11622_v44  ;;  %vm2469_vm8 = vcmp.eq.f32.partialorder %v11623_v2, %v8439_v48  ;;  %v1873_v46 = vsel %vm1872_vm9, %v11596_v42, %v1871_v26  ;;  %v5564_v45 = vpop.eup %5563  ;;  %v11633_v13 = vld [vmem:[#allocation105_spill] sm:$0xff] }
 0x467   : > { %v2002_v62 = vsel %vm2000_vm15, %v11621_v18, %v1999_v50  ;;  %v1983_v20 = vmul.f32 %v5560_v0, %v11600_v49  ;;  %v2470_v32 = vsel %vm2469_vm8, %v2465_v55, inf  ;;  %v1875_v34 = vand.u32 2147483648, %v11596_v42  ;;  %v8464_v40 = vpop.eup %5565 }
 0x468   : > { %v8450_v37 = vpop.xlane.xlu1 %2707  ;;  %5585 = vrcp.f32 %v2104_v59  ;;  %v2102_v50 = vadd.f32 1e-08, %v2016_v24  ;;  %2471 = vmin.xlane.f32.xlu0 %v2470_v32  ;;  %vm1874_vm12 = vcmp.eq.f32.partialorder %v11596_v42, 0.0  ;;  %v2101_v47 = vadd.f32 1e-08, %v2009_v12  ;;  %11627 = vst [vmem:[#allocation127_spill] sm:$0xff] %v8464_v40  ;;  %v8467_v26 = vpop.eup %5567 }
 0x469   : > { %11624 = vst [vmem:[#allocation67_spill] sm:$0xff] %v8450_v37  ;;  %vm2709_vm0 = vcmp.eq.f32.partialorder %v11625_v17, %v8450_v37  ;;  %5587 = vrcp.f32 %v2103_v19  ;;  %v11626_v63 = vand.u32 2147483648, %v11592_v30  ;;  %vm1984_vm14 = vcmp.eq.f32.partialorder %v11600_v49, inf  ;;  %11628 = vst [vmem:[#allocation129_spill] sm:$0xff] %v8467_v26  ;;  %v11629_v42 = vld [vmem:[#allocation104_spill] sm:$0xff]  ;;  %v11703_v37 = vld [vmem:[#allocation145_spill] sm:$0xff] }
 0x46a   : > { %v2710_v51 = vsel %vm2709_vm0, %v2705_v10, inf  ;;  %5589 = vrcp.f32 %v2083_v23  ;;  %v2100_v56 = vadd.f32 1e-08, %v2002_v62  ;;  %v1876_v8 = vsel %vm1874_vm12, %v1875_v34, %v1873_v46  ;;  %v8471_v57 = vpop.eup %5569 }
 0x46b   : > { %v1995_v53 = vsel %vm1993_vm13, %v11626_v63, %v1992_v7  ;;  %2711 = vmin.xlane.f32.xlu1 %v2710_v51  ;;  %v1985_v59 = vsel %vm1984_vm14, %v11600_v49, %v1983_v20  ;;  %5591 = vrsqrt.f32 %v11629_v42  ;;  %11630 = vst [vmem:[#allocation71_spill] sm:$0xff] %v8471_v57  ;;  %v1987_v0 = vand.u32 2147483648, %v11600_v49  ;;  %v8475_v19 = vpop.eup %5571  ;;  %v11636_v20 = vld [vmem:[#allocation106_spill] sm:$0xff] }
 0x46c   : > { %v1864_v30 = vmul.f32 %v5564_v45, %v11607_v35  ;;  %5593 = vrcp.f32 %v2102_v50  ;;  %v2099_v7 = vadd.f32 1e-08, %v1995_v53  ;;  %11631 = vst [vmem:[#allocation131_spill] sm:$0xff] %v8475_v19  ;;  %vm1986_vm2 = vcmp.eq.f32.partialorder %v11600_v49, 0.0  ;;  %v8478_v24 = vpop.eup %5573  ;;  %v11638_v45 = vld [vmem:[#allocation107_spill] sm:$0xff] }
 0x46d   : > { %5595 = vrcp.f32 %v2101_v47  ;;  %v2082_v9 = vadd.f32 1e-08, %v1876_v8  ;;  %11632 = vst [vmem:[#allocation72_spill] sm:$0xff] %v8478_v24  ;;  %v1988_v15 = vsel %vm1986_vm2, %v1987_v0, %v1985_v59  ;;  %v5576_v23 = vpop.eup %5575  ;;  %vm1865_vm4 = vcmp.eq.f32.partialorder %v11607_v35, inf }
 0x46e   : > { %5597 = vrcp.f32 %v2100_v56  ;;  %v2448_v12 = vand.u32 65535, %v7966_v52  ;;  %v1866_v18 = vsel %vm1865_vm4, %v11607_v35, %v1864_v30  ;;  %v1868_v49 = vand.u32 2147483648, %v11607_v35  ;;  %v11644_v30 = vld [vmem:[#allocation139_spill] sm:$0xff] }
 0x46f   : > { %5599 = vrsqrt.f32 %v11633_v13  ;;  %v5578_v55 = vpop.eup %5577  ;;  %v2098_v2 = vadd.f32 1e-08, %v1988_v15  ;;  %v2688_v10 = vand.u32 65535, %v7973_v16  ;;  %vm1867_vm11 = vcmp.eq.f32.partialorder %v11607_v35, 0.0  ;;  %v11639_v16 = vld [vmem:[#allocation138_spill] sm:$0xff]  ;;  %v11646_v15 = vld [vmem:[#allocation77_spill] sm:$0xff] }
 0x470   : > { %5601 = vrcp.f32 %v2099_v7  ;;  %v8484_v62 = vpop.eup %5579  ;;  %v1976_v52 = vmul.f32 %v5576_v23, %v11613_v29  ;;  %v1869_v17 = vsel %vm1867_vm11, %v1868_v49, %v1866_v18  ;;  %v3050_v34 = vmul.f32 %v5578_v55, %v11615_v3 }
 0x471   : > { %11634 = vst [vmem:[#allocation102_spill] sm:$0xff] %v8484_v62  ;;  %5603 = vrcp.f32 %v2082_v9  ;;  %v8488_v46 = vpop.eup %5581  ;;  %v2450_v51 = vcvt.s32.f32 %v2448_v12  ;;  %vm1977_vm10 = vcmp.eq.f32.partialorder %v11613_v29, inf  ;;  %v2690_v56 = vcvt.s32.f32 %v2688_v10 }
 0x472   : > { %11635 = vst [vmem:[#allocation133_spill] sm:$0xff] %v8488_v46  ;;  %5605 = vrsqrt.f32 %v11636_v20  ;;  %v8507_v59 = vadd.f32 1e-08, %v1869_v17  ;;  %vm3051_vm15 = vcmp.eq.f32.partialorder %v11615_v3, inf  ;;  %v8518_v9 = vsel %vm1977_vm10, %v11613_v29, %v1976_v52 }
 0x473   : > { %v5584_v32 = vpop.eup %5583  ;;  %5607 = vrsqrt.f32 %v11638_v45  ;;  %v3052_v23 = vsel %vm3051_vm15, %v11615_v3, %v3050_v34  ;;  %v8526_v49 = vsel %vm1839_vm5, %v8154_v33, 0.0  ;;  %v8532_v10 = vsel %vm1838_vm6, %v8159_v4, 0.0 }
 0x474   : > { %5609 = vrcp.f32 %v2098_v2  ;;  %11643 = vst [vmem:[#allocation105_spill] sm:$0xff] %v8507_v59  ;;  %v3043_v0 = vmul.f32 %v5584_v32, %v11622_v44  ;;  %v11649_v32 = vld [vmem:[#allocation70_spill] sm:$0xff]  ;;  %v3054_v17 = vand.u32 2147483648, %v11615_v3  ;;  %vm3053_vm13 = vcmp.eq.f32.partialorder %v11615_v3, 0.0  ;;  %v11661_v3 = vld [vmem:[#allocation7_spill] sm:$0xff] }
 0x475   : > { %v8500_v47 = vpop.eup %5585  ;;  %5611 = vrsqrt.f32 %v11646_v15  ;;  %vm11650_vm3 = vcmp.eq.s32.totalorder %v11404_v11, %v11649_v32  ;;  %vm3044_vm7 = vcmp.eq.f32.partialorder %v11622_v44, inf  ;;  %vm11662_vm0 = vcmp.eq.s32.totalorder %v11404_v11, %v11661_v3  ;;  %v11667_v3 = vld [vmem:[#allocation13_spill] sm:$0xff] }
 0x476   : > { %11640 = vst [vmem:[#allocation134_spill] sm:$0xff] %v8500_v47  ;;  %v8505_v8 = vpop.eup %5587  ;;  %v8538_v52 = vsel %vm11650_vm3, %v8165_v31, 0.0  ;;  %v3055_v2 = vsel %vm3053_vm13, %v3054_v17, %v3052_v23  ;;  %v3045_v32 = vsel %vm3044_vm7, %v11622_v44, %v3043_v0  ;;  %v8573_v35 = vsel %vm11662_vm0, %v8190_v25, 0.0 }
 0x477   : > { %11642 = vst [vmem:[#allocation104_spill] sm:$0xff] %v8505_v8  ;;  %v8513_v7 = vpop.eup %5589  ;;  %v3047_v23 = vand.u32 2147483648, %v11622_v44  ;;  %vm11668_vm2 = vcmp.eq.s32.totalorder %v11404_v11, %v11667_v3  ;;  %vm3046_vm11 = vcmp.eq.f32.partialorder %v11622_v44, 0.0  ;;  %v11674_v3 = vld [vmem:[#allocation82_spill] sm:$0xff]  ;;  %v3183_v31 = vadd.f32 1e-08, %v3055_v2 }
 0x478   : > { %v8494_v50 = vpop.xlane.xlu0 %2452  ;;  %11645 = vst [vmem:[#allocation106_spill] sm:$0xff] %v8513_v7  ;;  %v5592_v55 = vpop.eup %5591  ;;  %v8593_v25 = vsel %vm11668_vm2, %v8261_v38, 0.0  ;;  %v11677_v44 = vld [vmem:[#allocation83_spill] sm:$0xff]  ;;  %vm3037_vm3 = vcmp.eq.f32.partialorder %v11629_v42, inf  ;;  %vm3039_vm0 = vcmp.eq.f32.partialorder %v11629_v42, 0.0  ;;  %vm3023_vm2 = vcmp.eq.f32.partialorder %v11636_v20, inf }
 0x479   : > { %11637 = vst [vmem:[#allocation103_spill] sm:$0xff] %v8494_v50  ;;  %vm2454_vm1 = vcmp.eq.f32.partialorder %v11639_v16, %v8494_v50  ;;  %v8541_v34 = vpop.eup %5593  ;;  %v3036_v0 = vmul.f32 %v5592_v55, %v11629_v42  ;;  %vm11678_vm15 = vcmp.eq.s32.totalorder %v11404_v11, %v11677_v44  ;;  %v11684_v44 = vld [vmem:[#allocation86_spill] sm:$0xff] }
 0x47a   : > { %v2455_v63 = vsel %vm2454_vm1, %v2450_v51, inf  ;;  %11651 = vst [vmem:[#allocation107_spill] sm:$0xff] %v8541_v34  ;;  %v11652_v51 = vld [vmem:[#allocation74_spill] sm:$0xff]  ;;  %vm11675_vm1 = vcmp.eq.s32.totalorder %v11404_v11, %v11674_v3  ;;  %v8622_v4 = vsel %vm11678_vm15, %v8467_v26, 0.0  ;;  %v11681_v3 = vld [vmem:[#allocation109_spill] sm:$0xff] }
 0x47b   : > { %v8503_v53 = vpop.xlane.xlu1 %2692  ;;  %2456 = vmin.xlane.f32.xlu0 %v2455_v63  ;;  %vm11653_vm5 = vcmp.eq.s32.totalorder %v11404_v11, %v11652_v51  ;;  %v11654_v63 = vld [vmem:[#allocation76_spill] sm:$0xff]  ;;  %v8614_v38 = vsel %vm11675_vm1, %v8464_v40, 0.0  ;;  %v11686_v40 = vld [vmem:[#allocation87_spill] sm:$0xff] }
 0x47c   : > { %11641 = vst [vmem:[#allocation135_spill] sm:$0xff] %v8503_v53  ;;  %vm2694_vm9 = vcmp.eq.f32.partialorder %v11644_v30, %v8503_v53  ;;  %v8547_v16 = vsel %vm11653_vm5, %v8169_v28, 0.0  ;;  %vm11655_vm6 = vcmp.eq.s32.totalorder %v11404_v11, %v11654_v63  ;;  %v8557_v30 = vpop.eup %5595  ;;  %v11659_v51 = vld [vmem:[#allocation108_spill] sm:$0xff]  ;;  %vm11687_vm13 = vcmp.eq.s32.totalorder %v11404_v11, %v11686_v40 }
 0x47d   : > { %v2695_v12 = vsel %vm2694_vm9, %v2690_v56, inf  ;;  %v8553_v56 = vsel %vm11655_vm6, %v8174_v58, 0.0  ;;  %11656 = vst [vmem:[#allocation138_spill] sm:$0xff] %v8557_v30  ;;  %5613 = vrsqrt.f32 %v11659_v51  ;;  %v8567_v63 = vpop.eup %5597  ;;  %v11663_v58 = vld [vmem:[#allocation9_spill] sm:$0xff]  ;;  %vm11685_vm6 = vcmp.eq.s32.totalorder %v11404_v11, %v11684_v44 }
 0x47e   : > { %2696 = vmin.xlane.f32.xlu1 %v2695_v12  ;;  %v11657_v12 = vld [vmem:[#allocation5_spill] sm:$0xff]  ;;  %11660 = vst [vmem:[#allocation139_spill] sm:$0xff] %v8567_v63  ;;  %vm11664_vm12 = vcmp.eq.s32.totalorder %v11404_v11, %v11663_v58  ;;  %v5600_v17 = vpop.eup %5599  ;;  %v11669_v58 = vld [vmem:[#allocation80_spill] sm:$0xff]  ;;  %5615 = vrsqrt.f32 %v11681_v3  ;;  %v8642_v26 = vsel %vm11685_vm6, %v8478_v24, 0.0  ;;  %v8650_v33 = vsel %vm11687_vm13, %v8484_v62, 0.0  ;;  %v11694_v62 = vld [vmem:[#allocation142_spill] sm:$0xff] }
 0x47f   : > { %vm11658_vm8 = vcmp.eq.s32.totalorder %v11404_v11, %v11657_v12  ;;  %v8579_v12 = vsel %vm11664_vm12, %v8193_v39, 0.0  ;;  %vm11670_vm4 = vcmp.eq.s32.totalorder %v11404_v11, %v11669_v58  ;;  %v8602_v55 = vpop.eup %5601  ;;  %v3048_v58 = vsel %vm3046_vm11, %v3047_v23, %v3045_v32  ;;  %v11682_v32 = vld [vmem:[#allocation85_spill] sm:$0xff] }
 0x480   : > { %v8563_v18 = vsel %vm11658_vm8, %v8181_v14, 0.0  ;;  %v11665_v14 = vld [vmem:[#allocation11_spill] sm:$0xff]  ;;  %v8599_v39 = vsel %vm11670_vm4, %v8304_v60, 0.0  ;;  %11671 = vst [vmem:[#allocation63_spill] sm:$0xff] %v8602_v55  ;;  %v8616_v60 = vpop.eup %5603  ;;  %vm11683_vm5 = vcmp.eq.s32.totalorder %v11404_v11, %v11682_v32  ;;  %v11688_v32 = vld [vmem:[#allocation88_spill] sm:$0xff]  ;;  %v3040_v44 = vand.u32 2147483648, %v11629_v42 }
 0x481   : > { %vm11666_vm14 = vcmp.eq.s32.totalorder %v11404_v11, %v11665_v14  ;;  %v11672_v14 = vld [vmem:[#allocation81_spill] sm:$0xff]  ;;  %11676 = vst [vmem:[#allocation68_spill] sm:$0xff] %v8616_v60  ;;  %v5606_v2 = vpop.eup %5605  ;;  %v8636_v23 = vsel %vm11683_vm5, %v8475_v19, 0.0  ;;  %vm11689_vm7 = vcmp.eq.s32.totalorder %v11404_v11, %v11688_v32  ;;  %v3182_v53 = vadd.f32 1e-08, %v3048_v58  ;;  %v11693_v58 = vld [vmem:[#allocation110_spill] sm:$0xff] }
 0x482   : > { %v8587_v28 = vsel %vm11666_vm14, %v8223_v43, 0.0  ;;  %vm11673_vm10 = vcmp.eq.s32.totalorder %v11404_v11, %v11672_v14  ;;  %v11679_v14 = vld [vmem:[#allocation84_spill] sm:$0xff]  ;;  %v8656_v19 = vsel %vm11689_vm7, %v8488_v46, 0.0  ;;  %v5608_v24 = vpop.eup %5607  ;;  %5617 = vrcp.f32 %v3183_v31  ;;  %v11695_v31 = vld [vmem:[#allocation143_spill] sm:$0xff]  ;;  %v11700_v60 = vld [vmem:[#allocation146_spill] sm:$0xff] }
 0x483   : > { %v8608_v43 = vsel %vm11673_vm10, %v8441_v36, 0.0  ;;  %vm11680_vm9 = vcmp.eq.s32.totalorder %v11404_v11, %v11679_v14  ;;  %v3038_v14 = vsel %vm3037_vm3, %v11629_v42, %v3036_v0  ;;  %v11690_v0 = vld [vmem:[#allocation89_spill] sm:$0xff]  ;;  %vm3030_vm12 = vcmp.eq.f32.partialorder %v11633_v13, inf  ;;  %v8667_v40 = vpop.eup %5609 }
 0x484   : > { %v8628_v36 = vsel %vm11680_vm9, %v8471_v57, 0.0  ;;  %v3029_v57 = vmul.f32 %v5600_v17, %v11633_v13  ;;  %vm11691_vm8 = vcmp.eq.s32.totalorder %v11404_v11, %v11690_v0  ;;  %11692 = vst [vmem:[#allocation70_spill] sm:$0xff] %v8667_v40  ;;  %v3041_v32 = vsel %vm3039_vm0, %v3040_v44, %v3038_v14  ;;  %v8676_v42 = vpop.eup %5611 }
 0x485   : > { %v8663_v17 = vsel %vm11691_vm8, %v8500_v47, 0.0  ;;  %v3022_v46 = vmul.f32 %v5606_v2, %v11636_v20  ;;  %5619 = vrsqrt.f32 %v11693_v58  ;;  %v2433_v50 = vand.u32 65535, %v11694_v62  ;;  %11696 = vst [vmem:[#allocation74_spill] sm:$0xff] %v8676_v42 }
 0x486   : > { %v3031_v15 = vsel %vm3030_vm12, %v11633_v13, %v3029_v57  ;;  %vm3032_vm14 = vcmp.eq.f32.partialorder %v11633_v13, 0.0  ;;  %v3033_v0 = vand.u32 2147483648, %v11633_v13  ;;  %v2673_v47 = vand.u32 65535, %v11695_v31  ;;  %v11697_v57 = vld [vmem:[#allocation111_spill] sm:$0xff]  ;;  %v11698_v31 = vld [vmem:[#allocation112_spill] sm:$0xff] }
 0x487   : > { %5621 = vrcp.f32 %v3182_v53  ;;  %vm3025_vm4 = vcmp.eq.f32.partialorder %v11636_v20, 0.0  ;;  %v3015_v2 = vmul.f32 %v5608_v24, %v11638_v45  ;;  %v3181_v14 = vadd.f32 1e-08, %v3041_v32  ;;  %v11701_v32 = vld [vmem:[#allocation144_spill] sm:$0xff] }
 0x488   : > { %v3026_v62 = vand.u32 2147483648, %v11636_v20  ;;  %vm3016_vm11 = vcmp.eq.f32.partialorder %v11638_v45, inf  ;;  %5623 = vrsqrt.f32 %v11697_v57  ;;  %v3034_v44 = vsel %vm3032_vm14, %v3033_v0, %v3031_v15 }
 0x489   : > { %v3024_v13 = vsel %vm3023_vm2, %v11636_v20, %v3022_v46  ;;  %5625 = vrsqrt.f32 %v11698_v31  ;;  %v2435_v53 = vcvt.s32.f32 %v2433_v50  ;;  %vm3018_vm10 = vcmp.eq.f32.partialorder %v11638_v45, 0.0 }
 0x48a   : > { %v5614_v40 = vpop.eup %5613  ;;  %v2669_v24 = vcvt.f32.s32 %v11700_v60  ;;  %v2675_v55 = vcvt.s32.f32 %v2673_v47  ;;  %v3017_v15 = vsel %vm3016_vm11, %v11638_v45, %v3015_v2  ;;  %v3019_v46 = vand.u32 2147483648, %v11638_v45  ;;  %v11704_v47 = vld [vmem:[#allocation113_spill] sm:$0xff] }
 0x48b   : > { %v8686_v42 = vpop.xlane.xlu0 %2437  ;;  %5627 = vrcp.f32 %v3181_v14  ;;  %v3180_v50 = vadd.f32 1e-08, %v3034_v44  ;;  %v3027_v48 = vsel %vm3025_vm4, %v3026_v62, %v3024_v13  ;;  %vm3009_vm9 = vcmp.eq.f32.partialorder %v11659_v51, inf  ;;  %v11705_v44 = vld [vmem:[#allocation147_spill] sm:$0xff] }
 0x48c   : > { %11699 = vst [vmem:[#allocation76_spill] sm:$0xff] %v8686_v42  ;;  %vm2439_vm1 = vcmp.eq.f32.partialorder %v11701_v32, %v8686_v42  ;;  %v3008_v32 = vmul.f32 %v5614_v40, %v11659_v51  ;;  %vm3011_vm3 = vcmp.eq.f32.partialorder %v11659_v51, 0.0  ;;  %5629 = vrsqrt.f32 %v11704_v47 }
 0x48d   : > { %v2440_v0 = vsel %vm2439_vm1, %v2435_v53, inf  ;;  %v5616_v53 = vpop.eup %5615  ;;  %v2670_v14 = vshll.u32 %v2669_v24, 16  ;;  %v2654_v20 = vcvt.f32.s32 %v11705_v44  ;;  %v3179_v13 = vadd.f32 1e-08, %v3027_v48 }
 0x48e   : > { %v8692_v59 = vpop.xlane.xlu1 %2677  ;;  %2441 = vmin.xlane.f32.xlu0 %v2440_v0  ;;  %vm3002_vm5 = vcmp.eq.f32.partialorder %v11681_v3, inf  ;;  %vm3004_vm6 = vcmp.eq.f32.partialorder %v11681_v3, 0.0  ;;  %5631 = vrcp.f32 %v3180_v50  ;;  %v3005_v40 = vand.u32 2147483648, %v11681_v3  ;;  %v11708_v50 = vld [vmem:[#allocation34_spill] sm:$0xff] }
 0x48f   : > { %11702 = vst [vmem:[#allocation5_spill] sm:$0xff] %v8692_v59  ;;  %vm2679_vm15 = vcmp.eq.f32.partialorder %v11703_v37, %v8692_v59  ;;  %v2667_v2 = vpop.xlane.xlu0 %2666  ;;  %v3020_v37 = vsel %vm3018_vm10, %v3019_v46, %v3017_v15  ;;  %vm2995_vm13 = vcmp.eq.f32.partialorder %v11693_v58, inf  ;;  %v3010_v24 = vsel %vm3009_vm9, %v11659_v51, %v3008_v32  ;;  %v11707_v15 = vld [vmem:[#allocation114_spill] sm:$0xff] }
 0x490   : > { %v2680_v60 = vsel %vm2679_vm15, %v2675_v55, inf  ;;  %v2668_v62 = vcvt.f32.s32 %v2667_v2  ;;  %v3012_v55 = vand.u32 2147483648, %v11659_v51  ;;  %v3178_v45 = vadd.f32 1e-08, %v3020_v37 }
 0x491   : > { %2681 = vmin.xlane.f32.xlu1 %v2680_v60  ;;  %v8712_v60 = vpop.eup %5617  ;;  %v3001_v48 = vmul.f32 %v5616_v53, %v11681_v3  ;;  %5633 = vrsqrt.f32 %v11707_v15  ;;  %v2655_v44 = vshll.u32 %v2654_v20, 16  ;;  %v2639_v59 = vcvt.f32.s32 %v11708_v50 }
 0x492   : > { %v2671_v0 = vadd.s32 %v2670_v14, %v2668_v62  ;;  %11706 = vst [vmem:[#allocation108_spill] sm:$0xff] %v8712_v60  ;;  %v5620_v2 = vpop.eup %5619  ;;  %5635 = vrcp.f32 %v3179_v13  ;;  %vm2997_vm8 = vcmp.eq.f32.partialorder %v11693_v58, 0.0  ;;  %v2998_v37 = vand.u32 2147483648, %v11693_v58  ;;  %v11709_v14 = vld [vmem:[#allocation65_spill] sm:$0xff] }
 0x493   : > { %v2652_v46 = vpop.xlane.xlu0 %2651  ;;  %v3013_v20 = vsel %vm3011_vm3, %v3012_v55, %v3010_v24  ;;  %vm2988_vm0 = vcmp.eq.f32.partialorder %v11697_v57, inf  ;;  %vm11713_vm12 = vcmask 523264   ;;  %5637 = vrcp.f32 %v3178_v45  ;;  %v11716_v45 = vld [vmem:[#allocation69_spill] sm:$0xff] }
 0x494   : > { %v2653_v42 = vcvt.f32.s32 %v2652_v46  ;;  %vm2927_vm7 = vcmp.eq.s32.totalorder %v11404_v11, %v2671_v0  ;;  %v8730_v53 = vpop.eup %5621  ;;  %vm2981_vm14 = vcmp.eq.f32.partialorder %v11698_v31, inf  ;;  %v2640_v24 = vshll.u32 %v2639_v59, 16  ;;  %vm11719_vm10 = vmmov %vm11713_vm12 }
 0x495   : > { %v8724_v62 = vsel %vm2927_vm7, inf, %v11709_v14  ;;  %v8728_v32 = vsel %vm2927_vm7, %v8712_v60, %v8526_v49  ;;  %11712 = vst [vmem:[#allocation11_spill] sm:$0xff] %v8730_v53  ;;  %v5624_v50 = vpop.eup %5623  ;;  %v3003_v49 = vsel %vm3002_vm5, %v11681_v3, %v3001_v48  ;;  %v2994_v14 = vmul.f32 %v5620_v2, %v11693_v58  ;;  %v11715_v60 = vld [vmem:[#allocation115_spill] sm:$0xff]  ;;  %vm11726_vm15 = vmmov %vm11719_vm10 }
 0x496   : > { %11710 = vst [vmem:[#allocation7_spill] sm:$0xff] %v8724_v62  ;;  %11711 = vst [vmem:[#allocation9_spill] sm:$0xff] %v8728_v32  ;;  %v2656_v0 = vadd.s32 %v2655_v44, %v2653_v42  ;;  %v3405_v46 = vsel %vm11713_vm12, %v8724_v62, inf  ;;  %v5626_v55 = vpop.eup %5625  ;;  %v11714_v32 = vld [vmem:[#allocation148_spill] sm:$0xff]  ;;  %v3177_v44 = vadd.f32 1e-08, %v3013_v20  ;;  %5639 = vrsqrt.f32 %v11715_v60 }
 0x497   : > { %3406 = vmin.xlane.f32.xlu0 %v3405_v46  ;;  %v2637_v51 = vpop.xlane.xlu0 %2636  ;;  %v2624_v13 = vcvt.f32.s32 %v11714_v32  ;;  %v3006_v2 = vsel %vm3004_vm6, %v3005_v40, %v3003_v49  ;;  %vm2990_vm4 = vcmp.eq.f32.partialorder %v11697_v57, 0.0  ;;  %vm2983_vm11 = vcmp.eq.f32.partialorder %v11698_v31, 0.0  ;;  %vm11735_vm6 = vmmov %vm11719_vm10 }
 0x498   : > { %v2638_v42 = vcvt.f32.s32 %v2637_v51  ;;  %vm2926_vm2 = vcmp.eq.s32.totalorder %v11404_v11, %v2656_v0  ;;  %v8759_v20 = vpop.eup %5627  ;;  %v2996_v0 = vsel %vm2995_vm13, %v11693_v58, %v2994_v14  ;;  %v2980_v46 = vmul.f32 %v5626_v55, %v11698_v31  ;;  %v11725_v55 = vld [vmem:[#allocation116_spill] sm:$0xff]  ;;  %v11728_v58 = vld [vmem:[#allocation117_spill] sm:$0xff] }
 0x499   : > { %v8747_v62 = vsel %vm2926_vm2, inf, %v11716_v45  ;;  %v8751_v48 = vsel %vm2926_vm2, %v8730_v53, %v8532_v10  ;;  %11720 = vst [vmem:[#allocation81_spill] sm:$0xff] %v8759_v20  ;;  %v2987_v10 = vmul.f32 %v5624_v50, %v11697_v57  ;;  %v2984_v3 = vand.u32 2147483648, %v11698_v31  ;;  %v5630_v49 = vpop.eup %5629  ;;  %v11722_v53 = vld [vmem:[#allocation73_spill] sm:$0xff] }
 0x49a   : > { %11717 = vst [vmem:[#allocation13_spill] sm:$0xff] %v8747_v62  ;;  %11718 = vst [vmem:[#allocation80_spill] sm:$0xff] %v8751_v48  ;;  %v2641_v59 = vadd.s32 %v2640_v24, %v2638_v42  ;;  %v3402_v32 = vsel %vm11719_vm10, %v8747_v62, inf  ;;  %v2625_v51 = vshll.u32 %v2624_v13, 16  ;;  %v11721_v24 = vld [vmem:[#allocation36_spill] sm:$0xff]  ;;  %5641 = vrcp.f32 %v3177_v44 }
 0x49b   : > { %3403 = vmin.xlane.f32.xlu0 %v3402_v32  ;;  %v2622_v40 = vpop.xlane.xlu0 %2621  ;;  %v2609_v42 = vcvt.f32.s32 %v11721_v24  ;;  %v3176_v48 = vadd.f32 1e-08, %v3006_v2  ;;  %v2999_v14 = vsel %vm2997_vm8, %v2998_v37, %v2996_v0  ;;  %5643 = vrsqrt.f32 %v11725_v55  ;;  %v11729_v0 = vld [vmem:[#allocation38_spill] sm:$0xff] }
 0x49c   : > { %v2623_v45 = vcvt.f32.s32 %v2622_v40  ;;  %vm2925_vm1 = vcmp.eq.s32.totalorder %v11404_v11, %v2641_v59  ;;  %v8781_v40 = vpop.eup %5631  ;;  %v3162_v44 = vmul.f32 %v5630_v49, %v11704_v47  ;;  %5645 = vrsqrt.f32 %v11728_v58 }
 0x49d   : > { %v8770_v62 = vsel %vm2925_vm1, inf, %v11722_v53  ;;  %v8774_v50 = vsel %vm2925_vm1, %v8759_v20, %v8538_v52  ;;  %11727 = vst [vmem:[#allocation84_spill] sm:$0xff] %v8781_v40  ;;  %v2989_v53 = vsel %vm2988_vm0, %v11697_v57, %v2987_v10  ;;  %v2982_v52 = vsel %vm2981_vm14, %v11698_v31, %v2980_v46  ;;  %v11730_v10 = vld [vmem:[#allocation118_spill] sm:$0xff]  ;;  %vm11742_vm0 = vmmov %vm11735_vm6 }
 0x49e   : > { %11723 = vst [vmem:[#allocation82_spill] sm:$0xff] %v8770_v62  ;;  %11724 = vst [vmem:[#allocation83_spill] sm:$0xff] %v8774_v50  ;;  %v2626_v13 = vadd.s32 %v2625_v51, %v2623_v45  ;;  %v3399_v32 = vsel %vm11726_vm15, %v8770_v62, inf  ;;  %v5634_v2 = vpop.eup %5633  ;;  %v2610_v59 = vshll.u32 %v2609_v42, 16  ;;  %v2594_v51 = vcvt.f32.s32 %v11729_v0  ;;  %v11731_v45 = vld [vmem:[#allocation75_spill] sm:$0xff] }
 0x49f   : > { %3400 = vmin.xlane.f32.xlu0 %v3399_v32  ;;  %v2607_v37 = vpop.xlane.xlu0 %2606  ;;  %vm3163_vm3 = vcmp.eq.f32.partialorder %v11704_v47, inf  ;;  %5647 = vrsqrt.f32 %v11730_v10  ;;  %v8802_v49 = vpop.eup %5635  ;;  %vm3165_vm5 = vcmp.eq.f32.partialorder %v11704_v47, 0.0  ;;  %v3166_v42 = vand.u32 2147483648, %v11704_v47  ;;  %v11739_v62 = vld [vmem:[#allocation79_spill] sm:$0xff] }
 0x4a0   : > { %v2608_v24 = vcvt.f32.s32 %v2607_v37  ;;  %vm2924_vm9 = vcmp.eq.s32.totalorder %v11404_v11, %v2626_v13  ;;  %11734 = vst [vmem:[#allocation86_spill] sm:$0xff] %v8802_v49  ;;  %5649 = vrcp.f32 %v3176_v48  ;;  %v3175_v37 = vadd.f32 1e-08, %v2999_v14  ;;  %v11738_v48 = vld [vmem:[#allocation39_spill] sm:$0xff] }
 0x4a1   : > { %v8796_v50 = vsel %vm2924_vm9, inf, %v11731_v45  ;;  %v8800_v46 = vsel %vm2924_vm9, %v8781_v40, %v8547_v16  ;;  %v11736_v0 = vand.u32 2147483648, %v11697_v57  ;;  %v2985_v16 = vsel %vm2983_vm11, %v2984_v3, %v2982_v52 }
 0x4a2   : > { %11732 = vst [vmem:[#allocation109_spill] sm:$0xff] %v8796_v50  ;;  %11733 = vst [vmem:[#allocation85_spill] sm:$0xff] %v8800_v46  ;;  %v2611_v32 = vadd.s32 %v2610_v59, %v2608_v24  ;;  %v3396_v13 = vsel %vm11735_vm6, %v8796_v50, inf  ;;  %v8814_v46 = vpop.eup %5637  ;;  %v3164_v40 = vsel %vm3163_vm3, %v11704_v47, %v3162_v44  ;;  %v3155_v59 = vmul.f32 %v5634_v2, %v11707_v15 }
 0x4a3   : > { %v2992_v45 = vsel %vm2990_vm4, %v11736_v0, %v2989_v53  ;;  %3397 = vmin.xlane.f32.xlu0 %v3396_v13  ;;  %11737 = vst [vmem:[#allocation87_spill] sm:$0xff] %v8814_v46  ;;  %v2595_v24 = vshll.u32 %v2594_v51, 16  ;;  %v2592_v20 = vpop.xlane.xlu0 %2591  ;;  %v2579_v14 = vcvt.f32.s32 %v11738_v48  ;;  %v5640_v3 = vpop.eup %5639  ;;  %vm3156_vm7 = vcmp.eq.f32.partialorder %v11707_v15, inf  ;;  %v11741_v53 = vld [vmem:[#allocation119_spill] sm:$0xff]  ;;  %v11743_v13 = vld [vmem:[#allocation120_spill] sm:$0xff]  ;;  %vm11748_vm4 = vmmov %vm11742_vm0 }
 0x4a4   : > { %vm2923_vm13 = vcmp.eq.s32.totalorder %v11404_v11, %v2611_v32  ;;  %v2593_v50 = vcvt.f32.s32 %v2592_v20  ;;  %vm3158_vm8 = vcmp.eq.f32.partialorder %v11707_v15, 0.0  ;;  %5651 = vrsqrt.f32 %v11741_v53 }
 0x4a5   : > { %v8821_v57 = vsel %vm2923_vm13, inf, %v11739_v62  ;;  %v8825_v31 = vsel %vm2923_vm13, %v8802_v49, %v8553_v56  ;;  %v3174_v44 = vadd.f32 1e-08, %v2992_v45  ;;  %v3159_v20 = vand.u32 2147483648, %v11707_v15 }
 0x4a6   : > { %11740 = vst [vmem:[#allocation88_spill] sm:$0xff] %v8825_v31  ;;  %v3393_v52 = vsel %vm11742_vm0, %v8821_v57, inf  ;;  %vm3149_vm12 = vcmp.eq.f32.partialorder %v11715_v60, inf  ;;  %v2596_v62 = vadd.s32 %v2595_v24, %v2593_v50  ;;  %5653 = vrcp.f32 %v3175_v37  ;;  %v11745_v31 = vld [vmem:[#allocation42_spill] sm:$0xff] }
 0x4a7   : > { %3394 = vmin.xlane.f32.xlu0 %v3393_v52  ;;  %v3173_v56 = vadd.f32 1e-08, %v2985_v16  ;;  %v3167_v2 = vsel %vm3165_vm5, %v3166_v42, %v3164_v40  ;;  %v3157_v51 = vsel %vm3156_vm7, %v11707_v15, %v3155_v59  ;;  %v3148_v32 = vmul.f32 %v5640_v3, %v11715_v60  ;;  %v2577_v48 = vpop.xlane.xlu0 %2576  ;;  %v8840_v45 = vpop.eup %5641  ;;  %v11746_v37 = vld [vmem:[#allocation6_spill] sm:$0xff]  ;;  %v11750_v15 = vld [vmem:[#allocation8_spill] sm:$0xff]  ;;  %vm11753_vm5 = vmmov %vm11742_vm0 }
 0x4a8   : > { %5655 = vrsqrt.f32 %v11743_v13  ;;  %v2580_v0 = vshll.u32 %v2579_v14, 16  ;;  %vm2922_vm14 = vcmp.eq.s32.totalorder %v11404_v11, %v2596_v62  ;;  %11744 = vst [vmem:[#allocation89_spill] sm:$0xff] %v8840_v45  ;;  %v2564_v50 = vcvt.f32.s32 %v11745_v31  ;;  %v5644_v40 = vpop.eup %5643 }
 0x4a9   : > { %v2578_v24 = vcvt.f32.s32 %v2577_v48  ;;  %v8844_v16 = vsel %vm2922_vm14, inf, %v11746_v37  ;;  %v8848_v47 = vsel %vm2922_vm14, %v8814_v46, %v8563_v18  ;;  %5657 = vrcp.f32 %v3174_v44  ;;  %v5646_v14 = vpop.eup %5645 }
 0x4aa   : > { %11747 = vst [vmem:[#allocation110_spill] sm:$0xff] %v8848_v47  ;;  %vm3151_vm2 = vcmp.eq.f32.partialorder %v11715_v60, 0.0  ;;  %v3152_v42 = vand.u32 2147483648, %v11715_v60  ;;  %v3390_v59 = vsel %vm11748_vm4, %v8844_v16, inf  ;;  %v3199_v3 = vadd.f32 1e-08, %v3167_v2 }
 0x4ab   : > { %vm3142_vm11 = vcmp.eq.f32.partialorder %v11725_v55, inf  ;;  %v2581_v52 = vadd.s32 %v2580_v0, %v2578_v24  ;;  %3391 = vmin.xlane.f32.xlu0 %v3390_v59  ;;  %5659 = vrcp.f32 %v3173_v56  ;;  %v3160_v18 = vsel %vm3158_vm8, %v3159_v20, %v3157_v51  ;;  %v2562_v62 = vpop.xlane.xlu0 %2561  ;;  %v11749_v2 = vld [vmem:[#allocation43_spill] sm:$0xff]  ;;  %vm11757_vm8 = vmmov %vm11742_vm0 }
 0x4ac   : > { %v3150_v44 = vsel %vm3149_vm12, %v11715_v60, %v3148_v32  ;;  %vm2974_vm10 = vcmp.eq.f32.partialorder %v11728_v58, inf  ;;  %v5648_v48 = vpop.eup %5647  ;;  %v2565_v37 = vshll.u32 %v2564_v50, 16  ;;  %v2549_v47 = vcvt.f32.s32 %v11749_v2 }
 0x4ad   : > { %v2563_v46 = vcvt.f32.s32 %v2562_v62  ;;  %vm2921_vm1 = vcmp.eq.s32.totalorder %v11404_v11, %v2581_v52  ;;  %v2977_v0 = vand.u32 2147483648, %v11728_v58  ;;  %vm3135_vm15 = vcmp.eq.f32.partialorder %v11730_v10, inf  ;;  %v8873_v51 = vpop.eup %5649 }
 0x4ae   : > { %v8867_v20 = vsel %vm2921_vm1, inf, %v11750_v15  ;;  %v8871_v56 = vsel %vm2921_vm1, %v8840_v45, %v8573_v35  ;;  %11752 = vst [vmem:[#allocation143_spill] sm:$0xff] %v8873_v51  ;;  %5661 = vrcp.f32 %v3199_v3  ;;  %v3198_v32 = vadd.f32 1e-08, %v3160_v18 }
 0x4af   : > { %11751 = vst [vmem:[#allocation142_spill] sm:$0xff] %v8871_v56  ;;  %vm3144_vm9 = vcmp.eq.f32.partialorder %v11725_v55, 0.0  ;;  %vm2976_vm3 = vcmp.eq.f32.partialorder %v11728_v58, 0.0  ;;  %v2566_v50 = vadd.s32 %v2565_v37, %v2563_v46  ;;  %v3387_v24 = vsel %vm11753_vm5, %v8867_v20, inf  ;;  %v2547_v3 = vpop.xlane.xlu0 %2546 }
 0x4b0   : > { %v3153_v59 = vsel %vm3151_vm2, %v3152_v42, %v3150_v44  ;;  %v3141_v52 = vmul.f32 %v5644_v40, %v11725_v55  ;;  %v2973_v35 = vmul.f32 %v5646_v14, %v11728_v58  ;;  %v3134_v62 = vmul.f32 %v5648_v48, %v11730_v10  ;;  %3388 = vmin.xlane.f32.xlu0 %v3387_v24  ;;  %v11754_v42 = vld [vmem:[#allocation121_spill] sm:$0xff]  ;;  %v11755_v40 = vld [vmem:[#allocation10_spill] sm:$0xff]  ;;  %vm11763_vm2 = vmmov %vm11748_vm4 }
 0x4b1   : > { %vm3137_vm6 = vcmp.eq.f32.partialorder %v11730_v10, 0.0  ;;  %v2550_v18 = vshll.u32 %v2549_v47, 16  ;;  %v2534_v2 = vcvt.f32.s32 %v8093_v1  ;;  %v2548_v46 = vcvt.f32.s32 %v2547_v3  ;;  %v5652_v37 = vpop.eup %5651 }
 0x4b2   : > { %vm2920_vm13 = vcmp.eq.s32.totalorder %v11404_v11, %v2566_v50  ;;  %v3138_v60 = vand.u32 2147483648, %v11730_v10  ;;  %5663 = vrsqrt.f32 %v11754_v42  ;;  %vm3128_vm7 = vcmp.eq.f32.partialorder %v11741_v53, inf }
 0x4b3   : > { %v8890_v44 = vsel %vm2920_vm13, inf, %v11755_v40  ;;  %v8894_v14 = vsel %vm2920_vm13, %v8873_v51, %v8579_v12  ;;  %5665 = vrcp.f32 %v3198_v32  ;;  %v2551_v47 = vadd.s32 %v2550_v18, %v2548_v46  ;;  %v8899_v48 = vpop.eup %5653  ;;  %v2532_v32 = vpop.xlane.xlu0 %2531 }
 0x4b4   : > { %11756 = vst [vmem:[#allocation111_spill] sm:$0xff] %v8894_v14  ;;  %v3384_v1 = vsel %vm11757_vm8, %v8890_v44, inf  ;;  %11758 = vst [vmem:[#allocation112_spill] sm:$0xff] %v8899_v48  ;;  %v3197_v15 = vadd.f32 1e-08, %v3153_v59  ;;  %v3143_v50 = vsel %vm3142_vm11, %v11725_v55, %v3141_v52  ;;  %v2975_v24 = vsel %vm2974_vm10, %v11728_v58, %v2973_v35  ;;  %v11759_v35 = vld [vmem:[#allocation12_spill] sm:$0xff] }
 0x4b5   : > { %v3136_v12 = vsel %vm3135_vm15, %v11730_v10, %v3134_v62  ;;  %3385 = vmin.xlane.f32.xlu0 %v3384_v1  ;;  %v5656_v3 = vpop.eup %5655  ;;  %v3127_v18 = vmul.f32 %v5652_v37, %v11741_v53  ;;  %vm3130_vm0 = vcmp.eq.f32.partialorder %v11741_v53, 0.0  ;;  %v2535_v59 = vshll.u32 %v2534_v2, 16  ;;  %v11762_v37 = vld [vmem:[#allocation122_spill] sm:$0xff]  ;;  %v11767_v14 = vld [vmem:[#allocation123_spill] sm:$0xff]  ;;  %vm11770_vm11 = vmmov %vm11763_vm2 }
 0x4b6   : > { %v2533_v46 = vcvt.f32.s32 %v2532_v32  ;;  %vm2919_vm12 = vcmp.eq.s32.totalorder %v11404_v11, %v2551_v47  ;;  %v2519_v52 = vcvt.f32.s32 %v8113_v21  ;;  %v2909_v40 = vcvt.f32.s32 %v8115_v6  ;;  %v8922_v1 = vpop.eup %5657 }
 0x4b7   : > { %v8916_v31 = vsel %vm2919_vm12, inf, %v11759_v35  ;;  %v8920_v62 = vsel %vm2919_vm12, %v8899_v48, %v8587_v28  ;;  %11761 = vst [vmem:[#allocation144_spill] sm:$0xff] %v8922_v1  ;;  %vm3121_vm14 = vcmp.eq.f32.partialorder %v11743_v13, inf  ;;  %5667 = vrsqrt.f32 %v11762_v37  ;;  %v11765_v35 = vld [vmem:[#allocation124_spill] sm:$0xff] }
 0x4b8   : > { %11760 = vst [vmem:[#allocation146_spill] sm:$0xff] %v8920_v62  ;;  %v2536_v2 = vadd.s32 %v2535_v59, %v2533_v46  ;;  %v3381_v47 = vsel %vm11763_vm2, %v8916_v31, inf  ;;  %v11764_v21 = vand.u32 2147483648, %v11725_v55  ;;  %v2978_v32 = vsel %vm2976_vm3, %v2977_v0, %v2975_v24  ;;  %v8936_v62 = vpop.eup %5659  ;;  %v2517_v0 = vpop.xlane.xlu0 %2516  ;;  %vm11779_vm3 = vmmov %vm11763_vm2 }
 0x4b9   : > { %v3120_v28 = vmul.f32 %v5656_v3, %v11743_v13  ;;  %5669 = vrsqrt.f32 %v11765_v35  ;;  %3382 = vmin.xlane.f32.xlu0 %v3381_v47  ;;  %11766 = vst [vmem:[#allocation145_spill] sm:$0xff] %v8936_v62  ;;  %v3139_v59 = vsel %vm3137_vm6, %v3138_v60, %v3136_v12  ;;  %v3129_v46 = vsel %vm3128_vm7, %v11741_v53, %v3127_v18 }
 0x4ba   : > { %v3146_v6 = vsel %vm3144_vm9, %v11764_v21, %v3143_v50  ;;  %5671 = vrsqrt.f32 %v11767_v14  ;;  %vm2918_vm4 = vcmp.eq.s32.totalorder %v11404_v11, %v2536_v2  ;;  %v2520_v55 = vshll.u32 %v2519_v52, 16  ;;  %v11768_v50 = vld [vmem:[#allocation14_spill] sm:$0xff]  ;;  %vm11778_vm9 = vmmov %vm11763_vm2 }
 0x4bb   : > { %v2910_v58 = vshll.u32 %v2909_v40, 16  ;;  %v8946_v24 = vsel %vm2918_vm4, inf, %v11768_v50  ;;  %v8950_v3 = vsel %vm2918_vm4, %v8922_v1, %v8593_v25  ;;  %v2907_v10 = vpop.xlane.xlu1 %2906  ;;  %v2894_v60 = vcvt.f32.s32 %v8130_v61  ;;  %v8955_v21 = vpop.eup %5661 }
 0x4bc   : > { %11769 = vst [vmem:[#allocation113_spill] sm:$0xff] %v8950_v3  ;;  %v2518_v12 = vcvt.f32.s32 %v2517_v0  ;;  %v3378_v18 = vsel %vm11770_vm11, %v8946_v24, inf  ;;  %v2908_v47 = vcvt.f32.s32 %v2907_v10  ;;  %11771 = vst [vmem:[#allocation147_spill] sm:$0xff] %v8955_v21  ;;  %5673 = vrcp.f32 %v3197_v15  ;;  %v11772_v15 = vld [vmem:[#allocation125_spill] sm:$0xff] }
 0x4bd   : > { %v3131_v52 = vand.u32 2147483648, %v11741_v53  ;;  %v3122_v40 = vsel %vm3121_vm14, %v11743_v13, %v3120_v28  ;;  %vm3123_vm10 = vcmp.eq.f32.partialorder %v11743_v13, 0.0  ;;  %3379 = vmin.xlane.f32.xlu0 %v3378_v18  ;;  %v3196_v25 = vadd.f32 1e-08, %v3146_v6  ;;  %v11776_v53 = vld [vmem:[#allocation16_spill] sm:$0xff] }
 0x4be   : > { %v3124_v61 = vand.u32 2147483648, %v11743_v13  ;;  %v2521_v2 = vadd.s32 %v2520_v55, %v2518_v12  ;;  %v2911_v0 = vadd.s32 %v2910_v58, %v2908_v47  ;;  %v3172_v50 = vadd.f32 1e-08, %v2978_v32  ;;  %v11774_v13 = vld [vmem:[#allocation15_spill] sm:$0xff] }
 0x4bf   : > { %v3195_v3 = vadd.f32 1e-08, %v3139_v59  ;;  %v3132_v10 = vsel %vm3130_vm0, %v3131_v52, %v3129_v46  ;;  %5675 = vrsqrt.f32 %v11772_v15  ;;  %v5664_v56 = vpop.eup %5663  ;;  %v2895_v48 = vshll.u32 %v2894_v60, 16  ;;  %v2892_v6 = vpop.xlane.xlu1 %2891  ;;  %vm11785_vm0 = vmmov %vm11763_vm2 }
 0x4c0   : > { %v3125_v1 = vsel %vm3123_vm10, %v3124_v61, %v3122_v40  ;;  %vm2917_vm1 = vcmp.eq.s32.totalorder %v11404_v11, %v2521_v2  ;;  %vm2943_vm15 = vcmp.eq.s32.totalorder %v11404_v11, %v2911_v0  ;;  %v8968_v28 = vpop.eup %5665  ;;  %v2879_v58 = vcvt.f32.s32 %v8140_v5  ;;  %v11780_v5 = vld [vmem:[#allocation126_spill] sm:$0xff]  ;;  %vm11791_vm10 = vmmov %vm11785_vm0 }
 0x4c1   : > { %11773 = vst [vmem:[#allocation114_spill] sm:$0xff] %v8968_v28  ;;  %v8971_v55 = vsel %vm2917_vm1, inf, %v11774_v13  ;;  %v8975_v32 = vsel %vm2917_vm1, %v8936_v62, %v8599_v39  ;;  %v8978_v59 = vsel %vm2943_vm15, inf, %v11776_v53  ;;  %v8982_v46 = vsel %vm2943_vm15, %v8955_v21, %v8608_v43  ;;  %v11783_v53 = vld [vmem:[#allocation128_spill] sm:$0xff]  ;;  %v11795_v62 = vld [vmem:[#allocation55_spill] sm:$0xff] }
 0x4c2   : > { %11775 = vst [vmem:[#allocation34_spill] sm:$0xff] %v8975_v32  ;;  %11777 = vst [vmem:[#allocation65_spill] sm:$0xff] %v8982_v46  ;;  %v2893_v60 = vcvt.f32.s32 %v2892_v6  ;;  %v3375_v12 = vsel %vm11778_vm9, %v8971_v55, inf  ;;  %v3453_v18 = vsel %vm11779_vm3, %v8978_v59, inf  ;;  %5677 = vrcp.f32 %v3196_v25  ;;  %v11794_v32 = vld [vmem:[#allocation132_spill] sm:$0xff] }
 0x4c3   : > { %v3194_v47 = vadd.f32 1e-08, %v3132_v10  ;;  %v3113_v39 = vmul.f32 %v5664_v56, %v11754_v42  ;;  %vm3114_vm5 = vcmp.eq.f32.partialorder %v11754_v42, inf  ;;  %3376 = vmin.xlane.f32.xlu0 %v3375_v12  ;;  %3454 = vmin.xlane.f32.xlu1 %v3453_v18  ;;  %vm3116_vm6 = vcmp.eq.f32.partialorder %v11754_v42, 0.0  ;;  %v2877_v56 = vpop.xlane.xlu1 %2876  ;;  %vm11800_vm3 = vmmov %vm11785_vm0 }
 0x4c4   : > { %v3117_v43 = vand.u32 2147483648, %v11754_v42  ;;  %5679 = vrsqrt.f32 %v11780_v5  ;;  %v2896_v52 = vadd.s32 %v2895_v48, %v2893_v60  ;;  %v5668_v40 = vpop.eup %5667  ;;  %v3193_v61 = vadd.f32 1e-08, %v3125_v1  ;;  %v11781_v1 = vld [vmem:[#allocation17_spill] sm:$0xff] }
 0x4c5   : > { %5681 = vrcp.f32 %v3172_v50  ;;  %vm3107_vm13 = vcmp.eq.f32.partialorder %v11762_v37, inf  ;;  %vm2967_vm7 = vcmp.eq.f32.partialorder %v11765_v35, inf  ;;  %v2880_v0 = vshll.u32 %v2879_v58, 16 }
 0x4c6   : > { %v5670_v2 = vpop.eup %5669  ;;  %5683 = vrcp.f32 %v3195_v3  ;;  %v2878_v10 = vcvt.f32.s32 %v2877_v56  ;;  %vm2942_vm8 = vcmp.eq.s32.totalorder %v11404_v11, %v2896_v52  ;;  %v3115_v48 = vsel %vm3114_vm5, %v11754_v42, %v3113_v39  ;;  %v11784_v3 = vld [vmem:[#allocation45_spill] sm:$0xff] }
 0x4c7   : > { %v5672_v6 = vpop.eup %5671  ;;  %5685 = vrcp.f32 %v3194_v47  ;;  %v9002_v50 = vsel %vm2942_vm8, inf, %v11781_v1  ;;  %v9006_v13 = vsel %vm2942_vm8, %v8968_v28, %v8614_v38  ;;  %v2864_v58 = vcvt.f32.s32 %v11784_v3  ;;  %v11787_v56 = vld [vmem:[#allocation49_spill] sm:$0xff]  ;;  %v11788_v1 = vld [vmem:[#allocation18_spill] sm:$0xff] }
 0x4c8   : > { %11782 = vst [vmem:[#allocation148_spill] sm:$0xff] %v9006_v13  ;;  %5687 = vrsqrt.f32 %v11783_v53  ;;  %v2881_v60 = vadd.s32 %v2880_v0, %v2878_v10  ;;  %v3450_v12 = vsel %vm11785_vm0, %v9002_v50, inf  ;;  %vm3109_vm12 = vcmp.eq.f32.partialorder %v11762_v37, 0.0  ;;  %v2862_v10 = vpop.xlane.xlu1 %2861 }
 0x4c9   : > { %5689 = vrcp.f32 %v3193_v61  ;;  %vm2969_vm14 = vcmp.eq.f32.partialorder %v11765_v35, 0.0  ;;  %v2970_v18 = vand.u32 2147483648, %v11765_v35  ;;  %vm3100_vm2 = vcmp.eq.f32.partialorder %v11767_v14, inf  ;;  %3451 = vmin.xlane.f32.xlu1 %v3450_v12  ;;  %v9016_v38 = vpop.eup %5673 }
 0x4ca   : > { %11786 = vst [vmem:[#allocation115_spill] sm:$0xff] %v9016_v38  ;;  %v3118_v47 = vsel %vm3116_vm6, %v3117_v43, %v3115_v48  ;;  %v3106_v39 = vmul.f32 %v5668_v40, %v11762_v37  ;;  %v2966_v52 = vmul.f32 %v5670_v2, %v11765_v35  ;;  %vm3102_vm4 = vcmp.eq.f32.partialorder %v11767_v14, 0.0  ;;  %v11790_v48 = vld [vmem:[#allocation52_spill] sm:$0xff]  ;;  %vm11806_vm6 = vmmov %vm11785_vm0 }
 0x4cb   : > { %vm2941_vm11 = vcmp.eq.s32.totalorder %v11404_v11, %v2881_v60  ;;  %v3099_v61 = vmul.f32 %v5672_v6, %v11767_v14  ;;  %v2504_v0 = vcvt.f32.s32 %v11787_v56  ;;  %v2865_v40 = vshll.u32 %v2864_v58, 16 }
 0x4cc   : > { %v9027_v3 = vsel %vm2941_vm11, inf, %v11788_v1  ;;  %v9031_v42 = vsel %vm2941_vm11, %v9016_v38, %v8622_v4  ;;  %v5676_v43 = vpop.eup %5675  ;;  %v2849_v2 = vcvt.f32.s32 %v11790_v48  ;;  %v2863_v12 = vcvt.f32.s32 %v2862_v10  ;;  %v11792_v1 = vld [vmem:[#allocation130_spill] sm:$0xff]  ;;  %v2502_v48 = vpop.xlane.xlu0 %2501 }
 0x4cd   : > { %11789 = vst [vmem:[#allocation69_spill] sm:$0xff] %v9031_v42  ;;  %v3447_v60 = vsel %vm11791_vm10, %v9027_v3, inf  ;;  %v3103_v6 = vand.u32 2147483648, %v11767_v14  ;;  %vm3093_vm1 = vcmp.eq.f32.partialorder %v11772_v15, inf  ;;  %v3096_v56 = vand.u32 2147483648, %v11772_v15  ;;  %vm11822_vm10 = vmmov %vm11785_vm0 }
 0x4ce   : > { %5691 = vrsqrt.f32 %v11792_v1  ;;  %3448 = vmin.xlane.f32.xlu1 %v3447_v60  ;;  %v3192_v25 = vadd.f32 1e-08, %v3118_v47  ;;  %v3108_v4 = vsel %vm3107_vm13, %v11762_v37, %v3106_v39  ;;  %v2968_v58 = vsel %vm2967_vm7, %v11765_v35, %v2966_v52  ;;  %v2847_v52 = vpop.xlane.xlu1 %2846 }
 0x4cf   : > { %v2866_v10 = vadd.s32 %v2865_v40, %v2863_v12  ;;  %v3101_v42 = vsel %vm3100_vm2, %v11767_v14, %v3099_v61  ;;  %v3092_v13 = vmul.f32 %v5676_v43, %v11772_v15  ;;  %vm3095_vm15 = vcmp.eq.f32.partialorder %v11772_v15, 0.0  ;;  %v9051_v46 = vpop.eup %5677  ;;  %v11796_v61 = vld [vmem:[#allocation19_spill] sm:$0xff]  ;;  %vm11813_vm2 = vmmov %vm11785_vm0 }
 0x4d0   : > { %v2505_v60 = vshll.u32 %v2504_v0, 16  ;;  %v2503_v47 = vcvt.f32.s32 %v2502_v48  ;;  %11793 = vst [vmem:[#allocation36_spill] sm:$0xff] %v9051_v46  ;;  %5693 = vrsqrt.f32 %v11794_v32  ;;  %v2850_v39 = vshll.u32 %v2849_v2, 16 }
 0x4d1   : > { %v2834_v51 = vcvt.f32.s32 %v11795_v62  ;;  %vm2940_vm9 = vcmp.eq.s32.totalorder %v11404_v11, %v2866_v10  ;;  %v5680_v40 = vpop.eup %5679  ;;  %v2848_v45 = vcvt.f32.s32 %v2847_v52  ;;  %5695 = vrcp.f32 %v3192_v25 }
 0x4d2   : > { %v2506_v12 = vadd.s32 %v2505_v60, %v2503_v47  ;;  %v9057_v49 = vsel %vm2940_vm9, inf, %v11796_v61  ;;  %v9061_v0 = vsel %vm2940_vm9, %v9051_v46, %v8628_v36  ;;  %v9063_v43 = vpop.eup %5681  ;;  %v11799_v2 = vand.u32 2147483648, %v11762_v37 }
 0x4d3   : > { %11797 = vst [vmem:[#allocation73_spill] sm:$0xff] %v9061_v0  ;;  %11798 = vst [vmem:[#allocation116_spill] sm:$0xff] %v9063_v43  ;;  %v2971_v10 = vsel %vm2969_vm14, %v2970_v18, %v2968_v58  ;;  %v3444_v48 = vsel %vm11800_vm3, %v9057_v49, inf  ;;  %v9073_v60 = vpop.eup %5683  ;;  %v3104_v36 = vsel %vm3102_vm4, %v3103_v6, %v3101_v42  ;;  %v3094_v25 = vsel %vm3093_vm1, %v11772_v15, %v3092_v13  ;;  %v11803_v58 = vld [vmem:[#allocation21_spill] sm:$0xff]  ;;  %v11805_v6 = vld [vmem:[#allocation56_spill] sm:$0xff] }
 0x4d4   : > { %v3111_v62 = vsel %vm3109_vm12, %v11799_v2, %v3108_v4  ;;  %11801 = vst [vmem:[#allocation117_spill] sm:$0xff] %v9073_v60  ;;  %v2851_v47 = vadd.s32 %v2850_v39, %v2848_v45  ;;  %3445 = vmin.xlane.f32.xlu1 %v3444_v48  ;;  %vm2916_vm5 = vcmp.eq.s32.totalorder %v11404_v11, %v2506_v12  ;;  %v9081_v37 = vpop.eup %5685  ;;  %v2835_v18 = vshll.u32 %v2834_v51, 16  ;;  %v2832_v4 = vpop.xlane.xlu1 %2831 }
 0x4d5   : > { %11802 = vst [vmem:[#allocation38_spill] sm:$0xff] %v9081_v37  ;;  %v3085_v35 = vmul.f32 %v5680_v40, %v11780_v5  ;;  %v9085_v52 = vsel %vm2916_vm5, inf, %v11803_v58  ;;  %v9089_v14 = vsel %vm2916_vm5, %v9063_v43, %v8636_v23  ;;  %v5688_v42 = vpop.eup %5687  ;;  %v2819_v13 = vcvt.f32.s32 %v11805_v6  ;;  %v11808_v40 = vld [vmem:[#allocation20_spill] sm:$0xff] }
 0x4d6   : > { %11804 = vst [vmem:[#allocation118_spill] sm:$0xff] %v9089_v14  ;;  %v2833_v45 = vcvt.f32.s32 %v2832_v4  ;;  %v3372_v39 = vsel %vm11806_vm6, %v9085_v52, inf  ;;  %vm2939_vm13 = vcmp.eq.s32.totalorder %v11404_v11, %v2851_v47  ;;  %v9095_v12 = vpop.eup %5689  ;;  %v3191_v51 = vadd.f32 1e-08, %v3111_v62 }
 0x4d7   : > { %11807 = vst [vmem:[#allocation75_spill] sm:$0xff] %v9095_v12  ;;  %vm3086_vm7 = vcmp.eq.f32.partialorder %v11780_v5, inf  ;;  %3373 = vmin.xlane.f32.xlu0 %v3372_v39  ;;  %v9099_v61 = vsel %vm2939_vm13, inf, %v11808_v40  ;;  %v9103_v23 = vsel %vm2939_vm13, %v9073_v60, %v8642_v26  ;;  %v3171_v2 = vadd.f32 1e-08, %v2971_v10  ;;  %v11810_v26 = vld [vmem:[#allocation58_spill] sm:$0xff]  ;;  %vm11826_vm13 = vmmov %vm11785_vm0 }
 0x4d8   : > { %11809 = vst [vmem:[#allocation39_spill] sm:$0xff] %v9103_v23  ;;  %vm3088_vm8 = vcmp.eq.f32.partialorder %v11780_v5, 0.0  ;;  %v2836_v48 = vadd.s32 %v2835_v18, %v2833_v45  ;;  %v3441_v47 = vsel %vm11785_vm0, %v9099_v61, inf  ;;  %v3190_v4 = vadd.f32 1e-08, %v3104_v36  ;;  %v2817_v39 = vpop.xlane.xlu1 %2816  ;;  %v11811_v36 = vld [vmem:[#allocation22_spill] sm:$0xff] }
 0x4d9   : > { %v3097_v62 = vsel %vm3095_vm15, %v3096_v56, %v3094_v25  ;;  %v3087_v58 = vsel %vm3086_vm7, %v11780_v5, %v3085_v35  ;;  %v3078_v6 = vmul.f32 %v5688_v42, %v11783_v53  ;;  %3442 = vmin.xlane.f32.xlu1 %v3441_v47  ;;  %v2820_v40 = vshll.u32 %v2819_v13, 16 }
 0x4da   : > { %v2804_v23 = vcvt.f32.s32 %v11810_v26  ;;  %v2818_v10 = vcvt.f32.s32 %v2817_v39  ;;  %vm2938_vm12 = vcmp.eq.s32.totalorder %v11404_v11, %v2836_v48  ;;  %5697 = vrcp.f32 %v3191_v51  ;;  %v11815_v39 = vld [vmem:[#allocation60_spill] sm:$0xff] }
 0x4db   : > { %v5692_v18 = vpop.eup %5691  ;;  %v3089_v45 = vand.u32 2147483648, %v11780_v5  ;;  %v9116_v14 = vsel %vm2938_vm12, inf, %v11811_v36  ;;  %v9120_v15 = vsel %vm2938_vm12, %v9081_v37, %v8650_v33  ;;  %5699 = vrcp.f32 %v3171_v2  ;;  %v11814_v33 = vld [vmem:[#allocation136_spill] sm:$0xff] }
 0x4dc   : > { %11812 = vst [vmem:[#allocation79_spill] sm:$0xff] %v9120_v15  ;;  %vm3079_vm14 = vcmp.eq.f32.partialorder %v11783_v53, inf  ;;  %v2821_v56 = vadd.s32 %v2820_v40, %v2818_v10  ;;  %v3438_v25 = vsel %vm11813_vm2, %v9116_v14, inf  ;;  %5701 = vrcp.f32 %v3190_v4  ;;  %v2802_v47 = vpop.xlane.xlu1 %2801  ;;  %v11816_v4 = vld [vmem:[#allocation23_spill] sm:$0xff] }
 0x4dd   : > { %v3189_v35 = vadd.f32 1e-08, %v3097_v62  ;;  %v3090_v42 = vsel %vm3088_vm8, %v3089_v45, %v3087_v58  ;;  %v3080_v13 = vsel %vm3079_vm14, %v11783_v53, %v3078_v6  ;;  %3439 = vmin.xlane.f32.xlu1 %v3438_v25  ;;  %v5694_v51 = vpop.eup %5693  ;;  %v2959_v48 = vmul.f32 %v5692_v18, %v11792_v1  ;;  %v11819_v6 = vld [vmem:[#allocation90_spill] sm:$0xff]  ;;  %v11821_v18 = vld [vmem:[#allocation137_spill] sm:$0xff]  ;;  %vm11837_vm14 = vmmov %vm11813_vm2 }
 0x4de   : > { %5703 = vrsqrt.f32 %v11814_v33  ;;  %v2805_v2 = vshll.u32 %v2804_v23, 16  ;;  %vm2937_vm4 = vcmp.eq.s32.totalorder %v11404_v11, %v2821_v56  ;;  %v2789_v40 = vcvt.f32.s32 %v11815_v39  ;;  %v9139_v58 = vpop.eup %5695 }
 0x4df   : > { %v2803_v26 = vcvt.f32.s32 %v2802_v47  ;;  %v9133_v62 = vsel %vm2937_vm4, inf, %v11816_v4  ;;  %v9137_v5 = vsel %vm2937_vm4, %v9095_v12, %v8656_v19  ;;  %11818 = vst [vmem:[#allocation120_spill] sm:$0xff] %v9139_v58  ;;  %vm11820_vm11 = vcmp.eq.s32.totalorder %v11404_v11, %v11819_v6  ;;  %v11823_v4 = vld [vmem:[#allocation62_spill] sm:$0xff]  ;;  %vm11840_vm4 = vmmov %vm11822_vm10 }
 0x4e0   : > { %11817 = vst [vmem:[#allocation119_spill] sm:$0xff] %v9137_v5  ;;  %v2199_v23 = vsel %vm11820_vm11, %v8505_v8, 0.0  ;;  %v3082_v10 = vand.u32 2147483648, %v11783_v53  ;;  %5705 = vrsqrt.f32 %v11821_v18  ;;  %v3435_v45 = vsel %vm11822_vm10, %v9133_v62, inf  ;;  %v2787_v5 = vpop.xlane.xlu1 %2786  ;;  %v11824_v8 = vld [vmem:[#allocation24_spill] sm:$0xff] }
 0x4e1   : > { %vm1979_vm1 = vcmp.eq.f32.partialorder %v11613_v29, 0.0  ;;  %vm3081_vm15 = vcmp.eq.f32.partialorder %v11783_v53, 0.0  ;;  %vm2960_vm9 = vcmp.eq.f32.partialorder %v11792_v1, inf  ;;  %v3071_v19 = vmul.f32 %v5694_v51, %v11794_v32  ;;  %3436 = vmin.xlane.f32.xlu1 %v3435_v45 }
 0x4e2   : > { %v2806_v36 = vadd.s32 %v2805_v2, %v2803_v26  ;;  %5707 = vrcp.f32 %v3189_v35  ;;  %v3188_v56 = vadd.f32 1e-08, %v3090_v42  ;;  %v3083_v25 = vsel %vm3081_vm15, %v3082_v10, %v3080_v13  ;;  %v2487_v2 = vpop.xlane.xlu0 %2486 }
 0x4e3   : > { %vm3072_vm3 = vcmp.eq.f32.partialorder %v11794_v32, inf  ;;  %v2961_v47 = vsel %vm2960_vm9, %v11792_v1, %v2959_v48  ;;  %v2790_v39 = vshll.u32 %v2789_v40, 16  ;;  %v2489_v6 = vcvt.f32.s32 %v11823_v4 }
 0x4e4   : > { %vm2936_vm5 = vcmp.eq.s32.totalorder %v11404_v11, %v2806_v36  ;;  %v2774_v53 = vcvt.f32.s32 %v8333_v27  ;;  %v2788_v15 = vcvt.f32.s32 %v2787_v5  ;;  %vm2962_vm6 = vcmp.eq.f32.partialorder %v11792_v1, 0.0  ;;  %v2772_v36 = vpop.xlane.xlu1 %2771 }
 0x4e5   : > { %v9159_v51 = vsel %vm2936_vm5, inf, %v11824_v8  ;;  %v9163_v35 = vsel %vm2936_vm5, %v9139_v58, %v8663_v17  ;;  %v2963_v42 = vand.u32 2147483648, %v11792_v1  ;;  %v3073_v13 = vsel %vm3072_vm3, %v11794_v32, %v3071_v19 }
 0x4e6   : > { %11825 = vst [vmem:[#allocation42_spill] sm:$0xff] %v9163_v35  ;;  %v3432_v48 = vsel %vm11826_vm13, %v9159_v51, inf  ;;  %5709 = vrcp.f32 %v3188_v56  ;;  %vm3074_vm7 = vcmp.eq.f32.partialorder %v11794_v32, 0.0  ;;  %v3075_v27 = vand.u32 2147483648, %v11794_v32  ;;  %v11858_v35 = vld [vmem:[#allocation29_spill] sm:$0xff] }
 0x4e7   : > { %v2791_v8 = vadd.s32 %v2790_v39, %v2788_v15  ;;  %3433 = vmin.xlane.f32.xlu1 %v3432_v48  ;;  %v3187_v40 = vadd.f32 1e-08, %v3083_v25  ;;  %v2964_v17 = vsel %vm2962_vm6, %v2963_v42, %v2961_v47  ;;  %v2490_v26 = vshll.u32 %v2489_v6, 16  ;;  %v9172_v10 = vpop.eup %5697  ;;  %v11829_v15 = vld [vmem:[#allocation25_spill] sm:$0xff]  ;;  %v11832_v6 = vld [vmem:[#allocation91_spill] sm:$0xff] }
 0x4e8   : > { %v2488_v5 = vcvt.f32.s32 %v2487_v2  ;;  %11827 = vst [vmem:[#allocation6_spill] sm:$0xff] %v9172_v10  ;;  %v3076_v1 = vsel %vm3074_vm7, %v3075_v27, %v3073_v13  ;;  %v2775_v45 = vshll.u32 %v2774_v53, 16  ;;  %v2759_v19 = vcvt.f32.s32 %v8368_v54  ;;  %v9176_v56 = vpop.eup %5699  ;;  %v11834_v53 = vld [vmem:[#allocation92_spill] sm:$0xff] }
 0x4e9   : > { %vm2935_vm8 = vcmp.eq.s32.totalorder %v11404_v11, %v2791_v8  ;;  %11828 = vst [vmem:[#allocation43_spill] sm:$0xff] %v9176_v56  ;;  %v2773_v32 = vcvt.f32.s32 %v2772_v36  ;;  %v9184_v47 = vpop.eup %5701  ;;  %vm11833_vm0 = vcmp.eq.s32.totalorder %v11404_v11, %v11832_v6  ;;  %vm11835_vm12 = vcmp.eq.s32.totalorder %v11404_v11, %v11834_v53  ;;  %v2757_v36 = vpop.xlane.xlu1 %2756 }
 0x4ea   : > { %v2491_v4 = vadd.s32 %v2490_v26, %v2488_v5  ;;  %v9179_v39 = vsel %vm2935_vm8, inf, %v11829_v15  ;;  %v9182_v25 = vsel %vm2935_vm8, %v9172_v10, %v2199_v23  ;;  %11831 = vst [vmem:[#allocation121_spill] sm:$0xff] %v9184_v47  ;;  %v2179_v54 = vsel %vm11833_vm0, %v8513_v7, 0.0  ;;  %v11838_v15 = vld [vmem:[#allocation27_spill] sm:$0xff] }
 0x4eb   : > { %11830 = vst [vmem:[#allocation8_spill] sm:$0xff] %v9182_v25  ;;  %v2198_v42 = vsel %vm11835_vm12, %v8541_v34, 0.0  ;;  %v11836_v13 = vand.u32 2147483648, %v11613_v29  ;;  %v3429_v23 = vsel %vm11837_vm14, %v9179_v39, inf  ;;  %v5704_v27 = vpop.eup %5703  ;;  %5711 = vrcp.f32 %v3187_v40 }
 0x4ec   : > { %v3170_v8 = vadd.f32 1e-08, %v2964_v17  ;;  %v2776_v2 = vadd.s32 %v2775_v45, %v2773_v32  ;;  %3430 = vmin.xlane.f32.xlu1 %v3429_v23  ;;  %vm2915_vm2 = vcmp.eq.s32.totalorder %v11404_v11, %v2491_v4  ;;  %v3186_v26 = vadd.f32 1e-08, %v3076_v1  ;;  %v11841_v17 = vld [vmem:[#allocation78_spill] sm:$0xff]  ;;  %v11842_v1 = vld [vmem:[#allocation93_spill] sm:$0xff] }
 0x4ed   : > { %v1981_v48 = vsel %vm1979_vm1, %v11836_v13, %v8518_v9  ;;  %v2760_v5 = vshll.u32 %v2759_v19, 16  ;;  %v9203_v6 = vsel %vm2915_vm2, inf, %v11838_v15  ;;  %v9206_v53 = vsel %vm2915_vm2, %v9176_v56, %v2179_v54  ;;  %v5706_v29 = vpop.eup %5705  ;;  %v11844_v19 = vld [vmem:[#allocation26_spill] sm:$0xff]  ;;  %vm11847_vm1 = vmmov %vm11840_vm4 }
 0x4ee   : > { %11839 = vst [vmem:[#allocation10_spill] sm:$0xff] %v9206_v53  ;;  %v2744_v9 = vcvt.f32.s32 %v8396_v22  ;;  %v2758_v13 = vcvt.f32.s32 %v2757_v36  ;;  %v3369_v40 = vsel %vm11840_vm4, %v9203_v6, inf  ;;  %vm2934_vm11 = vcmp.eq.s32.totalorder %v11404_v11, %v2776_v2  ;;  %v11848_v36 = vld [vmem:[#allocation94_spill] sm:$0xff]  ;;  %vm11855_vm6 = vmmov %vm11847_vm1  ;;  %v11857_v53 = vld [vmem:[#allocation67_spill] sm:$0xff] }
 0x4ef   : > { %5713 = vrsqrt.f32 %v11841_v17  ;;  %vm11843_vm10 = vcmp.eq.s32.totalorder %v11404_v11, %v11842_v1  ;;  %3370 = vmin.xlane.f32.xlu0 %v3369_v40  ;;  %v9218_v4 = vsel %vm2934_vm11, inf, %v11844_v19  ;;  %v9221_v32 = vsel %vm2934_vm11, %v9184_v47, %v2198_v42  ;;  %v9223_v22 = vpop.eup %5707  ;;  %v2742_v40 = vpop.xlane.xlu1 %2741  ;;  %vm11860_vm0 = vmmov %vm11847_vm1 }
 0x4f0   : > { %v2197_v45 = vsel %vm11843_vm10, %v8557_v30, 0.0  ;;  %11845 = vst [vmem:[#allocation12_spill] sm:$0xff] %v9221_v32  ;;  %11846 = vst [vmem:[#allocation122_spill] sm:$0xff] %v9223_v22  ;;  %5715 = vrcp.f32 %v3170_v8  ;;  %v2952_v54 = vmul.f32 %v5704_v27, %v11814_v33  ;;  %v2761_v23 = vadd.s32 %v2760_v5, %v2758_v13  ;;  %v11850_v5 = vld [vmem:[#allocation140_spill] sm:$0xff] }
 0x4f1   : > { %v3426_v2 = vsel %vm11847_vm1, %v9218_v4, inf  ;;  %vm11849_vm15 = vcmp.eq.s32.totalorder %v11404_v11, %v11848_v36  ;;  %5717 = vrcp.f32 %v3186_v26  ;;  %vm2953_vm9 = vcmp.eq.f32.partialorder %v11814_v33, inf  ;;  %v11851_v13 = vld [vmem:[#allocation28_spill] sm:$0xff]  ;;  %vm11868_vm2 = vmmov %vm11860_vm0 }
 0x4f2   : > { %v2196_v15 = vsel %vm11849_vm15, %v8567_v63, 0.0  ;;  %v3064_v42 = vmul.f32 %v5706_v29, %v11821_v18  ;;  %3427 = vmin.xlane.f32.xlu1 %v3426_v2  ;;  %v2745_v1 = vshll.u32 %v2744_v9, 16  ;;  %v2729_v8 = vcvt.f32.s32 %v8424_v41  ;;  %v11854_v9 = vld [vmem:[#allocation141_spill] sm:$0xff]  ;;  %vm11881_vm15 = vmmov %vm11860_vm0 }
 0x4f3   : > { %v2743_v27 = vcvt.f32.s32 %v2742_v40  ;;  %vm2933_vm3 = vcmp.eq.s32.totalorder %v11404_v11, %v2761_v23  ;;  %vm3065_vm5 = vcmp.eq.f32.partialorder %v11821_v18, inf  ;;  %5719 = vrsqrt.f32 %v11850_v5  ;;  %v9244_v36 = vpop.eup %5709 }
 0x4f4   : > { %v9239_v19 = vsel %vm2933_vm3, inf, %v11851_v13  ;;  %v9242_v26 = vsel %vm2933_vm3, %v9223_v22, %v2197_v45  ;;  %11853 = vst [vmem:[#allocation123_spill] sm:$0xff] %v9244_v36  ;;  %v2954_v29 = vsel %vm2953_vm9, %v11814_v33, %v2952_v54  ;;  %5721 = vrsqrt.f32 %v11854_v9  ;;  %v11856_v13 = vld [vmem:[#allocation64_spill] sm:$0xff]  ;;  %v2727_v45 = vpop.xlane.xlu1 %2726  ;;  %vm11884_vm9 = vmmov %vm11860_vm0 }
 0x4f5   : > { %11852 = vst [vmem:[#allocation124_spill] sm:$0xff] %v9242_v26  ;;  %v2746_v41 = vadd.s32 %v2745_v1, %v2743_v27  ;;  %v3423_v23 = vsel %vm11855_vm6, %v9239_v19, inf  ;;  %vm2955_vm13 = vcmp.eq.f32.partialorder %v11814_v33, 0.0  ;;  %v2956_v2 = vand.u32 2147483648, %v11814_v33 }
 0x4f6   : > { %v3066_v40 = vsel %vm3065_vm5, %v11821_v18, %v3064_v42  ;;  %v2474_v32 = vcvt.f32.s32 %v11856_v13  ;;  %3424 = vmin.xlane.f32.xlu1 %v3423_v23  ;;  %v2730_v26 = vshll.u32 %v2729_v8, 16  ;;  %v2714_v25 = vcvt.f32.s32 %v11857_v53  ;;  %v2472_v53 = vpop.xlane.xlu0 %2471 }
 0x4f7   : > { %v2728_v54 = vcvt.f32.s32 %v2727_v45  ;;  %vm2932_vm7 = vcmp.eq.s32.totalorder %v11404_v11, %v2746_v41  ;;  %v2957_v1 = vsel %vm2955_vm13, %v2956_v2, %v2954_v29  ;;  %v3068_v27 = vand.u32 2147483648, %v11821_v18  ;;  %v11862_v41 = vld [vmem:[#allocation63_spill] sm:$0xff] }
 0x4f8   : > { %v9258_v63 = vsel %vm2932_vm7, inf, %v11858_v35  ;;  %v9261_v33 = vsel %vm2932_vm7, %v9244_v36, %v2196_v15  ;;  %v2097_v42 = vadd.f32 1e-08, %v1981_v48  ;;  %vm3067_vm8 = vcmp.eq.f32.partialorder %v11821_v18, 0.0  ;;  %v9266_v13 = vpop.eup %5711  ;;  %v11863_v29 = vld [vmem:[#allocation95_spill] sm:$0xff] }
 0x4f9   : > { %11859 = vst [vmem:[#allocation14_spill] sm:$0xff] %v9261_v33  ;;  %v2731_v23 = vadd.s32 %v2730_v26, %v2728_v54  ;;  %v3420_v8 = vsel %vm11860_vm0, %v9258_v63, inf  ;;  %11861 = vst [vmem:[#allocation125_spill] sm:$0xff] %v9266_v13  ;;  %vm11864_vm12 = vcmp.eq.s32.totalorder %v11404_v11, %v11863_v29  ;;  %v3069_v35 = vsel %vm3067_vm8, %v3068_v27, %v3066_v40  ;;  %v2712_v33 = vpop.xlane.xlu1 %2711  ;;  %v11865_v54 = vld [vmem:[#allocation30_spill] sm:$0xff]  ;;  %v11867_v29 = vld [vmem:[#allocation105_spill] sm:$0xff] }
 0x4fa   : > { %v2195_v2 = vsel %vm11864_vm12, %v11862_v41, 0.0  ;;  %v2475_v45 = vshll.u32 %v2474_v32, 16  ;;  %3421 = vmin.xlane.f32.xlu1 %v3420_v8  ;;  %v2473_v15 = vcvt.f32.s32 %v2472_v53  ;;  %v3169_v48 = vadd.f32 1e-08, %v2957_v1  ;;  %v11873_v8 = vld [vmem:[#allocation70_spill] sm:$0xff]  ;;  %v11874_v53 = vld [vmem:[#allocation97_spill] sm:$0xff] }
 0x4fb   : > { %v2715_v36 = vshll.u32 %v2714_v25, 16  ;;  %vm2931_vm14 = vcmp.eq.s32.totalorder %v11404_v11, %v2731_v23  ;;  %v2713_v18 = vcvt.f32.s32 %v2712_v33  ;;  %5723 = vrcp.f32 %v11867_v29  ;;  %v11870_v25 = vld [vmem:[#allocation68_spill] sm:$0xff] }
 0x4fc   : > { %v2476_v26 = vadd.s32 %v2475_v45, %v2473_v15  ;;  %v9274_v56 = vsel %vm2931_vm14, inf, %v11865_v54  ;;  %v9277_v7 = vsel %vm2931_vm14, %v9266_v13, %v2195_v2  ;;  %v5714_v22 = vpop.eup %5713  ;;  %v3185_v40 = vadd.f32 1e-08, %v3069_v35  ;;  %v11871_v33 = vld [vmem:[#allocation96_spill] sm:$0xff]  ;;  %v11880_v54 = vld [vmem:[#allocation74_spill] sm:$0xff] }
 0x4fd   : > { %11866 = vst [vmem:[#allocation15_spill] sm:$0xff] %v9277_v7  ;;  %v3417_v32 = vsel %vm11868_vm2, %v9274_v56, inf  ;;  %v2716_v27 = vadd.s32 %v2715_v36, %v2713_v18  ;;  %v9282_v1 = vpop.eup %5715  ;;  %vm11872_vm4 = vcmp.eq.s32.totalorder %v11404_v11, %v11871_v33  ;;  %vm11875_vm11 = vcmp.eq.s32.totalorder %v11404_v11, %v11874_v53  ;;  %v11877_v36 = vld [vmem:[#allocation31_spill] sm:$0xff]  ;;  %v11879_v18 = vld [vmem:[#allocation77_spill] sm:$0xff] }
 0x4fe   : > { %11869 = vst [vmem:[#allocation16_spill] sm:$0xff] %v9282_v1  ;;  %v2178_v23 = vsel %vm11872_vm4, %v11870_v25, 0.0  ;;  %v2194_v2 = vsel %vm11875_vm11, %v11873_v8, 0.0  ;;  %5725 = vrcp.f32 %v2097_v42  ;;  %3418 = vmin.xlane.f32.xlu1 %v3417_v32  ;;  %vm2914_vm10 = vcmp.eq.s32.totalorder %v11404_v11, %v2476_v26  ;;  %v9293_v35 = vpop.eup %5717  ;;  %v11882_v32 = vld [vmem:[#allocation32_spill] sm:$0xff]  ;;  %vm11897_vm11 = vmmov %vm11884_vm9 }
 0x4ff   : > { %11876 = vst [vmem:[#allocation126_spill] sm:$0xff] %v9293_v35  ;;  %5727 = vrcp.f32 %v3169_v48  ;;  %v9296_v45 = vsel %vm2914_vm10, inf, %v11877_v36  ;;  %v9299_v15 = vsel %vm2914_vm10, %v9282_v1, %v2178_v23  ;;  %vm2930_vm1 = vcmp.eq.s32.totalorder %v11404_v11, %v2716_v27 }
 0x500   : > { %11878 = vst [vmem:[#allocation17_spill] sm:$0xff] %v9299_v15  ;;  %v1857_v29 = vmul.f32 %v11880_v54, %v11879_v18  ;;  %v3366_v42 = vsel %vm11881_vm15, %v9296_v45, inf  ;;  %v9307_v33 = vsel %vm2930_vm1, inf, %v11882_v32  ;;  %v9310_v26 = vsel %vm2930_vm1, %v9293_v35, %v2194_v2  ;;  %v5720_v48 = vpop.eup %5719  ;;  %v11885_v32 = vld [vmem:[#allocation103_spill] sm:$0xff]  ;;  %vm11900_vm1 = vmmov %vm11884_vm9 }
 0x501   : > { %11883 = vst [vmem:[#allocation128_spill] sm:$0xff] %v9310_v26  ;;  %5729 = vrcp.f32 %v3185_v40  ;;  %3367 = vmin.xlane.f32.xlu0 %v3366_v42  ;;  %v3414_v23 = vsel %vm11884_vm9, %v9307_v33, inf  ;;  %v5722_v53 = vpop.eup %5721  ;;  %v1969_v27 = vmul.f32 %v5714_v22, %v11841_v17  ;;  %vm1858_vm3 = vcmp.eq.f32.partialorder %v11879_v18, inf  ;;  %v11886_v22 = vld [vmem:[#allocation135_spill] sm:$0xff] }
 0x502   : > { %3415 = vmin.xlane.f32.xlu1 %v3414_v23  ;;  %v1859_v36 = vsel %vm1858_vm3, %v11879_v18, %v1857_v29  ;;  %v2945_v54 = vmul.f32 %v5720_v48, %v11850_v5  ;;  %v2459_v15 = vcvt.f32.s32 %v11885_v32  ;;  %v1861_v2 = vand.u32 2147483648, %v11879_v18 }
 0x503   : > { %vm1970_vm5 = vcmp.eq.f32.partialorder %v11841_v17, inf  ;;  %v3057_v40 = vmul.f32 %v5722_v53, %v11854_v9  ;;  %vm1860_vm6 = vcmp.eq.f32.partialorder %v11879_v18, 0.0  ;;  %v2699_v23 = vcvt.f32.s32 %v11886_v22 }
 0x504   : > { %v1971_v42 = vsel %vm1970_vm5, %v11841_v17, %v1969_v27  ;;  %vm1972_vm13 = vcmp.eq.f32.partialorder %v11841_v17, 0.0  ;;  %v1973_v29 = vand.u32 2147483648, %v11841_v17  ;;  %v1862_v26 = vsel %vm1860_vm6, %v1861_v2, %v1859_v36  ;;  %v2457_v48 = vpop.xlane.xlu0 %2456  ;;  %vm11913_vm6 = vmmov %vm11900_vm1 }
 0x505   : > { %vm2946_vm7 = vcmp.eq.f32.partialorder %v11850_v5, inf  ;;  %vm3058_vm8 = vcmp.eq.f32.partialorder %v11854_v9, inf  ;;  %v2460_v7 = vshll.u32 %v2459_v15, 16  ;;  %v2458_v53 = vcvt.f32.s32 %v2457_v48 }
 0x506   : > { %v2947_v32 = vsel %vm2946_vm7, %v11850_v5, %v2945_v54  ;;  %v1974_v35 = vsel %vm1972_vm13, %v1973_v29, %v1971_v42  ;;  %vm2948_vm0 = vcmp.eq.f32.partialorder %v11850_v5, 0.0  ;;  %v2949_v18 = vand.u32 2147483648, %v11850_v5  ;;  %v11890_v5 = vld [vmem:[#allocation98_spill] sm:$0xff]  ;;  %vm11916_vm13 = vmmov %vm11900_vm1 }
 0x507   : > { %v3059_v27 = vsel %vm3058_vm8, %v11854_v9, %v3057_v40  ;;  %v2697_v22 = vpop.xlane.xlu1 %2696  ;;  %v3061_v17 = vand.u32 2147483648, %v11854_v9  ;;  %v2700_v36 = vshll.u32 %v2699_v23, 16  ;;  %v2461_v2 = vadd.s32 %v2460_v7, %v2458_v53  ;;  %v11892_v7 = vld [vmem:[#allocation33_spill] sm:$0xff]  ;;  %vm11918_vm8 = vmmov %vm11900_vm1 }
 0x508   : > { %v9333_v8 = vpop.eup %5723  ;;  %v2698_v1 = vcvt.f32.s32 %v2697_v22  ;;  %v2080_v25 = vadd.f32 1e-08, %v1862_v26  ;;  %v2950_v15 = vsel %vm2948_vm0, %v2949_v18, %v2947_v32  ;;  %vm3060_vm12 = vcmp.eq.f32.partialorder %v11854_v9, 0.0  ;;  %v11895_v9 = vld [vmem:[#allocation99_spill] sm:$0xff] }
 0x509   : > { %11887 = vst [vmem:[#allocation45_spill] sm:$0xff] %v9333_v8  ;;  %vm11891_vm14 = vcmp.eq.s32.totalorder %v11404_v11, %v11890_v5  ;;  %v3062_v29 = vsel %vm3060_vm12, %v3061_v17, %v3059_v27  ;;  %vm2913_vm2 = vcmp.eq.s32.totalorder %v11404_v11, %v2461_v2  ;;  %v2096_v23 = vadd.f32 1e-08, %v1974_v35  ;;  %v11898_v27 = vld [vmem:[#allocation35_spill] sm:$0xff]  ;;  %vm11921_vm12 = vmmov %vm11900_vm1 }
 0x50a   : > { %v2177_v40 = vsel %vm11891_vm14, %v9333_v8, 0.0  ;;  %v2701_v48 = vadd.s32 %v2700_v36, %v2698_v1  ;;  %v9347_v53 = vsel %vm2913_vm2, inf, %v11892_v7  ;;  %vm11896_vm4 = vcmp.eq.s32.totalorder %v11404_v11, %v11895_v9 }
 0x50b   : > { %v9336_v54 = vpop.eup %5725  ;;  %v3168_v22 = vadd.f32 1e-08, %v2950_v15  ;;  %v3363_v1 = vsel %vm11897_vm11, %v9347_v53, inf  ;;  %v3184_v35 = vadd.f32 1e-08, %v3062_v29  ;;  %5731 = vrcp.f32 %v2080_v25  ;;  %v11901_v15 = vld [vmem:[#allocation76_spill] sm:$0xff]  ;;  %vm11927_vm11 = vmmov %vm11900_vm1 }
 0x50c   : > { %11888 = vst [vmem:[#allocation49_spill] sm:$0xff] %v9336_v54  ;;  %v9339_v42 = vpop.eup %5727  ;;  %v2193_v18 = vsel %vm11896_vm4, %v9336_v54, 0.0  ;;  %vm2929_vm10 = vcmp.eq.s32.totalorder %v11404_v11, %v2701_v48  ;;  %3364 = vmin.xlane.f32.xlu0 %v3363_v1  ;;  %5733 = vrcp.f32 %v2096_v23  ;;  %v2444_v5 = vcvt.f32.s32 %v11901_v15  ;;  %v11909_v15 = vld [vmem:[#allocation101_spill] sm:$0xff] }
 0x50d   : > { %11889 = vst [vmem:[#allocation18_spill] sm:$0xff] %v9339_v42  ;;  %v9350_v26 = vsel %vm2913_vm2, %v9339_v42, %v2177_v40  ;;  %v9362_v17 = vsel %vm2929_vm10, inf, %v11898_v27  ;;  %5735 = vrcp.f32 %v3168_v22  ;;  %v11902_v40 = vld [vmem:[#allocation5_spill] sm:$0xff]  ;;  %v11906_v22 = vld [vmem:[#allocation100_spill] sm:$0xff]  ;;  %vm11910_vm3 = vcmp.eq.s32.totalorder %v11404_v11, %v11909_v15  ;;  %vm11924_vm2 = vmmov %vm11900_vm1 }
 0x50e   : > { %11893 = vst [vmem:[#allocation52_spill] sm:$0xff] %v9350_v26  ;;  %v9352_v32 = vpop.eup %5729  ;;  %v3411_v2 = vsel %vm11900_vm1, %v9362_v17, inf  ;;  %5737 = vrcp.f32 %v3184_v35  ;;  %v2684_v48 = vcvt.f32.s32 %v11902_v40  ;;  %v2445_v7 = vshll.u32 %v2444_v5, 16  ;;  %v11911_v40 = vld [vmem:[#allocation40_spill] sm:$0xff] }
 0x50f   : > { %11894 = vst [vmem:[#allocation130_spill] sm:$0xff] %v9352_v32  ;;  %v9365_v36 = vsel %vm2929_vm10, %v9352_v32, %v2193_v18  ;;  %3412 = vmin.xlane.f32.xlu1 %v3411_v2  ;;  %vm11907_vm15 = vcmp.eq.s32.totalorder %v11404_v11, %v11906_v22  ;;  %v11917_v22 = vld [vmem:[#allocation7_spill] sm:$0xff] }
 0x510   : > { %11899 = vst [vmem:[#allocation132_spill] sm:$0xff] %v9365_v36  ;;  %v2685_v27 = vshll.u32 %v2684_v48, 16 }
 0x517   : > { %v2442_v29 = vpop.xlane.xlu0 %2441 }
 0x518   : > { %v2443_v9 = vcvt.f32.s32 %v2442_v29  ;;  %v9371_v18 = vpop.eup %5731 }
 0x519   : > { %11903 = vst [vmem:[#allocation55_spill] sm:$0xff] %v9371_v18  ;;  %v9373_v36 = vpop.eup %5733  ;;  %v2176_v35 = vsel %vm11907_vm15, %v9371_v18, 0.0 }
 0x51a   : > { %v2682_v1 = vpop.xlane.xlu1 %2681  ;;  %v2446_v25 = vadd.s32 %v2445_v7, %v2443_v9  ;;  %11904 = vst [vmem:[#allocation19_spill] sm:$0xff] %v9373_v36  ;;  %v9375_v23 = vpop.eup %5735  ;;  %v2192_v5 = vsel %vm11910_vm3, %v9373_v36, 0.0  ;;  %v11914_v7 = vld [vmem:[#allocation41_spill] sm:$0xff] }
 0x51b   : > { %v2683_v26 = vcvt.f32.s32 %v2682_v1  ;;  %11905 = vst [vmem:[#allocation21_spill] sm:$0xff] %v9375_v23  ;;  %v9382_v2 = vpop.eup %5737  ;;  %v11925_v36 = vld [vmem:[#allocation109_spill] sm:$0xff] }
 0x51c   : > { %vm2912_vm9 = vcmp.eq.s32.totalorder %v11404_v11, %v2446_v25  ;;  %11908 = vst [vmem:[#allocation56_spill] sm:$0xff] %v9382_v2 }
 0x51d   : > { %v2686_v32 = vadd.s32 %v2685_v27, %v2683_v26  ;;  %v9389_v48 = vsel %vm2912_vm9, inf, %v11911_v40  ;;  %v9392_v26 = vsel %vm2912_vm9, %v9375_v23, %v2176_v35  ;;  %v11919_v40 = vld [vmem:[#allocation13_spill] sm:$0xff]  ;;  %vm11930_vm9 = vmmov %vm11900_vm1 }
 0x51e   : > { %11912 = vst [vmem:[#allocation20_spill] sm:$0xff] %v9392_v26  ;;  %v3360_v29 = vsel %vm11913_vm6, %v9389_v48, inf }
 0x51f   : > { %vm2928_vm5 = vcmp.eq.s32.totalorder %v11404_v11, %v2686_v32  ;;  %3361 = vmin.xlane.f32.xlu0 %v3360_v29 }
 0x520   : > { %v9398_v9 = vsel %vm2928_vm5, inf, %v11914_v7  ;;  %v9401_v1 = vsel %vm2928_vm5, %v9382_v2, %v2192_v5  ;;  %v9405_v25 = vpop.xlane.xlu0 %3406  ;;  %vm11932_vm5 = vmmov %vm11900_vm1 }
 0x521   : > { %11915 = vst [vmem:[#allocation58_spill] sm:$0xff] %v9401_v1  ;;  %v3408_v27 = vsel %vm11916_vm13, %v9398_v9, inf  ;;  %vm3471_vm7 = vcmp.eq.f32.partialorder %v11917_v22, %v9405_v25  ;;  %vm11934_vm13 = vmmov %vm11900_vm1  ;;  %5739 = vrsqrt.f32 %v9405_v25 }
 0x522   : > { %3409 = vmin.xlane.f32.xlu1 %v3408_v27  ;;  %v3503_v32 = vsel %vm3471_vm7, %v11404_v11, 64 }
 0x523   : > { %v9413_v15 = vsel %vm11918_vm8, %v3503_v32, 2147483647  ;;  %v11922_v32 = vld [vmem:[#allocation82_spill] sm:$0xff]  ;;  %vm11936_vm8 = vmmov %vm11900_vm1 }
 0x524   : > { %v9410_v35 = vpop.xlane.xlu0 %3403  ;;  %v3747_v5 = vshra.s32 %v9413_v15, 16 }
 0x525   : > { %vm3470_vm0 = vcmp.eq.f32.partialorder %v11919_v40, %v9410_v35  ;;  %5741 = vrsqrt.f32 %v9410_v35 }
 0x526   : > { %v3502_v29 = vsel %vm3470_vm0, %v11404_v11, 64  ;;  %v9419_v7 = vcvt.s32.f32 %v3747_v5 }
 0x527   : > { %v9424_v22 = vsel %vm11921_vm12, %v3502_v29, 2147483647  ;;  %vm11937_vm12 = vmmov %vm11900_vm1 }
 0x528   : > { %v9421_v27 = vpop.xlane.xlu0 %3400  ;;  %3750 = vmin.xlane.f32.xlu0 %v9419_v7  ;;  %v3732_v1 = vshra.s32 %v9424_v22, 16 }
 0x529   : > { %11920 = vst [vmem:[#allocation22_spill] sm:$0xff] %v9421_v27  ;;  %vm3469_vm14 = vcmp.eq.f32.partialorder %v11922_v32, %v9421_v27 }
 0x52a   : > { %v3501_v26 = vsel %vm3469_vm14, %v11404_v11, 64  ;;  %v9431_v2 = vcvt.s32.f32 %v3732_v1 }
 0x52b   : > { %v9436_v5 = vsel %vm11924_vm2, %v3501_v26, 2147483647 }
 0x52c   : > { %v9433_v40 = vpop.xlane.xlu0 %3397  ;;  %3735 = vmin.xlane.f32.xlu0 %v9431_v2  ;;  %v3717_v29 = vshra.s32 %v9436_v5, 16 }
 0x52d   : > { %11923 = vst [vmem:[#allocation136_spill] sm:$0xff] %v9433_v40  ;;  %vm3468_vm4 = vcmp.eq.f32.partialorder %v11925_v36, %v9433_v40 }
 0x52e   : > { %v3500_v23 = vsel %vm3468_vm4, %v11404_v11, 64  ;;  %v9443_v18 = vcvt.s32.f32 %v3717_v29  ;;  %vm11941_vm4 = vmmov %vm11900_vm1 }
 0x52f   : > { %v9448_v1 = vsel %vm11927_vm11, %v3500_v23, 2147483647  ;;  %vm11942_vm11 = vmmov %vm11900_vm1 }
 0x530   : > { %v9445_v32 = vpop.xlane.xlu0 %3394  ;;  %3720 = vmin.xlane.f32.xlu0 %v9443_v18  ;;  %v3702_v26 = vshra.s32 %v9448_v1, 16 }
 0x531   : > { %11926 = vst [vmem:[#allocation60_spill] sm:$0xff] %v9445_v32  ;;  %vm3467_vm10 = vcmp.eq.f32.partialorder %v8821_v57, %v9445_v32 }
 0x532   : > { %v3499_v54 = vsel %vm3467_vm10, %v11404_v11, 64  ;;  %v9455_v42 = vcvt.s32.f32 %v3702_v26 }
 0x533   : > { %v9458_v36 = vsel %vm11900_vm1, %v3499_v54, 2147483647 }
 0x534   : > { %v9460_v29 = vpop.xlane.xlu0 %3391  ;;  %v3687_v8 = vshra.s32 %v9458_v36, 16  ;;  %3705 = vmin.xlane.f32.xlu0 %v9455_v42 }
 0x535   : > { %11928 = vst [vmem:[#allocation23_spill] sm:$0xff] %v9460_v29  ;;  %vm3466_vm15 = vcmp.eq.f32.partialorder %v8844_v16, %v9460_v29 }
 0x536   : > { %v9464_v23 = vcvt.s32.f32 %v3687_v8  ;;  %v3498_v57 = vsel %vm3466_vm15, %v11404_v11, 64 }
 0x537   : > { %v9473_v54 = vsel %vm11930_vm9, %v3498_v57, 2147483647  ;;  %vm11944_vm9 = vmmov %vm11900_vm1 }
 0x538   : > { %3690 = vmin.xlane.f32.xlu0 %v9464_v23  ;;  %v3672_v13 = vshra.s32 %v9473_v54, 16 }
 0x539   : > { %v9470_v26 = vpop.xlane.xlu0 %3388 }
 0x53a   : > { %11929 = vst [vmem:[#allocation90_spill] sm:$0xff] %v9470_v26  ;;  %vm3465_vm3 = vcmp.eq.f32.partialorder %v8867_v20, %v9470_v26  ;;  %v9479_v41 = vcvt.s32.f32 %v3672_v13 }
 0x53b   : > { %v3497_v8 = vsel %vm3465_vm3, %v11404_v11, 64 }
 0x53c   : > { %v9484_v16 = vsel %vm11932_vm5, %v3497_v8, 2147483647  ;;  %3675 = vmin.xlane.f32.xlu0 %v9479_v41 }
 0x53d   : > { %v3657_v47 = vshra.s32 %v9484_v16, 16 }
 0x53e   : > { %v9481_v30 = vpop.xlane.xlu0 %3385 }
 0x53f   : > { %11931 = vst [vmem:[#allocation137_spill] sm:$0xff] %v9481_v30  ;;  %vm3464_vm6 = vcmp.eq.f32.partialorder %v8890_v44, %v9481_v30  ;;  %v9491_v34 = vcvt.s32.f32 %v3657_v47 }
 0x540   : > { %v3496_v57 = vsel %vm3464_vm6, %v11404_v11, 64  ;;  %vm11948_vm6 = vmmov %vm11900_vm1 }
 0x541   : > { %v9496_v13 = vsel %vm11934_vm13, %v3496_v57, 2147483647  ;;  %3660 = vmin.xlane.f32.xlu0 %v9491_v34  ;;  %vm11949_vm13 = vmmov %vm11900_vm1 }
 0x542   : > { %v9493_v20 = vpop.xlane.xlu0 %3382  ;;  %v3642_v8 = vshra.s32 %v9496_v13, 16 }
 0x543   : > { %11933 = vst [vmem:[#allocation62_spill] sm:$0xff] %v9493_v20  ;;  %vm3463_vm7 = vcmp.eq.f32.partialorder %v8916_v31, %v9493_v20 }
 0x544   : > { %v3495_v10 = vsel %vm3463_vm7, %v11404_v11, 64  ;;  %v9503_v0 = vcvt.s32.f32 %v3642_v8 }
 0x545   : > { %v9508_v47 = vsel %vm11936_vm8, %v3495_v10, 2147483647  ;;  %vm11951_vm8 = vmmov %vm11900_vm1 }
 0x546   : > { %v9505_v44 = vpop.xlane.xlu0 %3379  ;;  %3645 = vmin.xlane.f32.xlu0 %v9503_v0  ;;  %v3627_v57 = vshra.s32 %v9508_v47, 16 }
 0x547   : > { %11935 = vst [vmem:[#allocation24_spill] sm:$0xff] %v9505_v44  ;;  %vm3462_vm0 = vcmp.eq.f32.partialorder %v8946_v24, %v9505_v44 }
 0x548   : > { %v3494_v43 = vsel %vm3462_vm0, %v11404_v11, 64  ;;  %v9515_v58 = vcvt.s32.f32 %v3627_v57 }
 0x549   : > { %v9518_v31 = vsel %vm11937_vm12, %v3494_v43, 2147483647  ;;  %vm11953_vm12 = vmmov %vm11900_vm1 }
 0x54a   : > { %v3612_v8 = vshra.s32 %v9518_v31, 16  ;;  %3630 = vmin.xlane.f32.xlu0 %v9515_v58 }
 0x54c   : > { %v9522_v10 = vpop.xlane.xlu1 %3454  ;;  %v9524_v12 = vpop.xlane.xlu0 %3376  ;;  %v9526_v37 = vcvt.s32.f32 %v3612_v8 }
 0x54d   : > { %11938 = vst [vmem:[#allocation25_spill] sm:$0xff] %v9522_v10  ;;  %11939 = vst [vmem:[#allocation91_spill] sm:$0xff] %v9524_v12  ;;  %vm3461_vm14 = vcmp.eq.f32.partialorder %v8971_v55, %v9524_v12  ;;  %vm3487_vm2 = vcmp.eq.f32.partialorder %v8978_v59, %v9522_v10 }
 0x54e   : > { %3615 = vmin.xlane.f32.xlu0 %v9526_v37  ;;  %v3493_v24 = vsel %vm3461_vm14, %v11404_v11, 64  ;;  %v3519_v43 = vsel %vm3487_vm2, %v11404_v11, 64  ;;  %vm11955_vm2 = vmmov %vm11900_vm1 }
 0x54f   : > { %v9538_v60 = vsel %vm11941_vm4, %v3493_v24, 2147483647  ;;  %v9541_v8 = vsel %vm11942_vm11, %v3519_v43, 2147483647  ;;  %vm11956_vm11 = vmmov %vm11900_vm1 }
 0x550   : > { %v3597_v46 = vshra.s32 %v9538_v60, 16  ;;  %v3987_v44 = vshra.s32 %v9541_v8, 16 }
 0x552   : > { %v9535_v57 = vpop.xlane.xlu1 %3451  ;;  %v9547_v55 = vcvt.s32.f32 %v3597_v46  ;;  %v9552_v12 = vcvt.s32.f32 %v3987_v44 }
 0x553   : > { %11940 = vst [vmem:[#allocation92_spill] sm:$0xff] %v9535_v57  ;;  %vm3486_vm10 = vcmp.eq.f32.partialorder %v9002_v50, %v9535_v57 }
 0x554   : > { %v3518_v10 = vsel %vm3486_vm10, %v11404_v11, 64  ;;  %3600 = vmin.xlane.f32.xlu0 %v9547_v55  ;;  %3990 = vmin.xlane.f32.xlu1 %v9552_v12 }
 0x555   : > { %v9557_v24 = vsel %vm11900_vm1, %v3518_v10, 2147483647 }
 0x556   : > { %v3972_v50 = vshra.s32 %v9557_v24, 16 }
 0x557   : > { %v9549_v59 = vpop.xlane.xlu1 %3448 }
 0x558   : > { %11943 = vst [vmem:[#allocation27_spill] sm:$0xff] %v9549_v59  ;;  %vm3485_vm15 = vcmp.eq.f32.partialorder %v9027_v3, %v9549_v59  ;;  %v9566_v57 = vcvt.s32.f32 %v3972_v50 }
 0x559   : > { %v3517_v46 = vsel %vm3485_vm15, %v11404_v11, 64  ;;  %vm11960_vm15 = vmmov %vm11955_vm2 }
 0x55a   : > { %v9564_v43 = vsel %vm11944_vm9, %v3517_v46, 2147483647  ;;  %3975 = vmin.xlane.f32.xlu1 %v9566_v57 }
 0x55b   : > { %v3957_v38 = vshra.s32 %v9564_v43, 16 }
 0x55d   : > { %v9568_v44 = vpop.xlane.xlu1 %3445  ;;  %v9572_v10 = vcvt.s32.f32 %v3957_v38 }
 0x55e   : > { %11945 = vst [vmem:[#allocation78_spill] sm:$0xff] %v9568_v44  ;;  %vm3484_vm3 = vcmp.eq.f32.partialorder %v9057_v49, %v9568_v44 }
 0x55f   : > { %v3516_v46 = vsel %vm3484_vm3, %v11404_v11, 64  ;;  %3960 = vmin.xlane.f32.xlu1 %v9572_v10  ;;  %vm11962_vm3 = vmmov %vm11955_vm2 }
 0x560   : > { %v9574_v28 = vpop.xlane.xlu0 %3373  ;;  %v9585_v50 = vsel %vm11948_vm6, %v3516_v46, 2147483647 }
 0x561   : > { %11946 = vst [vmem:[#allocation93_spill] sm:$0xff] %v9574_v28  ;;  %vm3460_vm5 = vcmp.eq.f32.partialorder %v9085_v52, %v9574_v28  ;;  %v3942_v59 = vshra.s32 %v9585_v50, 16 }
 0x562   : > { %v9578_v3 = vpop.xlane.xlu1 %3442  ;;  %v3492_v38 = vsel %vm3460_vm5, %v11404_v11, 64  ;;  %vm11964_vm5 = vmmov %vm11955_vm2 }
 0x563   : > { %11947 = vst [vmem:[#allocation26_spill] sm:$0xff] %v9578_v3  ;;  %v9590_v21 = vsel %vm11949_vm13, %v3492_v38, 2147483647  ;;  %vm3483_vm7 = vcmp.eq.f32.partialorder %v9099_v61, %v9578_v3  ;;  %v9598_v28 = vcvt.s32.f32 %v3942_v59  ;;  %vm11968_vm13 = vmmov %vm11955_vm2 }
 0x564   : > { %v3582_v44 = vshra.s32 %v9590_v21, 16  ;;  %v3515_v52 = vsel %vm3483_vm7, %v11404_v11, 64 }
 0x565   : > { %3945 = vmin.xlane.f32.xlu1 %v9598_v28  ;;  %v9604_v20 = vsel %vm11951_vm8, %v3515_v52, 2147483647  ;;  %vm11970_vm8 = vmmov %vm11955_vm2 }
 0x566   : > { %v9594_v49 = vpop.xlane.xlu1 %3439  ;;  %v9600_v46 = vcvt.s32.f32 %v3582_v44  ;;  %v3927_v61 = vshra.s32 %v9604_v20, 16 }
 0x567   : > { %11950 = vst [vmem:[#allocation94_spill] sm:$0xff] %v9594_v49  ;;  %vm3482_vm0 = vcmp.eq.f32.partialorder %v9116_v14, %v9594_v49 }
 0x568   : > { %3585 = vmin.xlane.f32.xlu0 %v9600_v46  ;;  %v3514_v3 = vsel %vm3482_vm0, %v11404_v11, 64  ;;  %v9613_v59 = vcvt.s32.f32 %v3927_v61 }
 0x569   : > { %v9616_v44 = vsel %vm11953_vm12, %v3514_v3, 2147483647  ;;  %vm11973_vm12 = vmmov %vm11955_vm2 }
 0x56a   : > { %v9610_v38 = vpop.xlane.xlu1 %3436  ;;  %v3912_v30 = vshra.s32 %v9616_v44, 16  ;;  %3930 = vmin.xlane.f32.xlu1 %v9613_v59 }
 0x56b   : > { %11952 = vst [vmem:[#allocation140_spill] sm:$0xff] %v9610_v38  ;;  %vm3481_vm14 = vcmp.eq.f32.partialorder %v9133_v62, %v9610_v38 }
 0x56c   : > { %v3513_v14 = vsel %vm3481_vm14, %v11404_v11, 64  ;;  %v9623_v52 = vcvt.s32.f32 %v3912_v30 }
 0x56d   : > { %v9628_v26 = vsel %vm11955_vm2, %v3513_v14, 2147483647 }
 0x56e   : > { %v3897_v61 = vshra.s32 %v9628_v26, 16  ;;  %3915 = vmin.xlane.f32.xlu1 %v9623_v52 }
 0x570   : > { %v9625_v49 = vpop.xlane.xlu1 %3433  ;;  %v9635_v3 = vcvt.s32.f32 %v3897_v61 }
 0x571   : > { %11954 = vst [vmem:[#allocation28_spill] sm:$0xff] %v9625_v49  ;;  %vm3480_vm4 = vcmp.eq.f32.partialorder %v9159_v51, %v9625_v49 }
 0x572   : > { %v3512_v62 = vsel %vm3480_vm4, %v11404_v11, 64  ;;  %3900 = vmin.xlane.f32.xlu1 %v9635_v3  ;;  %vm11976_vm4 = vmmov %vm11962_vm3 }
 0x573   : > { %v9638_v38 = vsel %vm11956_vm11, %v3512_v62, 2147483647  ;;  %vm11977_vm11 = vmmov %vm11962_vm3 }
 0x574   : > { %v3882_v29 = vshra.s32 %v9638_v38, 16 }
 0x575   : > { %v9640_v30 = vpop.xlane.xlu1 %3430 }
 0x576   : > { %11957 = vst [vmem:[#allocation141_spill] sm:$0xff] %v9640_v30  ;;  %v9644_v14 = vcvt.s32.f32 %v3882_v29  ;;  %vm3479_vm10 = vcmp.eq.f32.partialorder %v9179_v39, %v9640_v30 }
 0x577   : > { %v3511_v61 = vsel %vm3479_vm10, %v11404_v11, 64 }
 0x578   : > { %v9646_v32 = vpop.xlane.xlu0 %3370  ;;  %3885 = vmin.xlane.f32.xlu1 %v9644_v14  ;;  %v9657_v62 = vsel %vm11960_vm15, %v3511_v61, 2147483647  ;;  %vm11983_vm15 = vmmov %vm11962_vm3 }
 0x579   : > { %11958 = vst [vmem:[#allocation64_spill] sm:$0xff] %v9646_v32  ;;  %vm3459_vm1 = vcmp.eq.f32.partialorder %v9203_v6, %v9646_v32  ;;  %v3867_v49 = vshra.s32 %v9657_v62, 16 }
 0x57a   : > { %v3491_v29 = vsel %vm3459_vm1, %v11404_v11, 64 }
 0x57b   : > { %v9650_v51 = vpop.xlane.xlu1 %3427  ;;  %v9666_v30 = vsel %vm11962_vm3, %v3491_v29, 2147483647  ;;  %v9669_v27 = vcvt.s32.f32 %v3867_v49 }
 0x57c   : > { %11959 = vst [vmem:[#allocation67_spill] sm:$0xff] %v9650_v51  ;;  %vm3478_vm9 = vcmp.eq.f32.partialorder %v9218_v4, %v9650_v51  ;;  %v3567_v6 = vshra.s32 %v9666_v30, 16 }
 0x57d   : > { %v3510_v40 = vsel %vm3478_vm9, %v11404_v11, 64  ;;  %11963 = vst [vmem:[#allocation95_spill] sm:$0xff] %v9669_v27  ;;  %3870 = vmin.xlane.f32.xlu1 %v9669_v27  ;;  %vm11984_vm9 = vmmov %vm11962_vm3 }
 0x57e   : > { %v9673_v61 = vsel %vm11964_vm5, %v3510_v40, 2147483647  ;;  %v9678_v4 = vcvt.s32.f32 %v3567_v6 }
 0x57f   : > { %v9663_v39 = vpop.xlane.xlu1 %3424  ;;  %v3852_v51 = vshra.s32 %v9673_v61, 16 }
 0x580   : > { %11961 = vst [vmem:[#allocation29_spill] sm:$0xff] %v9663_v39  ;;  %vm3477_vm6 = vcmp.eq.f32.partialorder %v9239_v19, %v9663_v39  ;;  %11965 = vst [vmem:[#allocation30_spill] sm:$0xff] %v9678_v4  ;;  %3570 = vmin.xlane.f32.xlu0 %v9678_v4 }
 0x581   : > { %v3509_v32 = vsel %vm3477_vm6, %v11404_v11, 64  ;;  %v9685_v49 = vcvt.s32.f32 %v3852_v51  ;;  %vm11989_vm6 = vmmov %vm11976_vm4 }
 0x582   : > { %v9688_v40 = vsel %vm11968_vm13, %v3509_v32, 2147483647  ;;  %vm11990_vm13 = vmmov %vm11976_vm4 }
 0x583   : > { %v9681_v29 = vpop.xlane.xlu1 %3421  ;;  %11967 = vst [vmem:[#allocation96_spill] sm:$0xff] %v9685_v49  ;;  %v3837_v19 = vshra.s32 %v9688_v40, 16  ;;  %3855 = vmin.xlane.f32.xlu1 %v9685_v49 }
 0x584   : > { %11966 = vst [vmem:[#allocation105_spill] sm:$0xff] %v9681_v29  ;;  %vm3476_vm7 = vcmp.eq.f32.partialorder %v9258_v63, %v9681_v29 }
 0x585   : > { %v3508_v6 = vsel %vm3476_vm7, %v11404_v11, 64  ;;  %v9700_v4 = vcvt.s32.f32 %v3837_v19 }
 0x586   : > { %v9698_v27 = vsel %vm11970_vm8, %v3508_v6, 2147483647 }
 0x587   : > { %v9695_v39 = vpop.xlane.xlu1 %3418  ;;  %v3822_v51 = vshra.s32 %v9698_v27, 16  ;;  %3840 = vmin.xlane.f32.xlu1 %v9700_v4 }
 0x588   : > { %11969 = vst [vmem:[#allocation97_spill] sm:$0xff] %v9695_v39  ;;  %vm3475_vm0 = vcmp.eq.f32.partialorder %v9274_v56, %v9695_v39 }
 0x589   : > { %v9706_v63 = vcvt.s32.f32 %v3822_v51  ;;  %v3507_v29 = vsel %vm3475_vm0, %v11404_v11, 64 }
 0x58a   : > { %v9708_v32 = vpop.xlane.xlu0 %3367  ;;  %v9712_v49 = vsel %vm11973_vm12, %v3507_v29, 2147483647 }
 0x58b   : > { %11971 = vst [vmem:[#allocation31_spill] sm:$0xff] %v9706_v63  ;;  %11972 = vst [vmem:[#allocation77_spill] sm:$0xff] %v9708_v32  ;;  %v9714_v6 = vpop.xlane.xlu1 %3415  ;;  %3825 = vmin.xlane.f32.xlu1 %v9706_v63  ;;  %v3807_v19 = vshra.s32 %v9712_v49, 16  ;;  %vm3458_vm14 = vcmp.eq.f32.partialorder %v9296_v45, %v9708_v32 }
 0x58c   : > { %11974 = vst [vmem:[#allocation74_spill] sm:$0xff] %v9712_v49  ;;  %11975 = vst [vmem:[#allocation32_spill] sm:$0xff] %v9714_v6  ;;  %v3490_v51 = vsel %vm3458_vm14, %v11404_v11, 64  ;;  %vm3474_vm2 = vcmp.eq.f32.partialorder %v9307_v33, %v9714_v6 }
 0x58d   : > { %v9720_v56 = vcvt.s32.f32 %v3807_v19  ;;  %v9726_v39 = vsel %vm11976_vm4, %v3490_v51, 2147483647  ;;  %v3506_v29 = vsel %vm3474_vm2, %v11404_v11, 64 }
 0x58e   : > { %v3552_v63 = vshra.s32 %v9726_v39, 16  ;;  %v9732_v49 = vsel %vm11977_vm11, %v3506_v29, 2147483647 }
 0x58f   : > { %3810 = vmin.xlane.f32.xlu1 %v9720_v56  ;;  %11978 = vst [vmem:[#allocation103_spill] sm:$0xff] %v9732_v49  ;;  %v3792_v45 = vshra.s32 %v9732_v49, 16 }
 0x590   : > { %v9735_v19 = vcvt.s32.f32 %v3552_v63 }
 0x591   : > { %v9737_v32 = vcvt.s32.f32 %v3792_v45 }
 0x592   : > { %11979 = vst [vmem:[#allocation135_spill] sm:$0xff] %v9735_v19  ;;  %3555 = vmin.xlane.f32.xlu0 %v9735_v19 }
 0x593   : > { %11980 = vst [vmem:[#allocation98_spill] sm:$0xff] %v9737_v32  ;;  %3795 = vmin.xlane.f32.xlu1 %v9737_v32 }
 0x595   : > { %v9741_v33 = vpop.xlane.xlu0 %3364 }
 0x596   : > { %11981 = vst [vmem:[#allocation33_spill] sm:$0xff] %v9741_v33  ;;  %vm3457_vm10 = vcmp.eq.f32.partialorder %v9347_v53, %v9741_v33 }
 0x597   : > { %v3489_v29 = vsel %vm3457_vm10, %v11404_v11, 64 }
 0x598   : > { %v9743_v51 = vpop.xlane.xlu1 %3412  ;;  %v9751_v63 = vsel %vm11983_vm15, %v3489_v29, 2147483647 }
 0x599   : > { %11982 = vst [vmem:[#allocation99_spill] sm:$0xff] %v9743_v51  ;;  %vm3473_vm1 = vcmp.eq.f32.partialorder %v9362_v17, %v9743_v51  ;;  %v3537_v6 = vshra.s32 %v9751_v63, 16 }
 0x59a   : > { %v3505_v45 = vsel %vm3473_vm1, %v11404_v11, 64 }
 0x59b   : > { %v9756_v32 = vsel %vm11984_vm9, %v3505_v45, 2147483647  ;;  %v9759_v49 = vcvt.s32.f32 %v3537_v6 }
 0x59c   : > { %v3777_v19 = vshra.s32 %v9756_v32, 16 }
 0x59d   : > { %11985 = vst [vmem:[#allocation35_spill] sm:$0xff] %v9759_v49  ;;  %3540 = vmin.xlane.f32.xlu0 %v9759_v49  ;;  %v3746_v49 = vand.u32 65535, %v9413_v15 }
 0x59e   : > { %v9761_v53 = vcvt.s32.f32 %v3777_v19 }
 0x5a0   : > { %11986 = vst [vmem:[#allocation76_spill] sm:$0xff] %v9761_v53  ;;  %3780 = vmin.xlane.f32.xlu1 %v9761_v53 }
 0x5a8   : > { %v9765_v17 = vpop.xlane.xlu0 %3361 }
 0x5a9   : > { %11987 = vst [vmem:[#allocation5_spill] sm:$0xff] %v9765_v17  ;;  %vm3456_vm3 = vcmp.eq.f32.partialorder %v9389_v48, %v9765_v17 }
 0x5aa   : > { %v3488_v45 = vsel %vm3456_vm3, %v11404_v11, 64 }
 0x5ab   : > { %v9767_v29 = vpop.xlane.xlu1 %3409  ;;  %v9775_v6 = vsel %vm11989_vm6, %v3488_v45, 2147483647  ;;  %v3748_v45 = vcvt.s32.f32 %v3746_v49 }
 0x5ac   : > { %11988 = vst [vmem:[#allocation100_spill] sm:$0xff] %v9767_v29  ;;  %vm3472_vm5 = vcmp.eq.f32.partialorder %v9398_v9, %v9767_v29  ;;  %v3522_v51 = vshra.s32 %v9775_v6, 16  ;;  %v3731_v29 = vand.u32 65535, %v9424_v22  ;;  %v3701_v22 = vand.u32 65535, %v9448_v1 }
 0x5ad   : > { %v3504_v19 = vsel %vm3472_vm5, %v11404_v11, 64 }
 0x5ae   : > { %v9780_v33 = vsel %vm11990_vm13, %v3504_v19, 2147483647  ;;  %v9784_v48 = vcvt.s32.f32 %v3522_v51  ;;  %v3733_v15 = vcvt.s32.f32 %v3731_v29  ;;  %v3716_v51 = vand.u32 65535, %v9436_v5 }
 0x5af   : > { %v3762_v53 = vshra.s32 %v9780_v33, 16  ;;  %v3703_v29 = vcvt.s32.f32 %v3701_v22  ;;  %v3686_v5 = vand.u32 65535, %v9458_v36  ;;  %v3656_v36 = vand.u32 65535, %v9484_v16 }
 0x5b0   : > { %11991 = vst [vmem:[#allocation101_spill] sm:$0xff] %v9784_v48  ;;  %3525 = vmin.xlane.f32.xlu0 %v9784_v48  ;;  %v3718_v49 = vcvt.s32.f32 %v3716_v51  ;;  %v3626_v16 = vand.u32 65535, %v9508_v47 }
 0x5b1   : > { %v9786_v17 = vcvt.s32.f32 %v3762_v53  ;;  %v9789_v9 = vpop.xlane.xlu0 %3750  ;;  %v3658_v22 = vcvt.s32.f32 %v3656_v36 }
 0x5b2   : > { %vm3752_vm7 = vcmp.eq.f32.partialorder %v9419_v7, %v9789_v9 }
 0x5b3   : > { %3765 = vmin.xlane.f32.xlu1 %v9786_v17  ;;  %v3753_v19 = vsel %vm3752_vm7, %v3748_v45, inf }
 0x5b4   : > { %3754 = vmin.xlane.f32.xlu0 %v3753_v19 }
 0x5b5   : > { %v9795_v11 = vpop.xlane.xlu0 %3735 }
 0x5b6   : > { %vm3737_vm8 = vcmp.eq.f32.partialorder %v9431_v2, %v9795_v11 }
 0x5b7   : > { %v3738_v53 = vsel %vm3737_vm8, %v3733_v15, inf  ;;  %v3688_v15 = vcvt.s32.f32 %v3686_v5 }
 0x5b8   : > { %3739 = vmin.xlane.f32.xlu0 %v3738_v53 }
 0x5b9   : > { %v9800_v48 = vpop.xlane.xlu0 %3720 }
 0x5ba   : > { %vm3722_vm0 = vcmp.eq.f32.partialorder %v9443_v18, %v9800_v48  ;;  %v3671_v18 = vand.u32 65535, %v9473_v54 }
 0x5bb   : > { %v3723_v7 = vsel %vm3722_vm0, %v3718_v49, inf }
 0x5bc   : > { %3724 = vmin.xlane.f32.xlu0 %v3723_v7  ;;  %v3673_v53 = vcvt.s32.f32 %v3671_v18  ;;  %v3641_v7 = vand.u32 65535, %v9496_v13  ;;  %v3611_v13 = vand.u32 65535, %v9518_v31  ;;  %v3986_v18 = vand.u32 65535, %v9541_v8 }
 0x5bd   : > { %v9805_v45 = vpop.xlane.xlu0 %3705 }
 0x5be   : > { %vm3707_vm12 = vcmp.eq.f32.partialorder %v9455_v42, %v9805_v45  ;;  %v3988_v36 = vcvt.s32.f32 %v3986_v18 }
 0x5bf   : > { %v3708_v2 = vsel %vm3707_vm12, %v3703_v29, inf  ;;  %v3643_v29 = vcvt.s32.f32 %v3641_v7  ;;  %v3956_v7 = vand.u32 65535, %v9564_v43 }
 0x5c0   : > { %3709 = vmin.xlane.f32.xlu0 %v3708_v2  ;;  %v3628_v2 = vcvt.s32.f32 %v3626_v16  ;;  %v3581_v16 = vand.u32 65535, %v9590_v21 }
 0x5c1   : > { %v9810_v19 = vpop.xlane.xlu0 %3690 }
 0x5c2   : > { %vm3692_vm14 = vcmp.eq.f32.partialorder %v9464_v23, %v9810_v19 }
 0x5c3   : > { %v3693_v1 = vsel %vm3692_vm14, %v3688_v15, inf }
 0x5c4   : > { %3694 = vmin.xlane.f32.xlu0 %v3693_v1  ;;  %v3613_v1 = vcvt.s32.f32 %v3611_v13  ;;  %v3926_v13 = vand.u32 65535, %v9604_v20 }
 0x5c5   : > { %v9815_v51 = vpop.xlane.xlu0 %3675 }
 0x5c6   : > { %vm3677_vm2 = vcmp.eq.f32.partialorder %v9479_v41, %v9815_v51  ;;  %v3928_v21 = vcvt.s32.f32 %v3926_v13 }
 0x5c7   : > { %v3678_v42 = vsel %vm3677_vm2, %v3673_v53, inf }
 0x5c8   : > { %3679 = vmin.xlane.f32.xlu0 %v3678_v42 }
 0x5ca   : > { %v9820_v49 = vpop.xlane.xlu0 %3660 }
 0x5cb   : > { %vm3662_vm4 = vcmp.eq.f32.partialorder %v9491_v34, %v9820_v49 }
 0x5cc   : > { %v3663_v23 = vsel %vm3662_vm4, %v3658_v22, inf }
 0x5cd   : > { %3664 = vmin.xlane.f32.xlu0 %v3663_v23 }
 0x5cf   : > { %v9825_v54 = vpop.xlane.xlu0 %3645 }
 0x5d0   : > { %vm3647_vm11 = vcmp.eq.f32.partialorder %v9503_v0, %v9825_v54  ;;  %v3596_v0 = vand.u32 65535, %v9538_v60 }
 0x5d1   : > { %v3648_v41 = vsel %vm3647_vm11, %v3643_v29, inf  ;;  %v3958_v29 = vcvt.s32.f32 %v3956_v7  ;;  %v11998_v7 = vld [vmem:[#allocation95_spill] sm:$0xff] }
 0x5d2   : > { %3649 = vmin.xlane.f32.xlu0 %v3648_v41  ;;  %v3598_v31 = vcvt.s32.f32 %v3596_v0  ;;  %v3896_v0 = vand.u32 65535, %v9628_v26 }
 0x5d3   : > { %v9830_v5 = vpop.xlane.xlu0 %3630 }
 0x5d4   : > { %vm3632_vm10 = vcmp.eq.f32.partialorder %v9515_v58, %v9830_v5 }
 0x5d5   : > { %v3633_v34 = vsel %vm3632_vm10, %v3628_v2, inf  ;;  %v3583_v2 = vcvt.s32.f32 %v3581_v16  ;;  %v3836_v16 = vand.u32 65535, %v9688_v40 }
 0x5d6   : > { %3634 = vmin.xlane.f32.xlu0 %v3633_v34 }
 0x5d7   : > { %v9835_v15 = vpop.xlane.xlu0 %3615 }
 0x5d8   : > { %vm3617_vm1 = vcmp.eq.f32.partialorder %v9526_v37, %v9835_v15  ;;  %v3971_v37 = vand.u32 65535, %v9557_v24  ;;  %v3941_v24 = vand.u32 65535, %v9585_v50 }
 0x5d9   : > { %v3618_v47 = vsel %vm3617_vm1, %v3613_v1, inf  ;;  %v3911_v1 = vand.u32 65535, %v9616_v44  ;;  %v3881_v44 = vand.u32 65535, %v9638_v38  ;;  %vm4139_vm1 = vcmp.eq.f32.partialorder %v9405_v25, inf }
 0x5da   : > { %3619 = vmin.xlane.f32.xlu0 %v3618_v47  ;;  %v3973_v8 = vcvt.s32.f32 %v3971_v37  ;;  %v3943_v43 = vcvt.s32.f32 %v3941_v24  ;;  %v3566_v37 = vand.u32 65535, %v9666_v30 }
 0x5db   : > { %v3913_v20 = vcvt.s32.f32 %v3911_v1  ;;  %v12005_v1 = vld [vmem:[#allocation60_spill] sm:$0xff] }
 0x5dd   : > { %v9841_v53 = vpop.xlane.xlu0 %3600  ;;  %v9845_v58 = vpop.xlane.xlu1 %3990 }
 0x5de   : > { %vm3602_vm15 = vcmp.eq.f32.partialorder %v9547_v55, %v9841_v53  ;;  %vm3992_vm9 = vcmp.eq.f32.partialorder %v9552_v12, %v9845_v58 }
 0x5df   : > { %v3603_v42 = vsel %vm3602_vm15, %v3598_v31, inf  ;;  %v3993_v22 = vsel %vm3992_vm9, %v3988_v36, inf  ;;  %v3898_v31 = vcvt.s32.f32 %v3896_v0  ;;  %vm4132_vm9 = vcmp.eq.f32.partialorder %v9410_v35, inf }
 0x5e0   : > { %3604 = vmin.xlane.f32.xlu0 %v3603_v42  ;;  %3994 = vmin.xlane.f32.xlu1 %v3993_v22  ;;  %v3883_v42 = vcvt.s32.f32 %v3881_v44  ;;  %v3851_v22 = vand.u32 65535, %v9673_v61  ;;  %v12002_v61 = vld [vmem:[#allocation96_spill] sm:$0xff] }
 0x5e2   : > { %v3853_v24 = vcvt.s32.f32 %v3851_v22 }
 0x5e3   : > { %v9850_v60 = vpop.xlane.xlu1 %3975 }
 0x5e4   : > { %vm3977_vm3 = vcmp.eq.f32.partialorder %v9566_v57, %v9850_v60 }
 0x5e5   : > { %v3978_v55 = vsel %vm3977_vm3, %v3973_v8, inf  ;;  %v11997_v8 = vld [vmem:[#allocation22_spill] sm:$0xff]  ;;  %vm4141_vm3 = vcmp.eq.f32.partialorder %v9405_v25, 0.0 }
 0x5e6   : > { %3979 = vmin.xlane.f32.xlu1 %v3978_v55  ;;  %5743 = vrsqrt.f32 %v11997_v8 }
 0x5e8   : > { %v9855_v23 = vpop.xlane.xlu1 %3960 }
 0x5e9   : > { %vm3962_vm5 = vcmp.eq.f32.partialorder %v9572_v10, %v9855_v23 }
 0x5ea   : > { %v3963_v12 = vsel %vm3962_vm5, %v3958_v29, inf  ;;  %v12000_v29 = vld [vmem:[#allocation30_spill] sm:$0xff]  ;;  %vm4134_vm5 = vcmp.eq.f32.partialorder %v9410_v35, 0.0 }
 0x5eb   : > { %3964 = vmin.xlane.f32.xlu1 %v3963_v12 }
 0x5ee   : > { %v9861_v41 = vpop.xlane.xlu1 %3945 }
 0x5ef   : > { %vm3947_vm6 = vcmp.eq.f32.partialorder %v9598_v28, %v9861_v41 }
 0x5f0   : > { %v3948_v34 = vsel %vm3947_vm6, %v3943_v43, inf  ;;  %v12003_v43 = vld [vmem:[#allocation136_spill] sm:$0xff]  ;;  %vm4125_vm6 = vcmp.eq.f32.partialorder %v11997_v8, inf }
 0x5f1   : > { %v9865_v57 = vpop.xlane.xlu0 %3585  ;;  %3949 = vmin.xlane.f32.xlu1 %v3948_v34  ;;  %5745 = vrsqrt.f32 %v12003_v43  ;;  %v3838_v34 = vcvt.s32.f32 %v3836_v16 }
 0x5f2   : > { %vm3587_vm13 = vcmp.eq.f32.partialorder %v9600_v46, %v9865_v57  ;;  %5747 = vrsqrt.f32 %v12005_v1 }
 0x5f3   : > { %v3588_v10 = vsel %vm3587_vm13, %v3583_v2, inf  ;;  %v9870_v50 = vpop.xlane.xlu1 %3930 }
 0x5f4   : > { %3589 = vmin.xlane.f32.xlu0 %v3588_v10  ;;  %11992 = vst [vmem:[#allocation40_spill] sm:$0xff] %v9870_v50  ;;  %vm3932_vm7 = vcmp.eq.f32.partialorder %v9613_v59, %v9870_v50  ;;  %v3821_v10 = vand.u32 65535, %v9698_v27 }
 0x5f5   : > { %v3933_v28 = vsel %vm3932_vm7, %v3928_v21, inf  ;;  %v5740_v21 = vpop.eup %5739 }
 0x5f6   : > { %3934 = vmin.xlane.f32.xlu1 %v3933_v28  ;;  %v5742_v28 = vpop.eup %5741  ;;  %v3823_v0 = vcvt.s32.f32 %v3821_v10  ;;  %v4138_v44 = vmul.f32 %v5740_v21, %v9405_v25 }
 0x5f7   : > { %v9875_v47 = vpop.xlane.xlu1 %3915  ;;  %v5744_v27 = vpop.eup %5743 }
 0x5f8   : > { %11993 = vst [vmem:[#allocation41_spill] sm:$0xff] %v9875_v47  ;;  %vm3917_vm8 = vcmp.eq.f32.partialorder %v9623_v52, %v9875_v47  ;;  %v3866_v52 = vand.u32 65535, %v9657_v62  ;;  %v3568_v62 = vcvt.s32.f32 %v3566_v37  ;;  %v4140_v22 = vsel %vm4139_vm1, %v9405_v25, %v4138_v44 }
 0x5f9   : > { %v3918_v46 = vsel %vm3917_vm8, %v3913_v20, inf  ;;  %vm4127_vm8 = vcmp.eq.f32.partialorder %v11997_v8, 0.0  ;;  %v3761_v47 = vand.u32 65535, %v9780_v33 }
 0x5fa   : > { %3919 = vmin.xlane.f32.xlu1 %v3918_v46  ;;  %v12007_v46 = vld [vmem:[#allocation74_spill] sm:$0xff] }
 0x5fb   : > { %v9880_v18 = vpop.xlane.xlu1 %3900 }
 0x5fc   : > { %11994 = vst [vmem:[#allocation7_spill] sm:$0xff] %v9880_v18  ;;  %vm3902_vm0 = vcmp.eq.f32.partialorder %v9635_v3, %v9880_v18  ;;  %v3868_v3 = vcvt.s32.f32 %v3866_v52  ;;  %v12064_v18 = vld [vmem:[#allocation144_spill] sm:$0xff] }
 0x5fd   : > { %v3903_v59 = vsel %vm3902_vm0, %v3898_v31, inf  ;;  %v3806_v31 = vand.u32 65535, %v12007_v46  ;;  %vm4118_vm0 = vcmp.eq.f32.partialorder %v12003_v43, inf }
 0x5fe   : > { %3904 = vmin.xlane.f32.xlu1 %v3903_v59  ;;  %v12008_v59 = vld [vmem:[#allocation31_spill] sm:$0xff]  ;;  %v5746_v16 = vpop.eup %5745 }
 0x5ff   : > { %v3808_v37 = vcvt.s32.f32 %v3806_v31  ;;  %v4117_v31 = vmul.f32 %v5746_v16, %v12003_v43 }
 0x601   : > { %v9885_v36 = vpop.xlane.xlu1 %3885 }
 0x602   : > { %11995 = vst [vmem:[#allocation13_spill] sm:$0xff] %v9885_v36  ;;  %vm3887_vm12 = vcmp.eq.f32.partialorder %v9644_v14, %v9885_v36  ;;  %v12063_v36 = vld [vmem:[#allocation59_spill] sm:$0xff] }
 0x603   : > { %v3888_v26 = vsel %vm3887_vm12, %v3883_v42, inf  ;;  %vm4120_vm12 = vcmp.eq.f32.partialorder %v12003_v43, 0.0 }
 0x604   : > { %3889 = vmin.xlane.f32.xlu1 %v3888_v26  ;;  %v12009_v26 = vld [vmem:[#allocation23_spill] sm:$0xff] }
 0x605   : > { %5749 = vrsqrt.f32 %v12009_v26  ;;  %vm4106_vm1 = vcmp.eq.f32.partialorder %v12009_v26, 0.0 }
 0x606   : > { %v9893_v38 = vpop.xlane.xlu1 %3870 }
 0x607   : > { %11996 = vst [vmem:[#allocation82_spill] sm:$0xff] %v9893_v38  ;;  %vm3872_vm14 = vcmp.eq.f32.partialorder %v11998_v7, %v9893_v38  ;;  %v4124_v7 = vmul.f32 %v5744_v27, %v11997_v8  ;;  %v12062_v38 = vld [vmem:[#allocation27_spill] sm:$0xff] }
 0x608   : > { %v3873_v55 = vsel %vm3872_vm14, %v3868_v3, inf  ;;  %v3551_v3 = vand.u32 65535, %v9726_v39  ;;  %vm4111_vm14 = vcmp.eq.f32.partialorder %v12005_v1, inf }
 0x609   : > { %v9899_v14 = vpop.xlane.xlu0 %3570  ;;  %3874 = vmin.xlane.f32.xlu1 %v3873_v55  ;;  %v12011_v55 = vld [vmem:[#allocation103_spill] sm:$0xff]  ;;  %v4126_v21 = vsel %vm4125_vm6, %v11997_v8, %v4124_v7 }
 0x60a   : > { %11999 = vst [vmem:[#allocation109_spill] sm:$0xff] %v9899_v14  ;;  %vm3572_vm2 = vcmp.eq.f32.partialorder %v12000_v29, %v9899_v14  ;;  %v4142_v29 = vand.u32 2147483648, %v9405_v25  ;;  %v3553_v10 = vcvt.s32.f32 %v3551_v3  ;;  %v12015_v25 = vld [vmem:[#allocation135_spill] sm:$0xff]  ;;  %v12018_v3 = vld [vmem:[#allocation44_spill] sm:$0xff] }
 0x60b   : > { %v3573_v12 = vsel %vm3572_vm2, %v3568_v62, inf  ;;  %v3791_v62 = vand.u32 65535, %v12011_v55  ;;  %v12020_v55 = vld [vmem:[#allocation46_spill] sm:$0xff]  ;;  %vm4113_vm2 = vcmp.eq.f32.partialorder %v12005_v1, 0.0 }
 0x60c   : > { %v9903_v30 = vpop.xlane.xlu1 %3855  ;;  %3574 = vmin.xlane.f32.xlu0 %v3573_v12  ;;  %v12012_v12 = vld [vmem:[#allocation90_spill] sm:$0xff] }
 0x60d   : > { %12001 = vst [vmem:[#allocation22_spill] sm:$0xff] %v9903_v30  ;;  %vm3857_vm4 = vcmp.eq.f32.partialorder %v12002_v61, %v9903_v30  ;;  %5751 = vrsqrt.f32 %v12012_v12  ;;  %v12013_v61 = vld [vmem:[#allocation137_spill] sm:$0xff] }
 0x60e   : > { %v3858_v2 = vsel %vm3857_vm4, %v3853_v24, inf  ;;  %5753 = vrsqrt.f32 %v12013_v61  ;;  %vm4104_vm4 = vcmp.eq.f32.partialorder %v12009_v26, inf  ;;  %v12060_v30 = vld [vmem:[#allocation57_spill] sm:$0xff] }
 0x60f   : > { %3859 = vmin.xlane.f32.xlu1 %v3858_v2  ;;  %v4135_v2 = vand.u32 2147483648, %v9410_v35 }
 0x610   : > { %v9909_v13 = vpop.xlane.xlu1 %3840 }
 0x611   : > { %12004 = vst [vmem:[#allocation95_spill] sm:$0xff] %v9909_v13  ;;  %vm3842_vm11 = vcmp.eq.f32.partialorder %v9700_v4, %v9909_v13  ;;  %v4131_v4 = vmul.f32 %v5742_v28, %v9410_v35 }
 0x612   : > { %v3843_v40 = vsel %vm3842_vm11, %v3838_v34, inf }
 0x613   : > { %3844 = vmin.xlane.f32.xlu1 %v3843_v40  ;;  %v4133_v39 = vsel %vm4132_vm9, %v9410_v35, %v4131_v4  ;;  %v4128_v40 = vand.u32 2147483648, %v11997_v8  ;;  %v12017_v35 = vld [vmem:[#allocation98_spill] sm:$0xff]  ;;  %vm4090_vm9 = vcmp.eq.f32.partialorder %v12013_v61, inf }
 0x614   : > { %v9915_v20 = vpop.xlane.xlu1 %3825  ;;  %v4136_v46 = vsel %vm4134_vm5, %v4135_v2, %v4133_v39  ;;  %v12022_v8 = vld [vmem:[#allocation62_spill] sm:$0xff]  ;;  %vm4092_vm5 = vcmp.eq.f32.partialorder %v12013_v61, 0.0 }
 0x615   : > { %12006 = vst [vmem:[#allocation30_spill] sm:$0xff] %v9915_v20  ;;  %vm3827_vm10 = vcmp.eq.f32.partialorder %v12008_v59, %v9915_v20  ;;  %v5748_v59 = vpop.eup %5747  ;;  %v4129_v4 = vsel %vm4127_vm8, %v4128_v40, %v4126_v21  ;;  %5755 = vrsqrt.f32 %v12022_v8  ;;  %v12023_v39 = vld [vmem:[#allocation66_spill] sm:$0xff]  ;;  %v4121_v21 = vand.u32 2147483648, %v12003_v43  ;;  %v12025_v40 = vld [vmem:[#allocation127_spill] sm:$0xff] }
 0x616   : > { %v3828_v42 = vsel %vm3827_vm10, %v3823_v0, inf  ;;  %v3793_v0 = vcvt.s32.f32 %v3791_v62  ;;  %v12021_v62 = vld [vmem:[#allocation11_spill] sm:$0xff]  ;;  %v4110_v16 = vmul.f32 %v5748_v59, %v12005_v1  ;;  %vm4083_vm6 = vcmp.eq.f32.partialorder %v12022_v8, inf }
 0x617   : > { %3829 = vmin.xlane.f32.xlu1 %v3828_v42  ;;  %v12059_v20 = vld [vmem:[#allocation143_spill] sm:$0xff] }
 0x618   : > { %v9924_v52 = vpop.xlane.xlu1 %3810 }
 0x619   : > { %12010 = vst [vmem:[#allocation96_spill] sm:$0xff] %v9924_v52  ;;  %vm3812_vm15 = vcmp.eq.f32.partialorder %v9720_v56, %v9924_v52  ;;  %v4143_v56 = vsel %vm4141_vm3, %v4142_v29, %v4140_v22  ;;  %v12019_v22 = vld [vmem:[#allocation108_spill] sm:$0xff]  ;;  %v9960_v29 = vadd.f32 %v12021_v62, %v12020_v55  ;;  %v4112_v55 = vsel %vm4111_vm14, %v12005_v1, %v4110_v16  ;;  %v12049_v52 = vld [vmem:[#allocation133_spill] sm:$0xff] }
 0x61a   : > { %v3813_v24 = vsel %vm3812_vm15, %v3808_v37, inf  ;;  %v4271_v27 = vadd.f32 1e-08, %v4143_v56  ;;  %v4270_v37 = vadd.f32 1e-08, %v4136_v46  ;;  %v9956_v7 = vadd.f32 %v12019_v22, %v12018_v3  ;;  %v12024_v56 = vld [vmem:[#allocation147_spill] sm:$0xff]  ;;  %v5750_v46 = vpop.eup %5749 }
 0x61b   : > { %3814 = vmin.xlane.f32.xlu1 %v3813_v24  ;;  %v9941_v34 = vpop.xlane.xlu0 %3555  ;;  %v4119_v24 = vsel %vm4118_vm0, %v12003_v43, %v4117_v31  ;;  %v9967_v2 = vadd.f32 %v12024_v56, %v12023_v39  ;;  %v3536_v31 = vand.u32 65535, %v9751_v63  ;;  %v12030_v3 = vld [vmem:[#allocation81_spill] sm:$0xff]  ;;  %v12031_v62 = vld [vmem:[#allocation24_spill] sm:$0xff]  ;;  %v12032_v43 = vld [vmem:[#allocation71_spill] sm:$0xff]  ;;  %vm4097_vm15 = vcmp.eq.f32.partialorder %v12012_v12, inf }
 0x61c   : > { %12014 = vst [vmem:[#allocation136_spill] sm:$0xff] %v9941_v34  ;;  %vm3557_vm13 = vcmp.eq.f32.partialorder %v12015_v25, %v9941_v34  ;;  %v9947_v28 = vpop.xlane.xlu1 %3795  ;;  %5757 = vrcp.f32 %v4271_v27  ;;  %v12026_v25 = vld [vmem:[#allocation114_spill] sm:$0xff]  ;;  %v4122_v27 = vsel %vm4120_vm12, %v4121_v21, %v4119_v24  ;;  %v12033_v63 = vld [vmem:[#allocation36_spill] sm:$0xff]  ;;  %v4103_v24 = vmul.f32 %v5750_v46, %v12009_v26  ;;  %v12041_v46 = vld [vmem:[#allocation35_spill] sm:$0xff] }
 0x61d   : > { %12016 = vst [vmem:[#allocation60_spill] sm:$0xff] %v9947_v28  ;;  %v3558_v44 = vsel %vm3557_vm13, %v3553_v10, inf  ;;  %vm3797_vm7 = vcmp.eq.f32.partialorder %v12017_v35, %v9947_v28  ;;  %v4269_v10 = vadd.f32 1e-08, %v4129_v4  ;;  %v12028_v35 = vld [vmem:[#allocation115_spill] sm:$0xff]  ;;  %5759 = vrcp.f32 %v4270_v37  ;;  %v12034_v56 = vld [vmem:[#allocation48_spill] sm:$0xff] }
 0x61e   : > { %3559 = vmin.xlane.f32.xlu0 %v3558_v44  ;;  %v3798_v42 = vsel %vm3797_vm7, %v3793_v0, inf  ;;  %v9972_v0 = vadd.f32 %v12026_v25, %v12025_v40  ;;  %v12027_v44 = vld [vmem:[#allocation129_spill] sm:$0xff]  ;;  %v3776_v4 = vand.u32 65535, %v9756_v32  ;;  %5761 = vrsqrt.f32 %v12031_v62  ;;  %v12035_v40 = vld [vmem:[#allocation84_spill] sm:$0xff]  ;;  %v12046_v34 = vld [vmem:[#allocation38_spill] sm:$0xff] }
 0x61f   : > { %3799 = vmin.xlane.f32.xlu1 %v3798_v42  ;;  %v9978_v59 = vadd.f32 %v12028_v35, %v12027_v44  ;;  %v12029_v42 = vld [vmem:[#allocation47_spill] sm:$0xff]  ;;  %v9990_v39 = vadd.f32 %v12033_v63, %v12032_v43  ;;  %v9994_v25 = vadd.f32 %v12035_v40, %v12034_v56  ;;  %v5752_v44 = vpop.eup %5751  ;;  %5763 = vrcp.f32 %v4269_v10  ;;  %v12036_v21 = vld [vmem:[#allocation72_spill] sm:$0xff]  ;;  %v12037_v32 = vld [vmem:[#allocation117_spill] sm:$0xff] }
 0x620   : > { %v9982_v22 = vadd.f32 %v12030_v3, %v12029_v42  ;;  %v4114_v37 = vand.u32 2147483648, %v12005_v1  ;;  %v10000_v35 = vadd.f32 %v12037_v32, %v12036_v21  ;;  %v5754_v16 = vpop.eup %5753  ;;  %v4268_v42 = vadd.f32 1e-08, %v4122_v27  ;;  %v12039_v63 = vld [vmem:[#allocation50_spill] sm:$0xff]  ;;  %v12043_v32 = vld [vmem:[#allocation91_spill] sm:$0xff] }
 0x621   : > { %v3538_v43 = vcvt.s32.f32 %v3536_v31  ;;  %v12040_v56 = vld [vmem:[#allocation86_spill] sm:$0xff]  ;;  %v3778_v21 = vcvt.s32.f32 %v3776_v4  ;;  %v4096_v27 = vmul.f32 %v5752_v44, %v12012_v12  ;;  %5765 = vrsqrt.f32 %v12043_v32  ;;  %v12044_v31 = vld [vmem:[#allocation76_spill] sm:$0xff]  ;;  %v12047_v44 = vld [vmem:[#allocation51_spill] sm:$0xff] }
 0x622   : > { %v10007_v40 = vadd.f32 %v12040_v56, %v12039_v63  ;;  %v4115_v10 = vsel %vm4113_vm2, %v4114_v37, %v4112_v55  ;;  %v4105_v63 = vsel %vm4104_vm4, %v12009_v26, %v4103_v24  ;;  %v4089_v55 = vmul.f32 %v5754_v16, %v12013_v61  ;;  %v12045_v56 = vld [vmem:[#allocation102_spill] sm:$0xff]  ;;  %v12051_v16 = vld [vmem:[#allocation25_spill] sm:$0xff] }
 0x623   : > { %5767 = vrcp.f32 %v4268_v42  ;;  %v4107_v4 = vand.u32 2147483648, %v12009_v26  ;;  %v4267_v24 = vadd.f32 1e-08, %v4115_v10  ;;  %v4098_v42 = vsel %vm4097_vm15, %v12012_v12, %v4096_v27  ;;  %v12054_v10 = vld [vmem:[#allocation89_spill] sm:$0xff]  ;;  %v12055_v26 = vld [vmem:[#allocation134_spill] sm:$0xff] }
 0x624   : > { %5769 = vrsqrt.f32 %v12051_v16  ;;  %vm4099_vm3 = vcmp.eq.f32.partialorder %v12012_v12, 0.0  ;;  %v4093_v27 = vand.u32 2147483648, %v12013_v61  ;;  %vm4085_vm13 = vcmp.eq.f32.partialorder %v12022_v8, 0.0 }
 0x625   : > { %vm4076_vm7 = vcmp.eq.f32.partialorder %v12031_v62, inf  ;;  %vm4078_vm8 = vcmp.eq.f32.partialorder %v12031_v62, 0.0  ;;  %vm4069_vm0 = vcmp.eq.f32.partialorder %v12043_v32, inf  ;;  %vm4071_vm12 = vcmp.eq.f32.partialorder %v12043_v32, 0.0 }
 0x626   : > { %v10003_v3 = vpop.xlane.xlu0 %3540  ;;  %vm4251_vm14 = vcmp.eq.f32.partialorder %v12051_v16, inf  ;;  %vm4237_vm15 = vcmp.eq.f32.partialorder %v12062_v38, inf }
 0x627   : > { %12038 = vst [vmem:[#allocation74_spill] sm:$0xff] %v10003_v3  ;;  %vm3542_vm11 = vcmp.eq.f32.partialorder %v12041_v46, %v10003_v3  ;;  %v10022_v46 = vadd.f32 %v12046_v34, %v12045_v56  ;;  %v12048_v3 = vld [vmem:[#allocation87_spill] sm:$0xff]  ;;  %v4108_v34 = vsel %vm4106_vm1, %v4107_v4, %v4105_v63  ;;  %v12058_v4 = vld [vmem:[#allocation54_spill] sm:$0xff] }
 0x628   : > { %v3543_v1 = vsel %vm3542_vm11, %v3538_v43, inf  ;;  %v10027_v43 = vadd.f32 %v12048_v3, %v12047_v44  ;;  %v5756_v3 = vpop.eup %5755  ;;  %v12056_v44 = vld [vmem:[#allocation120_spill] sm:$0xff]  ;;  %v10055_v13 = vadd.f32 %v12059_v20, %v12058_v4  ;;  %v10068_v20 = vadd.f32 %v12064_v18, %v12063_v36 }
 0x629   : > { %v10012_v28 = vpop.xlane.xlu1 %3780  ;;  %3544 = vmin.xlane.f32.xlu0 %v3543_v1  ;;  %v4100_v1 = vand.u32 2147483648, %v12012_v12  ;;  %v10049_v63 = vpop.eup %5757  ;;  %v4082_v12 = vmul.f32 %v5756_v3, %v12022_v8  ;;  %v4086_v18 = vand.u32 2147483648, %v12022_v8  ;;  %vm4253_vm11 = vcmp.eq.f32.partialorder %v12051_v16, 0.0 }
 0x62a   : > { %12042 = vst [vmem:[#allocation31_spill] sm:$0xff] %v10012_v28  ;;  %vm3782_vm10 = vcmp.eq.f32.partialorder %v12044_v31, %v10012_v28  ;;  %v12050_v31 = vld [vmem:[#allocation75_spill] sm:$0xff] }
 0x62b   : > { %v3783_v37 = vsel %vm3782_vm10, %v3778_v21, inf  ;;  %v10031_v28 = vadd.f32 %v12050_v31, %v12049_v52  ;;  %v12052_v21 = vld [vmem:[#allocation92_spill] sm:$0xff]  ;;  %v4091_v52 = vsel %vm4090_vm9, %v12013_v61, %v4089_v55  ;;  %v10047_v31 = vadd.f32 %v12056_v44, %v12055_v26  ;;  %v10062_v26 = vpop.eup %5759 }
 0x62c   : > { %3784 = vmin.xlane.f32.xlu1 %v3783_v37  ;;  %5771 = vrsqrt.f32 %v12052_v21  ;;  %v12053_v37 = vld [vmem:[#allocation53_spill] sm:$0xff]  ;;  %v12061_v55 = vld [vmem:[#allocation112_spill] sm:$0xff]  ;;  %v4094_v44 = vsel %vm4092_vm5, %v4093_v27, %v4091_v52  ;;  %v5762_v4 = vpop.eup %5761  ;;  %vm4244_vm2 = vcmp.eq.f32.partialorder %v12052_v21, inf  ;;  %vm4246_vm1 = vcmp.eq.f32.partialorder %v12052_v21, 0.0 }
 0x62d   : > { %v10043_v56 = vadd.f32 %v12054_v10, %v12053_v37  ;;  %12057 = vst [vmem:[#allocation23_spill] sm:$0xff] %v10047_v31  ;;  %v10059_v14 = vadd.f32 %v12061_v55, %v12060_v30  ;;  %5773 = vrcp.f32 %v4267_v24  ;;  %v4266_v37 = vadd.f32 1e-08, %v4108_v34  ;;  %v12065_v24 = vld [vmem:[#allocation61_spill] sm:$0xff]  ;;  %v10081_v3 = vpop.eup %5763 }
 0x62e   : > { %v4101_v10 = vsel %vm4099_vm3, %v4100_v1, %v4098_v42  ;;  %5775 = vrsqrt.f32 %v12062_v38  ;;  %v4399_v30 = vadd.f32 %v10049_v63, %v9956_v7  ;;  %v12066_v34 = vld [vmem:[#allocation145_spill] sm:$0xff]  ;;  %v12067_v42 = vld [vmem:[#allocation131_spill] sm:$0xff]  ;;  %v12068_v1 = vld [vmem:[#allocation116_spill] sm:$0xff]  ;;  %v4264_v36 = vadd.f32 1e-08, %v4094_v44 }
 0x62f   : > { %v10075_v61 = vadd.f32 %v12066_v34, %v12065_v24  ;;  %v10079_v52 = vadd.f32 %v12068_v1, %v12067_v42  ;;  %v4265_v27 = vadd.f32 1e-08, %v4101_v10  ;;  %5777 = vrcp.f32 %v4266_v37  ;;  %v12069_v34 = vld [vmem:[#allocation78_spill] sm:$0xff]  ;;  %v5766_v42 = vpop.eup %5765 }
 0x630   : > { %v4398_v7 = vadd.f32 %v10062_v26, %v9960_v29  ;;  %v4084_v55 = vsel %vm4083_vm6, %v12022_v8, %v4082_v12  ;;  %v4075_v24 = vmul.f32 %v5762_v4, %v12031_v62  ;;  %5779 = vrsqrt.f32 %v12069_v34  ;;  %v10100_v44 = vpop.eup %5767 }
 0x631   : > { %v3521_v10 = vand.u32 65535, %v9775_v6  ;;  %v4079_v1 = vand.u32 2147483648, %v12031_v62  ;;  %5781 = vrcp.f32 %v4399_v30  ;;  %v4397_v37 = vadd.f32 %v10081_v3, %v9982_v22  ;;  %v5770_v12 = vpop.eup %5769 }
 0x632   : > { %5783 = vrcp.f32 %v4265_v27  ;;  %v4072_v29 = vand.u32 2147483648, %v12043_v32  ;;  %v4087_v6 = vsel %vm4085_vm13, %v4086_v18, %v4084_v55  ;;  %v4077_v22 = vsel %vm4076_vm7, %v12031_v62, %v4075_v24  ;;  %v12071_v18 = vld [vmem:[#allocation101_spill] sm:$0xff] }
 0x633   : > { %5785 = vrcp.f32 %v4398_v7  ;;  %v4068_v4 = vmul.f32 %v5766_v42, %v12043_v32  ;;  %v3523_v27 = vcvt.s32.f32 %v3521_v10  ;;  %v3757_v8 = vcvt.f32.s32 %v9789_v9 }
 0x634   : > { %5787 = vrcp.f32 %v4264_v36  ;;  %v3763_v36 = vcvt.s32.f32 %v3761_v47  ;;  %v4263_v55 = vadd.f32 1e-08, %v4087_v6  ;;  %v4247_v24 = vand.u32 2147483648, %v12052_v21 }
 0x635   : > { %v4080_v10 = vsel %vm4078_vm8, %v4079_v1, %v4077_v22  ;;  %v4250_v9 = vmul.f32 %v5770_v12, %v12051_v16  ;;  %v4396_v1 = vadd.f32 %v10100_v44, %v9994_v25  ;;  %v3758_v22 = vshll.u32 %v3757_v8, 16  ;;  %v12075_v25 = vld [vmem:[#allocation94_spill] sm:$0xff] }
 0x636   : > { %vm4239_vm9 = vcmp.eq.f32.partialorder %v12062_v38, 0.0  ;;  %vm4230_vm5 = vcmp.eq.f32.partialorder %v12069_v34, inf  ;;  %vm4232_vm6 = vcmp.eq.f32.partialorder %v12069_v34, 0.0 }
 0x639   : > { %v10110_v30 = vpop.xlane.xlu0 %3525  ;;  %v5772_v31 = vpop.eup %5771 }
 0x63a   : > { %12070 = vst [vmem:[#allocation103_spill] sm:$0xff] %v10110_v30  ;;  %vm3527_vm4 = vcmp.eq.f32.partialorder %v12071_v18, %v10110_v30  ;;  %v12073_v18 = vld [vmem:[#allocation93_spill] sm:$0xff]  ;;  %v10127_v6 = vpop.eup %5773  ;;  %v4243_v33 = vmul.f32 %v5772_v31, %v12052_v21 }
 0x63b   : > { %v3528_v42 = vsel %vm3527_vm4, %v3523_v27, inf  ;;  %5789 = vrsqrt.f32 %v12073_v18  ;;  %v4070_v27 = vsel %vm4069_vm0, %v12043_v32, %v4068_v4  ;;  %v5776_v12 = vpop.eup %5775  ;;  %v4252_v4 = vsel %vm4251_vm14, %v12051_v16, %v4250_v9 }
 0x63c   : > { %v10116_v7 = vpop.xlane.xlu1 %3765  ;;  %3529 = vmin.xlane.f32.xlu0 %v3528_v42  ;;  %v3742_v42 = vcvt.f32.s32 %v9795_v11  ;;  %v4073_v31 = vsel %vm4071_vm12, %v4072_v29, %v4070_v27  ;;  %v4245_v11 = vsel %vm4244_vm2, %v12052_v21, %v4243_v33  ;;  %v4395_v32 = vadd.f32 %v10127_v6, %v10007_v40  ;;  %v12076_v27 = vld [vmem:[#allocation37_spill] sm:$0xff] }
 0x63d   : > { %12072 = vst [vmem:[#allocation90_spill] sm:$0xff] %v10116_v7  ;;  %vm3767_vm10 = vcmp.eq.f32.partialorder %v9786_v17, %v10116_v7  ;;  %v12074_v17 = vld [vmem:[#allocation26_spill] sm:$0xff]  ;;  %v3755_v62 = vpop.xlane.xlu0 %3754  ;;  %v4262_v7 = vadd.f32 1e-08, %v4080_v10  ;;  %v3727_v9 = vcvt.f32.s32 %v9800_v48  ;;  %v12077_v33 = vld [vmem:[#allocation9_spill] sm:$0xff]  ;;  %v4248_v30 = vsel %vm4246_vm1, %v4247_v24, %v4245_v11  ;;  %v12080_v24 = vld [vmem:[#allocation28_spill] sm:$0xff] }
 0x63e   : > { %v3768_v47 = vsel %vm3767_vm10, %v3763_v36, inf  ;;  %5791 = vrsqrt.f32 %v12074_v17  ;;  %v3756_v36 = vcvt.f32.s32 %v3755_v62  ;;  %v3743_v10 = vshll.u32 %v3742_v42, 16  ;;  %v12081_v11 = vld [vmem:[#allocation80_spill] sm:$0xff] }
 0x63f   : > { %3769 = vmin.xlane.f32.xlu1 %v3768_v47  ;;  %5793 = vrcp.f32 %v4397_v37  ;;  %v10145_v47 = vpop.eup %5777  ;;  %v4236_v37 = vmul.f32 %v5776_v12, %v12062_v38  ;;  %v4261_v40 = vadd.f32 1e-08, %v4073_v31  ;;  %v12078_v42 = vand.u32 2147483648, %v12051_v16 }
 0x640   : > { %5795 = vrcp.f32 %v4263_v55  ;;  %v3759_v8 = vadd.s32 %v3758_v22, %v3756_v36  ;;  %v5780_v29 = vpop.eup %5779  ;;  %v4240_v36 = vand.u32 2147483648, %v12062_v38  ;;  %v3728_v16 = vshll.u32 %v3727_v9, 16 }
 0x641   : > { %5797 = vrsqrt.f32 %v12075_v25  ;;  %v3740_v55 = vpop.xlane.xlu0 %3739  ;;  %v10155_v22 = vpop.eup %5781  ;;  %v4255_v48 = vsel %vm4253_vm11, %v12078_v42, %v4252_v4  ;;  %v4229_v31 = vmul.f32 %v5780_v29, %v12069_v34  ;;  %v3712_v4 = vcvt.f32.s32 %v9805_v45 }
 0x642   : > { %5799 = vrcp.f32 %v4396_v1  ;;  %vm4015_vm3 = vcmp.eq.s32.totalorder %v12076_v27, %v3759_v8  ;;  %v3741_v62 = vcvt.f32.s32 %v3740_v55  ;;  %v10163_v12 = vpop.eup %5783  ;;  %v12079_v8 = vld [vmem:[#allocation140_spill] sm:$0xff]  ;;  %v4233_v21 = vand.u32 2147483648, %v12069_v34 }
 0x643   : > { %5801 = vrcp.f32 %v4262_v7  ;;  %v10161_v1 = vsel %vm4015_vm3, %v10049_v63, %v12077_v33  ;;  %v5786_v55 = vpop.eup %5785  ;;  %v4238_v63 = vsel %vm4237_vm15, %v12062_v38, %v4236_v37  ;;  %v4394_v45 = vadd.f32 %v10145_v47, %v10027_v43 }
 0x644   : > { %5803 = vrsqrt.f32 %v12079_v8  ;;  %v3744_v7 = vadd.s32 %v3743_v10, %v3741_v62  ;;  %v10177_v50 = vpop.eup %5787  ;;  %v4287_v62 = vadd.f32 1e-08, %v4255_v48  ;;  %v4241_v29 = vsel %vm4239_vm9, %v4240_v36, %v4238_v63 }
 0x645   : > { %v3725_v33 = vpop.xlane.xlu0 %3724  ;;  %5805 = vrcp.f32 %v4395_v32  ;;  %v4231_v48 = vsel %vm4230_vm5, %v12069_v34, %v4229_v31  ;;  %vm4062_vm7 = vcmp.eq.f32.partialorder %v12073_v18, inf  ;;  %v3713_v36 = vshll.u32 %v3712_v4, 16 }
 0x646   : > { %vm4014_vm13 = vcmp.eq.s32.totalorder %v12076_v27, %v3744_v7  ;;  %v3726_v10 = vcvt.f32.s32 %v3725_v33  ;;  %5807 = vrsqrt.f32 %v12080_v24  ;;  %v4286_v7 = vadd.f32 1e-08, %v4248_v30  ;;  %v12082_v30 = vld [vmem:[#allocation83_spill] sm:$0xff] }
 0x647   : > { %v4366_v37 = vsel %vm4014_vm13, %v10062_v26, %v12081_v11  ;;  %5809 = vrcp.f32 %v4261_v40  ;;  %v4065_v26 = vand.u32 2147483648, %v12073_v18  ;;  %v4285_v40 = vadd.f32 1e-08, %v4241_v29 }
 0x648   : > { %v3729_v32 = vadd.s32 %v3728_v16, %v3726_v10  ;;  %v10187_v42 = vmul.f32 %v5786_v55, %v4366_v37  ;;  %v5790_v9 = vpop.eup %5789  ;;  %v3697_v55 = vcvt.f32.s32 %v9810_v19  ;;  %5811 = vrcp.f32 %v4287_v62 }
 0x649   : > { %v3710_v33 = vpop.xlane.xlu0 %3709  ;;  %vm4223_vm0 = vcmp.eq.f32.partialorder %v12074_v17, inf  ;;  %vm4064_vm12 = vcmp.eq.f32.partialorder %v12073_v18, 0.0  ;;  %5813 = vrcp.f32 %v4394_v45  ;;  %v4393_v19 = vadd.f32 %v10163_v12, %v10043_v56  ;;  %v12083_v56 = vld [vmem:[#allocation85_spill] sm:$0xff] }
 0x64a   : > { %vm4013_vm8 = vcmp.eq.s32.totalorder %v12076_v27, %v3729_v32  ;;  %v3711_v63 = vcvt.f32.s32 %v3710_v33  ;;  %5815 = vrcp.f32 %v4286_v7  ;;  %v4234_v62 = vsel %vm4232_vm6, %v4233_v21, %v4231_v48  ;;  %v4866_v21 = vld [vmem:[%s10850_s6 + $0x10] sm:$0xff] }
 0x64b   : > { %v5792_v38 = vpop.eup %5791  ;;  %v4365_v31 = vsel %vm4013_vm8, %v10081_v3, %v12082_v30  ;;  %v4061_v37 = vmul.f32 %v5790_v9, %v12073_v18  ;;  %vm4225_vm14 = vcmp.eq.f32.partialorder %v12074_v17, 0.0  ;;  %v4226_v3 = vand.u32 2147483648, %v12074_v17  ;;  %v12084_v30 = vld [vmem:[#allocation141_spill] sm:$0xff] }
 0x64c   : > { %v5794_v43 = vpop.eup %5793  ;;  %v3714_v10 = vadd.s32 %v3713_v36, %v3711_v63  ;;  %v4222_v33 = vmul.f32 %v5792_v38, %v12074_v17  ;;  %v3698_v36 = vshll.u32 %v3697_v55, 16  ;;  %5817 = vrcp.f32 %v4285_v40 }
 0x64d   : > { %v10201_v16 = vpop.eup %5795  ;;  %v10204_v11 = vmul.f32 %v5794_v43, %v4365_v31  ;;  %v3695_v29 = vpop.xlane.xlu0 %3694  ;;  %vm4216_vm4 = vcmp.eq.f32.partialorder %v12075_v25, inf  ;;  %v4392_v9 = vadd.f32 %v10177_v50, %v10055_v13  ;;  %v3682_v48 = vcvt.f32.s32 %v9815_v51 }
 0x64e   : > { %v5798_v4 = vpop.eup %5797  ;;  %vm4012_vm2 = vcmp.eq.s32.totalorder %v12076_v27, %v3714_v10  ;;  %v3696_v45 = vcvt.f32.s32 %v3695_v29  ;;  %5819 = vrcp.f32 %v4393_v19  ;;  %v4284_v43 = vadd.f32 1e-08, %v4234_v62  ;;  %v12085_v19 = vld [vmem:[#allocation88_spill] sm:$0xff]  ;;  %v4918_v29 = vld [vmem:[%s10852_s8 + $0x30] sm:$0xff] }
 0x64f   : > { %v5800_v32 = vpop.eup %5799  ;;  %v4364_v34 = vsel %vm4012_vm2, %v10100_v44, %v12083_v56  ;;  %vm4218_vm11 = vcmp.eq.f32.partialorder %v12075_v25, 0.0  ;;  %v4219_v44 = vand.u32 2147483648, %v12075_v25  ;;  %v4212_v40 = vand.u32 2147483648, %v12079_v8 }
 0x650   : > { %v10223_v7 = vpop.eup %5801  ;;  %v3699_v38 = vadd.s32 %v3698_v36, %v3696_v45  ;;  %v10226_v55 = vmul.f32 %v5800_v32, %v4364_v34  ;;  %5821 = vrsqrt.f32 %v12084_v30  ;;  %v4063_v51 = vsel %vm4062_vm7, %v12073_v18, %v4061_v37  ;;  %v4480_v32 = vld [vmem:[%s10245_s27] sm:$0xff] }
 0x651   : > { %v5804_v63 = vpop.eup %5803  ;;  %v4224_v31 = vsel %vm4223_vm0, %v12074_v17, %v4222_v33  ;;  %v4215_v10 = vmul.f32 %v5798_v4, %v12075_v25  ;;  %vm4209_vm10 = vcmp.eq.f32.partialorder %v12079_v8, inf  ;;  %v3680_v37 = vpop.xlane.xlu0 %3679  ;;  %5823 = vrcp.f32 %v4392_v9  ;;  %v4655_v9 = vld [vmem:[%s429_s20] sm:$0xff] }
 0x652   : > { %v5806_v13 = vpop.eup %5805  ;;  %vm4011_vm1 = vcmp.eq.s32.totalorder %v12076_v27, %v3699_v38  ;;  %4880 = vperm.xlu0 %5481, %v4866_v21   ;;  %v4391_v4 = vadd.f32 %v10201_v16, %v10059_v14  ;;  %v3683_v36 = vshll.u32 %v3682_v48, 16  ;;  %v3667_v45 = vcvt.f32.s32 %v9820_v49  ;;  %v12087_v49 = vld [vmem:[#allocation64_spill] sm:$0xff]  ;;  %v4656_v21 = vld [vmem:[%s429_s20 + $0x8] sm:$0xff]  ;;  %v4657_v48 = vld [vmem:[%s10849_s5] sm:$0xff]  ;;  %s5272_s20 = sshll.u32 %s400_s18, 7 }
 0x653   : > { %v4363_v62 = vsel %vm4011_vm1, %v10127_v6, %v12085_v19  ;;  %v5808_v33 = vpop.eup %5807  ;;  %v3681_v56 = vcvt.f32.s32 %v3680_v37  ;;  %vm12086_vm15 = vcmask 523264   ;;  %v6013_v6 = vmov 0.0   ;;  %4704 = vmatprep.subr.mxu1 %v4656_v21  ;;  %s10770_s23 = scalar_lea.vmem [#allocation2], %s5272_s20  ;;  %s5938_s20 = scalar_lea.vmem %s5937_s16, 4096 }
 0x654   : > { %v10257_v34 = vmul.f32 %v5806_v13, %v4363_v62  ;;  %5368 = vmatprep.mubr.msk.f32.mxu0 %vm12086_vm15, %v4480_v32  ;;  %4738 = vmatprep.mubr.f32.mxu1 %v6013_v6  ;;  %v4066_v14 = vsel %vm4064_vm12, %v4065_v26, %v4063_v51  ;;  %vm4202_vm9 = vcmp.eq.f32.partialorder %v12080_v24, inf  ;;  %5825 = vrsqrt.f32 %v12087_v49  ;;  %v10273_v38 = vpop.eup %5809 }
 0x655   : > { %vm4661_vm3 = vcmask 64512   ;;  %5827 = vrcp.f32 %v4284_v43  ;;  %v4227_v13 = vsel %vm4225_vm14, %v4226_v3, %v4224_v31  ;;  %v4217_v18 = vsel %vm4216_vm4, %v12075_v25, %v4215_v10  ;;  %4705 = vmatpush1.msra.mxu1 %v4655_v9  ;;  %v10285_v17 = vpop.eup %5811 }
 0x656   : > { %vm4211_vm5 = vcmp.eq.f32.partialorder %v12079_v8, 0.0  ;;  %v3684_v26 = vadd.s32 %v3683_v36, %v3681_v56  ;;  %4952 = vperm.xlu0 %5481, %v4918_v29   ;;  %v4208_v51 = vmul.f32 %v5804_v63, %v12079_v8  ;;  %v4201_v19 = vmul.f32 %v5808_v33, %v12080_v24  ;;  %v3665_v62 = vpop.xlane.xlu0 %3664  ;;  %5312 = vmatmul.mubr.msk.f32.vlgmr.msra.gmra.mxu1 %vm4661_vm3, %v4657_v48  ;;  %v5814_v37 = vpop.eup %5813  ;;  %v12088_v29 = vld [vmem:[#allocation67_spill] sm:$0xff]  ;;  %v12090_v36 = vld [vmem:[#allocation29_spill] sm:$0xff] }
 0x657   : > { %5829 = vrcp.f32 %v4391_v4  ;;  %v4390_v43 = vadd.f32 %v10223_v7, %v10068_v20  ;;  %v3668_v3 = vshll.u32 %v3667_v45, 16  ;;  %v3652_v31 = vcvt.f32.s32 %v9825_v54  ;;  %v12089_v4 = vld [vmem:[#allocation110_spill] sm:$0xff]  ;;  %4744 = vmatprep.mubr.f32.mxu1 %v6013_v6  ;;  %v10298_v32 = vpop.eup %5815 }
 0x658   : > { %vm4010_vm6 = vcmp.eq.s32.totalorder %v12076_v27, %v3684_v26  ;;  %v3666_v10 = vcvt.f32.s32 %v3665_v62  ;;  %v4260_v63 = vadd.f32 1e-08, %v4066_v14  ;;  %vm4204_vm13 = vcmp.eq.f32.partialorder %v12080_v24, 0.0  ;;  %v4658_v54 = vld [vmem:[%s10849_s5 + $0x8] sm:$0xff] }
 0x659   : > { %5831 = vrsqrt.f32 %v12088_v29  ;;  %v4362_v20 = vsel %vm4010_vm6, %v10145_v47, %v12089_v4  ;;  %v4220_v33 = vsel %vm4218_vm11, %v4219_v44, %v4217_v18  ;;  %v4283_v14 = vadd.f32 1e-08, %v4227_v13  ;;  %v10313_v48 = vpop.eup %5817  ;;  %v12091_v62 = vld [vmem:[#allocation142_spill] sm:$0xff] }
 0x65a   : > { %5833 = vrsqrt.f32 %v12090_v36  ;;  %v3669_v45 = vadd.s32 %v3668_v3, %v3666_v10  ;;  %v10305_v56 = vmul.f32 %v5814_v37, %v4362_v20  ;;  %v4210_v47 = vsel %vm4209_vm10, %v12079_v8, %v4208_v51  ;;  %5313 = vmatmul.mubr.msk.f32.gmra.mxu1 %vm4661_vm3, %v4658_v54 }
 0x65b   : > { %v4203_v21 = vsel %vm4202_vm9, %v12080_v24, %v4201_v19  ;;  %v3650_v9 = vpop.xlane.xlu0 %3649  ;;  %5835 = vrcp.f32 %v4390_v43  ;;  %v3653_v25 = vshll.u32 %v3652_v31, 16  ;;  %v3637_v44 = vcvt.f32.s32 %v9830_v5  ;;  %v5820_v13 = vpop.eup %5819  ;;  %4750 = vmatprep.mubr.f32.mxu1 %v6013_v6  ;;  %v4659_v43 = vld [vmem:[%s10849_s5 + $0x10] sm:$0xff] }
 0x65c   : > { %vm4009_vm7 = vcmp.eq.s32.totalorder %v12076_v27, %v3669_v45  ;;  %v3651_v18 = vcvt.f32.s32 %v3650_v9  ;;  %5837 = vrcp.f32 %v4260_v63  ;;  %v4282_v26 = vadd.f32 1e-08, %v4220_v33 }
 0x65d   : > { %v4205_v51 = vand.u32 2147483648, %v12080_v24  ;;  %v4361_v19 = vsel %vm4009_vm7, %v10163_v12, %v12091_v62  ;;  %v5822_v5 = vpop.eup %5821  ;;  %vm4195_vm8 = vcmp.eq.f32.partialorder %v12084_v30, inf  ;;  %v4198_v3 = vand.u32 2147483648, %v12084_v30  ;;  %v12092_v24 = vld [vmem:[#allocation111_spill] sm:$0xff] }
 0x65e   : > { %v3654_v31 = vadd.s32 %v3653_v25, %v3651_v18  ;;  %v10327_v10 = vmul.f32 %v5820_v13, %v4361_v19  ;;  %5839 = vrcp.f32 %v4283_v14  ;;  %v4213_v12 = vsel %vm4211_vm5, %v4212_v40, %v4210_v47  ;;  %v5824_v20 = vpop.eup %5823  ;;  %5314 = vmatmul.mubr.msk.f32.gmra.mxu1 %vm4661_vm3, %v4659_v43  ;;  %v12095_v19 = vld [vmem:[#allocation146_spill] sm:$0xff] }
 0x65f   : > { %v4206_v37 = vsel %vm4204_vm13, %v4205_v51, %v4203_v21  ;;  %vm4197_vm0 = vcmp.eq.f32.partialorder %v12084_v30, 0.0  ;;  %v3635_v63 = vpop.xlane.xlu0 %3634  ;;  %v4389_v4 = vadd.f32 %v10273_v38, %v10075_v61  ;;  %v3638_v54 = vshll.u32 %v3637_v44, 16  ;;  %4756 = vmatprep.mubr.f32.mxu1 %v6013_v6 }
 0x660   : > { %v3622_v33 = vcvt.f32.s32 %v9835_v15  ;;  %vm4008_vm12 = vcmp.eq.s32.totalorder %v12076_v27, %v3654_v31  ;;  %v3636_v45 = vcvt.f32.s32 %v3635_v63  ;;  %5841 = vrcp.f32 %v4282_v26  ;;  %v12093_v15 = vld [vmem:[#allocation105_spill] sm:$0xff] }
 0x661   : > { %v4194_v8 = vmul.f32 %v5822_v5, %v12084_v30  ;;  %v4360_v40 = vsel %vm4008_vm12, %v10177_v50, %v12092_v24  ;;  %v4415_v14 = vadd.f32 %v10285_v17, %v9967_v2  ;;  %v5826_v61 = vpop.eup %5825  ;;  %vm4055_vm14 = vcmp.eq.f32.partialorder %v12087_v49, inf  ;;  %v12094_v50 = vld [vmem:[#allocation97_spill] sm:$0xff] }
 0x662   : > { %5843 = vrsqrt.f32 %v12093_v15  ;;  %v3639_v47 = vadd.s32 %v3638_v54, %v3636_v45  ;;  %v10349_v21 = vmul.f32 %v5824_v20, %v4360_v40  ;;  %v10351_v9 = vpop.eup %5827  ;;  %v4281_v25 = vadd.f32 1e-08, %v4213_v12  ;;  %v12096_v31 = vld [vmem:[#allocation77_spill] sm:$0xff] }
 0x663   : > { %v4280_v44 = vadd.f32 1e-08, %v4206_v37  ;;  %vm4057_vm2 = vcmp.eq.f32.partialorder %v12087_v49, 0.0  ;;  %5845 = vrsqrt.f32 %v12094_v50  ;;  %v3620_v18 = vpop.xlane.xlu0 %3619  ;;  %v3623_v13 = vshll.u32 %v3622_v33, 16  ;;  %v12097_v24 = vld [vmem:[#allocation113_spill] sm:$0xff] }
 0x664   : > { %v5830_v2 = vpop.eup %5829  ;;  %vm4007_vm4 = vcmp.eq.s32.totalorder %v12076_v27, %v3639_v47  ;;  %v3621_v26 = vcvt.f32.s32 %v3620_v18  ;;  %5847 = vrcp.f32 %v4389_v4  ;;  %v4196_v51 = vsel %vm4195_vm8, %v12084_v30, %v4194_v8 }
 0x665   : > { %v4054_v62 = vmul.f32 %v5826_v61, %v12087_v49  ;;  %v4359_v43 = vsel %vm4007_vm4, %v10201_v16, %v12095_v19  ;;  %5849 = vrcp.f32 %v4415_v14  ;;  %v4414_v37 = vadd.f32 %v10298_v32, %v9972_v0 }
 0x666   : > { %v5832_v5 = vpop.eup %5831  ;;  %5851 = vrsqrt.f32 %v12096_v31  ;;  %v3624_v12 = vadd.s32 %v3623_v13, %v3621_v26  ;;  %v10365_v63 = vmul.f32 %v5830_v2, %v4359_v43  ;;  %v4058_v20 = vand.u32 2147483648, %v12087_v49 }
 0x667   : > { %v5834_v4 = vpop.eup %5833  ;;  %5853 = vrcp.f32 %v4281_v25  ;;  %vm4188_vm11 = vcmp.eq.f32.partialorder %v12088_v29, inf  ;;  %vm4190_vm10 = vcmp.eq.f32.partialorder %v12088_v29, 0.0  ;;  %v4199_v16 = vsel %vm4197_vm0, %v4198_v3, %v4196_v51  ;;  %v12098_v25 = vld [vmem:[#allocation32_spill] sm:$0xff] }
 0x668   : > { %v5836_v54 = vpop.eup %5835  ;;  %5855 = vrcp.f32 %v4280_v44  ;;  %v3607_v33 = vcvt.f32.s32 %v9841_v53  ;;  %vm4006_vm1 = vcmp.eq.s32.totalorder %v12076_v27, %v3624_v12  ;;  %v4056_v0 = vsel %vm4055_vm14, %v12087_v49, %v4054_v62 }
 0x669   : > { %v4187_v45 = vmul.f32 %v5832_v5, %v12088_v29  ;;  %v3997_v8 = vcvt.f32.s32 %v9845_v58  ;;  %v4358_v40 = vsel %vm4006_vm1, %v10223_v7, %v12097_v24  ;;  %v10381_v14 = vpop.eup %5837  ;;  %v4191_v30 = vand.u32 2147483648, %v12088_v29  ;;  %v3605_v58 = vpop.xlane.xlu0 %3604 }
 0x66a   : > { %5857 = vrcp.f32 %v4414_v37  ;;  %v4413_v53 = vadd.f32 %v10313_v48, %v9978_v59  ;;  %v10386_v3 = vmul.f32 %v5836_v54, %v4358_v40  ;;  %v4279_v61 = vadd.f32 1e-08, %v4199_v16  ;;  %v3995_v13 = vpop.xlane.xlu1 %3994 }
 0x66b   : > { %vm4181_vm15 = vcmp.eq.f32.partialorder %v12090_v36, inf  ;;  %v4184_v47 = vand.u32 2147483648, %v12090_v36  ;;  %5859 = vrsqrt.f32 %v12098_v25  ;;  %v10391_v44 = vpop.eup %5839  ;;  %v4059_v7 = vsel %vm4057_vm2, %v4058_v20, %v4056_v0 }
 0x66c   : > { %v4180_v18 = vmul.f32 %v5834_v4, %v12090_v36  ;;  %vm4183_vm9 = vcmp.eq.f32.partialorder %v12090_v36, 0.0  ;;  %v3608_v59 = vshll.u32 %v3607_v33, 16  ;;  %v3606_v2 = vcvt.f32.s32 %v3605_v58 }
 0x66d   : > { %v4189_v26 = vsel %vm4188_vm11, %v12088_v29, %v4187_v45  ;;  %v3998_v51 = vshll.u32 %v3997_v8, 16  ;;  %v3982_v62 = vcvt.f32.s32 %v9850_v60  ;;  %v3996_v19 = vcvt.f32.s32 %v3995_v13  ;;  %v10401_v43 = vpop.eup %5841  ;;  %v12099_v8 = vld [vmem:[#allocation34_spill] sm:$0xff] }
 0x66e   : > { %vm4174_vm5 = vcmp.eq.f32.partialorder %v12093_v15, inf  ;;  %v4177_v49 = vand.u32 2147483648, %v12093_v15  ;;  %v3609_v5 = vadd.s32 %v3608_v59, %v3606_v2  ;;  %5861 = vrcp.f32 %v4413_v53 }
 0x66f   : > { %v5844_v12 = vpop.eup %5843  ;;  %5863 = vrcp.f32 %v4279_v61  ;;  %v4259_v37 = vadd.f32 1e-08, %v4059_v7  ;;  %v4170_v4 = vand.u32 2147483648, %v12094_v50  ;;  %v3999_v20 = vadd.s32 %v3998_v51, %v3996_v19  ;;  %v3980_v29 = vpop.xlane.xlu1 %3979 }
 0x670   : > { %v5846_v54 = vpop.eup %5845  ;;  %v4192_v16 = vsel %vm4190_vm10, %v4191_v30, %v4189_v26  ;;  %v4182_v60 = vsel %vm4181_vm15, %v12090_v36, %v4180_v18  ;;  %vm4005_vm6 = vcmp.eq.s32.totalorder %v12076_v27, %v3609_v5  ;;  %v4412_v33 = vadd.f32 %v10351_v9, %v9990_v39  ;;  %v12100_v39 = vld [vmem:[#allocation65_spill] sm:$0xff] }
 0x671   : > { %v5848_v0 = vpop.eup %5847  ;;  %vm4176_vm13 = vcmp.eq.f32.partialorder %v12093_v15, 0.0  ;;  %vm4167_vm7 = vcmp.eq.f32.partialorder %v12094_v50, inf  ;;  %v3983_v45 = vshll.u32 %v3982_v62, 16  ;;  %v4357_v24 = vsel %vm4005_vm6, %v10273_v38, %v12099_v8 }
 0x672   : > { %vm4031_vm8 = vcmp.eq.s32.totalorder %v12076_v27, %v3999_v20  ;;  %v4388_v40 = vadd.f32 %v10381_v14, %v10079_v52  ;;  %v5850_v30 = vpop.eup %5849  ;;  %v3967_v53 = vcvt.f32.s32 %v9855_v23  ;;  %v3981_v61 = vcvt.f32.s32 %v3980_v29  ;;  %v12104_v20 = vld [vmem:[#allocation33_spill] sm:$0xff] }
 0x673   : > { %v4383_v58 = vsel %vm4031_vm8, %v10285_v17, %v12100_v39  ;;  %v10424_v7 = vmul.f32 %v5848_v0, %v4357_v24  ;;  %v5852_v18 = vpop.eup %5851  ;;  %5865 = vrcp.f32 %v4259_v37  ;;  %v4278_v59 = vadd.f32 1e-08, %v4192_v16  ;;  %v12106_v24 = vld [vmem:[#allocation99_spill] sm:$0xff]  ;;  %v12107_v29 = vld [vmem:[#allocation69_spill] sm:$0xff] }
 0x674   : > { %v4173_v38 = vmul.f32 %v5844_v12, %v12093_v15  ;;  %v4479_v2 = vmul.f32 %v5850_v30, %v4383_v58  ;;  %v10427_v13 = vpop.eup %5853  ;;  %vm4048_vm0 = vcmp.eq.f32.partialorder %v12096_v31, inf  ;;  %v3984_v52 = vadd.s32 %v3983_v45, %v3981_v61  ;;  %v3965_v62 = vpop.xlane.xlu1 %3964  ;;  %v12109_v61 = vld [vmem:[#allocation40_spill] sm:$0xff] }
 0x675   : > { %v4463_v23 = vmul.f32 %v10155_v22, %v10161_v1  ;;  %5867 = vrcp.f32 %v4412_v33  ;;  %v10432_v26 = vpop.eup %5855  ;;  %v4185_v17 = vsel %vm4183_vm9, %v4184_v47, %v4182_v60  ;;  %v4166_v51 = vmul.f32 %v5846_v54, %v12094_v50 }
 0x676   : > { %vm12101_vm12 = vcmask 523264   ;;  %v4411_v19 = vadd.f32 %v10391_v44, %v10000_v35  ;;  %5869 = vrcp.f32 %v4388_v40  ;;  %vm4169_vm14 = vcmp.eq.f32.partialorder %v12094_v50, 0.0  ;;  %v12103_v35 = vld [vmem:[#allocation148_spill] sm:$0xff] }
 0x677   : > { %5336 = vmatprep.subr.msk.mxu0 %vm12101_vm12, %v4479_v2  ;;  %v4047_v5 = vmul.f32 %v5852_v18, %v12096_v31  ;;  %v3968_v22 = vshll.u32 %v3967_v53, 16  ;;  %vm4030_vm2 = vcmp.eq.s32.totalorder %v12076_v27, %v3984_v52  ;;  %v3966_v1 = vcvt.f32.s32 %v3965_v62  ;;  %vm12102_vm4 = vmmov %vm12101_vm12  ;;  %v5858_v36 = vpop.eup %5857 }
 0x678   : > { %5337 = vmatpush3.xpose.msk.msra.mxu0 %vm12102_vm4, %v4463_v23  ;;  %5871 = vrcp.f32 %v4278_v59  ;;  %v4175_v47 = vsel %vm4174_vm5, %v12093_v15, %v4173_v38  ;;  %vm4050_vm11 = vcmp.eq.f32.partialorder %v12096_v31, 0.0  ;;  %v4382_v12 = vsel %vm4030_vm2, %v10298_v32, %v12103_v35  ;;  %v5860_v37 = vpop.eup %5859  ;;  %vm12105_vm1 = vmmov %vm12102_vm4 }
 0x679   : > { %5873 = vrsqrt.f32 %v12104_v20  ;;  %v3952_v54 = vcvt.f32.s32 %v9861_v41  ;;  %v3969_v16 = vadd.s32 %v3968_v22, %v3966_v1  ;;  %v4478_v60 = vmul.f32 %v5858_v36, %v4382_v12  ;;  %vm12108_vm15 = vmmov %vm12105_vm1  ;;  %v12112_v22 = vld [vmem:[#allocation23_spill] sm:$0xff]  ;;  %v12113_v1 = vld [vmem:[#allocation41_spill] sm:$0xff] }
 0x67a   : > { %v4277_v33 = vadd.f32 1e-08, %v4185_v17  ;;  %v3592_v0 = vcvt.f32.s32 %v9865_v57  ;;  %5875 = vrcp.f32 %v4411_v19  ;;  %v4410_v45 = vadd.f32 %v10401_v43, %v10022_v46  ;;  %vm12110_vm5 = vmmov %vm12105_vm1  ;;  %v12114_v36 = vld [vmem:[#allocation73_spill] sm:$0xff] }
 0x67b   : > { %v4178_v8 = vsel %vm4176_vm13, %v4177_v49, %v4175_v47  ;;  %v4168_v32 = vsel %vm4167_vm7, %v12094_v50, %v4166_v51  ;;  %v4049_v41 = vsel %vm4048_vm0, %v12096_v31, %v4047_v5  ;;  %vm4029_vm10 = vcmp.eq.s32.totalorder %v12076_v27, %v3969_v16  ;;  %5338 = vmatprep.subr.msk.mxu0 %vm12105_vm1, %v4478_v60  ;;  %v5862_v57 = vpop.eup %5861  ;;  %v3950_v49 = vpop.xlane.xlu1 %3949  ;;  %vm12111_vm6 = vmmov %vm12105_vm1 }
 0x67c   : > { %v4159_v46 = vmul.f32 %v5860_v37, %v12098_v25  ;;  %5877 = vrsqrt.f32 %v12106_v24  ;;  %v4381_v15 = vsel %vm4029_vm10, %v10313_v48, %v12107_v29  ;;  %5339 = vmatpush3.xpose.msk.msra.mxu0 %vm12108_vm15, %v10187_v42  ;;  %v4409_v40 = vadd.f32 %v10427_v13, %v10031_v28  ;;  %v10475_v30 = vpop.eup %5863  ;;  %v12115_v37 = vld [vmem:[#allocation118_spill] sm:$0xff]  ;;  %vm12116_vm0 = vmmov %vm12105_vm1 }
 0x67d   : > { %v3953_v53 = vshll.u32 %v3952_v54, 16  ;;  %v3937_v39 = vcvt.f32.s32 %v12109_v61  ;;  %v3951_v58 = vcvt.f32.s32 %v3950_v49  ;;  %v3590_v18 = vpop.xlane.xlu0 %3589  ;;  %v4477_v59 = vmul.f32 %v5862_v57, %v4381_v15  ;;  %v12119_v15 = vld [vmem:[#allocation39_spill] sm:$0xff]  ;;  %vm12129_vm4 = vmmov %vm12116_vm0 }
 0x67e   : > { %v4051_v38 = vand.u32 2147483648, %v12096_v31  ;;  %v3593_v2 = vshll.u32 %v3592_v0, 16  ;;  %v3591_v52 = vcvt.f32.s32 %v3590_v18  ;;  %5879 = vrcp.f32 %v4410_v45  ;;  %vm12132_vm10 = vmmov %vm12116_vm0 }
 0x67f   : > { %5881 = vrcp.f32 %v4277_v33  ;;  %v4276_v48 = vadd.f32 1e-08, %v4178_v8  ;;  %vm4160_vm9 = vcmp.eq.f32.partialorder %v12098_v25, inf  ;;  %v3954_v42 = vadd.s32 %v3953_v53, %v3951_v58  ;;  %5340 = vmatprep.subr.msk.mxu0 %vm12110_vm5, %v4477_v59  ;;  %v3935_v5 = vpop.xlane.xlu1 %3934  ;;  %v12121_v53 = vld [vmem:[#allocation6_spill] sm:$0xff]  ;;  %v12123_v58 = vld [vmem:[#allocation121_spill] sm:$0xff]  ;;  %vm12134_vm15 = vmmov %vm12116_vm0 }
 0x680   : > { %v4171_v28 = vsel %vm4169_vm14, %v4170_v4, %v4168_v32  ;;  %v4052_v23 = vsel %vm4050_vm11, %v4051_v38, %v4049_v41  ;;  %v4161_v17 = vsel %vm4160_vm9, %v12098_v25, %v4159_v46  ;;  %v3594_v51 = vadd.s32 %v3593_v2, %v3591_v52  ;;  %5341 = vmatpush3.xpose.msk.msra.mxu0 %vm12111_vm6, %v10204_v11  ;;  %v10490_v62 = vpop.eup %5865  ;;  %vm12118_vm14 = vmmov %vm12116_vm0  ;;  %v12124_v59 = vld [vmem:[#allocation138_spill] sm:$0xff] }
 0x681   : > { %v3938_v19 = vshll.u32 %v3937_v39, 16  ;;  %vm4028_vm13 = vcmp.eq.s32.totalorder %v12076_v27, %v3954_v42  ;;  %5883 = vrcp.f32 %v4409_v40  ;;  %v4408_v50 = vadd.f32 %v10432_v26, %v12112_v22  ;;  %v12120_v40 = vld [vmem:[#allocation104_spill] sm:$0xff]  ;;  %v12122_v39 = vld [vmem:[#allocation107_spill] sm:$0xff]  ;;  %v12125_v38 = vld [vmem:[#allocation122_spill] sm:$0xff] }
 0x682   : > { %v5868_v4 = vpop.eup %5867  ;;  %v3922_v31 = vcvt.f32.s32 %v12113_v1  ;;  %v4380_v47 = vsel %vm4028_vm13, %v10351_v9, %v12114_v36  ;;  %vm4004_vm7 = vcmp.eq.s32.totalorder %v12076_v27, %v3594_v51  ;;  %v3936_v35 = vcvt.f32.s32 %v3935_v5  ;;  %v12126_v42 = vld [vmem:[#allocation106_spill] sm:$0xff]  ;;  %v12128_v22 = vld [vmem:[#allocation13_spill] sm:$0xff]  ;;  %v12131_v36 = vld [vmem:[#allocation79_spill] sm:$0xff] }
 0x683   : > { %v5870_v11 = vpop.eup %5869  ;;  %vm4162_vm8 = vcmp.eq.f32.partialorder %v12098_v25, 0.0  ;;  %v4163_v12 = vand.u32 2147483648, %v12098_v25  ;;  %v4356_v54 = vsel %vm4004_vm7, %v10381_v14, %v12115_v37  ;;  %v4476_v16 = vmul.f32 %v5868_v4, %v4380_v47  ;;  %v3920_v32 = vpop.xlane.xlu1 %3919  ;;  %v12117_v25 = vld [vmem:[#allocation7_spill] sm:$0xff]  ;;  %v12133_v37 = vld [vmem:[#allocation100_spill] sm:$0xff]  ;;  %vm12136_vm6 = vmmov %vm12116_vm0 }
 0x684   : > { %5885 = vrcp.f32 %v4276_v48  ;;  %v4275_v60 = vadd.f32 1e-08, %v4171_v28  ;;  %v3939_v33 = vadd.s32 %v3938_v19, %v3936_v35  ;;  %v10503_v0 = vmul.f32 %v5870_v11, %v4356_v54  ;;  %v12127_v28 = vld [vmem:[#allocation43_spill] sm:$0xff] }
 0x685   : > { %v10505_v45 = vpop.eup %5871  ;;  %v4258_v9 = vadd.f32 1e-08, %v4052_v23  ;;  %v4164_v8 = vsel %vm4162_vm8, %v4163_v12, %v4161_v17  ;;  %5342 = vmatprep.subr.msk.mxu0 %vm12116_vm0, %v4476_v16  ;;  %5887 = vrcp.f32 %v4408_v50  ;;  %v3923_v57 = vshll.u32 %v3922_v31, 16  ;;  %v12130_v31 = vld [vmem:[#allocation5_spill] sm:$0xff]  ;;  %vm12138_vm8 = vmmov %vm12116_vm0 }
 0x686   : > { %v5874_v41 = vpop.eup %5873  ;;  %v3907_v46 = vcvt.f32.s32 %v12117_v25  ;;  %vm4027_vm12 = vcmp.eq.s32.totalorder %v12076_v27, %v3939_v33  ;;  %v3921_v14 = vcvt.f32.s32 %v3920_v32  ;;  %5343 = vmatpush3.xpose.msk.msra.mxu0 %vm12118_vm14, %v10226_v55  ;;  %v3319_v61 = vadd.f32 %v12121_v53, %v12120_v40  ;;  %v12137_v40 = vld [vmem:[#allocation82_spill] sm:$0xff]  ;;  %vm12147_vm14 = vmmov %vm12116_vm0 }
 0x687   : > { %v5876_v29 = vpop.eup %5875  ;;  %v4379_v49 = vsel %vm4027_vm12, %v10391_v44, %v12119_v15  ;;  %v3318_v18 = vadd.f32 %v12123_v58, %v12122_v39  ;;  %v3317_v2 = vadd.f32 %v12125_v38, %v12124_v59  ;;  %5889 = vrcp.f32 %v4275_v60  ;;  %v3905_v51 = vpop.xlane.xlu1 %3904  ;;  %v12141_v59 = vld [vmem:[#allocation109_spill] sm:$0xff]  ;;  %vm12144_vm12 = vmmov %vm12116_vm0 }
 0x688   : > { %v3924_v52 = vadd.s32 %v3923_v57, %v3921_v14  ;;  %v4475_v48 = vmul.f32 %v5876_v29, %v4379_v49  ;;  %v3299_v23 = vadd.f32 %v12127_v28, %v12126_v42  ;;  %5891 = vrcp.f32 %v4258_v9 }
 0x689   : > { %v5878_v55 = vpop.eup %5877  ;;  %v4274_v17 = vadd.f32 1e-08, %v4164_v8  ;;  %v4040_v44 = vmul.f32 %v5874_v41, %v12104_v20  ;;  %v4407_v19 = vadd.f32 %v10475_v30, %v3319_v61  ;;  %v3908_v5 = vshll.u32 %v3907_v46, 16  ;;  %v12135_v41 = vld [vmem:[#allocation119_spill] sm:$0xff] }
 0x68a   : > { %v3892_v50 = vcvt.f32.s32 %v12128_v22  ;;  %vm4026_vm2 = vcmp.eq.s32.totalorder %v12076_v27, %v3924_v52  ;;  %v3906_v4 = vcvt.f32.s32 %v3905_v51  ;;  %5344 = vmatprep.subr.msk.mxu0 %vm12129_vm4, %v4475_v48  ;;  %vm4041_vm11 = vcmp.eq.f32.partialorder %v12104_v20, inf  ;;  %v12142_v52 = vld [vmem:[#allocation42_spill] sm:$0xff]  ;;  %v12146_v22 = vld [vmem:[#allocation125_spill] sm:$0xff] }
 0x68b   : > { %v5880_v1 = vpop.eup %5879  ;;  %5893 = vrsqrt.f32 %v12130_v31  ;;  %v4378_v47 = vsel %vm4026_vm2, %v10401_v43, %v12131_v36  ;;  %5345 = vmatpush3.xpose.msk.msra.mxu0 %vm12132_vm10, %v10257_v34  ;;  %v4387_v35 = vadd.f32 %v10490_v62, %v3299_v23  ;;  %v4152_v12 = vmul.f32 %v5878_v55, %v12106_v24  ;;  %v12143_v55 = vld [vmem:[#allocation22_spill] sm:$0xff]  ;;  %vm12156_vm10 = vmmov %vm12116_vm0 }
 0x68c   : > { %v10534_v11 = vpop.eup %5881  ;;  %5895 = vrsqrt.f32 %v12133_v37  ;;  %v3909_v54 = vadd.s32 %v3908_v5, %v3906_v4  ;;  %v4474_v16 = vmul.f32 %v5880_v1, %v4378_v47  ;;  %v4042_v60 = vsel %vm4041_vm11, %v12104_v20, %v4040_v44  ;;  %v12148_v47 = vld [vmem:[#allocation95_spill] sm:$0xff] }
 0x68d   : > { %v4044_v33 = vand.u32 2147483648, %v12104_v20  ;;  %v3890_v9 = vpop.xlane.xlu1 %3889  ;;  %5897 = vrcp.f32 %v4407_v19  ;;  %v4406_v43 = vadd.f32 %v10505_v45, %v3318_v18  ;;  %v3893_v34 = vshll.u32 %v3892_v50, 16 }
 0x68e   : > { %v5884_v8 = vpop.eup %5883  ;;  %5899 = vrcp.f32 %v4274_v17  ;;  %vm4025_vm1 = vcmp.eq.s32.totalorder %v12076_v27, %v3909_v54  ;;  %v3891_v32 = vcvt.f32.s32 %v3890_v9  ;;  %5346 = vmatprep.subr.msk.mxu0 %vm12134_vm15, %v4474_v16  ;;  %vm4043_vm9 = vcmp.eq.f32.partialorder %v12104_v20, 0.0  ;;  %v12149_v16 = vld [vmem:[#allocation68_spill] sm:$0xff] }
 0x68f   : > { %vm4153_vm5 = vcmp.eq.f32.partialorder %v12106_v24, inf  ;;  %v4377_v57 = vsel %vm4025_vm1, %v10427_v13, %v12135_v41  ;;  %5347 = vmatpush3.xpose.msk.msra.mxu0 %vm12136_vm6, %v10305_v56  ;;  %5901 = vrcp.f32 %v4387_v35  ;;  %v4045_v25 = vsel %vm4043_vm9, %v4044_v33, %v4042_v60  ;;  %v12139_v56 = vld [vmem:[#allocation139_spill] sm:$0xff]  ;;  %v12150_v60 = vld [vmem:[#allocation16_spill] sm:$0xff]  ;;  %vm12158_vm1 = vmmov %vm12116_vm0 }
 0x690   : > { %v4154_v46 = vsel %vm4153_vm5, %v12106_v24, %v4152_v12  ;;  %v3894_v14 = vadd.s32 %v3893_v34, %v3891_v32  ;;  %v4473_v29 = vmul.f32 %v5884_v8, %v4377_v57  ;;  %v4156_v49 = vand.u32 2147483648, %v12106_v24  ;;  %v12140_v13 = vld [vmem:[#allocation123_spill] sm:$0xff]  ;;  %v12151_v41 = vld [vmem:[#allocation8_spill] sm:$0xff]  ;;  %v12152_v57 = vld [vmem:[#allocation70_spill] sm:$0xff] }
 0x691   : > { %v10550_v15 = vpop.eup %5885  ;;  %v3877_v20 = vcvt.f32.s32 %v12137_v40  ;;  %5903 = vrcp.f32 %v4406_v43  ;;  %v4405_v53 = vadd.f32 %v10534_v11, %v3317_v2  ;;  %vm4155_vm13 = vcmp.eq.f32.partialorder %v12106_v24, 0.0  ;;  %vm12160_vm6 = vmmov %vm12116_vm0 }
 0x692   : > { %v5888_v61 = vpop.eup %5887  ;;  %vm4024_vm7 = vcmp.eq.s32.totalorder %v12076_v27, %v3894_v14  ;;  %5348 = vmatprep.subr.msk.mxu0 %vm12138_vm8, %v4473_v29  ;;  %v3316_v39 = vadd.f32 %v12140_v13, %v12139_v56  ;;  %v4257_v58 = vadd.f32 1e-08, %v4045_v25  ;;  %v4157_v18 = vsel %vm4155_vm13, %v4156_v49, %v4154_v46  ;;  %v3875_v2 = vpop.xlane.xlu1 %3874  ;;  %v12153_v25 = vld [vmem:[#allocation126_spill] sm:$0xff]  ;;  %vm12162_vm13 = vmmov %vm12116_vm0 }
 0x693   : > { %v3577_v38 = vcvt.f32.s32 %v12141_v59  ;;  %v4376_v48 = vsel %vm4024_vm7, %v10432_v26, %v12142_v52  ;;  %5349 = vmatpush3.xpose.msk.msra.mxu0 %vm12116_vm0, %v10327_v10  ;;  %v3878_v23 = vshll.u32 %v3877_v20, 16  ;;  %v3862_v17 = vcvt.f32.s32 %v12143_v55  ;;  %v12145_v26 = vld [vmem:[#allocation63_spill] sm:$0xff]  ;;  %v12154_v13 = vld [vmem:[#allocation10_spill] sm:$0xff] }
 0x694   : > { %v4472_v42 = vmul.f32 %v5888_v61, %v4376_v48  ;;  %v4404_v24 = vadd.f32 %v10550_v15, %v3316_v39  ;;  %v10566_v28 = vpop.eup %5889  ;;  %v3876_v44 = vcvt.f32.s32 %v3875_v2  ;;  %5905 = vrcp.f32 %v4405_v53  ;;  %v12157_v48 = vld [vmem:[#allocation12_spill] sm:$0xff] }
 0x695   : > { %v10569_v51 = vpop.eup %5891  ;;  %v4273_v19 = vadd.f32 1e-08, %v4157_v18  ;;  %v3575_v5 = vpop.xlane.xlu0 %3574  ;;  %v3315_v10 = vadd.f32 %v12146_v22, %v12145_v26  ;;  %5907 = vrcp.f32 %v4257_v58  ;;  %v3578_v50 = vshll.u32 %v3577_v38, 16  ;;  %v12155_v58 = vld [vmem:[#allocation30_spill] sm:$0xff] }
 0x696   : > { %5350 = vmatprep.subr.msk.mxu0 %vm12144_vm12, %v4472_v42  ;;  %v3879_v4 = vadd.s32 %v3878_v23, %v3876_v44  ;;  %v3576_v1 = vcvt.f32.s32 %v3575_v5  ;;  %v3847_v35 = vcvt.f32.s32 %v12148_v47  ;;  %5909 = vrcp.f32 %v4404_v24  ;;  %vm12164_vm12 = vmmov %vm12158_vm1 }
 0x697   : > { %5351 = vmatpush3.xpose.msk.msra.mxu0 %vm12147_vm14, %v10349_v21  ;;  %v4403_v54 = vadd.f32 %v10566_v28, %v3315_v10  ;;  %v3298_v33 = vadd.f32 %v12150_v60, %v12149_v16  ;;  %v3863_v43 = vshll.u32 %v3862_v17, 16  ;;  %5911 = vrcp.f32 %v4273_v19  ;;  %v12159_v19 = vld [vmem:[#allocation96_spill] sm:$0xff]  ;;  %vm12167_vm14 = vmmov %vm12158_vm1 }
 0x698   : > { %v5894_v36 = vpop.eup %5893  ;;  %v3860_v12 = vpop.xlane.xlu1 %3859  ;;  %vm4023_vm2 = vcmp.eq.s32.totalorder %v12076_v27, %v3879_v4  ;;  %v3579_v8 = vadd.s32 %v3578_v50, %v3576_v1  ;;  %v3314_v46 = vadd.f32 %v12153_v25, %v12152_v57  ;;  %v3848_v56 = vshll.u32 %v3847_v35, 16  ;;  %v12161_v10 = vld [vmem:[#allocation124_spill] sm:$0xff] }
 0x699   : > { %v5896_v9 = vpop.eup %5895  ;;  %v3861_v34 = vcvt.f32.s32 %v3860_v12  ;;  %v4375_v21 = vsel %vm4023_vm2, %v10475_v30, %v12151_v41  ;;  %v4386_v14 = vadd.f32 %v10569_v51, %v3298_v33  ;;  %v4033_v49 = vmul.f32 %v5894_v36, %v12130_v31  ;;  %v12163_v60 = vld [vmem:[#allocation136_spill] sm:$0xff]  ;;  %v12168_v41 = vld [vmem:[#allocation45_spill] sm:$0xff] }
 0x69a   : > { %v5898_v32 = vpop.eup %5897  ;;  %vm4003_vm4 = vcmp.eq.s32.totalorder %v12076_v27, %v3579_v8  ;;  %v4145_v61 = vmul.f32 %v5896_v9, %v12133_v37  ;;  %5913 = vrcp.f32 %v4403_v54  ;;  %v3832_v18 = vcvt.f32.s32 %v12155_v58  ;;  %v12166_v9 = vld [vmem:[#allocation14_spill] sm:$0xff] }
 0x69b   : > { %v10586_v29 = vpop.eup %5899  ;;  %v3864_v40 = vadd.s32 %v3863_v43, %v3861_v34  ;;  %v4471_v20 = vmul.f32 %v5898_v32, %v4375_v21  ;;  %v4355_v30 = vsel %vm4003_vm4, %v10490_v62, %v12154_v13  ;;  %vm4034_vm15 = vcmp.eq.f32.partialorder %v12130_v31, inf  ;;  %v12169_v21 = vld [vmem:[#allocation18_spill] sm:$0xff]  ;;  %vm12172_vm4 = vmmov %vm12158_vm1  ;;  %v12173_v13 = vld [vmem:[#allocation15_spill] sm:$0xff] }
 0x69c   : > { %v5902_v53 = vpop.eup %5901  ;;  %v3845_v39 = vpop.xlane.xlu1 %3844  ;;  %v4402_v62 = vadd.f32 %v10586_v29, %v3314_v46  ;;  %vm4146_vm9 = vcmp.eq.f32.partialorder %v12133_v37, inf  ;;  %v4035_v23 = vsel %vm4034_vm15, %v12130_v31, %v4033_v49  ;;  %5915 = vrcp.f32 %v4386_v14  ;;  %v12170_v14 = vld [vmem:[#allocation49_spill] sm:$0xff]  ;;  %v12171_v49 = vld [vmem:[#allocation130_spill] sm:$0xff] }
 0x69d   : > { %vm4022_vm11 = vcmp.eq.s32.totalorder %v12076_v27, %v3864_v40  ;;  %v3846_v59 = vcvt.f32.s32 %v3845_v39  ;;  %5352 = vmatprep.subr.msk.mxu0 %vm12156_vm10, %v4471_v20  ;;  %v10596_v38 = vmul.f32 %v5902_v53, %v4355_v30  ;;  %v4147_v55 = vsel %vm4146_vm9, %v12133_v37, %v4145_v61  ;;  %vm12176_vm9 = vmmov %vm12158_vm1 }
 0x69e   : > { %v5904_v52 = vpop.eup %5903  ;;  %v4374_v2 = vsel %vm4022_vm11, %v10505_v45, %v12157_v48  ;;  %5353 = vmatpush3.xpose.msk.msra.mxu0 %vm12158_vm1, %v10365_v63  ;;  %v3833_v44 = vshll.u32 %v3832_v18, 16  ;;  %v3817_v45 = vcvt.f32.s32 %v12159_v19  ;;  %v4037_v26 = vand.u32 2147483648, %v12130_v31  ;;  %vm12174_vm11 = vmmov %vm12158_vm1 }
 0x69f   : > { %v3849_v42 = vadd.s32 %v3848_v56, %v3846_v59  ;;  %v4470_v24 = vmul.f32 %v5904_v52, %v4374_v2  ;;  %v4149_v22 = vand.u32 2147483648, %v12133_v37  ;;  %5917 = vrcp.f32 %v4402_v62  ;;  %v12175_v2 = vld [vmem:[#allocation17_spill] sm:$0xff] }
 0x6a0   : > { %v3830_v17 = vpop.xlane.xlu1 %3829  ;;  %vm4036_vm7 = vcmp.eq.f32.partialorder %v12130_v31, 0.0  ;;  %vm4148_vm8 = vcmp.eq.f32.partialorder %v12133_v37, 0.0  ;;  %v3818_v16 = vshll.u32 %v3817_v45, 16  ;;  %v3562_v33 = vcvt.f32.s32 %v12163_v60  ;;  %v12186_v60 = vld [vmem:[#allocation56_spill] sm:$0xff] }
 0x6a1   : > { %vm4021_vm5 = vcmp.eq.s32.totalorder %v12076_v27, %v3849_v42  ;;  %v3831_v63 = vcvt.f32.s32 %v3830_v17  ;;  %5354 = vmatprep.subr.msk.mxu0 %vm12160_vm6, %v4470_v24  ;;  %v5906_v5 = vpop.eup %5905  ;;  %v4038_v47 = vsel %vm4036_vm7, %v4037_v26, %v4035_v23  ;;  %v4150_v35 = vsel %vm4148_vm8, %v4149_v22, %v4147_v55  ;;  %v12178_v55 = vld [vmem:[#allocation74_spill] sm:$0xff]  ;;  %vm12181_vm6 = vmmov %vm12158_vm1 }
 0x6a2   : > { %v4373_v50 = vsel %vm4021_vm5, %v10534_v11, %v12161_v10  ;;  %5355 = vmatpush3.xpose.msk.msra.mxu0 %vm12162_vm13, %v10386_v3  ;;  %v10618_v36 = vpop.eup %5907  ;;  %v12165_v3 = vld [vmem:[#allocation60_spill] sm:$0xff]  ;;  %v4256_v8 = vadd.f32 1e-08, %v4038_v47  ;;  %v3297_v57 = vadd.f32 %v12169_v21, %v12168_v41  ;;  %v4272_v25 = vadd.f32 1e-08, %v4150_v35  ;;  %vm12180_vm5 = vmmov %vm12158_vm1  ;;  %v12191_v41 = vld [vmem:[#allocation90_spill] sm:$0xff] }
 0x6a3   : > { %v3834_v4 = vadd.s32 %v3833_v44, %v3831_v63  ;;  %v4469_v1 = vmul.f32 %v5906_v5, %v4373_v50  ;;  %v5910_v54 = vpop.eup %5909  ;;  %v3802_v31 = vcvt.f32.s32 %v12165_v3  ;;  %v3313_v40 = vadd.f32 %v12171_v49, %v12170_v14  ;;  %v12179_v44 = vld [vmem:[#allocation31_spill] sm:$0xff]  ;;  %v12187_v3 = vld [vmem:[#allocation132_spill] sm:$0xff]  ;;  %vm12188_vm8 = vmmov %vm12158_vm1 }
 0x6a4   : > { %v3815_v12 = vpop.xlane.xlu1 %3814  ;;  %v5912_v43 = vpop.eup %5911  ;;  %v3563_v53 = vshll.u32 %v3562_v33, 16  ;;  %v4385_v61 = vadd.f32 %v10618_v36, %v3297_v57  ;;  %5919 = vrcp.f32 %v4256_v8  ;;  %v3547_v17 = vcvt.f32.s32 %v12178_v55 }
 0x6a5   : > { %vm4020_vm0 = vcmp.eq.s32.totalorder %v12076_v27, %v3834_v4  ;;  %v3816_v11 = vcvt.f32.s32 %v3815_v12  ;;  %5356 = vmatprep.subr.msk.mxu0 %vm12164_vm12, %v4469_v1  ;;  %v3803_v56 = vshll.u32 %v3802_v31, 16  ;;  %v4401_v58 = vadd.f32 %v5912_v43, %v3313_v40  ;;  %v12182_v4 = vld [vmem:[#allocation55_spill] sm:$0xff]  ;;  %v12183_v1 = vld [vmem:[#allocation21_spill] sm:$0xff]  ;;  %v12184_v12 = vld [vmem:[#allocation52_spill] sm:$0xff] }
 0x6a6   : > { %v4372_v37 = vsel %vm4020_vm0, %v10550_v15, %v12166_v9  ;;  %5357 = vmatpush3.xpose.msk.msra.mxu0 %vm12167_vm14, %v10424_v7  ;;  %5921 = vrcp.f32 %v4272_v25  ;;  %v3787_v19 = vcvt.f32.s32 %v12179_v44  ;;  %v3548_v45 = vshll.u32 %v3547_v17, 16  ;;  %vm12189_vm0 = vmmov %vm12158_vm1  ;;  %v4651_v17 = vld [vmem:[%s10848_s4] sm:$0xff]  ;;  %v4652_v44 = vld [vmem:[%s10848_s4 + $0x8] sm:$0xff] }
 0x6a7   : > { %v3819_v34 = vadd.s32 %v3818_v16, %v3816_v11  ;;  %v4468_v32 = vmul.f32 %v5910_v54, %v4372_v37  ;;  %v3560_v46 = vpop.xlane.xlu0 %3559  ;;  %v5914_v20 = vpop.eup %5913  ;;  %5923 = vrcp.f32 %v4385_v61  ;;  %v3296_v47 = vadd.f32 %v12183_v1, %v12182_v4  ;;  %v12185_v16 = vld [vmem:[#allocation19_spill] sm:$0xff] }
 0x6a8   : > { %v3561_v15 = vcvt.f32.s32 %v3560_v46  ;;  %v3800_v7 = vpop.xlane.xlu1 %3799  ;;  %5925 = vrcp.f32 %v4401_v58  ;;  %v3312_v33 = vadd.f32 %v12186_v60, %v12185_v16  ;;  %v3772_v21 = vcvt.f32.s32 %v12191_v41  ;;  %v5931_v58 = vld [vmem:[%s10245_s27] sm:$0xff]  ;;  %s5146_s27 = sshll.u32 %s10770_s23, 4  ;;  %s10793_s27 = int_to_ptr.vmem [resolvable:$true] %s5146_s27 }
 0x6a9   : > { %vm4019_vm2 = vcmp.eq.s32.totalorder %v12076_v27, %v3819_v34  ;;  %5358 = vmatprep.subr.msk.mxu0 %vm12172_vm4, %v4468_v32  ;;  %v3801_v39 = vcvt.f32.s32 %v3800_v7  ;;  %v5916_v48 = vpop.eup %5915  ;;  %v12190_v32 = vld [vmem:[#allocation103_spill] sm:$0xff]  ;;  %vm12195_vm4 = vmmov %vm12189_vm0  ;;  %s5932_s29 = scalar_lea.vmem %s10793_s27, 2048  ;;  %p5939_p1 = scmp.lt.s32.totalorder %s10793_s27, %s5937_s16 }
 0x6aa   : > { %v4371_v30 = vsel %vm4019_vm2, %v10566_v28, %v12173_v13  ;;  %5359 = vmatpush3.xpose.msk.msra.mxu0 %vm12174_vm11, %v10503_v0  ;;  %v3564_v18 = vadd.s32 %v3563_v53, %v3561_v15  ;;  %v12177_v28 = vld [vmem:[#allocation128_spill] sm:$0xff]  ;;  %vm12194_vm2 = vmmov %vm12189_vm0  ;;  %p5933_p12 = scmp.ne.s32.totalorder %s10793_s27, %s5932_s29  ;;  %p5940_p2 = scmp.lt.s32.totalorder %s5938_s20, %s5932_s29 }
 0x6ab   : > { %v4467_v59 = vmul.f32 %v5914_v20, %v4371_v30  ;;  %v3804_v52 = vadd.s32 %v3803_v56, %v3801_v39  ;;  %v12192_v15 = vld [vmem:[#allocation20_spill] sm:$0xff]  ;;  %v12193_v56 = vld [vmem:[#allocation58_spill] sm:$0xff]  ;;  %vm12196_vm11 = vmmov %vm12189_vm0 }
 0x6ac   : > { %vm4002_vm10 = vcmp.eq.s32.totalorder %v12076_v27, %v3564_v18  ;;  %v5918_v0 = vpop.eup %5917  ;;  %v4660_v18 = vld [vmem:[%s10849_s5 + $0x18] sm:$0xff]  ;;  %p5934_p13 = pnand %p5933_p12, %p6107_p4  ;;  %p5941_p3 = por %p5940_p2, %p5939_p1 }
 0x6ad   : > { %5360 = vmatprep.subr.msk.mxu0 %vm12158_vm1, %v4467_v59  ;;  %v4354_v62 = vsel %vm4002_vm10, %v10569_v51, %v12175_v2  ;;  %vm4018_vm15 = vcmp.eq.s32.totalorder %v12076_v27, %v3804_v52  ;;  %5315 = vmatmul.mubr.msk.f32.gmra.mxu1 %vm4661_vm3, %v4660_v18  ;;  %v4865_v59 = vld [vmem:[%s10850_s6 + $0x8] sm:$0xff]  ;;  %v4864_v52 = vld [vmem:[%s10850_s6] sm:$0xff]  ;;  %v4906_v18 = vld [vmem:[%s10851_s7 + $0x10] sm:$0xff] }
 0x6ae   : > { %5361 = vmatpush3.xpose.msk.msra.mxu0 %vm12176_vm9, %v10596_v38  ;;  %v4370_v42 = vsel %vm4018_vm15, %v10586_v29, %v12177_v28  ;;  %v4450_v24 = vmul.f32 %v5916_v48, %v4354_v62  ;;  %v3788_v38 = vshll.u32 %v3787_v19, 16  ;;  %4839 = vmatprep.mubr.f32.mxu1 %v6013_v6  ;;  %v4912_v48 = vld [vmem:[%s10852_s8] sm:$0xff]  ;;  %v4913_v2 = vld [vmem:[%s10852_s8 + $0x8] sm:$0xff]  ;;  %v4914_v62 = vld [vmem:[%s10852_s8 + $0x10] sm:$0xff]  ;;  %p5935_p0 = pneg %p5934_p13 }
 0x6af   : > { %v4466_v23 = vmul.f32 %v5918_v0, %v4370_v42  ;;  %v4915_v0 = vld [vmem:[%s10852_s8 + $0x18] sm:$0xff]  ;;  %v4916_v28 = vld [vmem:[%s10852_s8 + $0x20] sm:$0xff]  ;;  %v4917_v42 = vld [vmem:[%s10852_s8 + $0x28] sm:$0xff] }
 0x6b0   : > { %v4653_v19 = vld [vmem:[%s10848_s4 + $0x10] sm:$0xff]  ;;  %p5942_p5 = pnand %p5941_p3, %p5935_p0 }
 0x6b1   : > { %5362 = vmatprep.subr.msk.mxu0 %vm12180_vm5, %v4466_v23  ;;  %v5920_v10 = vpop.eup %5919 }
 0x6b2   : > { %5363 = vmatpush3.xpose.msk.msra.mxu0 %vm12181_vm6, %v4450_v24  ;;  %v3545_v51 = vpop.xlane.xlu0 %3544  ;;  %v4384_v37 = vadd.f32 %v5920_v10, %v3296_v47  ;;  %v4919_v24 = vld [vmem:[%s10852_s8 + $0x38] sm:$0xff] }
 0x6b3   : > { %v3546_v63 = vcvt.f32.s32 %v3545_v51  ;;  %v5922_v29 = vpop.eup %5921  ;;  %v4654_v51 = vld [vmem:[%s10848_s4 + $0x18] sm:$0xff] }
 0x6b4   : > { %v5924_v35 = vpop.eup %5923  ;;  %v4400_v34 = vadd.f32 %v5922_v29, %v3312_v33  ;;  %5927 = vrcp.f32 %v4384_v37 }
 0x6b5   : > { %v3785_v5 = vpop.xlane.xlu1 %3784  ;;  %v3549_v22 = vadd.s32 %v3548_v45, %v3546_v63  ;;  %v5926_v11 = vpop.eup %5925 }
 0x6b6   : > { %v3786_v26 = vcvt.f32.s32 %v3785_v5  ;;  %5929 = vrcp.f32 %v4400_v34 }
 0x6b7   : > { %vm4001_vm13 = vcmp.eq.s32.totalorder %v12076_v27, %v3549_v22 }
 0x6b8   : > { %v3789_v50 = vadd.s32 %v3788_v38, %v3786_v26  ;;  %v4353_v54 = vsel %vm4001_vm13, %v10618_v36, %v12184_v12  ;;  %v3532_v36 = vcvt.f32.s32 %v12190_v32 }
 0x6b9   : > { %v4449_v9 = vmul.f32 %v5924_v35, %v4353_v54 }
 0x6ba   : > { %vm4017_vm7 = vcmp.eq.s32.totalorder %v12076_v27, %v3789_v50  ;;  %v3533_v25 = vshll.u32 %v3532_v36, 16 }
 0x6bb   : > { %v4369_v31 = vsel %vm4017_vm7, %v5912_v43, %v12187_v3  ;;  %v3773_v43 = vshll.u32 %v3772_v21, 16 }
 0x6bc   : > { %v4465_v8 = vmul.f32 %v5926_v11, %v4369_v31 }
 0x6be   : > { %5364 = vmatprep.subr.msk.mxu0 %vm12188_vm8, %v4465_v8 }
 0x6bf   : > { %5365 = vmatpush3.xpose.msk.msra.mxu0 %vm12189_vm0, %v4449_v9 }
 0x6c1   : > { %v5928_v53 = vpop.eup %5927 }
 0x6c3   : > { %v5930_v61 = vpop.eup %5929 }
 0x6c5   : > { %v3530_v57 = vpop.xlane.xlu0 %3529 }
 0x6c6   : > { %v3531_v46 = vcvt.f32.s32 %v3530_v57 }
 0x6c8   : > { %v3770_v14 = vpop.xlane.xlu1 %3769  ;;  %v3534_v40 = vadd.s32 %v3533_v25, %v3531_v46 }
 0x6c9   : > { %v3771_v49 = vcvt.f32.s32 %v3770_v14 }
 0x6ca   : > { %vm4000_vm12 = vcmp.eq.s32.totalorder %v12076_v27, %v3534_v40 }
 0x6cb   : > { %v3774_v20 = vadd.s32 %v3773_v43, %v3771_v49  ;;  %v4352_v7 = vsel %vm4000_vm12, %v5920_v10, %v12192_v15 }
 0x6cc   : > { %v4448_v30 = vmul.f32 %v5928_v53, %v4352_v7 }
 0x6cd   : > { %vm4016_vm14 = vcmp.eq.s32.totalorder %v12076_v27, %v3774_v20  ;;  %v4867_v27 = vld [vmem:[%s10850_s6 + $0x18] sm:$0xff]  ;;  %v4881_v8 = vpop.permute.xlu0 %4880 }
 0x6ce   : > { %v4368_v13 = vsel %vm4016_vm14, %v5922_v29, %v12193_v56  ;;  %4885 = vperm.xlu1 %5482, %v4867_v27   ;;  %v4907_v27 = vld [vmem:[%s10851_s7 + $0x18] sm:$0xff] }
 0x6cf   : > { %v4464_v39 = vmul.f32 %v5930_v61, %v4368_v13 }
 0x6d1   : > { %5366 = vmatprep.subr.msk.mxu0 %vm12194_vm2, %v4464_v39  ;;  %v4904_v39 = vld [vmem:[%s10851_s7] sm:$0xff] }
 0x6d2   : > { %5367 = vmatpush3.xpose.msk.msra.mxu0 %vm12195_vm4, %v4448_v30  ;;  %4875 = vperm.xlu1 %5482, %v4865_v59   ;;  %v4908_v59 = vld [vmem:[%s10851_s7 + $0x20] sm:$0xff] }
 0x6d5   : > { %5369 = vmatmul.mubr.msk.f32.vlgmr.msra.gmra.mxu0 %vm12196_vm11, %v5931_v58  ;;  %v4905_v58 = vld [vmem:[%s10851_s7 + $0x8] sm:$0xff] }
 0x6d6   : > { %4870 = vperm.xlu1 %5482, %v4864_v52   ;;  %v4909_v52 = vld [vmem:[%s10851_s7 + $0x28] sm:$0xff] }
 0x6da   : > { %4922 = vperm.xlu1 %5482, %v4912_v48   ;;  %v4910_v48 = vld [vmem:[%s10851_s7 + $0x30] sm:$0xff] }
 0x6de   : > { %4927 = vperm.xlu1 %5482, %v4913_v2   ;;  %v4911_v2 = vld [vmem:[%s10851_s7 + $0x38] sm:$0xff] }
 0x6e2   : > { %4932 = vperm.xlu1 %5482, %v4914_v62  }
 0x6e6   : > { %4937 = vperm.xlu1 %5482, %v4915_v0  }
 0x6ea   : > { %4942 = vperm.xlu1 %5482, %v4916_v28  }
 0x6ee   : > { %4947 = vperm.xlu1 %5482, %v4917_v42  }
 0x6f2   : > { %4957 = vperm.xlu1 %5482, %v4919_v24  }
 0x716   : > { %v4740_v45 = vpop.f32.mrf.mxu1 }
 0x718   : > { %v4742_v63 = vpop.f32.mrf.mxu1 }
 0x71a   : > { %v4746_v5 = vpop.f32.mrf.mxu1 }
 0x71c   : > { %v4748_v38 = vpop.f32.mrf.mxu1 }
 0x71e   : > { %v4752_v26 = vpop.f32.mrf.mxu1 }
 0x720   : > { %v4754_v22 = vpop.f32.mrf.mxu1 }
 0x749   : > { %v4886_v35 = vpop.permute.xlu1 %4885 }
 0x74d   : > { %v4876_v11 = vpop.permute.xlu1 %4875 }
 0x751   : > { %v4871_v43 = vpop.permute.xlu1 %4870 }
 0x755   : > { %v4923_v62 = vpop.permute.xlu1 %4922 }
 0x759   : > { %v4928_v0 = vpop.permute.xlu1 %4927 }
 0x75d   : > { %v4933_v24 = vpop.permute.xlu1 %4932 }
 0x76d   : > { %v4758_v10 = vpop.f32.mrf.mxu1 }
 0x76f   : > { %v4760_v50 = vpop.f32.mrf.mxu1 }
 0x795   : > { %v4646_v23 = vpop.f32.mrf.mxu0 }
 0x797   : > { %v4648_v55 = vpop.f32.mrf.mxu0 }
 0x798   : > { %4805 = vmatprep.subr.mxu1 %v4648_v55 }
 0x799   : > { %4806 = vmatpush1.msra.mxu1 %v4646_v23 }
 0x79a   : > { %5316 = vmatmul.mubr.msk.f32.vlgmr.msra.gmra.mxu1 %vm4661_vm3, %v4651_v17 }
 0x79b   : > { %4845 = vmatprep.mubr.f32.mxu1 %v6013_v6 }
 0x79e   : > { %5317 = vmatmul.mubr.msk.f32.gmra.mxu1 %vm4661_vm3, %v4652_v44 }
 0x79f   : > { %4851 = vmatprep.mubr.f32.mxu1 %v6013_v6 }
 0x7a2   : > { %5318 = vmatmul.mubr.msk.f32.gmra.mxu1 %vm4661_vm3, %v4653_v19 }
 0x7a3   : > { %4857 = vmatprep.mubr.f32.mxu1 %v6013_v6 }
 0x7a6   : > { %5319 = vmatmul.mubr.msk.f32.gmra.mxu1 %vm4661_vm3, %v4654_v51  ;;  %vm4960_vm3 = vcmask 261120  }
 0x7a7   : > { %5049 = vmatprep.mubr.f32.mxu1 %v6013_v6 }
 0x85a   : > { %v4841_v29 = vpop.f32.mrf.mxu1 }
 0x85b   : > { %v4842_v57 = vadd.f32 %v4841_v29, %v4740_v45 }
 0x85c   : > { %v4843_v4 = vpop.f32.mrf.mxu1 }
 0x85d   : > { %v4844_v36 = vadd.f32 %v4843_v4, %v4742_v63  ;;  %v4888_v15 = vadd.f32 %v4871_v43, %v4842_v57  ;;  %v4953_v57 = vpop.permute.xlu0 %4952 }
 0x85e   : > { %v4847_v1 = vpop.f32.mrf.mxu1 }
 0x85f   : > { %v4848_v34 = vadd.f32 %v4847_v1, %v4746_v5  ;;  %v4889_v20 = vadd.f32 %v4871_v43, %v4844_v36  ;;  %v4896_v30 = vmax.f32 %v4888_v15, 0.0  ;;  %v4938_v5 = vpop.permute.xlu1 %4937 }
 0x860   : > { %v4849_v47 = vpop.f32.mrf.mxu1 }
 0x861   : > { %v4850_v9 = vadd.f32 %v4849_v47, %v4748_v38  ;;  %v4890_v49 = vadd.f32 %v4876_v11, %v4848_v34  ;;  %v4897_v13 = vmax.f32 %v4889_v20, 0.0 }
 0x862   : > { %v4853_v12 = vpop.f32.mrf.mxu1 }
 0x863   : > { %v4854_v3 = vadd.f32 %v4853_v12, %v4752_v26  ;;  %v4891_v46 = vadd.f32 %v4876_v11, %v4850_v9  ;;  %v4898_v56 = vmax.f32 %v4890_v49, 0.0 }
 0x864   : > { %v4855_v54 = vpop.f32.mrf.mxu1 }
 0x865   : > { %v4856_v60 = vadd.f32 %v4855_v54, %v4754_v22  ;;  %v4892_v25 = vadd.f32 %v4881_v8, %v4854_v3  ;;  %v4899_v61 = vmax.f32 %v4891_v46, 0.0 }
 0x866   : > { %v4859_v16 = vpop.f32.mrf.mxu1 }
 0x867   : > { %v4860_v33 = vadd.f32 %v4859_v16, %v4758_v10  ;;  %v4893_v41 = vadd.f32 %v4881_v8, %v4856_v60  ;;  %v4900_v7 = vmax.f32 %v4892_v25, 0.0 }
 0x868   : > { %v4861_v31 = vpop.f32.mrf.mxu1 }
 0x869   : > { %v4862_v37 = vadd.f32 %v4861_v31, %v4760_v50  ;;  %v4894_v32 = vadd.f32 %v4886_v35, %v4860_v33  ;;  %v4901_v53 = vmax.f32 %v4893_v41, 0.0 }
 0x86b   : > { %v4895_v21 = vadd.f32 %v4886_v35, %v4862_v37  ;;  %v4902_v40 = vmax.f32 %v4894_v32, 0.0  ;;  %v4943_v35 = vpop.permute.xlu1 %4942 }
 0x86d   : > { %v4903_v14 = vmax.f32 %v4895_v21, 0.0 }
 0x86f   : > { %5009 = vmatprep.subr.mxu1 %v4903_v14  ;;  %v4948_v37 = vpop.permute.xlu1 %4947 }
 0x870   : > { %5010 = vmatpush1.msra.mxu1 %v4902_v40 }
 0x871   : > { %5011 = vmatprep.subr.mxu1 %v4901_v53 }
 0x872   : > { %5012 = vmatpush1.msra.mxu1 %v4900_v7 }
 0x873   : > { %5013 = vmatprep.subr.mxu1 %v4899_v61  ;;  %v4958_v20 = vpop.permute.xlu1 %4957 }
 0x874   : > { %5014 = vmatpush1.msra.mxu1 %v4898_v56 }
 0x875   : > { %5015 = vmatprep.subr.mxu1 %v4897_v13 }
 0x876   : > { %5016 = vmatpush1.msra.mxu1 %v4896_v30 }
 0x877   : > { %5320 = vmatmul.mubr.msk.f32.vlgmr.msra.gmra.mxu1 %vm4960_vm3, %v4904_v39 }
 0x878   : > { %5055 = vmatprep.mubr.f32.mxu1 %v6013_v6 }
 0x87b   : > { %5321 = vmatmul.mubr.msk.f32.gmra.mxu1 %vm4960_vm3, %v4905_v58 }
 0x87c   : > { %5061 = vmatprep.mubr.f32.mxu1 %v6013_v6 }
 0x87f   : > { %5322 = vmatmul.mubr.msk.f32.gmra.mxu1 %vm4960_vm3, %v4906_v18 }
 0x880   : > { %5067 = vmatprep.mubr.f32.mxu1 %v6013_v6 }
 0x883   : > { %5323 = vmatmul.mubr.msk.f32.gmra.mxu1 %vm4960_vm3, %v4907_v27 }
 0x884   : > { %5073 = vmatprep.mubr.f32.mxu1 %v6013_v6 }
 0x887   : > { %5324 = vmatmul.mubr.msk.f32.gmra.mxu1 %vm4960_vm3, %v4908_v59 }
 0x888   : > { %5079 = vmatprep.mubr.f32.mxu1 %v6013_v6 }
 0x88b   : > { %5325 = vmatmul.mubr.msk.f32.gmra.mxu1 %vm4960_vm3, %v4909_v52 }
 0x88c   : > { %5085 = vmatprep.mubr.f32.mxu1 %v6013_v6 }
 0x88f   : > { %5326 = vmatmul.mubr.msk.f32.gmra.mxu1 %vm4960_vm3, %v4910_v48 }
 0x890   : > { %5091 = vmatprep.mubr.f32.mxu1 %v6013_v6 }
 0x893   : > { %5327 = vmatmul.mubr.msk.f32.gmra.mxu1 %vm4960_vm3, %v4911_v2 }
 0x937   : > { %v5051_v28 = vpop.f32.mrf.mxu1 }
 0x938   : > { %v5052_v42 = vadd.f32 %v5051_v28, %v4923_v62 }
 0x939   : > { %v5053_v23 = vpop.f32.mrf.mxu1 }
 0x93a   : > { %v5098_v55 = vmax.f32 %v5052_v42, 0.0  ;;  %v5054_v17 = vadd.f32 %v5053_v23, %v4923_v62 }
 0x93b   : > { %v5057_v44 = vpop.f32.mrf.mxu1 }
 0x93c   : > { %5114 = vst [vmem:[%s10770_s23] sm:$0xff] %v5098_v55  ;;  %v5099_v6 = vmax.f32 %v5054_v17, 0.0  ;;  %v5058_v19 = vadd.f32 %v5057_v44, %v4928_v0 }
 0x93d   : > { %v5059_v51 = vpop.f32.mrf.mxu1 }
 0x93e   : > { %5115 = vst [vmem:[%s10770_s23 + $0x8] sm:$0xff] %v5099_v6  ;;  %v5100_v45 = vmax.f32 %v5058_v19, 0.0  ;;  %v5060_v63 = vadd.f32 %v5059_v51, %v4928_v0 }
 0x93f   : > { %v5063_v38 = vpop.f32.mrf.mxu1 }
 0x940   : > { %5116 = vst [vmem:[%s10770_s23 + $0x10] sm:$0xff] %v5100_v45  ;;  %v5101_v26 = vmax.f32 %v5060_v63, 0.0  ;;  %v5064_v22 = vadd.f32 %v5063_v38, %v4933_v24 }
 0x941   : > { %v5065_v10 = vpop.f32.mrf.mxu1 }
 0x942   : > { %5117 = vst [vmem:[%s10770_s23 + $0x18] sm:$0xff] %v5101_v26  ;;  %v5102_v50 = vmax.f32 %v5064_v22, 0.0  ;;  %v5066_v29 = vadd.f32 %v5065_v10, %v4933_v24 }
 0x943   : > { %v5069_v4 = vpop.f32.mrf.mxu1 }
 0x944   : > { %5118 = vst [vmem:[%s10770_s23 + $0x20] sm:$0xff] %v5102_v50  ;;  %v5103_v1 = vmax.f32 %v5066_v29, 0.0  ;;  %v5070_v47 = vadd.f32 %v5069_v4, %v4938_v5 }
 0x945   : > { %v5071_v12 = vpop.f32.mrf.mxu1 }
 0x946   : > { %5119 = vst [vmem:[%s10770_s23 + $0x28] sm:$0xff] %v5103_v1  ;;  %v5104_v54 = vmax.f32 %v5070_v47, 0.0  ;;  %v5072_v16 = vadd.f32 %v5071_v12, %v4938_v5 }
 0x947   : > { %v5075_v60 = vpop.f32.mrf.mxu1 }
 0x948   : > { %5120 = vst [vmem:[%s10770_s23 + $0x30] sm:$0xff] %v5104_v54  ;;  %v5105_v33 = vmax.f32 %v5072_v16, 0.0  ;;  %v5076_v11 = vadd.f32 %v5075_v60, %v4943_v35 }
 0x949   : > { %v5077_v3 = vpop.f32.mrf.mxu1 }
 0x94a   : > { %5121 = vst [vmem:[%s10770_s23 + $0x38] sm:$0xff] %v5105_v33  ;;  %v5106_v31 = vmax.f32 %v5076_v11, 0.0  ;;  %v5078_v9 = vadd.f32 %v5077_v3, %v4943_v35 }
 0x94b   : > { %v5081_v8 = vpop.f32.mrf.mxu1 }
 0x94c   : > { %5122 = vst [vmem:[%s10770_s23 + $0x40] sm:$0xff] %v5106_v31  ;;  %v5107_v34 = vmax.f32 %v5078_v9, 0.0  ;;  %v5082_v32 = vadd.f32 %v5081_v8, %v4948_v37 }
 0x94d   : > { %v5083_v36 = vpop.f32.mrf.mxu1 }
 0x94e   : > { %5123 = vst [vmem:[%s10770_s23 + $0x48] sm:$0xff] %v5107_v34  ;;  %v5108_v41 = vmax.f32 %v5082_v32, 0.0  ;;  %v5084_v21 = vadd.f32 %v5083_v36, %v4948_v37 }
 0x94f   : > { %v5087_v25 = vpop.f32.mrf.mxu1 }
 0x950   : > { %5124 = vst [vmem:[%s10770_s23 + $0x50] sm:$0xff] %v5108_v41  ;;  %v5109_v46 = vmax.f32 %v5084_v21, 0.0  ;;  %v5088_v14 = vadd.f32 %v5087_v25, %v4953_v57 }
 0x951   : > { %v5089_v43 = vpop.f32.mrf.mxu1 }
 0x952   : > { %5125 = vst [vmem:[%s10770_s23 + $0x58] sm:$0xff] %v5109_v46  ;;  %v5110_v49 = vmax.f32 %v5088_v14, 0.0  ;;  %v5090_v40 = vadd.f32 %v5089_v43, %v4953_v57 }
 0x953   : > { %v5093_v53 = vpop.f32.mrf.mxu1 }
 0x954   : > { %5126 = vst [vmem:[%s10770_s23 + $0x60] sm:$0xff] %v5110_v49  ;;  %v5111_v15 = vmax.f32 %v5090_v40, 0.0  ;;  %v5094_v7 = vadd.f32 %v5093_v53, %v4958_v20 }
 0x955   : > { %v5095_v61 = vpop.f32.mrf.mxu1 }
 0x956   : > { %5127 = vst [vmem:[%s10770_s23 + $0x68] sm:$0xff] %v5111_v15  ;;  %v5112_v56 = vmax.f32 %v5094_v7, 0.0  ;;  %v5096_v13 = vadd.f32 %v5095_v61, %v4958_v20 }
 0x958   : > { %5128 = vst [vmem:[%s10770_s23 + $0x70] sm:$0xff] %v5112_v56  ;;  %v5113_v30 = vmax.f32 %v5096_v13, 0.0 }
 0x95a   : > { %5129 = vst [vmem:[%s10770_s23 + $0x78] sm:$0xff] %v5113_v30 }
 0x95b   : > { %5945 = shalt.err (!%p5942_p5)
}
 0x95c   : > { %s5946_s18 = scalar_lea.hbm %s10791_s28, 2048  ;;  %s5950_s25 = scalar_lea.hbm %s10853_s9, 4096 }
 0x95d   : > { %p5947_p6 = scmp.ne.s32.totalorder %s10791_s28, %s5946_s18  ;;  %p5951_p10 = scmp.lt.s32.totalorder %s10791_s28, %s10853_s9 }
 0x95e   : > { %p5952_p11 = scmp.lt.s32.totalorder %s5950_s25, %s5946_s18 }
 0x95f   : > { %p5948_p7 = pnand %p5947_p6, %p6107_p4 }
 0x960   : > { %p5953_p12 = por %p5952_p11, %p5951_p10 }
 0x961   : > { %p5949_p9 = pneg %p5948_p7 }
 0x963   : > { %p5954_p13 = pnand %p5953_p12, %p5949_p9 }
 0x965   : > { %5957 = shalt.err (!%p5954_p13)
}
 0x966   : > { %s6015_s29 = smov 256   ;;  %s6016_s16 = smov 16  }
 0x967   : > { %5370 = dma.vmem_to_hbm [thread:$0]  (%p6107_p4), %s10793_s27, 2048, %s10791_s28, %s10799_s12, %s6015_s29, %s6015_s29, %s6016_s16  }
 0x968 PF: > { %p5376_p0 = scmp.ge.s32.totalorder %s6008_s14, 2  ;;  %s5161_s20 = sand.u32 1, %s5988_s30  }
 0x969   : > { %s5162_s18 = scalar_lea.sflag [#allocation3], %s5161_s20 }
 0x96a   : > { %p5373_p1 = pnand %p5376_p0, %p6114_p8 }
 0x96c   : > { %p5374_p2 = pneg %p5373_p1 }
 0x96e   : > { %5983 = dma.done.wait (%p5374_p2), %s5162_s18, 2048  }
 0x96f   : > { %5985 = vsyncadd (%p5374_p2), %s5162_s18, 4294965248  ;;  %s22_s14 = sadd.s32 1, %s6008_s14   ;;  %s12197_s30 = smov %s5992_s10 }
 0x970   : > { %p19_p3 = scmp.ge.s32.totalorder %s22_s14, 4   ;;  %s12198_s10 = smov %s5996_s11 }
 0x971   : > { %s12199_s11 = smov %s6120_s22  ;;  %s12200_s12 = smov %s6004_s13 }
 0x972   : > { %s12201_s13 = smov %s12203_s17  ;;  %21 = sbr.rel (!%p19_p3) target bundleno = 4 (0x4), region = 100 }
 0x977   :  { %5167 = vsyncpa [#allocation3], 1 }
 0x978   :  { %5169 = vsyncpa [#allocation3 + $0x1], 1 }

</bundles_post_ra>
